<compile_context>
chip_gen: v7x
topology: tpu7x:2x2x1
jax: 0.10.0
libtpu: 0.0.40
codegen_flags: <defaults>
</compile_context>

<pallas_src>
import functools

import jax
import jax.numpy as jnp
from jax.experimental import pallas as pl
from jax.experimental.pallas import tpu as pltpu


# ----------------------------------------------------------------------------
# Kernel 1: fused Conv5x5(pad=2) + folded BatchNorm + ReLU + MaxPool2x2/2.
#
# Per grid step the kernel gets the phase-split activations of a block of B
# images:
#   ph[blk, eh*2+ew, ci, b*Hh*Wh + i*Wh + j] = xpad[blk, ci, b, 2i+eh, 2j+ew]
# It assembles the im2col master slab in VMEM with 36 shifted window copies
#   slab[(e*9 + oh*3 + ow)*Cin + ci, r] = ph[blk, e, ci, r + oh*Wh + ow]
# then each pool candidate is one MXU matmul against a zero-padded folded
# weight matrix; a running max + bias + ReLU epilogue writes the pooled output
# directly (positions r = b*Hh*Wh + i*Wh + j, valid for i < Hp, j < Wp).
# ----------------------------------------------------------------------------
def _make_conv_kernel(cin, r_width, shifts):
    def kernel(ph_ref, w_ref, b_ref, o_ref, slab_ref):
        # 1) assemble the master im2col slab in VMEM (36 shifted window copies)
        for e in range(4):
            for oi, s in enumerate(shifts):
                row0 = (e * 9 + oi) * cin
                slab_ref[row0:row0 + cin, :] = ph_ref[0, e, :, s:s + r_width]
        slab = slab_ref[...]
        # 2) one MXU matmul per pool candidate, running max (<= 2 f32 temps)
        y = jnp.dot(w_ref[0], slab, preferred_element_type=jnp.float32)
        for q in range(1, 4):
            y = jnp.maximum(
                y, jnp.dot(w_ref[q], slab, preferred_element_type=jnp.float32))
        # 3) folded-BN bias + ReLU (BN scale already folded into the weights)
        o_ref[0] = jnp.maximum(y + b_ref[...], 0.0).astype(o_ref.dtype)

    return kernel


def conv_bn_relu_pool(phases, w_cand, bias_col, *, cin, wh, r_width):
    nblk = phases.shape[0]
    rpad = phases.shape[-1]
    cout = w_cand.shape[1]
    k_rows = 36 * cin
    shifts = [oh * wh + ow for oh in range(3) for ow in range(3)]
    kernel = _make_conv_kernel(cin, r_width, shifts)
    return pl.pallas_call(
        kernel,
        out_shape=jax.ShapeDtypeStruct((nblk, cout, r_width), jnp.bfloat16),
        grid=(nblk,),
        in_specs=[
            pl.BlockSpec((1, 4, cin, rpad), lambda i: (i, 0, 0, 0)),
            pl.BlockSpec((4, cout, k_rows), lambda i: (0, 0, 0)),
            pl.BlockSpec((cout, 1), lambda i: (0, 0)),
        ],
        out_specs=pl.BlockSpec((1, cout, r_width), lambda i: (i, 0, 0)),
        scratch_shapes=[pltpu.VMEM((k_rows, r_width), jnp.bfloat16)],
        compiler_params=pltpu.CompilerParams(
            dimension_semantics=("parallel",),
            vmem_limit_bytes=48 * 1024 * 1024),
    )(phases, w_cand, bias_col)


# ----------------------------------------------------------------------------
# Kernel 2: fully-connected layer, tiled over batch rows.
# ----------------------------------------------------------------------------
def _fc_kernel(x_ref, w_ref, b_ref, o_ref):
    o_ref[...] = (
        jnp.dot(x_ref[...], w_ref[...], preferred_element_type=jnp.float32)
        + b_ref[...]).astype(o_ref.dtype)


def linear(x, w_t, b_row, block_rows):
    n, k = x.shape
    m = w_t.shape[1]
    return pl.pallas_call(
        _fc_kernel,
        out_shape=jax.ShapeDtypeStruct((n, m), jnp.float32),
        grid=(n // block_rows,),
        in_specs=[
            pl.BlockSpec((block_rows, k), lambda i: (i, 0)),
            pl.BlockSpec((k, m), lambda i: (0, 0)),
            pl.BlockSpec((1, m), lambda i: (0, 0)),
        ],
        out_specs=pl.BlockSpec((block_rows, m), lambda i: (i, 0)),
        compiler_params=pltpu.CompilerParams(
            dimension_semantics=("parallel",)),
    )(x, w_t, b_row)


# ----------------------------------------------------------------------------
# JAX glue: batch blocking, phase split, BN/weight folding.
# ----------------------------------------------------------------------------
def _round_up(x, m):
    return (x + m - 1) // m * m


def _pick_images_per_block(n):
    # Largest block that still leaves an even number (>= 2) of grid steps so
    # both v7x TensorCores get equal work.  Capped per generation: the layer-2
    # VMEM slab is ~93 KiB/image, so 64 images/block is comfortable under
    # v7x's 64 MiB VMEM; 128 is allowed on 128-MiB chips (v5e/v6e).
    try:
        vmem = pltpu.get_tpu_info().vmem_capacity_bytes
    except Exception:
        vmem = 64 * 1024 * 1024
    b_cap = 128 if vmem >= 100 * 1024 * 1024 else 64
    for b in (128, 64, 32, 16, 8, 4):
        if b <= b_cap and n >= 2 * b:
            return b
    return 4


def _phase_split_flat(x_blocks, pad, rpad):
    """(nblk, C, B, H, W) -> (nblk, 4, C, rpad) 2x2-phase-split, flattened.

    out[blk, eh*2+ew, c, b*Hh*Wh + i*Wh + j] = xpad[blk, c, b, 2i+eh, 2j+ew]
    with Hh = (H+2*pad)//2, Wh = (W+2*pad)//2; the tail [B*Hh*Wh, rpad) is 0.
    """
    nblk, c, b, h, w = x_blocks.shape
    hh, wh = (h + 2 * pad) // 2, (w + 2 * pad) // 2
    xp = jnp.pad(x_blocks, ((0, 0), (0, 0), (0, 0), (pad, pad), (pad, pad)))
    ph = jnp.stack([xp[:, :, :, eh::2, ew::2]
                    for eh in range(2) for ew in range(2)], axis=1)
    ph = ph.reshape(nblk, 4, c, b * hh * wh)
    return jnp.pad(ph, ((0, 0), (0, 0), (0, 0), (0, rpad - b * hh * wh)))


def fold_conv_bn_candidates(conv_w, conv_b, gamma, beta, mean, var, eps=1e-5):
    """Fold eval-mode BN into the conv, expanded to 4 pool-candidate matrices.

    Returns (4, Cout, 36*Cin) bf16 weights whose column order matches the
    kernel's master-slab rows (phase e, shift o, cin) -- columns whose conv
    tap falls outside the 5x5 window are zero -- plus a (Cout, 1) f32 bias.
    BN scale is folded into the weights in f32, then cast to bf16 once.
    """
    cout, cin, kk, _ = conv_w.shape
    scale = gamma / jnp.sqrt(var + eps)
    bias = (conv_b - mean) * scale + beta
    w_s = conv_w * scale[:, None, None, None]
    wc = jnp.zeros((4, 4, 9, cout, cin), jnp.float32)   # (cand, e, o, co, ci)
    for dh in range(2):
        for dw in range(2):
            for kh in range(kk):
                for kw in range(kk):
                    eh, oh = (dh + kh) % 2, (dh + kh) // 2
                    ew, ow = (dw + kw) % 2, (dw + kw) // 2
                    wc = wc.at[dh * 2 + dw, eh * 2 + ew, oh * 3 + ow].set(
                        w_s[:, :, kh, kw])
    wc = wc.transpose(0, 3, 1, 2, 4).reshape(4, cout, 36 * cin)
    return wc.astype(jnp.bfloat16), bias[:, None].astype(jnp.float32)


def convnet_forward(x_nchw, params):
    n = x_nchw.shape[0]
    cdt = jnp.bfloat16  # MXU input dtype (f32 accumulation, f32 epilogue)

    w1, b1 = fold_conv_bn_candidates(params["conv1_w"], params["conv1_b"],
                                     params["bn1_gamma"], params["bn1_beta"],
                                     params["bn1_mean"], params["bn1_var"])
    w2, b2 = fold_conv_bn_candidates(params["conv2_w"], params["conv2_b"],
                                     params["bn2_gamma"], params["bn2_beta"],
                                     params["bn2_mean"], params["bn2_var"])

    bsz = _pick_images_per_block(n)          # images per grid step
    np_ = _round_up(n, 2 * bsz)              # even number of blocks (>= 2)
    nblk = np_ // bsz

    # layer 1: Conv(1->16,5x5,p=2) + BN + ReLU + MaxPool2x2   (one fused kernel)
    x = jnp.pad(x_nchw, ((0, np_ - n), (0, 0), (0, 0), (0, 0))).astype(cdt)
    x = x.reshape(nblk, bsz, 1, 28, 28).transpose(0, 2, 1, 3, 4)
    wh1 = (28 + 4) // 2                       # 16; per-image half-res plane=256
    r1 = _round_up(bsz * wh1 * wh1, 128)
    ph1 = _phase_split_flat(x, 2, r1 + 128)                # (nblk, 4, 1, r1+128)
    y1 = conv_bn_relu_pool(ph1, w1, b1, cin=1, wh=wh1, r_width=r1)

    # layer 2: consumes layer-1's output layout directly (no NCHW round trip)
    y1 = y1[:, :, :bsz * wh1 * wh1].reshape(nblk, 16, bsz, wh1, wh1)
    y1 = y1[:, :, :, :14, :14]                              # valid 14x14 region
    wh2 = (14 + 4) // 2                       # 9; per-image half-res plane = 81
    r2 = _round_up(bsz * wh2 * wh2, 128)
    ph2 = _phase_split_flat(y1, 2, r2 + 128)               # (nblk, 4, 16, r2+128)
    y2 = conv_bn_relu_pool(ph2, w2, b2, cin=16, wh=wh2, r_width=r2)

    # flatten in PyTorch NCHW order (small tensor), then batch-tiled FC
    y2 = y2[:, :, :bsz * wh2 * wh2].reshape(nblk, 32, bsz, wh2, wh2)
    y2 = y2[:, :, :, :7, :7]
    flat = y2.transpose(0, 2, 1, 3, 4).reshape(np_, 32 * 7 * 7)
    fc_rows = next(r for r in (256, 128, 64, 32, 16, 8, 4, 2, 1) if np_ % r == 0)
    logits = linear(flat, params["fc_w"].T.astype(cdt),
                    params["fc_b"][None, :].astype(jnp.float32), fc_rows)
    return logits[:n]


# ----------------------------------------------------------------------------
# Pure-JAX reference (numerical sanity check)
# ----------------------------------------------------------------------------
def reference_forward(x_nchw, params, eps=1e-5):
    def layer(x, w, cb, g, bt, m, v):
        y = jax.lax.conv_general_dilated(
            x, w, (1, 1), ((2, 2), (2, 2)),
            dimension_numbers=("NCHW", "OIHW", "NCHW"))
        y = y + cb[None, :, None, None]
        y = (y - m[None, :, None, None]) / jnp.sqrt(v[None, :, None, None] + eps)
        y = y * g[None, :, None, None] + bt[None, :, None, None]
        y = jnp.maximum(y, 0.0)
        return jax.lax.reduce_window(y, -jnp.inf, jax.lax.max,
                                     (1, 1, 2, 2), (1, 1, 2, 2), "VALID")

    y = layer(x_nchw, params["conv1_w"], params["conv1_b"],
              params["bn1_gamma"], params["bn1_beta"],
              params["bn1_mean"], params["bn1_var"])
    y = layer(y, params["conv2_w"], params["conv2_b"],
              params["bn2_gamma"], params["bn2_beta"],
              params["bn2_mean"], params["bn2_var"])
    flat = y.reshape(y.shape[0], -1)
    return flat @ params["fc_w"].T + params["fc_b"]


def make_params(key, num_classes=10):
    ks = jax.random.split(key, 16)
    f32 = jnp.float32
    # BatchNorm is evaluated in inference mode (running stats folded into the
    # kernel's scale/bias).  All parameters are deterministic given the key.
    return {
        "conv1_w": 0.10 * jax.random.normal(ks[0], (16, 1, 5, 5), f32),
        "conv1_b": 0.10 * jax.random.normal(ks[1], (16,), f32),
        "bn1_gamma": 1.0 + 0.10 * jax.random.normal(ks[2], (16,), f32),
        "bn1_beta": 0.10 * jax.random.normal(ks[3], (16,), f32),
        "bn1_mean": 0.10 * jax.random.normal(ks[4], (16,), f32),
        "bn1_var": 0.9 + 0.2 * jax.random.uniform(ks[5], (16,), f32),
        "conv2_w": 0.05 * jax.random.normal(ks[6], (32, 16, 5, 5), f32),
        "conv2_b": 0.10 * jax.random.normal(ks[7], (32,), f32),
        "bn2_gamma": 1.0 + 0.10 * jax.random.normal(ks[8], (32,), f32),
        "bn2_beta": 0.10 * jax.random.normal(ks[9], (32,), f32),
        "bn2_mean": 0.10 * jax.random.normal(ks[10], (32,), f32),
        "bn2_var": 0.9 + 0.2 * jax.random.uniform(ks[11], (32,), f32),
        "fc_w": 0.02 * jax.random.normal(ks[12], (num_classes, 7 * 7 * 32), f32),
        "fc_b": 0.02 * jax.random.normal(ks[13], (num_classes,), f32),
    }


if __name__ == "__main__":
    key = jax.random.PRNGKey(0)
    k_params, k_x = jax.random.split(key)
    params = make_params(k_params, num_classes=10)

    # ConvNet's fc layer (7*7*32) implies 28x28 single-channel input.
    x = jax.random.normal(k_x, (2, 1, 28, 28), jnp.float32)

    fwd = jax.jit(functools.partial(convnet_forward, params=params))
    out = jax.block_until_ready(fwd(x))
    assert out.shape == (2, 10), out.shape

    ref = jax.block_until_ready(reference_forward(x, params))
    assert jnp.allclose(out, ref, rtol=5e-2, atol=5e-2), (
        float(jnp.max(jnp.abs(out - ref))))

    print("KERNEL_OK")
</pallas_src>

<mosaic_0001>
module attributes {stable_mosaic.version = 11 : i64} {
  func.func @kernel(%arg0: i32, %arg1: memref<1x4x1x1152xbf16, #tpu.memory_space<vmem>>, %arg2: memref<4x16x36xbf16, #tpu.memory_space<vmem>>, %arg3: memref<16x1xf32, #tpu.memory_space<vmem>>, %arg4: memref<1x16x1024xbf16, #tpu.memory_space<vmem>>, %arg5: memref<36x1024xbf16, #tpu.memory_space<vmem>>) attributes {dimension_semantics = [#tpu.dimension_semantics<parallel>], iteration_bounds = array<i64: 2>, scalar_prefetch = 0 : i64, scratch_operands = 1 : i64, tpu.core_type = #tpu.core_type<tc>, window_params = [{transform_indices = @transform_0, window_bounds = array<i64: 1, 4, 1, 1152>}, {pipeline_mode = #tpu.pipeline_mode<synchronous>, transform_indices = @transform_1, window_bounds = array<i64: 4, 16, 36>}, {pipeline_mode = #tpu.pipeline_mode<synchronous>, transform_indices = @transform_2, window_bounds = array<i64: 16, 1>}, {transform_indices = @transform_3, window_bounds = array<i64: 1, 16, 1024>}]} {
    %c0 = arith.constant 0 : index
    %c0_0 = arith.constant 0 : index
    %c0_1 = arith.constant 0 : index
    %c0_2 = arith.constant 0 : index
    %0 = vector.load %arg1[%c0, %c0_0, %c0_1, %c0_2] : memref<1x4x1x1152xbf16, #tpu.memory_space<vmem>>, vector<1x1x1x1024xbf16>
    %1 = vector.shape_cast %0 : vector<1x1x1x1024xbf16> to vector<1x1024xbf16>
    %c0_3 = arith.constant 0 : index
    %c0_4 = arith.constant 0 : index
    %2 = vector.load %arg5[%c0_3, %c0_4] : memref<36x1024xbf16, #tpu.memory_space<vmem>>, vector<1x1024xbf16>
    tpu.vector_store %arg5[%c0_3, %c0_4], %1 {strides = array<i32>} : memref<36x1024xbf16, #tpu.memory_space<vmem>>, vector<1x1024xbf16>,
    %c0_5 = arith.constant 0 : index
    %c0_6 = arith.constant 0 : index
    %c0_7 = arith.constant 0 : index
    %c1 = arith.constant 1 : index
    %3 = vector.load %arg1[%c0_5, %c0_6, %c0_7, %c1] : memref<1x4x1x1152xbf16, #tpu.memory_space<vmem>>, vector<1x1x1x1024xbf16>
    %4 = vector.shape_cast %3 : vector<1x1x1x1024xbf16> to vector<1x1024xbf16>
    %c1_8 = arith.constant 1 : index
    %c0_9 = arith.constant 0 : index
    %5 = vector.load %arg5[%c1_8, %c0_9] : memref<36x1024xbf16, #tpu.memory_space<vmem>>, vector<1x1024xbf16>
    tpu.vector_store %arg5[%c1_8, %c0_9], %4 {strides = array<i32>} : memref<36x1024xbf16, #tpu.memory_space<vmem>>, vector<1x1024xbf16>,
    %c0_10 = arith.constant 0 : index
    %c0_11 = arith.constant 0 : index
    %c0_12 = arith.constant 0 : index
    %c2 = arith.constant 2 : index
    %6 = vector.load %arg1[%c0_10, %c0_11, %c0_12, %c2] : memref<1x4x1x1152xbf16, #tpu.memory_space<vmem>>, vector<1x1x1x1024xbf16>
    %7 = vector.shape_cast %6 : vector<1x1x1x1024xbf16> to vector<1x1024xbf16>
    %c2_13 = arith.constant 2 : index
    %c0_14 = arith.constant 0 : index
    %8 = vector.load %arg5[%c2_13, %c0_14] : memref<36x1024xbf16, #tpu.memory_space<vmem>>, vector<1x1024xbf16>
    tpu.vector_store %arg5[%c2_13, %c0_14], %7 {strides = array<i32>} : memref<36x1024xbf16, #tpu.memory_space<vmem>>, vector<1x1024xbf16>,
    %c0_15 = arith.constant 0 : index
    %c0_16 = arith.constant 0 : index
    %c0_17 = arith.constant 0 : index
    %c16 = arith.constant 16 : index
    %9 = vector.load %arg1[%c0_15, %c0_16, %c0_17, %c16] : memref<1x4x1x1152xbf16, #tpu.memory_space<vmem>>, vector<1x1x1x1024xbf16>
    %10 = vector.shape_cast %9 : vector<1x1x1x1024xbf16> to vector<1x1024xbf16>
    %c3 = arith.constant 3 : index
    %c0_18 = arith.constant 0 : index
    %11 = vector.load %arg5[%c3, %c0_18] : memref<36x1024xbf16, #tpu.memory_space<vmem>>, vector<1x1024xbf16>
    tpu.vector_store %arg5[%c3, %c0_18], %10 {strides = array<i32>} : memref<36x1024xbf16, #tpu.memory_space<vmem>>, vector<1x1024xbf16>,
    %c0_19 = arith.constant 0 : index
    %c0_20 = arith.constant 0 : index
    %c0_21 = arith.constant 0 : index
    %c17 = arith.constant 17 : index
    %12 = vector.load %arg1[%c0_19, %c0_20, %c0_21, %c17] : memref<1x4x1x1152xbf16, #tpu.memory_space<vmem>>, vector<1x1x1x1024xbf16>
    %13 = vector.shape_cast %12 : vector<1x1x1x1024xbf16> to vector<1x1024xbf16>
    %c4 = arith.constant 4 : index
    %c0_22 = arith.constant 0 : index
    %14 = vector.load %arg5[%c4, %c0_22] : memref<36x1024xbf16, #tpu.memory_space<vmem>>, vector<1x1024xbf16>
    tpu.vector_store %arg5[%c4, %c0_22], %13 {strides = array<i32>} : memref<36x1024xbf16, #tpu.memory_space<vmem>>, vector<1x1024xbf16>,
    %c0_23 = arith.constant 0 : index
    %c0_24 = arith.constant 0 : index
    %c0_25 = arith.constant 0 : index
    %c18 = arith.constant 18 : index
    %15 = vector.load %arg1[%c0_23, %c0_24, %c0_25, %c18] : memref<1x4x1x1152xbf16, #tpu.memory_space<vmem>>, vector<1x1x1x1024xbf16>
    %16 = vector.shape_cast %15 : vector<1x1x1x1024xbf16> to vector<1x1024xbf16>
    %c5 = arith.constant 5 : index
    %c0_26 = arith.constant 0 : index
    %17 = vector.load %arg5[%c5, %c0_26] : memref<36x1024xbf16, #tpu.memory_space<vmem>>, vector<1x1024xbf16>
    tpu.vector_store %arg5[%c5, %c0_26], %16 {strides = array<i32>} : memref<36x1024xbf16, #tpu.memory_space<vmem>>, vector<1x1024xbf16>,
    %c0_27 = arith.constant 0 : index
    %c0_28 = arith.constant 0 : index
    %c0_29 = arith.constant 0 : index
    %c32 = arith.constant 32 : index
    %18 = vector.load %arg1[%c0_27, %c0_28, %c0_29, %c32] : memref<1x4x1x1152xbf16, #tpu.memory_space<vmem>>, vector<1x1x1x1024xbf16>
    %19 = vector.shape_cast %18 : vector<1x1x1x1024xbf16> to vector<1x1024xbf16>
    %c6 = arith.constant 6 : index
    %c0_30 = arith.constant 0 : index
    %20 = vector.load %arg5[%c6, %c0_30] : memref<36x1024xbf16, #tpu.memory_space<vmem>>, vector<1x1024xbf16>
    tpu.vector_store %arg5[%c6, %c0_30], %19 {strides = array<i32>} : memref<36x1024xbf16, #tpu.memory_space<vmem>>, vector<1x1024xbf16>,
    %c0_31 = arith.constant 0 : index
    %c0_32 = arith.constant 0 : index
    %c0_33 = arith.constant 0 : index
    %c33 = arith.constant 33 : index
    %21 = vector.load %arg1[%c0_31, %c0_32, %c0_33, %c33] : memref<1x4x1x1152xbf16, #tpu.memory_space<vmem>>, vector<1x1x1x1024xbf16>
    %22 = vector.shape_cast %21 : vector<1x1x1x1024xbf16> to vector<1x1024xbf16>
    %c7 = arith.constant 7 : index
    %c0_34 = arith.constant 0 : index
    %23 = vector.load %arg5[%c7, %c0_34] : memref<36x1024xbf16, #tpu.memory_space<vmem>>, vector<1x1024xbf16>
    tpu.vector_store %arg5[%c7, %c0_34], %22 {strides = array<i32>} : memref<36x1024xbf16, #tpu.memory_space<vmem>>, vector<1x1024xbf16>,
    %c0_35 = arith.constant 0 : index
    %c0_36 = arith.constant 0 : index
    %c0_37 = arith.constant 0 : index
    %c34 = arith.constant 34 : index
    %24 = vector.load %arg1[%c0_35, %c0_36, %c0_37, %c34] : memref<1x4x1x1152xbf16, #tpu.memory_space<vmem>>, vector<1x1x1x1024xbf16>
    %25 = vector.shape_cast %24 : vector<1x1x1x1024xbf16> to vector<1x1024xbf16>
    %c8 = arith.constant 8 : index
    %c0_38 = arith.constant 0 : index
    %26 = vector.load %arg5[%c8, %c0_38] : memref<36x1024xbf16, #tpu.memory_space<vmem>>, vector<1x1024xbf16>
    tpu.vector_store %arg5[%c8, %c0_38], %25 {strides = array<i32>} : memref<36x1024xbf16, #tpu.memory_space<vmem>>, vector<1x1024xbf16>,
    %c0_39 = arith.constant 0 : index
    %c1_40 = arith.constant 1 : index
    %c0_41 = arith.constant 0 : index
    %c0_42 = arith.constant 0 : index
    %27 = vector.load %arg1[%c0_39, %c1_40, %c0_41, %c0_42] : memref<1x4x1x1152xbf16, #tpu.memory_space<vmem>>, vector<1x1x1x1024xbf16>
    %28 = vector.shape_cast %27 : vector<1x1x1x1024xbf16> to vector<1x1024xbf16>
    %c9 = arith.constant 9 : index
    %c0_43 = arith.constant 0 : index
    %29 = vector.load %arg5[%c9, %c0_43] : memref<36x1024xbf16, #tpu.memory_space<vmem>>, vector<1x1024xbf16>
    tpu.vector_store %arg5[%c9, %c0_43], %28 {strides = array<i32>} : memref<36x1024xbf16, #tpu.memory_space<vmem>>, vector<1x1024xbf16>,
    %c0_44 = arith.constant 0 : index
    %c1_45 = arith.constant 1 : index
    %c0_46 = arith.constant 0 : index
    %c1_47 = arith.constant 1 : index
    %30 = vector.load %arg1[%c0_44, %c1_45, %c0_46, %c1_47] : memref<1x4x1x1152xbf16, #tpu.memory_space<vmem>>, vector<1x1x1x1024xbf16>
    %31 = vector.shape_cast %30 : vector<1x1x1x1024xbf16> to vector<1x1024xbf16>
    %c10 = arith.constant 10 : index
    %c0_48 = arith.constant 0 : index
    %32 = vector.load %arg5[%c10, %c0_48] : memref<36x1024xbf16, #tpu.memory_space<vmem>>, vector<1x1024xbf16>
    tpu.vector_store %arg5[%c10, %c0_48], %31 {strides = array<i32>} : memref<36x1024xbf16, #tpu.memory_space<vmem>>, vector<1x1024xbf16>,
    %c0_49 = arith.constant 0 : index
    %c1_50 = arith.constant 1 : index
    %c0_51 = arith.constant 0 : index
    %c2_52 = arith.constant 2 : index
    %33 = vector.load %arg1[%c0_49, %c1_50, %c0_51, %c2_52] : memref<1x4x1x1152xbf16, #tpu.memory_space<vmem>>, vector<1x1x1x1024xbf16>
    %34 = vector.shape_cast %33 : vector<1x1x1x1024xbf16> to vector<1x1024xbf16>
    %c11 = arith.constant 11 : index
    %c0_53 = arith.constant 0 : index
    %35 = vector.load %arg5[%c11, %c0_53] : memref<36x1024xbf16, #tpu.memory_space<vmem>>, vector<1x1024xbf16>
    tpu.vector_store %arg5[%c11, %c0_53], %34 {strides = array<i32>} : memref<36x1024xbf16, #tpu.memory_space<vmem>>, vector<1x1024xbf16>,
    %c0_54 = arith.constant 0 : index
    %c1_55 = arith.constant 1 : index
    %c0_56 = arith.constant 0 : index
    %c16_57 = arith.constant 16 : index
    %36 = vector.load %arg1[%c0_54, %c1_55, %c0_56, %c16_57] : memref<1x4x1x1152xbf16, #tpu.memory_space<vmem>>, vector<1x1x1x1024xbf16>
    %37 = vector.shape_cast %36 : vector<1x1x1x1024xbf16> to vector<1x1024xbf16>
    %c12 = arith.constant 12 : index
    %c0_58 = arith.constant 0 : index
    %38 = vector.load %arg5[%c12, %c0_58] : memref<36x1024xbf16, #tpu.memory_space<vmem>>, vector<1x1024xbf16>
    tpu.vector_store %arg5[%c12, %c0_58], %37 {strides = array<i32>} : memref<36x1024xbf16, #tpu.memory_space<vmem>>, vector<1x1024xbf16>,
    %c0_59 = arith.constant 0 : index
    %c1_60 = arith.constant 1 : index
    %c0_61 = arith.constant 0 : index
    %c17_62 = arith.constant 17 : index
    %39 = vector.load %arg1[%c0_59, %c1_60, %c0_61, %c17_62] : memref<1x4x1x1152xbf16, #tpu.memory_space<vmem>>, vector<1x1x1x1024xbf16>
    %40 = vector.shape_cast %39 : vector<1x1x1x1024xbf16> to vector<1x1024xbf16>
    %c13 = arith.constant 13 : index
    %c0_63 = arith.constant 0 : index
    %41 = vector.load %arg5[%c13, %c0_63] : memref<36x1024xbf16, #tpu.memory_space<vmem>>, vector<1x1024xbf16>
    tpu.vector_store %arg5[%c13, %c0_63], %40 {strides = array<i32>} : memref<36x1024xbf16, #tpu.memory_space<vmem>>, vector<1x1024xbf16>,
    %c0_64 = arith.constant 0 : index
    %c1_65 = arith.constant 1 : index
    %c0_66 = arith.constant 0 : index
    %c18_67 = arith.constant 18 : index
    %42 = vector.load %arg1[%c0_64, %c1_65, %c0_66, %c18_67] : memref<1x4x1x1152xbf16, #tpu.memory_space<vmem>>, vector<1x1x1x1024xbf16>
    %43 = vector.shape_cast %42 : vector<1x1x1x1024xbf16> to vector<1x1024xbf16>
    %c14 = arith.constant 14 : index
    %c0_68 = arith.constant 0 : index
    %44 = vector.load %arg5[%c14, %c0_68] : memref<36x1024xbf16, #tpu.memory_space<vmem>>, vector<1x1024xbf16>
    tpu.vector_store %arg5[%c14, %c0_68], %43 {strides = array<i32>} : memref<36x1024xbf16, #tpu.memory_space<vmem>>, vector<1x1024xbf16>,
    %c0_69 = arith.constant 0 : index
    %c1_70 = arith.constant 1 : index
    %c0_71 = arith.constant 0 : index
    %c32_72 = arith.constant 32 : index
    %45 = vector.load %arg1[%c0_69, %c1_70, %c0_71, %c32_72] : memref<1x4x1x1152xbf16, #tpu.memory_space<vmem>>, vector<1x1x1x1024xbf16>
    %46 = vector.shape_cast %45 : vector<1x1x1x1024xbf16> to vector<1x1024xbf16>
    %c15 = arith.constant 15 : index
    %c0_73 = arith.constant 0 : index
    %47 = vector.load %arg5[%c15, %c0_73] : memref<36x1024xbf16, #tpu.memory_space<vmem>>, vector<1x1024xbf16>
    tpu.vector_store %arg5[%c15, %c0_73], %46 {strides = array<i32>} : memref<36x1024xbf16, #tpu.memory_space<vmem>>, vector<1x1024xbf16>,
    %c0_74 = arith.constant 0 : index
    %c1_75 = arith.constant 1 : index
    %c0_76 = arith.constant 0 : index
    %c33_77 = arith.constant 33 : index
    %48 = vector.load %arg1[%c0_74, %c1_75, %c0_76, %c33_77] : memref<1x4x1x1152xbf16, #tpu.memory_space<vmem>>, vector<1x1x1x1024xbf16>
    %49 = vector.shape_cast %48 : vector<1x1x1x1024xbf16> to vector<1x1024xbf16>
    %c16_78 = arith.constant 16 : index
    %c0_79 = arith.constant 0 : index
    %50 = vector.load %arg5[%c16_78, %c0_79] : memref<36x1024xbf16, #tpu.memory_space<vmem>>, vector<1x1024xbf16>
    tpu.vector_store %arg5[%c16_78, %c0_79], %49 {strides = array<i32>} : memref<36x1024xbf16, #tpu.memory_space<vmem>>, vector<1x1024xbf16>,
    %c0_80 = arith.constant 0 : index
    %c1_81 = arith.constant 1 : index
    %c0_82 = arith.constant 0 : index
    %c34_83 = arith.constant 34 : index
    %51 = vector.load %arg1[%c0_80, %c1_81, %c0_82, %c34_83] : memref<1x4x1x1152xbf16, #tpu.memory_space<vmem>>, vector<1x1x1x1024xbf16>
    %52 = vector.shape_cast %51 : vector<1x1x1x1024xbf16> to vector<1x1024xbf16>
    %c17_84 = arith.constant 17 : index
    %c0_85 = arith.constant 0 : index
    %53 = vector.load %arg5[%c17_84, %c0_85] : memref<36x1024xbf16, #tpu.memory_space<vmem>>, vector<1x1024xbf16>
    tpu.vector_store %arg5[%c17_84, %c0_85], %52 {strides = array<i32>} : memref<36x1024xbf16, #tpu.memory_space<vmem>>, vector<1x1024xbf16>,
    %c0_86 = arith.constant 0 : index
    %c2_87 = arith.constant 2 : index
    %c0_88 = arith.constant 0 : index
    %c0_89 = arith.constant 0 : index
    %54 = vector.load %arg1[%c0_86, %c2_87, %c0_88, %c0_89] : memref<1x4x1x1152xbf16, #tpu.memory_space<vmem>>, vector<1x1x1x1024xbf16>
    %55 = vector.shape_cast %54 : vector<1x1x1x1024xbf16> to vector<1x1024xbf16>
    %c18_90 = arith.constant 18 : index
    %c0_91 = arith.constant 0 : index
    %56 = vector.load %arg5[%c18_90, %c0_91] : memref<36x1024xbf16, #tpu.memory_space<vmem>>, vector<1x1024xbf16>
    tpu.vector_store %arg5[%c18_90, %c0_91], %55 {strides = array<i32>} : memref<36x1024xbf16, #tpu.memory_space<vmem>>, vector<1x1024xbf16>,
    %c0_92 = arith.constant 0 : index
    %c2_93 = arith.constant 2 : index
    %c0_94 = arith.constant 0 : index
    %c1_95 = arith.constant 1 : index
    %57 = vector.load %arg1[%c0_92, %c2_93, %c0_94, %c1_95] : memref<1x4x1x1152xbf16, #tpu.memory_space<vmem>>, vector<1x1x1x1024xbf16>
    %58 = vector.shape_cast %57 : vector<1x1x1x1024xbf16> to vector<1x1024xbf16>
    %c19 = arith.constant 19 : index
    %c0_96 = arith.constant 0 : index
    %59 = vector.load %arg5[%c19, %c0_96] : memref<36x1024xbf16, #tpu.memory_space<vmem>>, vector<1x1024xbf16>
    tpu.vector_store %arg5[%c19, %c0_96], %58 {strides = array<i32>} : memref<36x1024xbf16, #tpu.memory_space<vmem>>, vector<1x1024xbf16>,
    %c0_97 = arith.constant 0 : index
    %c2_98 = arith.constant 2 : index
    %c0_99 = arith.constant 0 : index
    %c2_100 = arith.constant 2 : index
    %60 = vector.load %arg1[%c0_97, %c2_98, %c0_99, %c2_100] : memref<1x4x1x1152xbf16, #tpu.memory_space<vmem>>, vector<1x1x1x1024xbf16>
    %61 = vector.shape_cast %60 : vector<1x1x1x1024xbf16> to vector<1x1024xbf16>
    %c20 = arith.constant 20 : index
    %c0_101 = arith.constant 0 : index
    %62 = vector.load %arg5[%c20, %c0_101] : memref<36x1024xbf16, #tpu.memory_space<vmem>>, vector<1x1024xbf16>
    tpu.vector_store %arg5[%c20, %c0_101], %61 {strides = array<i32>} : memref<36x1024xbf16, #tpu.memory_space<vmem>>, vector<1x1024xbf16>,
    %c0_102 = arith.constant 0 : index
    %c2_103 = arith.constant 2 : index
    %c0_104 = arith.constant 0 : index
    %c16_105 = arith.constant 16 : index
    %63 = vector.load %arg1[%c0_102, %c2_103, %c0_104, %c16_105] : memref<1x4x1x1152xbf16, #tpu.memory_space<vmem>>, vector<1x1x1x1024xbf16>
    %64 = vector.shape_cast %63 : vector<1x1x1x1024xbf16> to vector<1x1024xbf16>
    %c21 = arith.constant 21 : index
    %c0_106 = arith.constant 0 : index
    %65 = vector.load %arg5[%c21, %c0_106] : memref<36x1024xbf16, #tpu.memory_space<vmem>>, vector<1x1024xbf16>
    tpu.vector_store %arg5[%c21, %c0_106], %64 {strides = array<i32>} : memref<36x1024xbf16, #tpu.memory_space<vmem>>, vector<1x1024xbf16>,
    %c0_107 = arith.constant 0 : index
    %c2_108 = arith.constant 2 : index
    %c0_109 = arith.constant 0 : index
    %c17_110 = arith.constant 17 : index
    %66 = vector.load %arg1[%c0_107, %c2_108, %c0_109, %c17_110] : memref<1x4x1x1152xbf16, #tpu.memory_space<vmem>>, vector<1x1x1x1024xbf16>
    %67 = vector.shape_cast %66 : vector<1x1x1x1024xbf16> to vector<1x1024xbf16>
    %c22 = arith.constant 22 : index
    %c0_111 = arith.constant 0 : index
    %68 = vector.load %arg5[%c22, %c0_111] : memref<36x1024xbf16, #tpu.memory_space<vmem>>, vector<1x1024xbf16>
    tpu.vector_store %arg5[%c22, %c0_111], %67 {strides = array<i32>} : memref<36x1024xbf16, #tpu.memory_space<vmem>>, vector<1x1024xbf16>,
    %c0_112 = arith.constant 0 : index
    %c2_113 = arith.constant 2 : index
    %c0_114 = arith.constant 0 : index
    %c18_115 = arith.constant 18 : index
    %69 = vector.load %arg1[%c0_112, %c2_113, %c0_114, %c18_115] : memref<1x4x1x1152xbf16, #tpu.memory_space<vmem>>, vector<1x1x1x1024xbf16>
    %70 = vector.shape_cast %69 : vector<1x1x1x1024xbf16> to vector<1x1024xbf16>
    %c23 = arith.constant 23 : index
    %c0_116 = arith.constant 0 : index
    %71 = vector.load %arg5[%c23, %c0_116] : memref<36x1024xbf16, #tpu.memory_space<vmem>>, vector<1x1024xbf16>
    tpu.vector_store %arg5[%c23, %c0_116], %70 {strides = array<i32>} : memref<36x1024xbf16, #tpu.memory_space<vmem>>, vector<1x1024xbf16>,
    %c0_117 = arith.constant 0 : index
    %c2_118 = arith.constant 2 : index
    %c0_119 = arith.constant 0 : index
    %c32_120 = arith.constant 32 : index
    %72 = vector.load %arg1[%c0_117, %c2_118, %c0_119, %c32_120] : memref<1x4x1x1152xbf16, #tpu.memory_space<vmem>>, vector<1x1x1x1024xbf16>
    %73 = vector.shape_cast %72 : vector<1x1x1x1024xbf16> to vector<1x1024xbf16>
    %c24 = arith.constant 24 : index
    %c0_121 = arith.constant 0 : index
    %74 = vector.load %arg5[%c24, %c0_121] : memref<36x1024xbf16, #tpu.memory_space<vmem>>, vector<1x1024xbf16>
    tpu.vector_store %arg5[%c24, %c0_121], %73 {strides = array<i32>} : memref<36x1024xbf16, #tpu.memory_space<vmem>>, vector<1x1024xbf16>,
    %c0_122 = arith.constant 0 : index
    %c2_123 = arith.constant 2 : index
    %c0_124 = arith.constant 0 : index
    %c33_125 = arith.constant 33 : index
    %75 = vector.load %arg1[%c0_122, %c2_123, %c0_124, %c33_125] : memref<1x4x1x1152xbf16, #tpu.memory_space<vmem>>, vector<1x1x1x1024xbf16>
    %76 = vector.shape_cast %75 : vector<1x1x1x1024xbf16> to vector<1x1024xbf16>
    %c25 = arith.constant 25 : index
    %c0_126 = arith.constant 0 : index
    %77 = vector.load %arg5[%c25, %c0_126] : memref<36x1024xbf16, #tpu.memory_space<vmem>>, vector<1x1024xbf16>
    tpu.vector_store %arg5[%c25, %c0_126], %76 {strides = array<i32>} : memref<36x1024xbf16, #tpu.memory_space<vmem>>, vector<1x1024xbf16>,
    %c0_127 = arith.constant 0 : index
    %c2_128 = arith.constant 2 : index
    %c0_129 = arith.constant 0 : index
    %c34_130 = arith.constant 34 : index
    %78 = vector.load %arg1[%c0_127, %c2_128, %c0_129, %c34_130] : memref<1x4x1x1152xbf16, #tpu.memory_space<vmem>>, vector<1x1x1x1024xbf16>
    %79 = vector.shape_cast %78 : vector<1x1x1x1024xbf16> to vector<1x1024xbf16>
    %c26 = arith.constant 26 : index
    %c0_131 = arith.constant 0 : index
    %80 = vector.load %arg5[%c26, %c0_131] : memref<36x1024xbf16, #tpu.memory_space<vmem>>, vector<1x1024xbf16>
    tpu.vector_store %arg5[%c26, %c0_131], %79 {strides = array<i32>} : memref<36x1024xbf16, #tpu.memory_space<vmem>>, vector<1x1024xbf16>,
    %c0_132 = arith.constant 0 : index
    %c3_133 = arith.constant 3 : index
    %c0_134 = arith.constant 0 : index
    %c0_135 = arith.constant 0 : index
    %81 = vector.load %arg1[%c0_132, %c3_133, %c0_134, %c0_135] : memref<1x4x1x1152xbf16, #tpu.memory_space<vmem>>, vector<1x1x1x1024xbf16>
    %82 = vector.shape_cast %81 : vector<1x1x1x1024xbf16> to vector<1x1024xbf16>
    %c27 = arith.constant 27 : index
    %c0_136 = arith.constant 0 : index
    %83 = vector.load %arg5[%c27, %c0_136] : memref<36x1024xbf16, #tpu.memory_space<vmem>>, vector<1x1024xbf16>
    tpu.vector_store %arg5[%c27, %c0_136], %82 {strides = array<i32>} : memref<36x1024xbf16, #tpu.memory_space<vmem>>, vector<1x1024xbf16>,
    %c0_137 = arith.constant 0 : index
    %c3_138 = arith.constant 3 : index
    %c0_139 = arith.constant 0 : index
    %c1_140 = arith.constant 1 : index
    %84 = vector.load %arg1[%c0_137, %c3_138, %c0_139, %c1_140] : memref<1x4x1x1152xbf16, #tpu.memory_space<vmem>>, vector<1x1x1x1024xbf16>
    %85 = vector.shape_cast %84 : vector<1x1x1x1024xbf16> to vector<1x1024xbf16>
    %c28 = arith.constant 28 : index
    %c0_141 = arith.constant 0 : index
    %86 = vector.load %arg5[%c28, %c0_141] : memref<36x1024xbf16, #tpu.memory_space<vmem>>, vector<1x1024xbf16>
    tpu.vector_store %arg5[%c28, %c0_141], %85 {strides = array<i32>} : memref<36x1024xbf16, #tpu.memory_space<vmem>>, vector<1x1024xbf16>,
    %c0_142 = arith.constant 0 : index
    %c3_143 = arith.constant 3 : index
    %c0_144 = arith.constant 0 : index
    %c2_145 = arith.constant 2 : index
    %87 = vector.load %arg1[%c0_142, %c3_143, %c0_144, %c2_145] : memref<1x4x1x1152xbf16, #tpu.memory_space<vmem>>, vector<1x1x1x1024xbf16>
    %88 = vector.shape_cast %87 : vector<1x1x1x1024xbf16> to vector<1x1024xbf16>
    %c29 = arith.constant 29 : index
    %c0_146 = arith.constant 0 : index
    %89 = vector.load %arg5[%c29, %c0_146] : memref<36x1024xbf16, #tpu.memory_space<vmem>>, vector<1x1024xbf16>
    tpu.vector_store %arg5[%c29, %c0_146], %88 {strides = array<i32>} : memref<36x1024xbf16, #tpu.memory_space<vmem>>, vector<1x1024xbf16>,
    %c0_147 = arith.constant 0 : index
    %c3_148 = arith.constant 3 : index
    %c0_149 = arith.constant 0 : index
    %c16_150 = arith.constant 16 : index
    %90 = vector.load %arg1[%c0_147, %c3_148, %c0_149, %c16_150] : memref<1x4x1x1152xbf16, #tpu.memory_space<vmem>>, vector<1x1x1x1024xbf16>
    %91 = vector.shape_cast %90 : vector<1x1x1x1024xbf16> to vector<1x1024xbf16>
    %c30 = arith.constant 30 : index
    %c0_151 = arith.constant 0 : index
    %92 = vector.load %arg5[%c30, %c0_151] : memref<36x1024xbf16, #tpu.memory_space<vmem>>, vector<1x1024xbf16>
    tpu.vector_store %arg5[%c30, %c0_151], %91 {strides = array<i32>} : memref<36x1024xbf16, #tpu.memory_space<vmem>>, vector<1x1024xbf16>,
    %c0_152 = arith.constant 0 : index
    %c3_153 = arith.constant 3 : index
    %c0_154 = arith.constant 0 : index
    %c17_155 = arith.constant 17 : index
    %93 = vector.load %arg1[%c0_152, %c3_153, %c0_154, %c17_155] : memref<1x4x1x1152xbf16, #tpu.memory_space<vmem>>, vector<1x1x1x1024xbf16>
    %94 = vector.shape_cast %93 : vector<1x1x1x1024xbf16> to vector<1x1024xbf16>
    %c31 = arith.constant 31 : index
    %c0_156 = arith.constant 0 : index
    %95 = vector.load %arg5[%c31, %c0_156] : memref<36x1024xbf16, #tpu.memory_space<vmem>>, vector<1x1024xbf16>
    tpu.vector_store %arg5[%c31, %c0_156], %94 {strides = array<i32>} : memref<36x1024xbf16, #tpu.memory_space<vmem>>, vector<1x1024xbf16>,
    %c0_157 = arith.constant 0 : index
    %c3_158 = arith.constant 3 : index
    %c0_159 = arith.constant 0 : index
    %c18_160 = arith.constant 18 : index
    %96 = vector.load %arg1[%c0_157, %c3_158, %c0_159, %c18_160] : memref<1x4x1x1152xbf16, #tpu.memory_space<vmem>>, vector<1x1x1x1024xbf16>
    %97 = vector.shape_cast %96 : vector<1x1x1x1024xbf16> to vector<1x1024xbf16>
    %c32_161 = arith.constant 32 : index
    %c0_162 = arith.constant 0 : index
    %98 = vector.load %arg5[%c32_161, %c0_162] : memref<36x1024xbf16, #tpu.memory_space<vmem>>, vector<1x1024xbf16>
    tpu.vector_store %arg5[%c32_161, %c0_162], %97 {strides = array<i32>} : memref<36x1024xbf16, #tpu.memory_space<vmem>>, vector<1x1024xbf16>,
    %c0_163 = arith.constant 0 : index
    %c3_164 = arith.constant 3 : index
    %c0_165 = arith.constant 0 : index
    %c32_166 = arith.constant 32 : index
    %99 = vector.load %arg1[%c0_163, %c3_164, %c0_165, %c32_166] : memref<1x4x1x1152xbf16, #tpu.memory_space<vmem>>, vector<1x1x1x1024xbf16>
    %100 = vector.shape_cast %99 : vector<1x1x1x1024xbf16> to vector<1x1024xbf16>
    %c33_167 = arith.constant 33 : index
    %c0_168 = arith.constant 0 : index
    %101 = vector.load %arg5[%c33_167, %c0_168] : memref<36x1024xbf16, #tpu.memory_space<vmem>>, vector<1x1024xbf16>
    tpu.vector_store %arg5[%c33_167, %c0_168], %100 {strides = array<i32>} : memref<36x1024xbf16, #tpu.memory_space<vmem>>, vector<1x1024xbf16>,
    %c0_169 = arith.constant 0 : index
    %c3_170 = arith.constant 3 : index
    %c0_171 = arith.constant 0 : index
    %c33_172 = arith.constant 33 : index
    %102 = vector.load %arg1[%c0_169, %c3_170, %c0_171, %c33_172] : memref<1x4x1x1152xbf16, #tpu.memory_space<vmem>>, vector<1x1x1x1024xbf16>
    %103 = vector.shape_cast %102 : vector<1x1x1x1024xbf16> to vector<1x1024xbf16>
    %c34_173 = arith.constant 34 : index
    %c0_174 = arith.constant 0 : index
    %104 = vector.load %arg5[%c34_173, %c0_174] : memref<36x1024xbf16, #tpu.memory_space<vmem>>, vector<1x1024xbf16>
    tpu.vector_store %arg5[%c34_173, %c0_174], %103 {strides = array<i32>} : memref<36x1024xbf16, #tpu.memory_space<vmem>>, vector<1x1024xbf16>,
    %c0_175 = arith.constant 0 : index
    %c3_176 = arith.constant 3 : index
    %c0_177 = arith.constant 0 : index
    %c34_178 = arith.constant 34 : index
    %105 = vector.load %arg1[%c0_175, %c3_176, %c0_177, %c34_178] : memref<1x4x1x1152xbf16, #tpu.memory_space<vmem>>, vector<1x1x1x1024xbf16>
    %106 = vector.shape_cast %105 : vector<1x1x1x1024xbf16> to vector<1x1024xbf16>
    %c35 = arith.constant 35 : index
    %c0_179 = arith.constant 0 : index
    %107 = vector.load %arg5[%c35, %c0_179] : memref<36x1024xbf16, #tpu.memory_space<vmem>>, vector<1x1024xbf16>
    tpu.vector_store %arg5[%c35, %c0_179], %106 {strides = array<i32>} : memref<36x1024xbf16, #tpu.memory_space<vmem>>, vector<1x1024xbf16>,
    %c0_180 = arith.constant 0 : index
    %c0_181 = arith.constant 0 : index
    %108 = vector.load %arg5[%c0_180, %c0_181] : memref<36x1024xbf16, #tpu.memory_space<vmem>>, vector<36x1024xbf16>
    %c0_182 = arith.constant 0 : index
    %c0_183 = arith.constant 0 : index
    %c0_184 = arith.constant 0 : index
    %109 = vector.load %arg2[%c0_182, %c0_183, %c0_184] : memref<4x16x36xbf16, #tpu.memory_space<vmem>>, vector<1x16x36xbf16>
    %110 = vector.shape_cast %109 : vector<1x16x36xbf16> to vector<16x36xbf16>
    %cst = arith.constant dense<0.000000e+00> : vector<16x1024xf32>
    %111 = tpu.matmul %110, %108, %cst {dimension_numbers = #tpu.dot_dimension_numbers<[1], [0], [0], [1], [0, 0, 1, 1], [], []>} : vector<16x36xbf16>, vector<36x1024xbf16>, vector<16x1024xf32> -> vector<16x1024xf32>
    %c1_185 = arith.constant 1 : index
    %c0_186 = arith.constant 0 : index
    %c0_187 = arith.constant 0 : index
    %112 = vector.load %arg2[%c1_185, %c0_186, %c0_187] : memref<4x16x36xbf16, #tpu.memory_space<vmem>>, vector<1x16x36xbf16>
    %113 = vector.shape_cast %112 : vector<1x16x36xbf16> to vector<16x36xbf16>
    %cst_188 = arith.constant dense<0.000000e+00> : vector<16x1024xf32>
    %114 = tpu.matmul %113, %108, %cst_188 {dimension_numbers = #tpu.dot_dimension_numbers<[1], [0], [0], [1], [0, 0, 1, 1], [], []>} : vector<16x36xbf16>, vector<36x1024xbf16>, vector<16x1024xf32> -> vector<16x1024xf32>
    %115 = arith.maximumf %111, %114 : vector<16x1024xf32>
    %c2_189 = arith.constant 2 : index
    %c0_190 = arith.constant 0 : index
    %c0_191 = arith.constant 0 : index
    %116 = vector.load %arg2[%c2_189, %c0_190, %c0_191] : memref<4x16x36xbf16, #tpu.memory_space<vmem>>, vector<1x16x36xbf16>
    %117 = vector.shape_cast %116 : vector<1x16x36xbf16> to vector<16x36xbf16>
    %cst_192 = arith.constant dense<0.000000e+00> : vector<16x1024xf32>
    %118 = tpu.matmul %117, %108, %cst_192 {dimension_numbers = #tpu.dot_dimension_numbers<[1], [0], [0], [1], [0, 0, 1, 1], [], []>} : vector<16x36xbf16>, vector<36x1024xbf16>, vector<16x1024xf32> -> vector<16x1024xf32>
    %119 = arith.maximumf %115, %118 : vector<16x1024xf32>
    %c3_193 = arith.constant 3 : index
    %c0_194 = arith.constant 0 : index
    %c0_195 = arith.constant 0 : index
    %120 = vector.load %arg2[%c3_193, %c0_194, %c0_195] : memref<4x16x36xbf16, #tpu.memory_space<vmem>>, vector<1x16x36xbf16>
    %121 = vector.shape_cast %120 : vector<1x16x36xbf16> to vector<16x36xbf16>
    %cst_196 = arith.constant dense<0.000000e+00> : vector<16x1024xf32>
    %122 = tpu.matmul %121, %108, %cst_196 {dimension_numbers = #tpu.dot_dimension_numbers<[1], [0], [0], [1], [0, 0, 1, 1], [], []>} : vector<16x36xbf16>, vector<36x1024xbf16>, vector<16x1024xf32> -> vector<16x1024xf32>
    %123 = arith.maximumf %119, %122 : vector<16x1024xf32>
    %c0_197 = arith.constant 0 : index
    %c0_198 = arith.constant 0 : index
    %124 = vector.load %arg3[%c0_197, %c0_198] : memref<16x1xf32, #tpu.memory_space<vmem>>, vector<16x1xf32>
    %125 = vector.broadcast %124 : vector<16x1xf32> to vector<16x1024xf32>
    %126 = arith.addf %123, %125 : vector<16x1024xf32>
    %cst_199 = arith.constant 0.000000e+00 : f32
    %127 = vector.broadcast %cst_199 : f32 to vector<16x1024xf32>
    %128 = arith.maximumf %126, %127 : vector<16x1024xf32>
    %129 = arith.truncf %128 : vector<16x1024xf32> to vector<16x1024xbf16>
    %c0_200 = arith.constant 0 : index
    %c0_201 = arith.constant 0 : index
    %c0_202 = arith.constant 0 : index
    %130 = vector.load %arg4[%c0_200, %c0_201, %c0_202] : memref<1x16x1024xbf16, #tpu.memory_space<vmem>>, vector<1x16x1024xbf16>
    %131 = vector.shape_cast %130 : vector<1x16x1024xbf16> to vector<16x1024xbf16>
    %132 = vector.shape_cast %129 : vector<16x1024xbf16> to vector<1x16x1024xbf16>
    tpu.vector_store %arg4[%c0_200, %c0_201, %c0_202], %132 {strides = array<i32>} : memref<1x16x1024xbf16, #tpu.memory_space<vmem>>, vector<1x16x1024xbf16>,
    return
  }
  func.func @transform_0(%arg0: i32) -> (i32, i32, i32, i32) {
    %c0_i32 = arith.constant 0 : i32
    %c0_i32_0 = arith.constant 0 : i32
    %c0_i32_1 = arith.constant 0 : i32
    %c0_i32_2 = arith.constant 0 : i32
    return %arg0, %c0_i32, %c0_i32_0, %c0_i32_1 : i32, i32, i32, i32
  }
  func.func @transform_1(%arg0: i32) -> (i32, i32, i32) {
    %c0_i32 = arith.constant 0 : i32
    %c0_i32_0 = arith.constant 0 : i32
    %c0_i32_1 = arith.constant 0 : i32
    %c0_i32_2 = arith.constant 0 : i32
    return %c0_i32, %c0_i32_0, %c0_i32_1 : i32, i32, i32
  }
  func.func @transform_2(%arg0: i32) -> (i32, i32) {
    %c0_i32 = arith.constant 0 : i32
    %c0_i32_0 = arith.constant 0 : i32
    %c0_i32_1 = arith.constant 0 : i32
    return %c0_i32, %c0_i32_0 : i32, i32
  }
  func.func @transform_3(%arg0: i32) -> (i32, i32, i32) {
    %c0_i32 = arith.constant 0 : i32
    %c0_i32_0 = arith.constant 0 : i32
    %c0_i32_1 = arith.constant 0 : i32
    return %arg0, %c0_i32, %c0_i32_0 : i32, i32, i32
  }
}

module attributes {stable_mosaic.version = 11 : i64} {
  func.func @kernel(%arg0: i32, %arg1: memref<1x4x16x512xbf16, #tpu.memory_space<vmem>>, %arg2: memref<4x32x576xbf16, #tpu.memory_space<vmem>>, %arg3: memref<32x1xf32, #tpu.memory_space<vmem>>, %arg4: memref<1x32x384xbf16, #tpu.memory_space<vmem>>, %arg5: memref<576x384xbf16, #tpu.memory_space<vmem>>) attributes {dimension_semantics = [#tpu.dimension_semantics<parallel>], iteration_bounds = array<i64: 2>, scalar_prefetch = 0 : i64, scratch_operands = 1 : i64, tpu.core_type = #tpu.core_type<tc>, window_params = [{transform_indices = @transform_0, window_bounds = array<i64: 1, 4, 16, 512>}, {pipeline_mode = #tpu.pipeline_mode<synchronous>, transform_indices = @transform_1, window_bounds = array<i64: 4, 32, 576>}, {pipeline_mode = #tpu.pipeline_mode<synchronous>, transform_indices = @transform_2, window_bounds = array<i64: 32, 1>}, {transform_indices = @transform_3, window_bounds = array<i64: 1, 32, 384>}]} {
    %c0 = arith.constant 0 : index
    %c0_0 = arith.constant 0 : index
    %c0_1 = arith.constant 0 : index
    %c0_2 = arith.constant 0 : index
    %0 = vector.load %arg1[%c0, %c0_0, %c0_1, %c0_2] : memref<1x4x16x512xbf16, #tpu.memory_space<vmem>>, vector<1x1x16x384xbf16>
    %1 = vector.shape_cast %0 : vector<1x1x16x384xbf16> to vector<16x384xbf16>
    %c0_3 = arith.constant 0 : index
    %c0_4 = arith.constant 0 : index
    %2 = vector.load %arg5[%c0_3, %c0_4] : memref<576x384xbf16, #tpu.memory_space<vmem>>, vector<16x384xbf16>
    tpu.vector_store %arg5[%c0_3, %c0_4], %1 {strides = array<i32>} : memref<576x384xbf16, #tpu.memory_space<vmem>>, vector<16x384xbf16>,
    %c0_5 = arith.constant 0 : index
    %c0_6 = arith.constant 0 : index
    %c0_7 = arith.constant 0 : index
    %c1 = arith.constant 1 : index
    %3 = vector.load %arg1[%c0_5, %c0_6, %c0_7, %c1] : memref<1x4x16x512xbf16, #tpu.memory_space<vmem>>, vector<1x1x16x384xbf16>
    %4 = vector.shape_cast %3 : vector<1x1x16x384xbf16> to vector<16x384xbf16>
    %c16 = arith.constant 16 : index
    %c0_8 = arith.constant 0 : index
    %5 = vector.load %arg5[%c16, %c0_8] : memref<576x384xbf16, #tpu.memory_space<vmem>>, vector<16x384xbf16>
    tpu.vector_store %arg5[%c16, %c0_8], %4 {strides = array<i32>} : memref<576x384xbf16, #tpu.memory_space<vmem>>, vector<16x384xbf16>,
    %c0_9 = arith.constant 0 : index
    %c0_10 = arith.constant 0 : index
    %c0_11 = arith.constant 0 : index
    %c2 = arith.constant 2 : index
    %6 = vector.load %arg1[%c0_9, %c0_10, %c0_11, %c2] : memref<1x4x16x512xbf16, #tpu.memory_space<vmem>>, vector<1x1x16x384xbf16>
    %7 = vector.shape_cast %6 : vector<1x1x16x384xbf16> to vector<16x384xbf16>
    %c32 = arith.constant 32 : index
    %c0_12 = arith.constant 0 : index
    %8 = vector.load %arg5[%c32, %c0_12] : memref<576x384xbf16, #tpu.memory_space<vmem>>, vector<16x384xbf16>
    tpu.vector_store %arg5[%c32, %c0_12], %7 {strides = array<i32>} : memref<576x384xbf16, #tpu.memory_space<vmem>>, vector<16x384xbf16>,
    %c0_13 = arith.constant 0 : index
    %c0_14 = arith.constant 0 : index
    %c0_15 = arith.constant 0 : index
    %c9 = arith.constant 9 : index
    %9 = vector.load %arg1[%c0_13, %c0_14, %c0_15, %c9] : memref<1x4x16x512xbf16, #tpu.memory_space<vmem>>, vector<1x1x16x384xbf16>
    %10 = vector.shape_cast %9 : vector<1x1x16x384xbf16> to vector<16x384xbf16>
    %c48 = arith.constant 48 : index
    %c0_16 = arith.constant 0 : index
    %11 = vector.load %arg5[%c48, %c0_16] : memref<576x384xbf16, #tpu.memory_space<vmem>>, vector<16x384xbf16>
    tpu.vector_store %arg5[%c48, %c0_16], %10 {strides = array<i32>} : memref<576x384xbf16, #tpu.memory_space<vmem>>, vector<16x384xbf16>,
    %c0_17 = arith.constant 0 : index
    %c0_18 = arith.constant 0 : index
    %c0_19 = arith.constant 0 : index
    %c10 = arith.constant 10 : index
    %12 = vector.load %arg1[%c0_17, %c0_18, %c0_19, %c10] : memref<1x4x16x512xbf16, #tpu.memory_space<vmem>>, vector<1x1x16x384xbf16>
    %13 = vector.shape_cast %12 : vector<1x1x16x384xbf16> to vector<16x384xbf16>
    %c64 = arith.constant 64 : index
    %c0_20 = arith.constant 0 : index
    %14 = vector.load %arg5[%c64, %c0_20] : memref<576x384xbf16, #tpu.memory_space<vmem>>, vector<16x384xbf16>
    tpu.vector_store %arg5[%c64, %c0_20], %13 {strides = array<i32>} : memref<576x384xbf16, #tpu.memory_space<vmem>>, vector<16x384xbf16>,
    %c0_21 = arith.constant 0 : index
    %c0_22 = arith.constant 0 : index
    %c0_23 = arith.constant 0 : index
    %c11 = arith.constant 11 : index
    %15 = vector.load %arg1[%c0_21, %c0_22, %c0_23, %c11] : memref<1x4x16x512xbf16, #tpu.memory_space<vmem>>, vector<1x1x16x384xbf16>
    %16 = vector.shape_cast %15 : vector<1x1x16x384xbf16> to vector<16x384xbf16>
    %c80 = arith.constant 80 : index
    %c0_24 = arith.constant 0 : index
    %17 = vector.load %arg5[%c80, %c0_24] : memref<576x384xbf16, #tpu.memory_space<vmem>>, vector<16x384xbf16>
    tpu.vector_store %arg5[%c80, %c0_24], %16 {strides = array<i32>} : memref<576x384xbf16, #tpu.memory_space<vmem>>, vector<16x384xbf16>,
    %c0_25 = arith.constant 0 : index
    %c0_26 = arith.constant 0 : index
    %c0_27 = arith.constant 0 : index
    %c18 = arith.constant 18 : index
    %18 = vector.load %arg1[%c0_25, %c0_26, %c0_27, %c18] : memref<1x4x16x512xbf16, #tpu.memory_space<vmem>>, vector<1x1x16x384xbf16>
    %19 = vector.shape_cast %18 : vector<1x1x16x384xbf16> to vector<16x384xbf16>
    %c96 = arith.constant 96 : index
    %c0_28 = arith.constant 0 : index
    %20 = vector.load %arg5[%c96, %c0_28] : memref<576x384xbf16, #tpu.memory_space<vmem>>, vector<16x384xbf16>
    tpu.vector_store %arg5[%c96, %c0_28], %19 {strides = array<i32>} : memref<576x384xbf16, #tpu.memory_space<vmem>>, vector<16x384xbf16>,
    %c0_29 = arith.constant 0 : index
    %c0_30 = arith.constant 0 : index
    %c0_31 = arith.constant 0 : index
    %c19 = arith.constant 19 : index
    %21 = vector.load %arg1[%c0_29, %c0_30, %c0_31, %c19] : memref<1x4x16x512xbf16, #tpu.memory_space<vmem>>, vector<1x1x16x384xbf16>
    %22 = vector.shape_cast %21 : vector<1x1x16x384xbf16> to vector<16x384xbf16>
    %c112 = arith.constant 112 : index
    %c0_32 = arith.constant 0 : index
    %23 = vector.load %arg5[%c112, %c0_32] : memref<576x384xbf16, #tpu.memory_space<vmem>>, vector<16x384xbf16>
    tpu.vector_store %arg5[%c112, %c0_32], %22 {strides = array<i32>} : memref<576x384xbf16, #tpu.memory_space<vmem>>, vector<16x384xbf16>,
    %c0_33 = arith.constant 0 : index
    %c0_34 = arith.constant 0 : index
    %c0_35 = arith.constant 0 : index
    %c20 = arith.constant 20 : index
    %24 = vector.load %arg1[%c0_33, %c0_34, %c0_35, %c20] : memref<1x4x16x512xbf16, #tpu.memory_space<vmem>>, vector<1x1x16x384xbf16>
    %25 = vector.shape_cast %24 : vector<1x1x16x384xbf16> to vector<16x384xbf16>
    %c128 = arith.constant 128 : index
    %c0_36 = arith.constant 0 : index
    %26 = vector.load %arg5[%c128, %c0_36] : memref<576x384xbf16, #tpu.memory_space<vmem>>, vector<16x384xbf16>
    tpu.vector_store %arg5[%c128, %c0_36], %25 {strides = array<i32>} : memref<576x384xbf16, #tpu.memory_space<vmem>>, vector<16x384xbf16>,
    %c0_37 = arith.constant 0 : index
    %c1_38 = arith.constant 1 : index
    %c0_39 = arith.constant 0 : index
    %c0_40 = arith.constant 0 : index
    %27 = vector.load %arg1[%c0_37, %c1_38, %c0_39, %c0_40] : memref<1x4x16x512xbf16, #tpu.memory_space<vmem>>, vector<1x1x16x384xbf16>
    %28 = vector.shape_cast %27 : vector<1x1x16x384xbf16> to vector<16x384xbf16>
    %c144 = arith.constant 144 : index
    %c0_41 = arith.constant 0 : index
    %29 = vector.load %arg5[%c144, %c0_41] : memref<576x384xbf16, #tpu.memory_space<vmem>>, vector<16x384xbf16>
    tpu.vector_store %arg5[%c144, %c0_41], %28 {strides = array<i32>} : memref<576x384xbf16, #tpu.memory_space<vmem>>, vector<16x384xbf16>,
    %c0_42 = arith.constant 0 : index
    %c1_43 = arith.constant 1 : index
    %c0_44 = arith.constant 0 : index
    %c1_45 = arith.constant 1 : index
    %30 = vector.load %arg1[%c0_42, %c1_43, %c0_44, %c1_45] : memref<1x4x16x512xbf16, #tpu.memory_space<vmem>>, vector<1x1x16x384xbf16>
    %31 = vector.shape_cast %30 : vector<1x1x16x384xbf16> to vector<16x384xbf16>
    %c160 = arith.constant 160 : index
    %c0_46 = arith.constant 0 : index
    %32 = vector.load %arg5[%c160, %c0_46] : memref<576x384xbf16, #tpu.memory_space<vmem>>, vector<16x384xbf16>
    tpu.vector_store %arg5[%c160, %c0_46], %31 {strides = array<i32>} : memref<576x384xbf16, #tpu.memory_space<vmem>>, vector<16x384xbf16>,
    %c0_47 = arith.constant 0 : index
    %c1_48 = arith.constant 1 : index
    %c0_49 = arith.constant 0 : index
    %c2_50 = arith.constant 2 : index
    %33 = vector.load %arg1[%c0_47, %c1_48, %c0_49, %c2_50] : memref<1x4x16x512xbf16, #tpu.memory_space<vmem>>, vector<1x1x16x384xbf16>
    %34 = vector.shape_cast %33 : vector<1x1x16x384xbf16> to vector<16x384xbf16>
    %c176 = arith.constant 176 : index
    %c0_51 = arith.constant 0 : index
    %35 = vector.load %arg5[%c176, %c0_51] : memref<576x384xbf16, #tpu.memory_space<vmem>>, vector<16x384xbf16>
    tpu.vector_store %arg5[%c176, %c0_51], %34 {strides = array<i32>} : memref<576x384xbf16, #tpu.memory_space<vmem>>, vector<16x384xbf16>,
    %c0_52 = arith.constant 0 : index
    %c1_53 = arith.constant 1 : index
    %c0_54 = arith.constant 0 : index
    %c9_55 = arith.constant 9 : index
    %36 = vector.load %arg1[%c0_52, %c1_53, %c0_54, %c9_55] : memref<1x4x16x512xbf16, #tpu.memory_space<vmem>>, vector<1x1x16x384xbf16>
    %37 = vector.shape_cast %36 : vector<1x1x16x384xbf16> to vector<16x384xbf16>
    %c192 = arith.constant 192 : index
    %c0_56 = arith.constant 0 : index
    %38 = vector.load %arg5[%c192, %c0_56] : memref<576x384xbf16, #tpu.memory_space<vmem>>, vector<16x384xbf16>
    tpu.vector_store %arg5[%c192, %c0_56], %37 {strides = array<i32>} : memref<576x384xbf16, #tpu.memory_space<vmem>>, vector<16x384xbf16>,
    %c0_57 = arith.constant 0 : index
    %c1_58 = arith.constant 1 : index
    %c0_59 = arith.constant 0 : index
    %c10_60 = arith.constant 10 : index
    %39 = vector.load %arg1[%c0_57, %c1_58, %c0_59, %c10_60] : memref<1x4x16x512xbf16, #tpu.memory_space<vmem>>, vector<1x1x16x384xbf16>
    %40 = vector.shape_cast %39 : vector<1x1x16x384xbf16> to vector<16x384xbf16>
    %c208 = arith.constant 208 : index
    %c0_61 = arith.constant 0 : index
    %41 = vector.load %arg5[%c208, %c0_61] : memref<576x384xbf16, #tpu.memory_space<vmem>>, vector<16x384xbf16>
    tpu.vector_store %arg5[%c208, %c0_61], %40 {strides = array<i32>} : memref<576x384xbf16, #tpu.memory_space<vmem>>, vector<16x384xbf16>,
    %c0_62 = arith.constant 0 : index
    %c1_63 = arith.constant 1 : index
    %c0_64 = arith.constant 0 : index
    %c11_65 = arith.constant 11 : index
    %42 = vector.load %arg1[%c0_62, %c1_63, %c0_64, %c11_65] : memref<1x4x16x512xbf16, #tpu.memory_space<vmem>>, vector<1x1x16x384xbf16>
    %43 = vector.shape_cast %42 : vector<1x1x16x384xbf16> to vector<16x384xbf16>
    %c224 = arith.constant 224 : index
    %c0_66 = arith.constant 0 : index
    %44 = vector.load %arg5[%c224, %c0_66] : memref<576x384xbf16, #tpu.memory_space<vmem>>, vector<16x384xbf16>
    tpu.vector_store %arg5[%c224, %c0_66], %43 {strides = array<i32>} : memref<576x384xbf16, #tpu.memory_space<vmem>>, vector<16x384xbf16>,
    %c0_67 = arith.constant 0 : index
    %c1_68 = arith.constant 1 : index
    %c0_69 = arith.constant 0 : index
    %c18_70 = arith.constant 18 : index
    %45 = vector.load %arg1[%c0_67, %c1_68, %c0_69, %c18_70] : memref<1x4x16x512xbf16, #tpu.memory_space<vmem>>, vector<1x1x16x384xbf16>
    %46 = vector.shape_cast %45 : vector<1x1x16x384xbf16> to vector<16x384xbf16>
    %c240 = arith.constant 240 : index
    %c0_71 = arith.constant 0 : index
    %47 = vector.load %arg5[%c240, %c0_71] : memref<576x384xbf16, #tpu.memory_space<vmem>>, vector<16x384xbf16>
    tpu.vector_store %arg5[%c240, %c0_71], %46 {strides = array<i32>} : memref<576x384xbf16, #tpu.memory_space<vmem>>, vector<16x384xbf16>,
    %c0_72 = arith.constant 0 : index
    %c1_73 = arith.constant 1 : index
    %c0_74 = arith.constant 0 : index
    %c19_75 = arith.constant 19 : index
    %48 = vector.load %arg1[%c0_72, %c1_73, %c0_74, %c19_75] : memref<1x4x16x512xbf16, #tpu.memory_space<vmem>>, vector<1x1x16x384xbf16>
    %49 = vector.shape_cast %48 : vector<1x1x16x384xbf16> to vector<16x384xbf16>
    %c256 = arith.constant 256 : index
    %c0_76 = arith.constant 0 : index
    %50 = vector.load %arg5[%c256, %c0_76] : memref<576x384xbf16, #tpu.memory_space<vmem>>, vector<16x384xbf16>
    tpu.vector_store %arg5[%c256, %c0_76], %49 {strides = array<i32>} : memref<576x384xbf16, #tpu.memory_space<vmem>>, vector<16x384xbf16>,
    %c0_77 = arith.constant 0 : index
    %c1_78 = arith.constant 1 : index
    %c0_79 = arith.constant 0 : index
    %c20_80 = arith.constant 20 : index
    %51 = vector.load %arg1[%c0_77, %c1_78, %c0_79, %c20_80] : memref<1x4x16x512xbf16, #tpu.memory_space<vmem>>, vector<1x1x16x384xbf16>
    %52 = vector.shape_cast %51 : vector<1x1x16x384xbf16> to vector<16x384xbf16>
    %c272 = arith.constant 272 : index
    %c0_81 = arith.constant 0 : index
    %53 = vector.load %arg5[%c272, %c0_81] : memref<576x384xbf16, #tpu.memory_space<vmem>>, vector<16x384xbf16>
    tpu.vector_store %arg5[%c272, %c0_81], %52 {strides = array<i32>} : memref<576x384xbf16, #tpu.memory_space<vmem>>, vector<16x384xbf16>,
    %c0_82 = arith.constant 0 : index
    %c2_83 = arith.constant 2 : index
    %c0_84 = arith.constant 0 : index
    %c0_85 = arith.constant 0 : index
    %54 = vector.load %arg1[%c0_82, %c2_83, %c0_84, %c0_85] : memref<1x4x16x512xbf16, #tpu.memory_space<vmem>>, vector<1x1x16x384xbf16>
    %55 = vector.shape_cast %54 : vector<1x1x16x384xbf16> to vector<16x384xbf16>
    %c288 = arith.constant 288 : index
    %c0_86 = arith.constant 0 : index
    %56 = vector.load %arg5[%c288, %c0_86] : memref<576x384xbf16, #tpu.memory_space<vmem>>, vector<16x384xbf16>
    tpu.vector_store %arg5[%c288, %c0_86], %55 {strides = array<i32>} : memref<576x384xbf16, #tpu.memory_space<vmem>>, vector<16x384xbf16>,
    %c0_87 = arith.constant 0 : index
    %c2_88 = arith.constant 2 : index
    %c0_89 = arith.constant 0 : index
    %c1_90 = arith.constant 1 : index
    %57 = vector.load %arg1[%c0_87, %c2_88, %c0_89, %c1_90] : memref<1x4x16x512xbf16, #tpu.memory_space<vmem>>, vector<1x1x16x384xbf16>
    %58 = vector.shape_cast %57 : vector<1x1x16x384xbf16> to vector<16x384xbf16>
    %c304 = arith.constant 304 : index
    %c0_91 = arith.constant 0 : index
    %59 = vector.load %arg5[%c304, %c0_91] : memref<576x384xbf16, #tpu.memory_space<vmem>>, vector<16x384xbf16>
    tpu.vector_store %arg5[%c304, %c0_91], %58 {strides = array<i32>} : memref<576x384xbf16, #tpu.memory_space<vmem>>, vector<16x384xbf16>,
    %c0_92 = arith.constant 0 : index
    %c2_93 = arith.constant 2 : index
    %c0_94 = arith.constant 0 : index
    %c2_95 = arith.constant 2 : index
    %60 = vector.load %arg1[%c0_92, %c2_93, %c0_94, %c2_95] : memref<1x4x16x512xbf16, #tpu.memory_space<vmem>>, vector<1x1x16x384xbf16>
    %61 = vector.shape_cast %60 : vector<1x1x16x384xbf16> to vector<16x384xbf16>
    %c320 = arith.constant 320 : index
    %c0_96 = arith.constant 0 : index
    %62 = vector.load %arg5[%c320, %c0_96] : memref<576x384xbf16, #tpu.memory_space<vmem>>, vector<16x384xbf16>
    tpu.vector_store %arg5[%c320, %c0_96], %61 {strides = array<i32>} : memref<576x384xbf16, #tpu.memory_space<vmem>>, vector<16x384xbf16>,
    %c0_97 = arith.constant 0 : index
    %c2_98 = arith.constant 2 : index
    %c0_99 = arith.constant 0 : index
    %c9_100 = arith.constant 9 : index
    %63 = vector.load %arg1[%c0_97, %c2_98, %c0_99, %c9_100] : memref<1x4x16x512xbf16, #tpu.memory_space<vmem>>, vector<1x1x16x384xbf16>
    %64 = vector.shape_cast %63 : vector<1x1x16x384xbf16> to vector<16x384xbf16>
    %c336 = arith.constant 336 : index
    %c0_101 = arith.constant 0 : index
    %65 = vector.load %arg5[%c336, %c0_101] : memref<576x384xbf16, #tpu.memory_space<vmem>>, vector<16x384xbf16>
    tpu.vector_store %arg5[%c336, %c0_101], %64 {strides = array<i32>} : memref<576x384xbf16, #tpu.memory_space<vmem>>, vector<16x384xbf16>,
    %c0_102 = arith.constant 0 : index
    %c2_103 = arith.constant 2 : index
    %c0_104 = arith.constant 0 : index
    %c10_105 = arith.constant 10 : index
    %66 = vector.load %arg1[%c0_102, %c2_103, %c0_104, %c10_105] : memref<1x4x16x512xbf16, #tpu.memory_space<vmem>>, vector<1x1x16x384xbf16>
    %67 = vector.shape_cast %66 : vector<1x1x16x384xbf16> to vector<16x384xbf16>
    %c352 = arith.constant 352 : index
    %c0_106 = arith.constant 0 : index
    %68 = vector.load %arg5[%c352, %c0_106] : memref<576x384xbf16, #tpu.memory_space<vmem>>, vector<16x384xbf16>
    tpu.vector_store %arg5[%c352, %c0_106], %67 {strides = array<i32>} : memref<576x384xbf16, #tpu.memory_space<vmem>>, vector<16x384xbf16>,
    %c0_107 = arith.constant 0 : index
    %c2_108 = arith.constant 2 : index
    %c0_109 = arith.constant 0 : index
    %c11_110 = arith.constant 11 : index
    %69 = vector.load %arg1[%c0_107, %c2_108, %c0_109, %c11_110] : memref<1x4x16x512xbf16, #tpu.memory_space<vmem>>, vector<1x1x16x384xbf16>
    %70 = vector.shape_cast %69 : vector<1x1x16x384xbf16> to vector<16x384xbf16>
    %c368 = arith.constant 368 : index
    %c0_111 = arith.constant 0 : index
    %71 = vector.load %arg5[%c368, %c0_111] : memref<576x384xbf16, #tpu.memory_space<vmem>>, vector<16x384xbf16>
    tpu.vector_store %arg5[%c368, %c0_111], %70 {strides = array<i32>} : memref<576x384xbf16, #tpu.memory_space<vmem>>, vector<16x384xbf16>,
    %c0_112 = arith.constant 0 : index
    %c2_113 = arith.constant 2 : index
    %c0_114 = arith.constant 0 : index
    %c18_115 = arith.constant 18 : index
    %72 = vector.load %arg1[%c0_112, %c2_113, %c0_114, %c18_115] : memref<1x4x16x512xbf16, #tpu.memory_space<vmem>>, vector<1x1x16x384xbf16>
    %73 = vector.shape_cast %72 : vector<1x1x16x384xbf16> to vector<16x384xbf16>
    %c384 = arith.constant 384 : index
    %c0_116 = arith.constant 0 : index
    %74 = vector.load %arg5[%c384, %c0_116] : memref<576x384xbf16, #tpu.memory_space<vmem>>, vector<16x384xbf16>
    tpu.vector_store %arg5[%c384, %c0_116], %73 {strides = array<i32>} : memref<576x384xbf16, #tpu.memory_space<vmem>>, vector<16x384xbf16>,
    %c0_117 = arith.constant 0 : index
    %c2_118 = arith.constant 2 : index
    %c0_119 = arith.constant 0 : index
    %c19_120 = arith.constant 19 : index
    %75 = vector.load %arg1[%c0_117, %c2_118, %c0_119, %c19_120] : memref<1x4x16x512xbf16, #tpu.memory_space<vmem>>, vector<1x1x16x384xbf16>
    %76 = vector.shape_cast %75 : vector<1x1x16x384xbf16> to vector<16x384xbf16>
    %c400 = arith.constant 400 : index
    %c0_121 = arith.constant 0 : index
    %77 = vector.load %arg5[%c400, %c0_121] : memref<576x384xbf16, #tpu.memory_space<vmem>>, vector<16x384xbf16>
    tpu.vector_store %arg5[%c400, %c0_121], %76 {strides = array<i32>} : memref<576x384xbf16, #tpu.memory_space<vmem>>, vector<16x384xbf16>,
    %c0_122 = arith.constant 0 : index
    %c2_123 = arith.constant 2 : index
    %c0_124 = arith.constant 0 : index
    %c20_125 = arith.constant 20 : index
    %78 = vector.load %arg1[%c0_122, %c2_123, %c0_124, %c20_125] : memref<1x4x16x512xbf16, #tpu.memory_space<vmem>>, vector<1x1x16x384xbf16>
    %79 = vector.shape_cast %78 : vector<1x1x16x384xbf16> to vector<16x384xbf16>
    %c416 = arith.constant 416 : index
    %c0_126 = arith.constant 0 : index
    %80 = vector.load %arg5[%c416, %c0_126] : memref<576x384xbf16, #tpu.memory_space<vmem>>, vector<16x384xbf16>
    tpu.vector_store %arg5[%c416, %c0_126], %79 {strides = array<i32>} : memref<576x384xbf16, #tpu.memory_space<vmem>>, vector<16x384xbf16>,
    %c0_127 = arith.constant 0 : index
    %c3 = arith.constant 3 : index
    %c0_128 = arith.constant 0 : index
    %c0_129 = arith.constant 0 : index
    %81 = vector.load %arg1[%c0_127, %c3, %c0_128, %c0_129] : memref<1x4x16x512xbf16, #tpu.memory_space<vmem>>, vector<1x1x16x384xbf16>
    %82 = vector.shape_cast %81 : vector<1x1x16x384xbf16> to vector<16x384xbf16>
    %c432 = arith.constant 432 : index
    %c0_130 = arith.constant 0 : index
    %83 = vector.load %arg5[%c432, %c0_130] : memref<576x384xbf16, #tpu.memory_space<vmem>>, vector<16x384xbf16>
    tpu.vector_store %arg5[%c432, %c0_130], %82 {strides = array<i32>} : memref<576x384xbf16, #tpu.memory_space<vmem>>, vector<16x384xbf16>,
    %c0_131 = arith.constant 0 : index
    %c3_132 = arith.constant 3 : index
    %c0_133 = arith.constant 0 : index
    %c1_134 = arith.constant 1 : index
    %84 = vector.load %arg1[%c0_131, %c3_132, %c0_133, %c1_134] : memref<1x4x16x512xbf16, #tpu.memory_space<vmem>>, vector<1x1x16x384xbf16>
    %85 = vector.shape_cast %84 : vector<1x1x16x384xbf16> to vector<16x384xbf16>
    %c448 = arith.constant 448 : index
    %c0_135 = arith.constant 0 : index
    %86 = vector.load %arg5[%c448, %c0_135] : memref<576x384xbf16, #tpu.memory_space<vmem>>, vector<16x384xbf16>
    tpu.vector_store %arg5[%c448, %c0_135], %85 {strides = array<i32>} : memref<576x384xbf16, #tpu.memory_space<vmem>>, vector<16x384xbf16>,
    %c0_136 = arith.constant 0 : index
    %c3_137 = arith.constant 3 : index
    %c0_138 = arith.constant 0 : index
    %c2_139 = arith.constant 2 : index
    %87 = vector.load %arg1[%c0_136, %c3_137, %c0_138, %c2_139] : memref<1x4x16x512xbf16, #tpu.memory_space<vmem>>, vector<1x1x16x384xbf16>
    %88 = vector.shape_cast %87 : vector<1x1x16x384xbf16> to vector<16x384xbf16>
    %c464 = arith.constant 464 : index
    %c0_140 = arith.constant 0 : index
    %89 = vector.load %arg5[%c464, %c0_140] : memref<576x384xbf16, #tpu.memory_space<vmem>>, vector<16x384xbf16>
    tpu.vector_store %arg5[%c464, %c0_140], %88 {strides = array<i32>} : memref<576x384xbf16, #tpu.memory_space<vmem>>, vector<16x384xbf16>,
    %c0_141 = arith.constant 0 : index
    %c3_142 = arith.constant 3 : index
    %c0_143 = arith.constant 0 : index
    %c9_144 = arith.constant 9 : index
    %90 = vector.load %arg1[%c0_141, %c3_142, %c0_143, %c9_144] : memref<1x4x16x512xbf16, #tpu.memory_space<vmem>>, vector<1x1x16x384xbf16>
    %91 = vector.shape_cast %90 : vector<1x1x16x384xbf16> to vector<16x384xbf16>
    %c480 = arith.constant 480 : index
    %c0_145 = arith.constant 0 : index
    %92 = vector.load %arg5[%c480, %c0_145] : memref<576x384xbf16, #tpu.memory_space<vmem>>, vector<16x384xbf16>
    tpu.vector_store %arg5[%c480, %c0_145], %91 {strides = array<i32>} : memref<576x384xbf16, #tpu.memory_space<vmem>>, vector<16x384xbf16>,
    %c0_146 = arith.constant 0 : index
    %c3_147 = arith.constant 3 : index
    %c0_148 = arith.constant 0 : index
    %c10_149 = arith.constant 10 : index
    %93 = vector.load %arg1[%c0_146, %c3_147, %c0_148, %c10_149] : memref<1x4x16x512xbf16, #tpu.memory_space<vmem>>, vector<1x1x16x384xbf16>
    %94 = vector.shape_cast %93 : vector<1x1x16x384xbf16> to vector<16x384xbf16>
    %c496 = arith.constant 496 : index
    %c0_150 = arith.constant 0 : index
    %95 = vector.load %arg5[%c496, %c0_150] : memref<576x384xbf16, #tpu.memory_space<vmem>>, vector<16x384xbf16>
    tpu.vector_store %arg5[%c496, %c0_150], %94 {strides = array<i32>} : memref<576x384xbf16, #tpu.memory_space<vmem>>, vector<16x384xbf16>,
    %c0_151 = arith.constant 0 : index
    %c3_152 = arith.constant 3 : index
    %c0_153 = arith.constant 0 : index
    %c11_154 = arith.constant 11 : index
    %96 = vector.load %arg1[%c0_151, %c3_152, %c0_153, %c11_154] : memref<1x4x16x512xbf16, #tpu.memory_space<vmem>>, vector<1x1x16x384xbf16>
    %97 = vector.shape_cast %96 : vector<1x1x16x384xbf16> to vector<16x384xbf16>
    %c512 = arith.constant 512 : index
    %c0_155 = arith.constant 0 : index
    %98 = vector.load %arg5[%c512, %c0_155] : memref<576x384xbf16, #tpu.memory_space<vmem>>, vector<16x384xbf16>
    tpu.vector_store %arg5[%c512, %c0_155], %97 {strides = array<i32>} : memref<576x384xbf16, #tpu.memory_space<vmem>>, vector<16x384xbf16>,
    %c0_156 = arith.constant 0 : index
    %c3_157 = arith.constant 3 : index
    %c0_158 = arith.constant 0 : index
    %c18_159 = arith.constant 18 : index
    %99 = vector.load %arg1[%c0_156, %c3_157, %c0_158, %c18_159] : memref<1x4x16x512xbf16, #tpu.memory_space<vmem>>, vector<1x1x16x384xbf16>
    %100 = vector.shape_cast %99 : vector<1x1x16x384xbf16> to vector<16x384xbf16>
    %c528 = arith.constant 528 : index
    %c0_160 = arith.constant 0 : index
    %101 = vector.load %arg5[%c528, %c0_160] : memref<576x384xbf16, #tpu.memory_space<vmem>>, vector<16x384xbf16>
    tpu.vector_store %arg5[%c528, %c0_160], %100 {strides = array<i32>} : memref<576x384xbf16, #tpu.memory_space<vmem>>, vector<16x384xbf16>,
    %c0_161 = arith.constant 0 : index
    %c3_162 = arith.constant 3 : index
    %c0_163 = arith.constant 0 : index
    %c19_164 = arith.constant 19 : index
    %102 = vector.load %arg1[%c0_161, %c3_162, %c0_163, %c19_164] : memref<1x4x16x512xbf16, #tpu.memory_space<vmem>>, vector<1x1x16x384xbf16>
    %103 = vector.shape_cast %102 : vector<1x1x16x384xbf16> to vector<16x384xbf16>
    %c544 = arith.constant 544 : index
    %c0_165 = arith.constant 0 : index
    %104 = vector.load %arg5[%c544, %c0_165] : memref<576x384xbf16, #tpu.memory_space<vmem>>, vector<16x384xbf16>
    tpu.vector_store %arg5[%c544, %c0_165], %103 {strides = array<i32>} : memref<576x384xbf16, #tpu.memory_space<vmem>>, vector<16x384xbf16>,
    %c0_166 = arith.constant 0 : index
    %c3_167 = arith.constant 3 : index
    %c0_168 = arith.constant 0 : index
    %c20_169 = arith.constant 20 : index
    %105 = vector.load %arg1[%c0_166, %c3_167, %c0_168, %c20_169] : memref<1x4x16x512xbf16, #tpu.memory_space<vmem>>, vector<1x1x16x384xbf16>
    %106 = vector.shape_cast %105 : vector<1x1x16x384xbf16> to vector<16x384xbf16>
    %c560 = arith.constant 560 : index
    %c0_170 = arith.constant 0 : index
    %107 = vector.load %arg5[%c560, %c0_170] : memref<576x384xbf16, #tpu.memory_space<vmem>>, vector<16x384xbf16>
    tpu.vector_store %arg5[%c560, %c0_170], %106 {strides = array<i32>} : memref<576x384xbf16, #tpu.memory_space<vmem>>, vector<16x384xbf16>,
    %c0_171 = arith.constant 0 : index
    %c0_172 = arith.constant 0 : index
    %108 = vector.load %arg5[%c0_171, %c0_172] : memref<576x384xbf16, #tpu.memory_space<vmem>>, vector<576x384xbf16>
    %c0_173 = arith.constant 0 : index
    %c0_174 = arith.constant 0 : index
    %c0_175 = arith.constant 0 : index
    %109 = vector.load %arg2[%c0_173, %c0_174, %c0_175] : memref<4x32x576xbf16, #tpu.memory_space<vmem>>, vector<1x32x576xbf16>
    %110 = vector.shape_cast %109 : vector<1x32x576xbf16> to vector<32x576xbf16>
    %cst = arith.constant dense<0.000000e+00> : vector<32x384xf32>
    %111 = tpu.matmul %110, %108, %cst {dimension_numbers = #tpu.dot_dimension_numbers<[1], [0], [0], [1], [0, 0, 1, 1], [], []>} : vector<32x576xbf16>, vector<576x384xbf16>, vector<32x384xf32> -> vector<32x384xf32>
    %c1_176 = arith.constant 1 : index
    %c0_177 = arith.constant 0 : index
    %c0_178 = arith.constant 0 : index
    %112 = vector.load %arg2[%c1_176, %c0_177, %c0_178] : memref<4x32x576xbf16, #tpu.memory_space<vmem>>, vector<1x32x576xbf16>
    %113 = vector.shape_cast %112 : vector<1x32x576xbf16> to vector<32x576xbf16>
    %cst_179 = arith.constant dense<0.000000e+00> : vector<32x384xf32>
    %114 = tpu.matmul %113, %108, %cst_179 {dimension_numbers = #tpu.dot_dimension_numbers<[1], [0], [0], [1], [0, 0, 1, 1], [], []>} : vector<32x576xbf16>, vector<576x384xbf16>, vector<32x384xf32> -> vector<32x384xf32>
    %115 = arith.maximumf %111, %114 : vector<32x384xf32>
    %c2_180 = arith.constant 2 : index
    %c0_181 = arith.constant 0 : index
    %c0_182 = arith.constant 0 : index
    %116 = vector.load %arg2[%c2_180, %c0_181, %c0_182] : memref<4x32x576xbf16, #tpu.memory_space<vmem>>, vector<1x32x576xbf16>
    %117 = vector.shape_cast %116 : vector<1x32x576xbf16> to vector<32x576xbf16>
    %cst_183 = arith.constant dense<0.000000e+00> : vector<32x384xf32>
    %118 = tpu.matmul %117, %108, %cst_183 {dimension_numbers = #tpu.dot_dimension_numbers<[1], [0], [0], [1], [0, 0, 1, 1], [], []>} : vector<32x576xbf16>, vector<576x384xbf16>, vector<32x384xf32> -> vector<32x384xf32>
    %119 = arith.maximumf %115, %118 : vector<32x384xf32>
    %c3_184 = arith.constant 3 : index
    %c0_185 = arith.constant 0 : index
    %c0_186 = arith.constant 0 : index
    %120 = vector.load %arg2[%c3_184, %c0_185, %c0_186] : memref<4x32x576xbf16, #tpu.memory_space<vmem>>, vector<1x32x576xbf16>
    %121 = vector.shape_cast %120 : vector<1x32x576xbf16> to vector<32x576xbf16>
    %cst_187 = arith.constant dense<0.000000e+00> : vector<32x384xf32>
    %122 = tpu.matmul %121, %108, %cst_187 {dimension_numbers = #tpu.dot_dimension_numbers<[1], [0], [0], [1], [0, 0, 1, 1], [], []>} : vector<32x576xbf16>, vector<576x384xbf16>, vector<32x384xf32> -> vector<32x384xf32>
    %123 = arith.maximumf %119, %122 : vector<32x384xf32>
    %c0_188 = arith.constant 0 : index
    %c0_189 = arith.constant 0 : index
    %124 = vector.load %arg3[%c0_188, %c0_189] : memref<32x1xf32, #tpu.memory_space<vmem>>, vector<32x1xf32>
    %125 = vector.broadcast %124 : vector<32x1xf32> to vector<32x384xf32>
    %126 = arith.addf %123, %125 : vector<32x384xf32>
    %cst_190 = arith.constant 0.000000e+00 : f32
    %127 = vector.broadcast %cst_190 : f32 to vector<32x384xf32>
    %128 = arith.maximumf %126, %127 : vector<32x384xf32>
    %129 = arith.truncf %128 : vector<32x384xf32> to vector<32x384xbf16>
    %c0_191 = arith.constant 0 : index
    %c0_192 = arith.constant 0 : index
    %c0_193 = arith.constant 0 : index
    %130 = vector.load %arg4[%c0_191, %c0_192, %c0_193] : memref<1x32x384xbf16, #tpu.memory_space<vmem>>, vector<1x32x384xbf16>
    %131 = vector.shape_cast %130 : vector<1x32x384xbf16> to vector<32x384xbf16>
    %132 = vector.shape_cast %129 : vector<32x384xbf16> to vector<1x32x384xbf16>
    tpu.vector_store %arg4[%c0_191, %c0_192, %c0_193], %132 {strides = array<i32>} : memref<1x32x384xbf16, #tpu.memory_space<vmem>>, vector<1x32x384xbf16>,
    return
  }
  func.func @transform_0(%arg0: i32) -> (i32, i32, i32, i32) {
    %c0_i32 = arith.constant 0 : i32
    %c0_i32_0 = arith.constant 0 : i32
    %c0_i32_1 = arith.constant 0 : i32
    %c0_i32_2 = arith.constant 0 : i32
    return %arg0, %c0_i32, %c0_i32_0, %c0_i32_1 : i32, i32, i32, i32
  }
  func.func @transform_1(%arg0: i32) -> (i32, i32, i32) {
    %c0_i32 = arith.constant 0 : i32
    %c0_i32_0 = arith.constant 0 : i32
    %c0_i32_1 = arith.constant 0 : i32
    %c0_i32_2 = arith.constant 0 : i32
    return %c0_i32, %c0_i32_0, %c0_i32_1 : i32, i32, i32
  }
  func.func @transform_2(%arg0: i32) -> (i32, i32) {
    %c0_i32 = arith.constant 0 : i32
    %c0_i32_0 = arith.constant 0 : i32
    %c0_i32_1 = arith.constant 0 : i32
    return %c0_i32, %c0_i32_0 : i32, i32
  }
  func.func @transform_3(%arg0: i32) -> (i32, i32, i32) {
    %c0_i32 = arith.constant 0 : i32
    %c0_i32_0 = arith.constant 0 : i32
    %c0_i32_1 = arith.constant 0 : i32
    return %arg0, %c0_i32, %c0_i32_0 : i32, i32, i32
  }
}

module attributes {stable_mosaic.version = 11 : i64} {
  func.func @_fc_kernel(%arg0: i32, %arg1: memref<8x1568xbf16, #tpu.memory_space<vmem>>, %arg2: memref<1568x10xbf16, #tpu.memory_space<vmem>>, %arg3: memref<1x10xf32, #tpu.memory_space<vmem>>, %arg4: memref<8x10xf32, #tpu.memory_space<vmem>>) attributes {dimension_semantics = [#tpu.dimension_semantics<parallel>], iteration_bounds = array<i64: 1>, scalar_prefetch = 0 : i64, scratch_operands = 0 : i64, tpu.core_type = #tpu.core_type<tc>, window_params = [{transform_indices = @transform_0, window_bounds = array<i64: 8, 1568>}, {pipeline_mode = #tpu.pipeline_mode<synchronous>, transform_indices = @transform_1, window_bounds = array<i64: 1568, 10>}, {pipeline_mode = #tpu.pipeline_mode<synchronous>, transform_indices = @transform_2, window_bounds = array<i64: 1, 10>}, {transform_indices = @transform_3, window_bounds = array<i64: 8, 10>}]} {
    %c0 = arith.constant 0 : index
    %c0_0 = arith.constant 0 : index
    %0 = vector.load %arg1[%c0, %c0_0] : memref<8x1568xbf16, #tpu.memory_space<vmem>>, vector<8x1568xbf16>
    %c0_1 = arith.constant 0 : index
    %c0_2 = arith.constant 0 : index
    %1 = vector.load %arg2[%c0_1, %c0_2] : memref<1568x10xbf16, #tpu.memory_space<vmem>>, vector<1568x10xbf16>
    %cst = arith.constant dense<0.000000e+00> : vector<8x10xf32>
    %2 = tpu.matmul %0, %1, %cst {dimension_numbers = #tpu.dot_dimension_numbers<[1], [0], [0], [1], [0, 0, 1, 1], [], []>} : vector<8x1568xbf16>, vector<1568x10xbf16>, vector<8x10xf32> -> vector<8x10xf32>
    %c0_3 = arith.constant 0 : index
    %c0_4 = arith.constant 0 : index
    %3 = vector.load %arg3[%c0_3, %c0_4] : memref<1x10xf32, #tpu.memory_space<vmem>>, vector<1x10xf32>
    %4 = vector.broadcast %3 : vector<1x10xf32> to vector<8x10xf32>
    %5 = arith.addf %2, %4 : vector<8x10xf32>
    %c0_5 = arith.constant 0 : index
    %c0_6 = arith.constant 0 : index
    %6 = vector.load %arg4[%c0_5, %c0_6] : memref<8x10xf32, #tpu.memory_space<vmem>>, vector<8x10xf32>
    tpu.vector_store %arg4[%c0_5, %c0_6], %5 {strides = array<i32>} : memref<8x10xf32, #tpu.memory_space<vmem>>, vector<8x10xf32>,
    return
  }
  func.func @transform_0(%arg0: i32) -> (i32, i32) {
    %c0_i32 = arith.constant 0 : i32
    %c0_i32_0 = arith.constant 0 : i32
    return %arg0, %c0_i32 : i32, i32
  }
  func.func @transform_1(%arg0: i32) -> (i32, i32) {
    %c0_i32 = arith.constant 0 : i32
    %c0_i32_0 = arith.constant 0 : i32
    %c0_i32_1 = arith.constant 0 : i32
    return %c0_i32, %c0_i32_0 : i32, i32
  }
  func.func @transform_2(%arg0: i32) -> (i32, i32) {
    %c0_i32 = arith.constant 0 : i32
    %c0_i32_0 = arith.constant 0 : i32
    %c0_i32_1 = arith.constant 0 : i32
    return %c0_i32, %c0_i32_0 : i32, i32
  }
  func.func @transform_3(%arg0: i32) -> (i32, i32) {
    %c0_i32 = arith.constant 0 : i32
    %c0_i32_0 = arith.constant 0 : i32
    return %arg0, %c0_i32 : i32, i32
  }
}

</mosaic_0001>

<bundles_post_ra>
// kernel: convnet_forward.3
= control target key start
LH: loop header
LB: loop body
LE: loop exit
PB: predicated region body
PF: predicated region fallthrough
CT: control target
= control target key end

     0   :  { %s5635_s12 = smov 0   ;;  %s7588_s0 = inlined_call_operand.vmem [shape: bf16[2,4,1,1152], index: 0, kind: input, shape index: {}]   ;;  %s7589_s1 = inlined_call_operand.vmem [shape: bf16[4,16,36], index: 1, kind: input, shape index: {}]   ;;  %s7590_s2 = inlined_call_operand.vmem [shape: f32[16,1], index: 2, kind: input, shape index: {}]   ;;  %s7591_s3 = inlined_call_operand.vmem [shape: bf16[2,16,1024], index: 3, kind: output, shape index: {}]  }
   0x1 LB: > { %s5169_s13 = sadd.s32 4294967295, %s5603_s12   ;;  %p5173_p0 = scmp.ge.s32.totalorder %s5603_s12, 1  ;;  %s5603_s12 = sphi %s5635_s12, %s13_s12  }
   0x2   : > { %p136_p1 = scmp.lt.s32.totalorder %s5603_s12, 3 }
   0x4   : > { %p137_p2 = pnand %p5173_p0, %p136_p1 }
   0x6   : > { %140 = sbr.rel (%p137_p2) target bundleno = 710 (0x2c6), region = 32 }
   0xd   : > { %p159_p3 = scmp.lt.s32.totalorder %s5169_s13, 1  ;;  %v175_v0 = vlaneseq  ;;  %v5605_v1 = vmov 1935823168   ;;  %vm585_vm0 = vsmask.f32 7942  ;;  %vm455_vm2 = vcmask 1041409  }
   0xe   : > { %v173_v2 = vunpack.c.l.s4 %v5605_v1  ;;  %vm587_vm1 = vsmask.f32 7958  ;;  %vm458_vm3 = vcmask 1045509   ;;  %vm586_vm4 = vmand %vm455_vm2, %vm585_vm0  ;;  %s5606_s18 = smov 111   ;;  %s5607_s19 = smov 126   ;;  %vm7593_vm7 = vcmask 1040384  }
   0xf   : > { %s7795_s13 = smov (!%p159_p3, %s5169_s13), 1  ;;  %v176_v3 = vshrl.u32 %v175_v0, 7  ;;  %vm588_vm5 = vmand %vm458_vm3, %vm587_vm1  ;;  %s5608_s20 = smov 96   ;;  %vm221_vm8 = vsmask.f32 256  ;;  %vm7592_vm9 = vcmask 1044484  }
  0x10   : > { %v174_v4 = vunpack.c.0.s8 %v173_v2  ;;  %s5336_s14 = smul.u32 36, %s7795_s13  ;;  %vm5661_vm6 = vmor %vm588_vm5, %vm586_vm4  ;;  %s5609_s21 = smov 94   ;;  %vm224_vm10 = vsmask.f32 4352  ;;  %vm824_vm14 = vsmask.f32 7946 }
  0x11   : > { %s5610_s22 = smov 127   ;;  %s5611_s23 = smov 112   ;;  %vm5858_vm11 = vmand %vm7593_vm7, %vm221_vm8  ;;  %vm826_vm15 = vsmask.f32 7962  ;;  %vm7595_vm0 = vcmask 1042434   ;;  %vm7594_vm1 = vcmask 1046534  }
  0x12   : > { %v5646_v5 = vsub.s32 %v174_v4, %v176_v3  ;;  %s5651_s17 = scalar_lea.vmem %s7588_s0, %s5336_s14  ;;  %s5612_s24 = smov 110   ;;  %vm225_vm12 = vmand %vm7592_vm9, %vm224_vm10  ;;  %vm1064_vm5 = vsmask.f32 7950  ;;  %vm934_vm10 = vcmask 1043459   ;;  %vm938_vm7 = vsmask.f32 7424 }
  0x13   : > { %v602_v6 = vld [vmem:[%s5651_s17] sm:$0xff]  ;;  %v5183_v21 = vld [vmem:[%s5651_s17 + $0x9] sm:$0xff]  ;;  %v5209_v41 = vld [vmem:[%s5651_s17 + $0x12] sm:$0xff]  ;;  %s5613_s25 = smov 95   ;;  %s5327_s11 = sshll.u32 %s7795_s13, 6 }
  0x14   : > { %v620_v7 = vrot.slane %v602_v6, %v5646_v5  ;;  %v606_v8 = vcombine.low %v602_v6, %v602_v6  ;;  %v367_v13 = vcombine.high %v602_v6, %v602_v6  ;;  %v1271_v22 = vrot.slane %v5183_v21, %v5646_v5  ;;  %v5229_v58 = vld [vmem:[%s5651_s17 + $0x1b] sm:$0xff]  ;;  %vm5888_vm13 = vmor %vm225_vm12, %vm5858_vm11  ;;  %s7563_s13 = scalar_lea.vmem %s7591_s3, %s5327_s11 }
  0x15   : > { %v1264_v23 = vcombine.high %v5183_v21, %v5183_v21  ;;  %v1489_v28 = vcombine.low %v5183_v21, %v5183_v21  ;;  %v2345_v43 = vcombine.low %v5209_v41, %v5209_v41  ;;  %v2796_v49 = vcombine.high %v5209_v41, %v5209_v41  ;;  %vm5909_vm4 = vmand %vm7595_vm0, %vm824_vm14 }
  0x16   : > { %v5657_v9 = vrot.slane %v620_v7, %v5646_v5  ;;  %v382_v10 = vcombine.low %v620_v7, %v620_v7  ;;  %v613_v11 = vrot.slane %v606_v8, %v5646_v5  ;;  %v5672_v16 = vrot.slane %v367_v13, %v5646_v5  ;;  %vm827_vm8 = vmand %vm7594_vm1, %vm826_vm15 }
  0x17   : > { %v622_v24 = vcombine.high %v620_v7, %v620_v7  ;;  %v1279_v27 = vcombine.low %v1271_v22, %v1271_v22  ;;  %v5698_v31 = vrot.slane %v1264_v23, %v5646_v5  ;;  %v5701_v32 = vrot.slane %v1271_v22, %v5646_v5  ;;  %vm5923_vm12 = vmand %vm934_vm10, %vm1064_vm5 }
  0x18   : > { %670 = vrot.lane.b32.xlu1 %v5657_v9, %s5606_s18  ;;  %429 = vrot.lane.b32.xlu0 %v5657_v9, %s5607_s19  ;;  %v390_v14 = vrot.slane %v382_v10, %v5646_v5  ;;  %v629_v15 = vrot.slane %v613_v11, %v5646_v5  ;;  %v621_v17 = vcombine.high %v613_v11, %v613_v11  ;;  %vm1066_vm11 = vsmask.f32 7966  ;;  %vm5929_vm9 = vmor %vm827_vm8, %vm5909_vm4 }
  0x19   : > { %v860_v19 = vcombine.low %v613_v11, %v613_v11  ;;  %v383_v20 = vcombine.low %v5672_v16, %v5672_v16  ;;  %v5691_v29 = vrot.slane %v622_v24, %v5646_v5  ;;  %v5695_v30 = vrot.slane %v5672_v16, %v5646_v5 }
  0x1a   : > { %v636_v18 = vrot.slane %v621_v17, %v5646_v5  ;;  %v1287_v33 = vrot.slane %v1279_v27, %v5646_v5  ;;  %v1280_v34 = vcombine.low %v5698_v31, %v5698_v31  ;;  %v1496_v35 = vrot.slane %v1489_v28, %v5646_v5 }
  0x1b   : > { %v868_v25 = vrot.slane %v860_v19, %v5646_v5  ;;  %v404_v26 = vrot.slane %v383_v20, %v5646_v5  ;;  %v1955_v44 = vcombine.high %v1271_v22, %v1271_v22  ;;  %v2352_v45 = vrot.slane %v2345_v43, %v5646_v5 }
  0x1c   : > { %666 = vrot.lane.b32.xlu1 %v629_v15, %s5606_s18  ;;  %427 = vrot.lane.b32.xlu0 %v390_v14, %s5607_s19  ;;  %v1301_v36 = vrot.slane %v1280_v34, %v5646_v5  ;;  %v1512_v37 = vrot.slane %v1496_v35, %v5646_v5  ;;  %v1504_v38 = vcombine.high %v1496_v35, %v1496_v35  ;;  %vm937_vm14 = vcmask 1047559  }
  0x1d   : > { %v1729_v40 = vcombine.low %v1496_v35, %v1496_v35  ;;  %v5731_v46 = vrot.slane %v1955_v44, %v5646_v5  ;;  %v5735_v47 = vrot.slane %v5698_v31, %v5646_v5  ;;  %v2360_v48 = vcombine.high %v2352_v45, %v2352_v45  ;;  %vm1067_vm15 = vmand %vm937_vm14, %vm1066_vm11 }
  0x1e   : > { %v1519_v39 = vrot.slane %v1504_v38, %v5646_v5  ;;  %v2359_v50 = vrot.slane %v5209_v41, %v5646_v5  ;;  %v2368_v51 = vrot.slane %v2352_v45, %v5646_v5  ;;  %v2585_v53 = vcombine.low %v2352_v45, %v2352_v45  ;;  %vm5950_vm4 = vmor %vm1067_vm15, %vm5923_vm12 }
  0x1f   : > { %v1737_v42 = vrot.slane %v1729_v40, %v5646_v5  ;;  %v2375_v52 = vrot.slane %v2360_v48, %v5646_v5  ;;  %v5745_v54 = vrot.slane %v2796_v49, %v5646_v5  ;;  %v3649_v60 = vcombine.high %v5229_v58, %v5229_v58 }
  0x20   : > { %908 = vrot.lane.b32.xlu1 %v629_v15, %s5608_s20  ;;  %910 = vrot.lane.b32.xlu0 %v390_v14, %s5608_s20  ;;  %v5750_v55 = vrot.slane %v2359_v50, %v5646_v5  ;;  %v2593_v56 = vrot.slane %v2585_v53, %v5646_v5  ;;  %v2586_v57 = vcombine.low %v2359_v50, %v2359_v50  ;;  %v5835_v44 = vshll.u32 %v5657_v9, 16 }
  0x21   : > { %v5756_v59 = vrot.slane %v5745_v54, %v5646_v5  ;;  %v2811_v61 = vcombine.high %v2359_v50, %v2359_v50  ;;  %v3198_v0 = vcombine.low %v5229_v58, %v5229_v58  ;;  %v5766_v1 = vrot.slane %v3649_v60, %v5646_v5  ;;  %v5847_v50 = vld.sshfl [vmem:[%s5651_s17 + $0x8] sm:$0x1 pattern:$0x73625140] }
  0x22   : > { %v2607_v63 = vrot.slane %v2586_v57, %v5646_v5  ;;  %v3212_v3 = vrot.slane %v5229_v58, %v5646_v5  ;;  %v3031_v14 = vcombine.low %v5745_v54, %v5745_v54  ;;  %v5838_v45 = vshll.u32 %v5750_v55, 16  ;;  %v5568_v58 = vld [vmem:[%s5651_s17 + $0x11] ss:$0 sps:$4 sm:$0x11]  }
  0x23   : > { %v5759_v62 = vshll.u32 %v5756_v59, 16  ;;  %v5769_v2 = vrot.slane %v2811_v61, %v5646_v5  ;;  %v3205_v7 = vrot.slane %v3198_v0, %v5646_v5  ;;  %v5781_v8 = vrot.slane %v5766_v1, %v5646_v5 }
  0x24   : > { %1144 = vrot.lane.b32.xlu1 %v5657_v9, %s5609_s21  ;;  %668 = vrot.lane.b32.xlu0 %v636_v18, %s5606_s18  ;;  %v3316_v13 = vcombine.high %v3212_v3, %v3212_v3  ;;  %v3052_v24 = vrot.slane %v3031_v14, %v5646_v5  ;;  %v5829_v40 = vrot.slane %v3212_v3, %v5646_v5  ;;  %v5871_v61 = vshll.u32 %v5691_v29, 16 }
  0x25   : > { %v5773_v4 = vshll.u32 %v5769_v2, 16  ;;  %v2293_v6 = vrot.slane %v5759_v62, 7  ;;  %v2518_v11 = vrot.slane %v5759_v62, 6  ;;  %v5798_v19 = vshll.u32 %v5781_v8, 16 }
  0x26   : > { %v5795_v18 = vrot.slane %v3316_v13, %v5646_v5  ;;  %v2744_v27 = vrot.slane %v5759_v62, 5  ;;  %v3221_v35 = vrot.slane %v3205_v7, %v5646_v5  ;;  %v494_v49 = vcombine.high %v5672_v16, %v5672_v16 }
  0x27   : > { %v2289_v10 = vrot.slane %v5773_v4, 7  ;;  %v2514_v17 = vrot.slane %v5773_v4, 6  ;;  %v3371_v22 = vrot.slane %v5798_v19, 6  ;;  %v2740_v23 = vrot.slane %v5773_v4, 5 }
  0x28   : > { %906 = vrot.lane.b32.xlu0 %v868_v25, %s5608_s20  ;;  %431 = vrot.lane.b32.xlu1 %v404_v26, %s5607_s19  ;;  %v5803_v21 = vshll.u32 %v5795_v18, 16  ;;  %v3213_v25 = vcombine.high %v3205_v7, %v3205_v7  ;;  %v4041_v60 = vrot.slane %v5798_v19, 7  ;;  %v2736_v16 = vrot.slane %v5838_v45, 5 }
  0x29   : > { %v5787_v15 = vpack.i.bf16 %v2293_v6, %v2289_v10  ;;  %v5800_v20 = vpack.i.bf16 %v2518_v11, %v2514_v17  ;;  %v5817_v34 = vpack.i.bf16 %v2744_v27, %v2740_v23  ;;  %v227_v6 = vld [vmem:[#allocation2] sm:$0x11]  ;;  %v309_v23 = vshll.u32 %v5695_v30, 16 }
  0x2a   : > { %v3367_v26 = vrot.slane %v5803_v21, 6  ;;  %v3593_v38 = vrot.slane %v5803_v21, 5  ;;  %v4037_v53 = vrot.slane %v5803_v21, 7  ;;  %vm456_vm5 = vsmask.f32 1280 }
  0x2b   : > { %vm459_vm8 = vsmask.f32 5376  ;;  %vm457_vm11 = vmand %vm455_vm2, %vm456_vm5  ;;  %vm935_vm15 = vsmask.f32 3328  ;;  %vm332_vm1 = vcmask 1043456   ;;  %vm443_vm2 = vcmask 1031168  }
  0x2c   : > { %1146 = vrot.lane.b32.xlu0 %v5691_v29, %s5609_s21  ;;  %1148 = vrot.lane.b32.xlu1 %v5695_v30, %s5609_s21  ;;  %v5879_v10 = vpack.i.bf16 %v4041_v60, %v4037_v53  ;;  %v787_v53 = vrot.slane %v309_v23, 6  ;;  %vm460_vm12 = vmand %vm458_vm3, %vm459_vm8  ;;  %vm7604_vm8 = vcmask 785408  }
  0x2d   : > { %vm5984_vm0 = vmor %vm460_vm12, %vm457_vm11  ;;  %vm698_vm11 = vsmask.f32 6400 }
  0x2e   : > { %vm5990_vm3 = vmand %vm934_vm10, %vm935_vm15  ;;  %vm695_vm10 = vsmask.f32 2304  ;;  %vm7676_vm15 = vcmask 1046534  }
  0x2f   : > { %vm939_vm5 = vmand %vm937_vm14, %vm938_vm7  ;;  %vm7673_vm14 = vcmask 1042434  }
  0x30   : > { %1324 = vrot.lane.b32.xlu0 %v1287_v33, %s5610_s22  ;;  %1326 = vrot.lane.b32.xlu1 %v5701_v32, %s5610_s22  ;;  %vm6010_vm7 = vmor %vm939_vm5, %vm5990_vm3  ;;  %vm7605_vm5 = vcmask 908288  }
  0x31   : > { %vm6019_vm12 = vmand %vm7673_vm14, %vm695_vm10  ;;  %vm348_vm14 = vsmask.f32 7954 }
  0x32   : > { %vm699_vm3 = vmand %vm7676_vm15, %vm698_vm11  ;;  %vm346_vm11 = vsmask.f32 7938  ;;  %vm334_vm15 = vcmask 1039360  }
  0x33   : > { %vm6040_vm10 = vmor %vm699_vm3, %vm6019_vm12  ;;  %vm7603_vm12 = vcmask 769024   ;;  %vm7681_vm3 = vcmask 1040384  }
  0x34   : > { %1328 = vrot.lane.b32.xlu0 %v1301_v36, %s5610_s22  ;;  %1549 = vrot.lane.b32.xlu1 %v1512_v37, %s5611_s23  ;;  %v3228_v36 = vrot.slane %v3213_v25, %v5646_v5 }
  0x38   : > { %1551 = vrot.lane.b32.xlu0 %v1519_v39, %s5611_s23  ;;  %1553 = vrot.lane.b32.xlu1 %v5701_v32, %s5611_s23  ;;  %v3597_v39 = vrot.slane %v5798_v19, 5 }
  0x3a   : > { %v5832_v43 = vpack.i.bf16 %v3597_v39, %v3593_v38  ;;  %v540_v38 = vrot.slane %v5835_v44, 7 }
  0x3c   : > { %1775 = vrot.lane.b32.xlu0 %v1737_v42, %s5612_s24  ;;  %1777 = vrot.lane.b32.xlu1 %v1512_v37, %s5612_s24  ;;  %v3438_v37 = vcombine.low %v3205_v7, %v3205_v7  ;;  %v3439_v42 = vcombine.low %v3212_v3, %v3212_v3  ;;  %v3884_v7 = vcombine.low %v5766_v1, %v5766_v1 }
  0x3e   : > { %v3446_v41 = vrot.slane %v3438_v37, %v5646_v5  ;;  %v3460_v48 = vrot.slane %v3439_v42, %v5646_v5  ;;  %v3905_v27 = vrot.slane %v3884_v7, %v5646_v5  ;;  %v548_v42 = vrot.slane %v309_v23, 7 }
  0x3f   : > { %v1019_v7 = vrot.slane %v5835_v44, 5 }
  0x40   : > { %1779 = vrot.lane.b32.xlu0 %v1287_v33, %s5612_s24  ;;  %1999 = vrot.lane.b32.xlu1 %v5701_v32, %s5613_s25  ;;  %v5815_v33 = vpack.i.bf16 %v3371_v22, %v3367_v26  ;;  %v230_v22 = vld [vmem:[#allocation2 + $0x8] sm:$0x11] }
  0x44   : > { %2001 = vrot.lane.b32.xlu0 %v5731_v46, %s5613_s25  ;;  %2003 = vrot.lane.b32.xlu1 %v5735_v47, %s5613_s25 }
  0x48   : > { %2405 = vrot.lane.b32.xlu0 %v2368_v51, %s5607_s19  ;;  %2407 = vrot.lane.b32.xlu1 %v2375_v52, %s5607_s19  ;;  %v5595_v52 = vld.sshfl [vmem:[%s5651_s17] sm:$0xff pattern:$0x73625140] }
  0x49   : > { %v186_v11 = vcombine.high %v5595_v52, %v5595_v52  ;;  %v194_v13 = vrot.slane %v5595_v52, %v5646_v5  ;;  %v783_v52 = vrot.slane %v5871_v61, 6 }
  0x4b   : > { %v201_v25 = vrot.slane %v186_v11, %v5646_v5  ;;  %v1023_v11 = vrot.slane %v5871_v61, 5 }
  0x4c   : > { %2409 = vrot.lane.b32.xlu0 %v5750_v55, %s5607_s19  ;;  %2631 = vrot.lane.b32.xlu1 %v2593_v56, %s5606_s18  ;;  %v5863_v56 = vrot.slane %v494_v49, %v5646_v5  ;;  %v779_v49 = vrot.slane %v5835_v44, 6 }
  0x4e   : > { %v5875_v0 = vshll.u32 %v5863_v56, 16 }
  0x50   : > { %2633 = vrot.lane.b32.xlu0 %v2368_v51, %s5606_s18  ;;  %2635 = vrot.lane.b32.xlu1 %v2607_v63, %s5606_s18  ;;  %v5851_v51 = vrot.slane %v5847_v50, %v5646_v5  ;;  %v552_v17 = vrot.slane %v5875_v0, 7 }
  0x52   : > { %v554_v57 = vshll.u32 %v5851_v51, 16 }
  0x54   : > { %2855 = vrot.lane.b32.xlu0 %v5750_v55, %s5608_s20  ;;  %2857 = vrot.lane.b32.xlu1 %v5769_v2, %s5608_s20  ;;  %v556_v3 = vrot.slane %v554_v57, 7 }
  0x56   : > { %v5897_v26 = vpack.i.bf16 %v556_v3, %v552_v17  ;;  %v5942_v17 = vshll.u32 %v5829_v40, 16 }
  0x58   : > { %2859 = vrot.lane.b32.xlu0 %v5756_v59, %s5608_s20  ;;  %3075 = vrot.lane.b32.xlu1 %v2607_v63, %s5609_s21  ;;  %v2285_v63 = vrot.slane %v5838_v45, 7 }
  0x5a   : > { %v5360_v37 = vpack.i.bf16 %v2285_v63, %v309_v23 }
  0x5c   : > { %3077 = vrot.lane.b32.xlu0 %v5750_v55, %s5609_s21  ;;  %3079 = vrot.lane.b32.xlu1 %v3052_v24, %s5609_s21  ;;  %v228_v24 = vsel %vm5888_vm13, %v194_v13, %v227_v6  ;;  %v5375_v6 = vpack.i.bf16 %v783_v52, %v779_v49  ;;  %v5939_v13 = vshll.u32 %v5701_v32, 16 }
  0x5d   : > { %229 = vst [vmem:[#allocation2] sm:$0x11] %v228_v24  ;;  %v1027_v24 = vrot.slane %v309_v23, 5  ;;  %v3363_v23 = vrot.slane %v5942_v17, 6 }
  0x5e   : > { %v1654_v39 = vrot.slane %v5939_v13, 6  ;;  %v1880_v52 = vrot.slane %v5939_v13, 5 }
  0x60   : > { %3258 = vrot.lane.b32.xlu0 %v3221_v35, %s5610_s22  ;;  %3260 = vrot.lane.b32.xlu1 %v3228_v36, %s5610_s22  ;;  %v231_v36 = vsel %vm5888_vm13, %v201_v25, %v230_v22  ;;  %v5380_v22 = vpack.i.bf16 %v2736_v16, %v787_v53  ;;  %v5945_v25 = vshll.u32 %v5731_v46, 16 }
  0x61   : > { %232 = vst [vmem:[#allocation2 + $0x8] sm:$0x11] %v231_v36  ;;  %v5390_v36 = vpack.i.bf16 %v5838_v45, %v1027_v24  ;;  %v419_v24 = vcombine.low %v5847_v50, %v5847_v50 }
  0x62   : > { %v1884_v57 = vrot.slane %v5945_v25, 5 }
  0x63   : > { %v426_v50 = vrot.slane %v419_v24, %v5646_v5 }
  0x64   : > { %3262 = vrot.lane.b32.xlu0 %v5829_v40, %s5610_s22  ;;  %3484 = vrot.lane.b32.xlu1 %v3446_v41, %s5611_s23  ;;  %v544_v41 = vrot.slane %v5871_v61, 7 }
  0x66   : > { %v5365_v63 = vpack.i.bf16 %v544_v41, %v540_v38 }
  0x68   : > { %3486 = vrot.lane.b32.xlu0 %v3221_v35, %s5611_s23  ;;  %3488 = vrot.lane.b32.xlu1 %v3460_v48, %s5611_s23  ;;  %v5355_v35 = vpack.i.bf16 %v5871_v61, %v5835_v44  ;;  %v5385_v44 = vpack.i.bf16 %v1023_v11, %v1019_v7  ;;  %v1429_v61 = vrot.slane %v5939_v13, 7  ;;  %v5565_v7 = vld [vmem:[%s5651_s17 + $0x8] ss:$0 sps:$4 sm:$0x11]   ;;  %v5415_v11 = vpack.i.bf16 %v1884_v57, %v1880_v52 }
  0x6c   : > { %3708 = vrot.lane.b32.xlu0 %v5829_v40, %s5612_s24  ;;  %3710 = vrot.lane.b32.xlu1 %v5795_v18, %s5612_s24 }
  0x70   : > { %3712 = vrot.lane.b32.xlu0 %v5781_v8, %s5612_s24  ;;  %3928 = vrot.lane.b32.xlu1 %v3460_v48, %s5613_s25  ;;  %v2510_v48 = vrot.slane %v5838_v45, 6  ;;  %v1658_v45 = vrot.slane %v5945_v25, 6 }
  0x72   : > { %v5370_v3 = vpack.i.bf16 %v2510_v48, %v548_v42  ;;  %v3589_v48 = vrot.slane %v5942_v17, 5  ;;  %v5405_v53 = vpack.i.bf16 %v1658_v45, %v1654_v39  ;;  %v462_v39 = vld [vmem:[#allocation2] sm:$0x22] }
  0x74   : > { %3930 = vrot.lane.b32.xlu0 %v5829_v40, %s5613_s25  ;;  %3932 = vrot.lane.b32.xlu1 %v3905_v27, %s5613_s25  ;;  %v1435_v27 = vshll.u32 %v5735_v47, 16 }
  0x76   : > { %v1437_v38 = vrot.slane %v1435_v27, 7  ;;  %v1662_v49 = vrot.slane %v1435_v27, 6 }
  0x78   : > { %5356 = vrot.lane.b32.xlu0 %v5355_v35, %s5610_s22  ;;  %5361 = vrot.lane.b32.xlu1 %v5360_v37, %s5610_s22  ;;  %v1433_v37 = vrot.slane %v5945_v25, 7  ;;  %v5400_v42 = vpack.i.bf16 %v3363_v23, %v1437_v38  ;;  %v5410_v16 = vpack.i.bf16 %v3589_v48, %v1662_v49 }
  0x7a   : > { %v5395_v41 = vpack.i.bf16 %v1433_v37, %v1429_v61 }
  0x7c   : > { %5366 = vrot.lane.b32.xlu0 %v5365_v63, %s5611_s23  ;;  %5371 = vrot.lane.b32.xlu1 %v5370_v3, %s5611_s23  ;;  %v1888_v63 = vrot.slane %v1435_v27, 5  ;;  %v5566_v27 = vld [vmem:[%s5651_s17 + $0x8] ss:$0 sps:$4 sm:$0x11]  }
  0x80   : > { %5376 = vrot.lane.b32.xlu0 %v5375_v6, %s5612_s24  ;;  %5381 = vrot.lane.b32.xlu1 %v5380_v22, %s5612_s24  ;;  %v5420_v22 = vpack.i.bf16 %v5942_v17, %v1888_v63 }
  0x84   : > { %5386 = vrot.lane.b32.xlu0 %v5385_v44, %s5613_s25  ;;  %5391 = vrot.lane.b32.xlu1 %v5390_v36, %s5613_s25 }
  0x88   : > { %5396 = vrot.lane.b32.xlu0 %v5395_v41, %s5607_s19  ;;  %5401 = vrot.lane.b32.xlu1 %v5400_v42, %s5607_s19  ;;  %v658_v41 = vrot.slane %v5565_v7, %v5646_v5  ;;  %v897_v42 = vrot.slane %v5566_v27, %v5646_v5  ;;  %v944_v7 = vld [vmem:[#allocation2 + $0x8] sm:$0x88] }
  0x8a   : > { %v5971_v3 = vpop.permute.xlu1 %670  ;;  %v5973_v6 = vpop.permute.xlu0 %429  ;;  %v898_v24 = vcombine.low %v897_v42, %v897_v42 }
  0x8b   : > { %v7597_v36 = vrot.slane %v5973_v6, 4 }
  0x8c   : > { %5406 = vrot.lane.b32.xlu0 %v5405_v53, %s5606_s18  ;;  %5411 = vrot.lane.b32.xlu1 %v5410_v16, %s5606_s18 }
  0x8e   : > { %v667_v44 = vpop.permute.xlu1 %666  ;;  %v428_v23 = vpop.permute.xlu0 %427 }
  0x8f   : > { %v437_v37 = vrot.slane %v428_v23, 4 }
  0x90   : > { %5416 = vrot.lane.b32.xlu0 %v5415_v11, %s5608_s20  ;;  %5421 = vrot.lane.b32.xlu1 %v5420_v22, %s5608_s20  ;;  %v665_v22 = vrot.slane %v658_v41, %v5646_v5  ;;  %v676_v41 = vrot.slane %v667_v44, 4 }
  0x91   : > { %v442_v48 = vsel %vm332_vm1, %v437_v37, %v7597_v36  ;;  %v701_v37 = vld [vmem:[#allocation2] sm:$0x44] }
  0x92   : > { %v444_v45 = vsel %vm443_vm2, %v428_v23, %v442_v48  ;;  %v909_v49 = vpop.permute.xlu1 %908  ;;  %v6004_v52 = vpop.permute.xlu0 %910  ;;  %v704_v48 = vld [vmem:[#allocation2 + $0x8] sm:$0x44] }
  0x93   : > { %7670 = vst [vmem:[#allocation3_spill] sm:$0xff] %v6004_v52  ;;  %v463_v53 = vsel %vm5984_vm0, %v444_v45, %v462_v39  ;;  %v917_v16 = vrot.slane %v909_v49, 4  ;;  %v7596_v63 = vrot.slane %v6004_v52, 4 }
  0x94   : > { %464 = vst [vmem:[#allocation2] sm:$0x22] %v463_v53  ;;  %433 = vrot.lane.b32.xlu0 %v5695_v30, %s5607_s19  ;;  %435 = vrot.lane.b32.xlu1 %v426_v50, %s5607_s19  ;;  %v6032_v39 = vld.sshfl [vmem:[%s5651_s17 + $0x11] sm:$0x1 pattern:$0x73625140] }
  0x95   : > { %v924_v27 = vsel %vm332_vm1, %v917_v16, %v7596_v63  ;;  %v7598_v50 = vrot.slane %v5971_v3, 4  ;;  %v5202_v53 = vld [vmem:[%s5651_s17 + $0x9] sm:$0xff]  ;;  %v5567_v63 = vld [vmem:[%s5651_s17 + $0x11] ss:$0 sps:$4 sm:$0x11]   ;;  %v1316_v11 = vcombine.low %v6032_v39, %v6032_v39 }
  0x96   : > { %v925_v23 = vsel %vm7604_vm8, %v909_v49, %v924_v27  ;;  %v6029_v30 = vpop.permute.xlu1 %1144  ;;  %v669_v38 = vpop.permute.xlu0 %668  ;;  %v905_v27 = vrot.slane %v898_v24, %v5646_v5 }
  0x97   : > { %v945_v42 = vsel %vm6010_vm7, %v925_v23, %v944_v7  ;;  %v677_v45 = vrot.slane %v669_v38, 4 }
  0x98   : > { %946 = vst [vmem:[#allocation2 + $0x8] sm:$0x88] %v945_v42  ;;  %672 = vrot.lane.b32.xlu0 %v5691_v29, %s5606_s18  ;;  %674 = vrot.lane.b32.xlu1 %v665_v22, %s5606_s18  ;;  %v6061_v22 = vrot.slane %v5202_v53, %v5646_v5 }
  0x99   : > { %v681_v7 = vsel %vm332_vm1, %v676_v41, %v677_v45  ;;  %v684_v23 = vsel %vm332_vm1, %v677_v45, %v7598_v50 }
  0x9a   : > { %v683_v42 = vsel %vm7605_vm5, %v667_v44, %v681_v7  ;;  %v685_v28 = vsel %vm7605_vm5, %v669_v38, %v684_v23  ;;  %v907_v29 = vpop.permute.xlu0 %906  ;;  %v6058_v36 = vpop.permute.xlu1 %431  ;;  %v941_v44 = vld [vmem:[#allocation2] sm:$0x88]  ;;  %v465_v38 = vld [vmem:[#allocation2 + $0x8] sm:$0x22]  ;;  %v1541_v7 = vrot.slane %v5567_v63, %v5646_v5  ;;  %v7679_v23 = vrot.slane %v5973_v6, 4 }
  0x9b   : > { %v702_v24 = vsel %vm6040_vm10, %v683_v42, %v701_v37  ;;  %v705_v41 = vsel %vm6040_vm10, %v685_v28, %v704_v48  ;;  %v916_v45 = vrot.slane %v907_v29, 4  ;;  %v7599_v50 = vrot.slane %v6058_v36, 4 }
  0x9c   : > { %703 = vst [vmem:[#allocation2] sm:$0x44] %v702_v24  ;;  %706 = vst [vmem:[#allocation2 + $0x8] sm:$0x44] %v705_v41  ;;  %912 = vrot.lane.b32.xlu0 %v5657_v9, %s5608_s20  ;;  %914 = vrot.lane.b32.xlu1 %v905_v27, %s5608_s20  ;;  %v6073_v37 = vrot.slane %v5568_v58, %v5646_v5  ;;  %v2042_v28 = vcombine.high %v5202_v53, %v5202_v53  ;;  %v1154_v27 = vrot.slane %v6029_v30, 4 }
  0x9d   : > { %v921_v48 = vsel %vm332_vm1, %v916_v45, %v917_v16  ;;  %v445_v42 = vsel %vm332_vm1, %v7679_v23, %v7599_v50  ;;  %v1323_v9 = vrot.slane %v1316_v11, %v5646_v5  ;;  %v2057_v16 = vcombine.high %v6061_v22, %v6061_v22  ;;  %v6096_v50 = vld [vmem:[%s5651_s17 + $0x12] sm:$0xff] }
  0x9e   : > { %v923_v24 = vsel %vm7604_vm8, %v907_v29, %v921_v48  ;;  %v446_v63 = vsel %vm443_vm2, %v5973_v6, %v445_v42  ;;  %v1147_v58 = vpop.permute.xlu0 %1146  ;;  %v6086_v41 = vpop.permute.xlu1 %1148  ;;  %v1172_v6 = vld [vmem:[#allocation2 + $0x20] sm:$0x11]  ;;  %v1175_v29 = vld [vmem:[#allocation2 + $0x28] sm:$0x11]  ;;  %v2165_v48 = vrot.slane %v6096_v50, %v5646_v5  ;;  %vm7684_vm8 = vcmask 1044484  }
  0x9f   : > { %7680 = vst [vmem:[#allocation4_spill] sm:$0xff] %v6086_v41  ;;  %v942_v53 = vsel %vm6010_vm7, %v923_v24, %v941_v44  ;;  %v466_v45 = vsel %vm5984_vm0, %v446_v63, %v465_v38  ;;  %v1155_v11 = vrot.slane %v1147_v58, 4  ;;  %v7602_v23 = vrot.slane %v6086_v41, 4  ;;  %vm6140_vm5 = vmand %vm7684_vm8, %vm348_vm14 }
  0xa0   : > { %943 = vst [vmem:[#allocation2] sm:$0x88] %v942_v53  ;;  %467 = vst [vmem:[#allocation2 + $0x8] sm:$0x22] %v466_v45  ;;  %1150 = vrot.lane.b32.xlu0 %v5863_v56, %s5609_s21  ;;  %1152 = vrot.lane.b32.xlu1 %v5851_v51, %s5609_s21  ;;  %v1548_v44 = vrot.slane %v1541_v7, %v5646_v5  ;;  %v6104_v38 = vrot.slane %v2042_v28, %v5646_v5  ;;  %vm1052_vm14 = vcmask 777216  }
  0xa1   : > { %v1159_v42 = vsel %vm332_vm1, %v1154_v27, %v1155_v11  ;;  %v1162_v24 = vsel %vm332_vm1, %v1155_v11, %v7602_v23  ;;  %v1767_v56 = vcombine.low %v6073_v37, %v6073_v37  ;;  %v2065_v51 = vrot.slane %v6061_v22, %v5646_v5  ;;  %v1351_v22 = vld [vmem:[#allocation2 + $0x20] sm:$0x22] }
  0xa2   : > { %v1161_v7 = vsel %vm7603_vm12, %v6029_v30, %v1159_v42  ;;  %v1163_v28 = vsel %vm7603_vm12, %v1147_v58, %v1162_v24  ;;  %v1325_v63 = vpop.permute.xlu0 %1324  ;;  %v1327_v53 = vpop.permute.xlu1 %1326  ;;  %v2072_v45 = vrot.slane %v2057_v16, %v5646_v5  ;;  %v2173_v27 = vcombine.low %v2165_v48, %v2165_v48  ;;  %vm6133_vm12 = vmand %vm7681_vm3, %vm346_vm11  ;;  %v2210_v42 = vld [vmem:[#allocation2 + $0x48] sm:$0x22] }
  0xa3   : > { %v1173_v41 = vsel %vm5888_vm13, %v1161_v7, %v1172_v6  ;;  %v1176_v11 = vsel %vm5888_vm13, %v1163_v28, %v1175_v29  ;;  %v1334_v37 = vrot.slane %v1325_v63, 4  ;;  %v1335_v23 = vrot.slane %v1327_v53, 4  ;;  %v2207_v29 = vld [vmem:[#allocation2 + $0x40] sm:$0x22]  ;;  %vm6163_vm8 = vmor %vm6140_vm5, %vm6133_vm12 }
  0xa4   : > { %1174 = vst [vmem:[#allocation2 + $0x20] sm:$0x11] %v1173_v41  ;;  %1177 = vst [vmem:[#allocation2 + $0x28] sm:$0x11] %v1176_v11  ;;  %1330 = vrot.lane.b32.xlu0 %v5735_v47, %s5610_s22  ;;  %1332 = vrot.lane.b32.xlu1 %v1323_v9, %s5610_s22  ;;  %v2079_v30 = vrot.slane %v6104_v38, %v5646_v5  ;;  %v2181_v58 = vrot.slane %v2173_v27, %v5646_v5  ;;  %v2105_v52 = vshll.u32 %v2072_v45, 16  ;;  %vm573_vm11 = vcmask 916480  }
  0xa5   : > { %v2188_v16 = vrot.slane %v2165_v48, %v5646_v5  ;;  %v1339_v41 = vsel %vm332_vm1, %v1334_v37, %v1335_v23  ;;  %v2102_v37 = vshll.u32 %v2065_v51, 16  ;;  %vm812_vm5 = vcmask 900096  }
  0xa6   : > { %v1340_v9 = vsel %vm334_vm15, %v1325_v63, %v1339_v41  ;;  %v6145_v24 = vpop.permute.xlu0 %1328  ;;  %v1550_v48 = vpop.permute.xlu1 %1549  ;;  %v2208_v7 = vsel %vm5984_vm0, %v2181_v58, %v2207_v29  ;;  %v1354_v63 = vld [vmem:[#allocation2 + $0x28] sm:$0x22]  ;;  %v1774_v58 = vrot.slane %v1767_v56, %v5646_v5  ;;  %v2108_v41 = vshll.u32 %v2079_v30, 16 }
  0xa7   : > { %v2211_v28 = vsel %vm5984_vm0, %v2188_v16, %v2210_v42  ;;  %v1352_v27 = vsel %vm5984_vm0, %v1340_v9, %v1351_v22  ;;  %v7615_v11 = vrot.slane %v6145_v24, 4  ;;  %2209 = vst [vmem:[#allocation2 + $0x40] sm:$0x22] %v2208_v7  ;;  %v4033_v16 = vrot.slane %v5942_v17, 7  ;;  %v1576_v9 = vld [vmem:[#allocation2 + $0x20] sm:$0x44] }
  0xa8   : > { %2212 = vst [vmem:[#allocation2 + $0x48] sm:$0x22] %v2211_v28  ;;  %1353 = vst [vmem:[#allocation2 + $0x20] sm:$0x22] %v1352_v27  ;;  %1555 = vrot.lane.b32.xlu0 %v5731_v46, %s5611_s23  ;;  %1557 = vrot.lane.b32.xlu1 %v1548_v44, %s5611_s23  ;;  %v1559_v44 = vrot.slane %v1550_v48, 4  ;;  %v5425_v47 = vpack.i.bf16 %v2105_v52, %v2102_v37  ;;  %vm7690_vm12 = vcmask 908288  }
  0xa9   : > { %v1341_v45 = vsel %vm332_vm1, %v1335_v23, %v7615_v11  ;;  %v1579_v7 = vld [vmem:[#allocation2 + $0x28] sm:$0x44]  ;;  %v5430_v28 = vpack.i.bf16 %v4033_v16, %v2108_v41  ;;  %vm7691_vm3 = vmmov %vm7690_vm12 }
  0xaa   : > { %v1342_v46 = vsel %vm334_vm15, %v1327_v53, %v1341_v45  ;;  %v1552_v56 = vpop.permute.xlu0 %1551  ;;  %v6171_v22 = vpop.permute.xlu1 %1553  ;;  %v1802_v45 = vld [vmem:[#allocation2 + $0x20] sm:$0x88] }
  0xab   : > { %v1248_v17 = vld [vmem:[#allocation2 + $0x20] sm:$0x11]  ;;  %v1251_v30 = vld [vmem:[#allocation2 + $0x28] sm:$0x11]  ;;  %v1355_v6 = vsel %vm5984_vm0, %v1342_v46, %v1354_v63  ;;  %v1560_v29 = vrot.slane %v1552_v56, 4  ;;  %v7614_v42 = vrot.slane %v6171_v22, 4 }
  0xac   : > { %v1249_v23 = vsel %vm6163_vm8, %v5939_v13, %v1248_v17  ;;  %v1252_v53 = vsel %vm6163_vm8, %v5945_v25, %v1251_v30  ;;  %1356 = vst [vmem:[#allocation2 + $0x28] sm:$0x22] %v1355_v6  ;;  %1781 = vrot.lane.b32.xlu0 %v5701_v32, %s5612_s24  ;;  %1783 = vrot.lane.b32.xlu1 %v1774_v58, %s5612_s24  ;;  %v1805_v6 = vld [vmem:[#allocation2 + $0x28] sm:$0x88] }
  0xad   : > { %1250 = vst [vmem:[#allocation2 + $0x20] sm:$0x11] %v1249_v23  ;;  %1253 = vst [vmem:[#allocation2 + $0x28] sm:$0x11] %v1252_v53  ;;  %v1564_v52 = vsel %vm332_vm1, %v1559_v44, %v1560_v29  ;;  %v1566_v13 = vsel %vm332_vm1, %v1560_v29, %v7614_v42  ;;  %v2026_v53 = vld [vmem:[#allocation2 + $0x40] sm:$0x11] }
  0xae   : > { %v1565_v27 = vsel %vm573_vm11, %v1550_v48, %v1564_v52  ;;  %v1567_v25 = vsel %vm573_vm11, %v1552_v56, %v1566_v13  ;;  %v1776_v37 = vpop.permute.xlu0 %1775  ;;  %v1778_v63 = vpop.permute.xlu1 %1777  ;;  %v2029_v13 = vld [vmem:[#allocation2 + $0x48] sm:$0x11] }
  0xaf   : > { %v1577_v32 = vsel %vm6040_vm10, %v1565_v27, %v1576_v9  ;;  %v1580_v58 = vsel %vm6040_vm10, %v1567_v25, %v1579_v7  ;;  %v1785_v41 = vrot.slane %v1776_v37, 4  ;;  %v1786_v16 = vrot.slane %v1778_v63, 4 }
  0xb0   : > { %1578 = vst [vmem:[#allocation2 + $0x20] sm:$0x44] %v1577_v32  ;;  %1581 = vst [vmem:[#allocation2 + $0x28] sm:$0x44] %v1580_v58  ;;  %5426 = vrot.lane.b32.xlu0 %v5425_v47, %s5609_s21  ;;  %5431 = vrot.lane.b32.xlu1 %v5430_v28, %s5609_s21  ;;  %v3665_v47 = vcombine.high %v5766_v1, %v5766_v1  ;;  %v7689_v25 = vpack.i.bf16 %v5759_v62, %v5773_v4 }
  0xb1   : > { %v1790_v48 = vsel %vm332_vm1, %v1785_v41, %v1786_v16  ;;  %v6235_v58 = vrot.slane %v6032_v39, %v5646_v5  ;;  %v5596_v41 = vld.sshfl [vmem:[%s5651_s17 + $0x1b] sm:$0xff pattern:$0x73625140] }
  0xb2   : > { %v1791_v46 = vsel %vm812_vm5, %v1776_v37, %v1790_v48  ;;  %v6199_v44 = vpop.permute.xlu0 %1779  ;;  %v2000_v56 = vpop.permute.xlu1 %1999  ;;  %v5572_v37 = vld [vmem:[%s5651_s17 + $0x1a] ss:$0 sps:$4 sm:$0x11]   ;;  %v2432_v39 = vld [vmem:[#allocation2 + $0x40] sm:$0x44] }
  0xb3   : > { %v1803_v17 = vsel %vm6010_vm7, %v1791_v46, %v1802_v45  ;;  %v7612_v30 = vrot.slane %v6199_v44, 4  ;;  %v2009_v28 = vrot.slane %v2000_v56, 4 }
  0xb4   : > { %1804 = vst [vmem:[#allocation2 + $0x20] sm:$0x88] %v1803_v17  ;;  %5436 = vrot.lane.b32.xlu0 %v5787_v15, %s5610_s22  ;;  %5441 = vrot.lane.b32.xlu1 %v5800_v20, %s5611_s23  ;;  %v1956_v15 = vcombine.high %v5698_v31, %v5698_v31 }
  0xb5   : > { %v1792_v29 = vsel %vm332_vm1, %v1786_v16, %v7612_v30  ;;  %v5204_v30 = vld.sshfl [vmem:[%s5651_s17 + $0x11] sm:$0x1 pattern:$0x73625140] }
  0xb6   : > { %v1793_v23 = vsel %vm812_vm5, %v1778_v63, %v1792_v29  ;;  %v2002_v9 = vpop.permute.xlu0 %2001  ;;  %v6214_v7 = vpop.permute.xlu1 %2003  ;;  %v5573_v63 = vld [vmem:[%s5651_s17 + $0x1a] ss:$0 sps:$4 sm:$0x11]   ;;  %v6241_v4 = vrot.slane %v1956_v15, %v5646_v5 }
  0xb7   : > { %v1806_v20 = vsel %vm6010_vm7, %v1793_v23, %v1805_v6  ;;  %v2010_v52 = vrot.slane %v2002_v9, 4  ;;  %v7610_v27 = vrot.slane %v6214_v7, 4  ;;  %v2622_v29 = vrot.slane %v5573_v63, %v5646_v5  ;;  %v5575_v63 = vld [vmem:[%s5651_s17 + $0x23] ss:$0 sps:$4 sm:$0x11]  }
  0xb8   : > { %1807 = vst [vmem:[#allocation2 + $0x28] sm:$0x88] %v1806_v20  ;;  %5446 = vrot.lane.b32.xlu0 %v5817_v34, %s5612_s24  ;;  %5451 = vrot.lane.b32.xlu1 %v7689_v25, %s5613_s25  ;;  %v2239_v23 = vcombine.high %v5745_v54, %v5745_v54  ;;  %v2435_v54 = vld [vmem:[#allocation2 + $0x48] sm:$0x44] }
  0xb9   : > { %v2014_v31 = vsel %vm332_vm1, %v2009_v28, %v2010_v52  ;;  %v2016_v32 = vsel %vm332_vm1, %v2010_v52, %v7610_v27  ;;  %v5221_v52 = vld.sshfl [vmem:[%s5651_s17 + $0x1a] sm:$0x1 pattern:$0x73625140]  ;;  %v2623_v25 = vcombine.low %v2622_v29, %v2622_v29  ;;  %v3105_v27 = vld [vmem:[#allocation2 + $0x68] sm:$0x22] }
  0xba   : > { %v2015_v34 = vsel %vm1052_vm14, %v2000_v56, %v2014_v31  ;;  %v2017_v16 = vsel %vm1052_vm14, %v2002_v9, %v2016_v32  ;;  %v2406_v45 = vpop.permute.xlu0 %2405  ;;  %v2408_v62 = vpop.permute.xlu1 %2407  ;;  %v2397_v56 = vrot.slane %v5572_v37, %v5646_v5  ;;  %v2058_v9 = vcombine.high %v6104_v38, %v6104_v38  ;;  %v5574_v32 = vld [vmem:[%s5651_s17 + $0x23] ss:$0 sps:$4 sm:$0x11]  }
  0xbb   : > { %v2027_v48 = vsel %vm5888_vm13, %v2015_v34, %v2026_v53  ;;  %v2030_v46 = vsel %vm5888_vm13, %v2017_v16, %v2029_v13  ;;  %v2415_v17 = vrot.slane %v2406_v45, 4  ;;  %v2416_v6 = vrot.slane %v2408_v62, 4 }
  0xbc   : > { %2028 = vst [vmem:[#allocation2 + $0x40] sm:$0x11] %v2027_v48  ;;  %2031 = vst [vmem:[#allocation2 + $0x48] sm:$0x11] %v2030_v46  ;;  %5456 = vrot.lane.b32.xlu0 %v5815_v33, %s5607_s19  ;;  %5461 = vrot.lane.b32.xlu1 %v5832_v43, %s5606_s18  ;;  %v2404_v13 = vrot.slane %v2397_v56, %v5646_v5  ;;  %v3132_v37 = vcombine.high %v5596_v41, %v5596_v41 }
  0xbd   : > { %v2420_v53 = vsel %vm332_vm1, %v2415_v17, %v2416_v6  ;;  %v6279_v48 = vrot.slane %v5221_v52, %v5646_v5  ;;  %v3140_v46 = vrot.slane %v5596_v41, %v5646_v5  ;;  %v3067_v17 = vcombine.low %v5221_v52, %v5221_v52 }
  0xbe   : > { %v2421_v15 = vsel %vm443_vm2, %v2406_v45, %v2420_v53  ;;  %v6259_v33 = vpop.permute.xlu0 %2409  ;;  %v2632_v20 = vpop.permute.xlu1 %2631  ;;  %v3147_v41 = vrot.slane %v3132_v37, %v5646_v5 }
  0xbf   : > { %v2433_v43 = vsel %vm6040_vm10, %v2421_v15, %v2432_v39  ;;  %v7608_v28 = vrot.slane %v6259_v33, 4  ;;  %v2641_v56 = vrot.slane %v2632_v20, 4  ;;  %v2661_v15 = vld [vmem:[#allocation2 + $0x48] sm:$0x88] }
  0xc0   : > { %2434 = vst [vmem:[#allocation2 + $0x40] sm:$0x44] %v2433_v43  ;;  %2005 = vrot.lane.b32.xlu0 %v6241_v4, %s5613_s25  ;;  %2007 = vrot.lane.b32.xlu1 %v6235_v58, %s5613_s25  ;;  %v3475_v43 = vrot.slane %v5575_v63, %v5646_v5 }
  0xc1   : > { %v2422_v31 = vsel %vm332_vm1, %v2416_v6, %v7608_v28  ;;  %v2658_v6 = vld [vmem:[#allocation2 + $0x40] sm:$0x88]  ;;  %v6298_v28 = vshll.u32 %v3140_v46, 16  ;;  %v3074_v46 = vrot.slane %v3067_v17, %v5646_v5 }
  0xc2   : > { %v2423_v34 = vsel %vm443_vm2, %v2408_v62, %v2422_v31  ;;  %v2634_v16 = vpop.permute.xlu0 %2633  ;;  %v6276_v45 = vpop.permute.xlu1 %2635  ;;  %v2630_v62 = vrot.slane %v2623_v25, %v5646_v5  ;;  %v3250_v31 = vrot.slane %v5574_v32, %v5646_v5  ;;  %v2882_v32 = vld [vmem:[#allocation2 + $0x60] sm:$0x11] }
  0xc3   : > { %v2436_v39 = vsel %vm6040_vm10, %v2423_v34, %v2435_v54  ;;  %v2642_v29 = vrot.slane %v2634_v16, 4  ;;  %v7609_v53 = vrot.slane %v6276_v45, 4 }
  0xc4   : > { %2437 = vst [vmem:[#allocation2 + $0x48] sm:$0x44] %v2436_v39  ;;  %2411 = vrot.lane.b32.xlu0 %v5769_v2, %s5607_s19  ;;  %2413 = vrot.lane.b32.xlu1 %v2404_v13, %s5607_s19 }
  0xc5   : > { %v2646_v52 = vsel %vm332_vm1, %v2641_v56, %v2642_v29  ;;  %v2648_v54 = vsel %vm332_vm1, %v2642_v29, %v7609_v53  ;;  %v5176_v29 = vld.sshfl [vmem:[%s5651_s17 + $0x8] sm:$0x1 pattern:$0x73625140]  ;;  %v3102_v53 = vld [vmem:[#allocation2 + $0x60] sm:$0x22] }
  0xc6   : > { %v2647_v34 = vsel %vm7690_vm12, %v2632_v20, %v2646_v52  ;;  %v2649_v2 = vsel %vm7691_vm3, %v2634_v16, %v2648_v54  ;;  %v2856_v13 = vpop.permute.xlu0 %2855  ;;  %v2858_v39 = vpop.permute.xlu1 %2857  ;;  %v6309_v20 = vrot.slane %v2239_v23, %v5646_v5  ;;  %v3167_v16 = vshll.u32 %v3147_v41, 16  ;;  %v5241_v54 = vld.sshfl [vmem:[%s5651_s17 + $0x23] sm:$0x1 pattern:$0x73625140] }
  0xc7   : > { %v2659_v25 = vsel %vm6010_vm7, %v2647_v34, %v2658_v6  ;;  %v2662_v37 = vsel %vm6010_vm7, %v2649_v2, %v2661_v15  ;;  %v2865_v63 = vrot.slane %v2856_v13, 4  ;;  %v2866_v56 = vrot.slane %v2858_v39, 4 }
  0xc8   : > { %2660 = vst [vmem:[#allocation2 + $0x40] sm:$0x88] %v2659_v25  ;;  %2663 = vst [vmem:[#allocation2 + $0x48] sm:$0x88] %v2662_v37  ;;  %2637 = vrot.lane.b32.xlu0 %v5750_v55, %s5606_s18  ;;  %2639 = vrot.lane.b32.xlu1 %v2630_v62, %s5606_s18  ;;  %v3476_v6 = vcombine.low %v3475_v43, %v3475_v43  ;;  %v3257_v52 = vrot.slane %v3250_v31, %v5646_v5  ;;  %vm7692_vm12 = vcmask 785408   ;;  %v6333_v31 = vrot.slane %v3167_v16, 7 }
  0xc9   : > { %v2870_v15 = vsel %vm332_vm1, %v2865_v63, %v2866_v56  ;;  %v301_v55 = vrot.slane %v5176_v29, %v5646_v5  ;;  %v6327_v41 = vrot.slane %v3665_v47, %v5646_v5  ;;  %v2885_v43 = vld [vmem:[#allocation2 + $0x68] sm:$0x11]  ;;  %v6337_v37 = vrot.slane %v5241_v54, %v5646_v5  ;;  %vm7693_vm3 = vmmov %vm7692_vm12 }
  0xca   : > { %v2871_v34 = vsel %vm7692_vm12, %v2856_v13, %v2870_v15  ;;  %v6316_v2 = vpop.permute.xlu0 %2859  ;;  %v3076_v25 = vpop.permute.xlu1 %3075  ;;  %v3483_v13 = vrot.slane %v3476_v6, %v5646_v5  ;;  %v3920_v47 = vcombine.low %v5241_v54, %v5241_v54  ;;  %vm7694_vm12 = vcmask 769024  }
  0xcb   : > { %v2883_v23 = vsel %vm5888_vm13, %v2871_v34, %v2882_v32  ;;  %v7611_v62 = vrot.slane %v6316_v2, 4  ;;  %v6345_v15 = vshll.u32 %v301_v55, 16  ;;  %v3085_v6 = vrot.slane %v3076_v25, 4 }
  0xcc   : > { %2884 = vst [vmem:[#allocation2 + $0x60] sm:$0x11] %v2883_v23  ;;  %2861 = vrot.lane.b32.xlu0 %v6309_v20, %s5608_s20  ;;  %2863 = vrot.lane.b32.xlu1 %v6279_v48, %s5608_s20 }
  0xcd   : > { %v2872_v1 = vsel %vm332_vm1, %v2866_v56, %v7611_v62  ;;  %v1035_v54 = vrot.slane %v6345_v15, 5 }
  0xce   : > { %v2873_v63 = vsel %vm7693_vm3, %v2858_v39, %v2872_v1  ;;  %v3078_v29 = vpop.permute.xlu0 %3077  ;;  %v6343_v32 = vpop.permute.xlu1 %3079  ;;  %v5592_v39 = vld [vmem:[%s5651_s17] sm:$0xff]  ;;  %v1031_v1 = vrot.slane %v5875_v0, 5  ;;  %vm7695_vm3 = vmmov %vm7694_vm12 }
  0xcf   : > { %v2886_v16 = vsel %vm5888_vm13, %v2873_v63, %v2885_v43  ;;  %v3086_v34 = vrot.slane %v3078_v29, 4  ;;  %v7613_v23 = vrot.slane %v6343_v32, 4  ;;  %v171_v56 = vcombine.high %v5592_v39, %v5592_v39 }
  0xd0   : > { %2887 = vst [vmem:[#allocation2 + $0x68] sm:$0x11] %v2886_v16  ;;  %3081 = vrot.lane.b32.xlu0 %v5756_v59, %s5609_s21  ;;  %3083 = vrot.lane.b32.xlu1 %v3074_v46, %s5609_s21  ;;  %v1668_v63 = vshll.u32 %v6235_v58, 16  ;;  %v6364_v39 = vshll.u32 %v6241_v4, 16  ;;  %v3285_v58 = vld [vmem:[#allocation2 + $0x60] sm:$0x44]  ;;  %v6375_v4 = vrot.slane %v3920_v47, %v5646_v5 }
  0xd1   : > { %v3090_v55 = vsel %vm332_vm1, %v3085_v6, %v3086_v34  ;;  %v3092_v43 = vsel %vm332_vm1, %v3086_v34, %v7613_v23 }
  0xd2   : > { %v3091_v16 = vsel %vm7694_vm12, %v3076_v25, %v3090_v55  ;;  %v3093_v59 = vsel %vm7695_vm3, %v3078_v29, %v3092_v43  ;;  %v3259_v62 = vpop.permute.xlu0 %3258  ;;  %v3261_v46 = vpop.permute.xlu1 %3260  ;;  %v791_v29 = vrot.slane %v5875_v0, 6  ;;  %v6386_v55 = vrot.slane %v2058_v9, %v5646_v5 }
  0xd3   : > { %v3103_v6 = vsel %vm5984_vm0, %v3091_v16, %v3102_v53  ;;  %v3106_v34 = vsel %vm5984_vm0, %v3093_v59, %v3105_v27  ;;  %v3268_v23 = vrot.slane %v3259_v62, 4  ;;  %v3269_v42 = vrot.slane %v3261_v46, 4 }
  0xd4   : > { %3104 = vst [vmem:[#allocation2 + $0x60] sm:$0x22] %v3103_v6  ;;  %3107 = vst [vmem:[#allocation2 + $0x68] sm:$0x22] %v3106_v34  ;;  %3264 = vrot.lane.b32.xlu0 %v5795_v18, %s5610_s22  ;;  %3266 = vrot.lane.b32.xlu1 %v3257_v52, %s5610_s22  ;;  %v795_v53 = vrot.slane %v6345_v15, 6  ;;  %v2100_v18 = vrot.slane %v5204_v30, %v5646_v5  ;;  %v6392_v16 = vpack.i.bf16 %v1035_v54, %v1031_v1  ;;  %vm7700_vm12 = vcmask 908288  }
  0xd5   : > { %v3273_v27 = vsel %vm332_vm1, %v3268_v23, %v3269_v42  ;;  %v6394_v59 = vrot.slane %v1668_v63, 6  ;;  %v185_v23 = vrot.slane %v171_v56, %v5646_v5  ;;  %v6401_v34 = vrot.slane %v1668_v63, 7  ;;  %v3288_v30 = vld [vmem:[#allocation2 + $0x68] sm:$0x44]  ;;  %vm7701_vm3 = vmmov %vm7700_vm12 }
  0xd6   : > { %v3274_v52 = vsel %vm334_vm15, %v3259_v62, %v3273_v27  ;;  %v6390_v47 = vpop.permute.xlu0 %3262  ;;  %v3485_v43 = vpop.permute.xlu1 %3484  ;;  %v1441_v62 = vrot.slane %v6364_v39, 7  ;;  %v6410_v1 = vshll.u32 %v2100_v18, 16 }
  0xd7   : > { %v3286_v6 = vsel %vm6040_vm10, %v3274_v52, %v3285_v58  ;;  %v7616_v38 = vrot.slane %v6390_v47, 4  ;;  %v187_v54 = vcombine.high %v185_v23, %v185_v23  ;;  %v6413_v58 = vshll.u32 %v6279_v48, 16  ;;  %v3511_v52 = vld [vmem:[#allocation2 + $0x60] sm:$0x88] }
  0xd8   : > { %3287 = vst [vmem:[#allocation2 + $0x60] sm:$0x44] %v3286_v6  ;;  %3490 = vrot.lane.b32.xlu0 %v5829_v40, %s5611_s23  ;;  %3492 = vrot.lane.b32.xlu1 %v3483_v13, %s5611_s23  ;;  %v3494_v27 = vrot.slane %v3485_v43, 4  ;;  %v3514_v40 = vld [vmem:[#allocation2 + $0x68] sm:$0x88]  ;;  %v208_v13 = vrot.slane %v185_v23, %v5646_v5 }
  0xd9   : > { %v3275_v56 = vsel %vm332_vm1, %v3269_v42, %v7616_v38  ;;  %v215_v25 = vrot.slane %v187_v54, %v5646_v5  ;;  %v6423_v38 = vpack.i.bf16 %v795_v53, %v791_v29  ;;  %v7697_v54 = vpack.i.bf16 %v5798_v19, %v5803_v21  ;;  %v236_v29 = vld [vmem:[#allocation2 + $0x18] sm:$0x11] }
  0xda   : > { %v3276_v63 = vsel %vm334_vm15, %v3261_v46, %v3275_v56  ;;  %v3487_v6 = vpop.permute.xlu0 %3486  ;;  %v6416_v11 = vpop.permute.xlu1 %3488  ;;  %v7696_v46 = vrot.slane %v6298_v28, 7  ;;  %v6439_v53 = vshll.u32 %v6309_v20, 16  ;;  %v233_v28 = vld [vmem:[#allocation2 + $0x10] sm:$0x11] }
  0xdb   : > { %v3182_v9 = vld [vmem:[#allocation2 + $0x60] sm:$0x22]  ;;  %v3185_v17 = vld [vmem:[#allocation2 + $0x68] sm:$0x22]  ;;  %v3289_v42 = vsel %vm6040_vm10, %v3276_v63, %v3288_v30  ;;  %v3495_v18 = vrot.slane %v3487_v6, 4  ;;  %v7629_v48 = vrot.slane %v6416_v11, 4  ;;  %v234_v19 = vsel %vm5888_vm13, %v208_v13, %v233_v28 }
  0xdc   : > { %v3183_v56 = vsel %vm5661_vm6, %v7696_v46, %v3182_v9  ;;  %v3186_v23 = vsel %vm5661_vm6, %v6333_v31, %v3185_v17  ;;  %3290 = vst [vmem:[#allocation2 + $0x68] sm:$0x44] %v3289_v42  ;;  %5466 = vrot.lane.b32.xlu0 %v7697_v54, %s5608_s20  ;;  %5471 = vrot.lane.b32.xlu1 %v5879_v10, %s5609_s21  ;;  %235 = vst [vmem:[#allocation2 + $0x10] sm:$0x11] %v234_v19  ;;  %v3735_v13 = vld [vmem:[#allocation2 + $0x80] sm:$0x11] }
  0xdd   : > { %3184 = vst [vmem:[#allocation2 + $0x60] sm:$0x22] %v3183_v56  ;;  %3187 = vst [vmem:[#allocation2 + $0x68] sm:$0x22] %v3186_v23  ;;  %v3499_v9 = vsel %vm332_vm1, %v3494_v27, %v3495_v18  ;;  %v3501_v17 = vsel %vm332_vm1, %v3495_v18, %v7629_v48  ;;  %v237_v21 = vsel %vm5888_vm13, %v215_v25, %v236_v29  ;;  %v2111_v25 = vshll.u32 %v6386_v55, 16 }
  0xde   : > { %v3500_v10 = vsel %vm573_vm11, %v3485_v43, %v3499_v9  ;;  %v3502_v20 = vsel %vm573_vm11, %v3487_v6, %v3501_v17  ;;  %v3709_v31 = vpop.permute.xlu0 %3708  ;;  %v3711_v30 = vpop.permute.xlu1 %3710  ;;  %238 = vst [vmem:[#allocation2 + $0x18] sm:$0x11] %v237_v21  ;;  %v1896_v43 = vrot.slane %v6410_v1, 5  ;;  %v1892_v6 = vrot.slane %v6364_v39, 5 }
  0xdf   : > { %v3512_v63 = vsel %vm6010_vm7, %v3500_v10, %v3511_v52  ;;  %v3515_v27 = vsel %vm6010_vm7, %v3502_v20, %v3514_v40  ;;  %v3718_v42 = vrot.slane %v3709_v31, 4  ;;  %v3719_v18 = vrot.slane %v3711_v30, 4  ;;  %v3738_v10 = vld [vmem:[#allocation2 + $0x88] sm:$0x11] }
  0xe0   : > { %3513 = vst [vmem:[#allocation2 + $0x60] sm:$0x88] %v3512_v63  ;;  %3516 = vst [vmem:[#allocation2 + $0x68] sm:$0x88] %v3515_v27  ;;  %3714 = vrot.lane.b32.xlu0 %v6327_v41, %s5612_s24  ;;  %3716 = vrot.lane.b32.xlu1 %v6337_v37, %s5612_s24  ;;  %v2522_v40 = vrot.slane %v6439_v53, 6  ;;  %v2526_v46 = vrot.slane %v6413_v58, 6  ;;  %v6479_v21 = vpack.i.bf16 %v6401_v34, %v1441_v62 }
  0xe1   : > { %v3723_v52 = vsel %vm332_vm1, %v3718_v42, %v3719_v18  ;;  %v2297_v28 = vrot.slane %v6439_v53, 7  ;;  %v2301_v29 = vrot.slane %v6413_v58, 7  ;;  %v7698_v17 = vrot.slane %v6364_v39, 6 }
  0xe2   : > { %v3724_v56 = vsel %vm812_vm5, %v3709_v31, %v3723_v52  ;;  %v6466_v23 = vpop.permute.xlu0 %3712  ;;  %v3929_v54 = vpop.permute.xlu1 %3928  ;;  %v6486_v20 = vpack.i.bf16 %v6410_v1, %v2111_v25  ;;  %v6493_v31 = vpack.i.bf16 %v2526_v46, %v2522_v40  ;;  %v2158_v1 = vcombine.high %v6096_v50, %v6096_v50  ;;  %v3955_v25 = vld [vmem:[#allocation2 + $0x80] sm:$0x22] }
  0xe3   : > { %v3736_v55 = vsel %vm5888_vm13, %v3724_v56, %v3735_v13  ;;  %v7627_v9 = vrot.slane %v6466_v23, 4  ;;  %v6476_v19 = vpack.i.bf16 %v6394_v59, %v7698_v17  ;;  %v6491_v59 = vpack.i.bf16 %v1896_v43, %v1892_v6 }
  0xe4   : > { %3737 = vst [vmem:[#allocation2 + $0x80] sm:$0x11] %v3736_v55  ;;  %3934 = vrot.lane.b32.xlu0 %v5781_v8, %s5613_s25  ;;  %3936 = vrot.lane.b32.xlu1 %v6375_v4, %s5613_s25  ;;  %v6498_v8 = vpack.i.bf16 %v2301_v29, %v2297_v28  ;;  %v2752_v4 = vrot.slane %v6413_v58, 5  ;;  %v3938_v42 = vrot.slane %v3929_v54, 4  ;;  %v7699_v43 = vpack.i.bf16 %v6345_v15, %v5875_v0 }
  0xe5   : > { %v3725_v39 = vsel %vm332_vm1, %v3719_v18, %v7627_v9  ;;  %v5530_v50 = vpack.i.bf16 %v6413_v58, %v6439_v53  ;;  %v2748_v52 = vrot.slane %v6439_v53, 5  ;;  %v6516_v6 = vshll.u32 %v6337_v37, 16  ;;  %v2143_v9 = vld [vmem:[#allocation2 + $0x40] sm:$0x11] }
  0xe6   : > { %v3726_v34 = vsel %vm812_vm5, %v3711_v30, %v3725_v39  ;;  %v3931_v62 = vpop.permute.xlu0 %3930  ;;  %v6496_v63 = vpop.permute.xlu1 %3932  ;;  %v3958_v30 = vld [vmem:[#allocation2 + $0x88] sm:$0x22]  ;;  %v2172_v40 = vrot.slane %v2158_v1, %v5646_v5  ;;  %v6524_v56 = vshll.u32 %v6327_v41, 16 }
  0xe7   : > { %v3739_v27 = vsel %vm5888_vm13, %v3726_v34, %v3738_v10  ;;  %v3939_v18 = vrot.slane %v3931_v62, 4  ;;  %v7626_v13 = vrot.slane %v6496_v63, 4 }
  0xe8   : > { %3740 = vst [vmem:[#allocation2 + $0x88] sm:$0x11] %v3739_v27  ;;  %5481 = vrot.lane.b32.xlu1 %v5897_v26, %s5611_s23  ;;  %5476 = vrot.lane.b32.xlu0 %v7699_v43, %s5610_s22  ;;  %v2174_v37 = vcombine.low %v2172_v40, %v2172_v40 }
  0xe9   : > { %v3943_v46 = vsel %vm332_vm1, %v3938_v42, %v3939_v18  ;;  %v3945_v26 = vsel %vm332_vm1, %v3939_v18, %v7626_v13  ;;  %v6542_v42 = vpack.i.bf16 %v2752_v4, %v2748_v52  ;;  %v2213_v18 = vld [vmem:[#allocation2 + $0x50] sm:$0x22]  ;;  %v354_v4 = vld [vmem:[#allocation2 + $0x8] sm:$0x11] }
  0xea   : > { %v3944_v0 = vsel %vm1052_vm14, %v3929_v54, %v3943_v46  ;;  %v3946_v15 = vsel %vm1052_vm14, %v3931_v62, %v3945_v26  ;;  %v5357_v28 = vpop.permute.xlu0 %5356  ;;  %v6528_v29 = vpop.permute.xlu1 %5361  ;;  %v3605_v54 = vrot.slane %v6516_v6, 5  ;;  %v2195_v34 = vrot.slane %v2174_v37, %v5646_v5 }
  0xeb   : > { %v3956_v55 = vsel %vm5984_vm0, %v3944_v0, %v3955_v25  ;;  %v3959_v17 = vsel %vm5984_vm0, %v3946_v15, %v3958_v30  ;;  %v5359_v10 = vunpack.i.h.bf16 %v5357_v28  ;;  %v5358_v39 = vunpack.i.l.bf16 %v5357_v28  ;;  %v2216_v25 = vld [vmem:[#allocation2 + $0x58] sm:$0x22]  ;;  %v351_v30 = vld [vmem:[#allocation2] sm:$0x11] }
  0xec   : > { %3957 = vst [vmem:[#allocation2 + $0x80] sm:$0x22] %v3956_v55  ;;  %3960 = vst [vmem:[#allocation2 + $0x88] sm:$0x22] %v3959_v17  ;;  %v7624_v41 = vunpack.i.l.bf16 %v6528_v29  ;;  %5491 = vrot.lane.b32.xlu1 %v6392_v16, %s5613_s25  ;;  %5486 = vrot.lane.b32.xlu0 %v6423_v38, %s5612_s24  ;;  %v2202_v62 = vrot.slane %v2172_v40, %v5646_v5  ;;  %v2214_v38 = vsel %vm5984_vm0, %v2195_v34, %v2213_v18 }
  0xed   : > { %v328_v1 = vrot.slane %v5359_v10, 4  ;;  %v327_v27 = vrot.slane %v5358_v39, 4  ;;  %2215 = vst [vmem:[#allocation2 + $0x50] sm:$0x22] %v2214_v38  ;;  %v3601_v55 = vrot.slane %v6524_v56, 5 }
  0xee   : > { %v6546_v43 = vrot.slane %v7624_v41, 4  ;;  %v5367_v16 = vpop.permute.xlu0 %5366  ;;  %v6548_v46 = vpop.permute.xlu1 %5371  ;;  %v2217_v40 = vsel %vm5984_vm0, %v2202_v62, %v2216_v25  ;;  %v590_v38 = vld [vmem:[#allocation2] sm:$0x22] }
  0xef   : > { %v333_v26 = vsel %vm332_vm1, %v327_v27, %v328_v1  ;;  %v5369_v52 = vunpack.i.h.bf16 %v5367_v16  ;;  %v5368_v0 = vunpack.i.l.bf16 %v5367_v16  ;;  %2218 = vst [vmem:[#allocation2 + $0x58] sm:$0x22] %v2217_v40  ;;  %v7625_v37 = vunpack.i.l.bf16 %v6548_v46 }
  0xf0   : > { %v335_v15 = vsel %vm334_vm15, %v5358_v39, %v333_v26  ;;  %v336_v28 = vsel %vm332_vm1, %v328_v1, %v6546_v43  ;;  %5501 = vrot.lane.b32.xlu1 %v6476_v19, %s5606_s18  ;;  %5496 = vrot.lane.b32.xlu0 %v6479_v21, %s5607_s19  ;;  %v3379_v21 = vrot.slane %v6516_v6, 6  ;;  %v3375_v16 = vrot.slane %v6524_v56, 6 }
  0xf1   : > { %v352_v17 = vsel %vm6163_vm8, %v335_v15, %v351_v30  ;;  %v337_v34 = vsel %vm334_vm15, %v5359_v10, %v336_v28  ;;  %v568_v62 = vrot.slane %v5369_v52, 4  ;;  %v567_v39 = vrot.slane %v5368_v0, 4  ;;  %v593_v28 = vld [vmem:[#allocation2 + $0x8] sm:$0x22] }
  0xf2   : > { %353 = vst [vmem:[#allocation2] sm:$0x11] %v352_v17  ;;  %v355_v1 = vsel %vm6163_vm8, %v337_v34, %v354_v4  ;;  %v6571_v27 = vrot.slane %v7625_v37, 4  ;;  %v5377_v19 = vpop.permute.xlu0 %5376  ;;  %v6573_v18 = vpop.permute.xlu1 %5381 }
  0xf3   : > { %356 = vst [vmem:[#allocation2 + $0x8] sm:$0x11] %v355_v1  ;;  %v572_v25 = vsel %vm332_vm1, %v567_v39, %v568_v62  ;;  %v5379_v30 = vunpack.i.h.bf16 %v5377_v19  ;;  %v5378_v10 = vunpack.i.l.bf16 %v5377_v19  ;;  %v7622_v4 = vunpack.i.l.bf16 %v6573_v18 }
  0xf4   : > { %v574_v40 = vsel %vm573_vm11, %v5368_v0, %v572_v25  ;;  %v575_v26 = vsel %vm332_vm1, %v568_v62, %v6571_v27  ;;  %5511 = vrot.lane.b32.xlu1 %v6486_v20, %s5609_s21  ;;  %5506 = vrot.lane.b32.xlu0 %v6491_v59, %s5608_s20  ;;  %v5540_v59 = vpack.i.bf16 %v3605_v54, %v3601_v55 }
  0xf5   : > { %v591_v15 = vsel %vm5661_vm6, %v574_v40, %v590_v38  ;;  %v576_v17 = vsel %vm573_vm11, %v5369_v52, %v575_v26  ;;  %v807_v34 = vrot.slane %v5379_v30, 4  ;;  %v806_v39 = vrot.slane %v5378_v10, 4  ;;  %v829_v52 = vld [vmem:[#allocation2] sm:$0x44] }
  0xf6   : > { %592 = vst [vmem:[#allocation2] sm:$0x22] %v591_v15  ;;  %v594_v0 = vsel %vm5661_vm6, %v576_v17, %v593_v28  ;;  %v6593_v62 = vrot.slane %v7622_v4, 4  ;;  %v5387_v20 = vpop.permute.xlu0 %5386  ;;  %v6595_v1 = vpop.permute.xlu1 %5391  ;;  %v5535_v54 = vpack.i.bf16 %v3379_v21, %v3375_v16  ;;  %v832_v28 = vld [vmem:[#allocation2 + $0x8] sm:$0x44] }
  0xf7   : > { %595 = vst [vmem:[#allocation2 + $0x8] sm:$0x22] %v594_v0  ;;  %v811_v19 = vsel %vm332_vm1, %v806_v39, %v807_v34  ;;  %v5389_v25 = vunpack.i.h.bf16 %v5387_v20  ;;  %v5388_v38 = vunpack.i.l.bf16 %v5387_v20  ;;  %v7623_v15 = vunpack.i.l.bf16 %v6595_v1 }
  0xf8   : > { %v813_v40 = vsel %vm812_vm5, %v5378_v10, %v811_v19  ;;  %v814_v26 = vsel %vm332_vm1, %v807_v34, %v6593_v62  ;;  %5521 = vrot.lane.b32.xlu1 %v6493_v31, %s5611_s23  ;;  %5516 = vrot.lane.b32.xlu0 %v6498_v8, %s5610_s22  ;;  %v4049_v8 = vrot.slane %v6516_v6, 7  ;;  %v1069_v19 = vld [vmem:[#allocation2] sm:$0x88] }
  0xf9   : > { %v830_v55 = vsel %vm5929_vm9, %v813_v40, %v829_v52  ;;  %v815_v17 = vsel %vm812_vm5, %v5379_v30, %v814_v26  ;;  %v1047_v39 = vrot.slane %v5389_v25, 4  ;;  %v1046_v10 = vrot.slane %v5388_v38, 4 }
  0xfa   : > { %831 = vst [vmem:[#allocation2] sm:$0x44] %v830_v55  ;;  %v833_v34 = vsel %vm5929_vm9, %v815_v17, %v832_v28  ;;  %v6613_v0 = vrot.slane %v7623_v15, 4  ;;  %v5397_v31 = vpop.permute.xlu0 %5396  ;;  %v6615_v20 = vpop.permute.xlu1 %5401  ;;  %v4045_v55 = vrot.slane %v6524_v56, 7  ;;  %v1072_v17 = vld [vmem:[#allocation2 + $0x8] sm:$0x88] }
  0xfb   : > { %834 = vst [vmem:[#allocation2 + $0x8] sm:$0x44] %v833_v34  ;;  %v1051_v21 = vsel %vm332_vm1, %v1046_v10, %v1047_v39  ;;  %v5399_v16 = vunpack.i.h.bf16 %v5397_v31  ;;  %v5398_v30 = vunpack.i.l.bf16 %v5397_v31  ;;  %v7617_v26 = vunpack.i.l.bf16 %v6615_v20 }
  0xfc   : > { %v1053_v52 = vsel %vm1052_vm14, %v5388_v38, %v1051_v21  ;;  %v1054_v40 = vsel %vm332_vm1, %v1047_v39, %v6613_v0  ;;  %5531 = vrot.lane.b32.xlu1 %v5530_v50, %s5613_s25  ;;  %5526 = vrot.lane.b32.xlu0 %v6542_v42, %s5612_s24 }
  0xfd   : > { %v1070_v28 = vsel %vm5950_vm4, %v1053_v52, %v1069_v19  ;;  %v1055_v38 = vsel %vm1052_vm14, %v5389_v25, %v1054_v40  ;;  %v1457_v10 = vrot.slane %v5399_v16, 4  ;;  %v1456_v39 = vrot.slane %v5398_v30, 4  ;;  %v1473_v19 = vld [vmem:[#allocation2 + $0x20] sm:$0x22] }
  0xfe   : > { %1071 = vst [vmem:[#allocation2] sm:$0x88] %v1070_v28  ;;  %v1073_v34 = vsel %vm5950_vm4, %v1055_v38, %v1072_v17  ;;  %v6637_v58 = vrot.slane %v7617_v26, 4  ;;  %v5407_v53 = vpop.permute.xlu0 %5406  ;;  %v6639_v50 = vpop.permute.xlu1 %5411  ;;  %v5545_v25 = vpack.i.bf16 %v6516_v6, %v6524_v56  ;;  %v5550_v17 = vpack.i.bf16 %v4049_v8, %v4045_v55  ;;  %v471_v26 = vld [vmem:[#allocation2 + $0x18] sm:$0x22] }
  0xff   : > { %1074 = vst [vmem:[#allocation2 + $0x8] sm:$0x88] %v1073_v34  ;;  %v1461_v42 = vsel %vm332_vm1, %v1456_v39, %v1457_v10  ;;  %v5409_v31 = vunpack.i.h.bf16 %v5407_v53  ;;  %v5408_v21 = vunpack.i.l.bf16 %v5407_v53  ;;  %v7619_v28 = vunpack.i.l.bf16 %v6639_v50  ;;  %v1476_v39 = vld [vmem:[#allocation2 + $0x28] sm:$0x22] }
 0x100   : > { %v1462_v52 = vsel %vm443_vm2, %v5398_v30, %v1461_v42  ;;  %v1463_v40 = vsel %vm332_vm1, %v1457_v10, %v6637_v58  ;;  %5541 = vrot.lane.b32.xlu1 %v5540_v59, %s5606_s18  ;;  %5536 = vrot.lane.b32.xlu0 %v5535_v54, %s5607_s19  ;;  %v7620_v42 = vmov 0  }
 0x101   : > { %v1474_v38 = vsel %vm5661_vm6, %v1462_v52, %v1473_v19  ;;  %v1464_v34 = vsel %vm443_vm2, %v5399_v16, %v1463_v40  ;;  %v1682_v6 = vrot.slane %v5409_v31, 4  ;;  %v1681_v56 = vrot.slane %v5408_v21, 4  ;;  %4277 = vmatprep.mubr.bf16.mxu0 %v7620_v42  ;;  %4320 = vmatprep.mubr.bf16.mxu1 %v7620_v42  ;;  %v1698_v16 = vld [vmem:[#allocation2 + $0x20] sm:$0x44] }
 0x102   : > { %1475 = vst [vmem:[#allocation2 + $0x20] sm:$0x22] %v1474_v38  ;;  %v1477_v30 = vsel %vm5661_vm6, %v1464_v34, %v1476_v39  ;;  %v6657_v10 = vrot.slane %v7619_v28, 4  ;;  %v5417_v59 = vpop.permute.xlu0 %5416  ;;  %v6659_v53 = vpop.permute.xlu1 %5421  ;;  %v1701_v39 = vld [vmem:[#allocation2 + $0x28] sm:$0x44]  ;;  %5555 = vset.pattern.permute.xlu0 %v7620_v42  ;;  %5556 = vset.pattern.permute.xlu1 %v7620_v42 }
 0x103   : > { %1478 = vst [vmem:[#allocation2 + $0x28] sm:$0x22] %v1477_v30  ;;  %v1686_v54 = vsel %vm332_vm1, %v1681_v56, %v1682_v6  ;;  %v5419_v8 = vunpack.i.h.bf16 %v5417_v59  ;;  %v5418_v55 = vunpack.i.l.bf16 %v5417_v59  ;;  %v7618_v40 = vunpack.i.l.bf16 %v6659_v53 }
 0x104   : > { %v1687_v19 = vsel %vm7700_vm12, %v5408_v21, %v1686_v54  ;;  %v1688_v52 = vsel %vm332_vm1, %v1682_v6, %v6657_v10  ;;  %5551 = vrot.lane.b32.xlu1 %v5550_v17, %s5609_s21  ;;  %5546 = vrot.lane.b32.xlu0 %v5545_v25, %s5608_s20  ;;  %vm7702_vm12 = vcmask 785408  }
 0x105   : > { %v1699_v38 = vsel %vm5929_vm9, %v1687_v19, %v1698_v16  ;;  %v1689_v34 = vsel %vm7701_vm3, %v5409_v31, %v1688_v52  ;;  %v1908_v56 = vrot.slane %v5419_v8, 4  ;;  %v1907_v30 = vrot.slane %v5418_v55, 4  ;;  %v1924_v16 = vld [vmem:[#allocation2 + $0x20] sm:$0x88]  ;;  %vm7703_vm3 = vmmov %vm7702_vm12 }
 0x106   : > { %1700 = vst [vmem:[#allocation2 + $0x20] sm:$0x44] %v1699_v38  ;;  %v1702_v21 = vsel %vm5929_vm9, %v1689_v34, %v1701_v39  ;;  %v6679_v17 = vrot.slane %v7618_v40, 4  ;;  %v434_v25 = vpop.permute.xlu0 %433  ;;  %v436_v6 = vpop.permute.xlu1 %435  ;;  %v468_v38 = vld [vmem:[#allocation2 + $0x10] sm:$0x22]  ;;  %v4090_v28 = vld [vmem:[#allocation2 + $0x8] sm:$0xff] }
 0x107   : > { %1703 = vst [vmem:[#allocation2 + $0x28] sm:$0x44] %v1702_v21  ;;  %v1912_v59 = vsel %vm332_vm1, %v1907_v30, %v1908_v56  ;;  %v440_v31 = vrot.slane %v434_v25, 4  ;;  %v441_v54 = vrot.slane %v436_v6, 4  ;;  %v1927_v34 = vld [vmem:[#allocation2 + $0x28] sm:$0x88] }
 0x108   : > { %v1913_v19 = vsel %vm7702_vm12, %v5418_v55, %v1912_v59  ;;  %v1914_v52 = vsel %vm332_vm1, %v1908_v56, %v6679_v17  ;;  %v7704_v21 = vrot.slane %v6058_v36, 4  ;;  %vm7706_vm12 = vcmask 908288  }
 0x109   : > { %v1925_v39 = vsel %vm5950_vm4, %v1913_v19, %v1924_v16  ;;  %v1915_v40 = vsel %vm7703_vm3, %v5419_v8, %v1914_v52  ;;  %v449_v6 = vsel %vm332_vm1, %v440_v31, %v441_v54  ;;  %vm7707_vm3 = vmmov %vm7706_vm12 }
 0x10a   : > { %v447_v30 = vsel %vm332_vm1, %v7704_v21, %v440_v31  ;;  %1926 = vst [vmem:[#allocation2 + $0x20] sm:$0x88] %v1925_v39  ;;  %v1928_v55 = vsel %vm5950_vm4, %v1915_v40, %v1927_v34  ;;  %v450_v59 = vsel %vm443_vm2, %v434_v25, %v449_v6  ;;  %v673_v16 = vpop.permute.xlu0 %672  ;;  %v675_v19 = vpop.permute.xlu1 %674  ;;  %v707_v39 = vld [vmem:[#allocation2 + $0x10] sm:$0x44]  ;;  %v710_v40 = vld [vmem:[#allocation2 + $0x18] sm:$0x44] }
 0x10b   : > { %v448_v56 = vsel %vm443_vm2, %v6058_v36, %v447_v30  ;;  %1929 = vst [vmem:[#allocation2 + $0x28] sm:$0x88] %v1928_v55  ;;  %v472_v52 = vsel %vm5984_vm0, %v450_v59, %v471_v26  ;;  %v679_v31 = vrot.slane %v673_v16, 4  ;;  %v680_v54 = vrot.slane %v675_v19, 4  ;;  %v5593_v34 = vld [vmem:[%s5651_s17 + $0x9] sm:$0xff] }
 0x10c   : > { %v469_v8 = vsel %vm5984_vm0, %v448_v56, %v468_v38  ;;  %473 = vst [vmem:[#allocation2 + $0x18] sm:$0x22] %v472_v52  ;;  %v1187_v21 = vcombine.high %v5593_v34, %v5593_v34  ;;  %v7705_v36 = vrot.slane %v5971_v3, 4  ;;  %v947_v52 = vld [vmem:[#allocation2 + $0x10] sm:$0x88] }
 0x10d   : > { %470 = vst [vmem:[#allocation2 + $0x10] sm:$0x22] %v469_v8  ;;  %v688_v30 = vsel %vm332_vm1, %v679_v31, %v680_v54  ;;  %v950_v34 = vld [vmem:[#allocation2 + $0x18] sm:$0x88]  ;;  %v7708_v54 = vld [vmem:[#allocation3_spill] sm:$0xff] }
 0x10e   : > { %v686_v25 = vsel %vm332_vm1, %v7705_v36, %v679_v31  ;;  %v689_v6 = vsel %vm7707_vm3, %v673_v16, %v688_v30  ;;  %v913_v26 = vpop.permute.xlu0 %912  ;;  %v915_v55 = vpop.permute.xlu1 %914  ;;  %v1201_v31 = vrot.slane %v1187_v21, %v5646_v5 }
 0x10f   : > { %v687_v38 = vsel %vm7706_vm12, %v5971_v3, %v686_v25  ;;  %v711_v59 = vsel %vm6040_vm10, %v689_v6, %v710_v40  ;;  %v919_v19 = vrot.slane %v913_v26, 4  ;;  %v920_v8 = vrot.slane %v915_v55, 4  ;;  %v4089_v25 = vld [vmem:[#allocation2] sm:$0xff] }
 0x110   : > { %v708_v56 = vsel %vm6040_vm10, %v687_v38, %v707_v39  ;;  %712 = vst [vmem:[#allocation2 + $0x18] sm:$0x44] %v711_v59  ;;  %v7709_v3 = vrot.slane %v7708_v54, 4  ;;  %vm7710_vm12 = vcmask 785408  }
 0x111   : > { %709 = vst [vmem:[#allocation2 + $0x10] sm:$0x44] %v708_v56  ;;  %v928_v36 = vsel %vm332_vm1, %v919_v19, %v920_v8  ;;  %v4093_v30 = vld [vmem:[#allocation2 + $0x20] sm:$0xff]  ;;  %vm7711_vm3 = vmmov %vm7710_vm12 }
 0x112   : > { %v926_v16 = vsel %vm332_vm1, %v7709_v3, %v919_v19  ;;  %v929_v40 = vsel %vm7711_vm3, %v913_v26, %v928_v36  ;;  %v1151_v38 = vpop.permute.xlu0 %1150  ;;  %v1153_v6 = vpop.permute.xlu1 %1152  ;;  %v6721_v55 = vcombine.high %v4089_v25, %v4093_v30  ;;  %v4094_v56 = vld [vmem:[#allocation2 + $0x28] sm:$0xff]  ;;  %v6723_v59 = vcombine.low %v4089_v25, %v4093_v30  ;;  %v1181_v26 = vld [vmem:[#allocation2 + $0x38] sm:$0x11] }
 0x113   : > { %v927_v39 = vsel %vm7710_vm12, %v7708_v54, %v926_v16  ;;  %v951_v19 = vsel %vm6010_vm7, %v929_v40, %v950_v34  ;;  %v1157_v8 = vrot.slane %v1151_v38, 4  ;;  %v1158_v3 = vrot.slane %v1153_v6, 4  ;;  %v1178_v54 = vld [vmem:[#allocation2 + $0x30] sm:$0x11]  ;;  %v7716_v30 = vld [vmem:[#allocation4_spill] sm:$0xff] }
 0x114   : > { %7712 = vst [vmem:[#allocation3_spill] sm:$0xff] %v6721_v55  ;;  %7713 = vst [vmem:[#allocation5_spill] sm:$0xff] %v6723_v59  ;;  %v948_v21 = vsel %vm6010_vm7, %v927_v39, %v947_v52  ;;  %v1203_v16 = vcombine.high %v1201_v31, %v1201_v31  ;;  %4245 = vmatprep.subr.bf16.mxu0 %v6721_v55  ;;  %v6730_v36 = vcombine.high %v4090_v28, %v4094_v56  ;;  %vm7718_vm12 = vcmask 769024   ;;  %v2557_v55 = vld [vmem:[#allocation2 + $0x48] sm:$0x44] }
 0x115   : > { %949 = vst [vmem:[#allocation2 + $0x10] sm:$0x88] %v948_v21  ;;  %952 = vst [vmem:[#allocation2 + $0x18] sm:$0x88] %v951_v19  ;;  %v6732_v25 = vcombine.low %v4090_v28, %v4094_v56  ;;  %v7717_v42 = vrot.slane %v7716_v30, 4  ;;  %v1166_v34 = vsel %vm332_vm1, %v1157_v8, %v1158_v3  ;;  %4246 = vmatpush1.bf16.msra.mxu0 %v6723_v59 }
 0x116   : > { %7714 = vst [vmem:[#allocation6_spill] sm:$0xff] %v6730_v36  ;;  %vm7719_vm3 = vmmov %vm7718_vm12  ;;  %4288 = vmatprep.subr.bf16.mxu1 %v6730_v36  ;;  %v1331_v6 = vpop.permute.xlu0 %1330  ;;  %v1333_v21 = vpop.permute.xlu1 %1332  ;;  %v1231_v3 = vrot.slane %v1203_v16, %v5646_v5 }
 0x117   : > { %7715 = vst [vmem:[#allocation7_spill] sm:$0xff] %v6732_v25  ;;  %v1164_v52 = vsel %vm332_vm1, %v7717_v42, %v1157_v8  ;;  %v1167_v40 = vsel %vm7719_vm3, %v1151_v38, %v1166_v34  ;;  %4289 = vmatpush1.bf16.msra.mxu1 %v6732_v25  ;;  %v1337_v42 = vrot.slane %v1331_v6, 4  ;;  %v1338_v19 = vrot.slane %v1333_v21, 4  ;;  %v1357_v38 = vld [vmem:[#allocation2 + $0x30] sm:$0x22] }
 0x118   : > { %v1165_v39 = vsel %vm7718_vm12, %v7716_v30, %v1164_v52  ;;  %v1182_v56 = vsel %vm5888_vm13, %v1167_v40, %v1181_v26  ;;  %v1224_v8 = vrot.slane %v1201_v31, %v5646_v5  ;;  %v1360_v30 = vld [vmem:[#allocation2 + $0x38] sm:$0x22]  ;;  %v7720_v52 = vrot.slane %v6145_v24, 4  ;;  %vm7724_vm12 = vmmov %vm7719_vm3 }
 0x119   : > { %v1179_v28 = vsel %vm5888_vm13, %v1165_v39, %v1178_v54  ;;  %1183 = vst [vmem:[#allocation2 + $0x38] sm:$0x11] %v1182_v56  ;;  %v1345_v54 = vsel %vm332_vm1, %v1337_v42, %v1338_v19  ;;  %v1242_v15 = vshll.u32 %v1231_v3, 16  ;;  %v1585_v19 = vld [vmem:[#allocation2 + $0x38] sm:$0x44] }
 0x11a   : > { %1180 = vst [vmem:[#allocation2 + $0x30] sm:$0x11] %v1179_v28  ;;  %v1343_v34 = vsel %vm332_vm1, %v7720_v52, %v1337_v42  ;;  %v1346_v39 = vsel %vm334_vm15, %v1331_v6, %v1345_v54  ;;  %v1556_v40 = vpop.permute.xlu0 %1555  ;;  %v1558_v21 = vpop.permute.xlu1 %1557  ;;  %v1239_v4 = vshll.u32 %v1224_v8, 16  ;;  %v1582_v42 = vld [vmem:[#allocation2 + $0x30] sm:$0x44] }
 0x11b   : > { %v1344_v26 = vsel %vm334_vm15, %v6145_v24, %v1343_v34  ;;  %v1361_v16 = vsel %vm5984_vm0, %v1346_v39, %v1360_v30  ;;  %v1562_v28 = vrot.slane %v1556_v40, 4  ;;  %v1563_v56 = vrot.slane %v1558_v21, 4 }
 0x11c   : > { %v1358_v31 = vsel %vm5984_vm0, %v1344_v26, %v1357_v38  ;;  %1362 = vst [vmem:[#allocation2 + $0x38] sm:$0x22] %v1361_v16  ;;  %v7721_v24 = vrot.slane %v6171_v22, 4 }
 0x11d   : > { %1359 = vst [vmem:[#allocation2 + $0x30] sm:$0x22] %v1358_v31  ;;  %v1570_v52 = vsel %vm332_vm1, %v1562_v28, %v1563_v56  ;;  %v5364_v56 = vunpack.i.h.bf16 %v6528_v29 }
 0x11e   : > { %v1568_v6 = vsel %vm332_vm1, %v7721_v24, %v1562_v28  ;;  %v1571_v34 = vsel %vm573_vm11, %v1556_v40, %v1570_v52  ;;  %v1782_v30 = vpop.permute.xlu0 %1781  ;;  %v1784_v54 = vpop.permute.xlu1 %1783  ;;  %v1808_v40 = vld [vmem:[#allocation2 + $0x30] sm:$0x88]  ;;  %v1811_v28 = vld [vmem:[#allocation2 + $0x38] sm:$0x88]  ;;  %v7632_v24 = vunpack.i.h.bf16 %v6548_v46 }
 0x11f   : > { %v1569_v38 = vsel %vm573_vm11, %v6171_v22, %v1568_v6  ;;  %v1586_v39 = vsel %vm6040_vm10, %v1571_v34, %v1585_v19  ;;  %v1788_v21 = vrot.slane %v1782_v30, 4  ;;  %v1789_v31 = vrot.slane %v1784_v54, 4 }
 0x120   : > { %v1257_v8 = vld [vmem:[#allocation2 + $0x38] sm:$0x11]  ;;  %v1583_v3 = vsel %vm6040_vm10, %v1569_v38, %v1582_v42  ;;  %1587 = vst [vmem:[#allocation2 + $0x38] sm:$0x44] %v1586_v39  ;;  %v7722_v42 = vrot.slane %v6199_v44, 4  ;;  %v7631_v6 = vunpack.i.h.bf16 %v6573_v18 }
 0x121   : > { %v1254_v26 = vld [vmem:[#allocation2 + $0x30] sm:$0x11]  ;;  %v1258_v22 = vsel %vm6163_vm8, %v1242_v15, %v1257_v8  ;;  %1584 = vst [vmem:[#allocation2 + $0x30] sm:$0x44] %v1583_v3  ;;  %v7630_v15 = vunpack.i.h.bf16 %v6595_v1 }
 0x122   : > { %v1255_v16 = vsel %vm6163_vm8, %v1239_v4, %v1254_v26  ;;  %1259 = vst [vmem:[#allocation2 + $0x38] sm:$0x11] %v1258_v22  ;;  %v1794_v19 = vsel %vm332_vm1, %v7722_v42, %v1788_v21  ;;  %v1796_v4 = vsel %vm332_vm1, %v1788_v21, %v1789_v31  ;;  %v5427_v34 = vpop.permute.xlu0 %5426  ;;  %v6787_v54 = vpop.permute.xlu1 %5431  ;;  %v7633_v21 = vunpack.i.h.bf16 %v6615_v20 }
 0x123   : > { %1256 = vst [vmem:[#allocation2 + $0x30] sm:$0x11] %v1255_v16  ;;  %v1795_v52 = vsel %vm812_vm5, %v6199_v44, %v1794_v19  ;;  %v1797_v38 = vsel %vm812_vm5, %v1782_v30, %v1796_v4  ;;  %v5429_v3 = vunpack.i.h.bf16 %v5427_v34  ;;  %v5428_v39 = vunpack.i.l.bf16 %v5427_v34  ;;  %v6796_v44 = vld [vmem:[%s5651_s17 + $0x1b] sm:$0xff] }
 0x124   : > { %v1809_v26 = vsel %vm6010_vm7, %v1795_v52, %v1808_v40  ;;  %v1812_v8 = vsel %vm6010_vm7, %v1797_v38, %v1811_v28  ;;  %v7628_v31 = vunpack.i.l.bf16 %v6787_v54  ;;  %v2312_v16 = vrot.slane %v5364_v56, 4 }
 0x125   : > { %1810 = vst [vmem:[#allocation2 + $0x30] sm:$0x88] %v1809_v26  ;;  %1813 = vst [vmem:[#allocation2 + $0x38] sm:$0x88] %v1812_v8  ;;  %v2537_v22 = vrot.slane %v7632_v24, 4  ;;  %v2127_v40 = vrot.slane %v5429_v3, 4  ;;  %v7637_v4 = vunpack.i.h.bf16 %v6639_v50 }
 0x126   : > { %v2126_v42 = vrot.slane %v5428_v39, 4  ;;  %v2763_v28 = vrot.slane %v7631_v6, 4  ;;  %v6806_v19 = vrot.slane %v7630_v15, 4  ;;  %v6811_v52 = vrot.slane %v7628_v31, 4  ;;  %v6813_v38 = vpop.permute.xlu0 %5436  ;;  %v6815_v34 = vpop.permute.xlu1 %5441  ;;  %v2146_v15 = vld [vmem:[#allocation2 + $0x48] sm:$0x11] }
 0x127   : > { %7723 = vst [vmem:[#allocation4_spill] sm:$0xff] %v6813_v38  ;;  %v7636_v8 = vunpack.i.h.bf16 %v6813_v38  ;;  %v5438_v41 = vunpack.i.l.bf16 %v6813_v38  ;;  %v6823_v13 = vrot.slane %v7633_v21, 4  ;;  %v5443_v30 = vunpack.i.l.bf16 %v6815_v34  ;;  %v2329_v24 = vld [vmem:[#allocation2 + $0x40] sm:$0x22] }
 0x128   : > { %v2131_v26 = vsel %vm332_vm1, %v2126_v42, %v2127_v40  ;;  %v2133_v48 = vsel %vm332_vm1, %v2127_v40, %v6811_v52 }
 0x129   : > { %v2132_v31 = vsel %vm7724_vm12, %v5428_v39, %v2131_v26  ;;  %v2134_v6 = vsel %vm7719_vm3, %v5429_v3, %v2133_v48  ;;  %v6834_v37 = vrot.slane %v7636_v8, 4  ;;  %v2313_v21 = vrot.slane %v5438_v41, 4  ;;  %v2332_v26 = vld [vmem:[#allocation2 + $0x48] sm:$0x22] }
 0x12a   : > { %v2144_v42 = vsel %vm6163_vm8, %v2132_v31, %v2143_v9  ;;  %v6838_v39 = vrot.slane %v7637_v4, 4  ;;  %v2147_v40 = vsel %vm6163_vm8, %v2134_v6, %v2146_v15  ;;  %v7725_v9 = vunpack.i.h.bf16 %v6815_v34  ;;  %v6846_v3 = vpop.permute.xlu0 %5446  ;;  %v6848_v25 = vpop.permute.xlu1 %5451 }
 0x12b   : > { %2145 = vst [vmem:[#allocation2 + $0x40] sm:$0x11] %v2144_v42  ;;  %v2538_v48 = vrot.slane %v5443_v30, 4  ;;  %7726 = vst [vmem:[#allocation8_spill] sm:$0xff] %v6846_v3  ;;  %v2317_v8 = vsel %vm332_vm1, %v2312_v16, %v2313_v21  ;;  %v2319_v4 = vsel %vm332_vm1, %v2313_v21, %v6834_v37  ;;  %v5448_v6 = vunpack.i.l.bf16 %v6846_v3  ;;  %v2554_v21 = vld [vmem:[#allocation2 + $0x40] sm:$0x44] }
 0x12c   : > { %v6844_v31 = vrot.slane %v7725_v9, 4  ;;  %7727 = vst [vmem:[#allocation9_spill] sm:$0xff] %v6848_v25  ;;  %2148 = vst [vmem:[#allocation2 + $0x48] sm:$0x11] %v2147_v40  ;;  %v2318_v15 = vsel %vm334_vm15, %v5364_v56, %v2317_v8  ;;  %v2320_v9 = vsel %vm334_vm15, %v5438_v41, %v2319_v4  ;;  %v7728_v42 = vunpack.i.h.bf16 %v6548_v46 }
 0x12d   : > { %v2542_v59 = vsel %vm332_vm1, %v2537_v22, %v2538_v48  ;;  %v2330_v40 = vsel %vm5661_vm6, %v2318_v15, %v2329_v24  ;;  %v2333_v16 = vsel %vm5661_vm6, %v2320_v9, %v2332_v26  ;;  %v7729_v24 = vunpack.i.h.bf16 %v6846_v3 }
 0x12e   : > { %v2544_v36 = vsel %vm332_vm1, %v2538_v48, %v6844_v31  ;;  %v2543_v38 = vsel %vm573_vm11, %v7728_v42, %v2542_v59  ;;  %2331 = vst [vmem:[#allocation2 + $0x40] sm:$0x22] %v2330_v40  ;;  %2334 = vst [vmem:[#allocation2 + $0x48] sm:$0x22] %v2333_v16  ;;  %v2764_v8 = vrot.slane %v5448_v6, 4  ;;  %v6876_v26 = vpop.permute.xlu0 %5456  ;;  %v6878_v48 = vpop.permute.xlu1 %5461  ;;  %v7648_v59 = vunpack.i.h.bf16 %v6848_v25 }
 0x12f   : > { %v2545_v56 = vsel %vm573_vm11, %v5443_v30, %v2544_v36  ;;  %v2555_v41 = vsel %vm5929_vm9, %v2543_v38, %v2554_v21  ;;  %v6874_v4 = vrot.slane %v7729_v24, 4  ;;  %7731 = vst [vmem:[#allocation11_spill] sm:$0xff] %v6876_v26  ;;  %7732 = vst [vmem:[#allocation12_spill] sm:$0xff] %v6878_v48  ;;  %v5453_v36 = vunpack.i.l.bf16 %v6848_v25  ;;  %v2780_v40 = vld [vmem:[#allocation2 + $0x40] sm:$0x88] }
 0x130   : > { %v2558_v22 = vsel %vm5929_vm9, %v2545_v56, %v2557_v55  ;;  %2556 = vst [vmem:[#allocation2 + $0x40] sm:$0x44] %v2555_v41  ;;  %v7647_v30 = vunpack.i.h.bf16 %v6876_v26  ;;  %v5458_v38 = vunpack.i.l.bf16 %v6876_v26  ;;  %v2768_v55 = vsel %vm332_vm1, %v2763_v28, %v2764_v8  ;;  %v2783_v16 = vld [vmem:[#allocation2 + $0x48] sm:$0x88]  ;;  %v3407_v26 = vld [vmem:[#allocation2 + $0x60] sm:$0x44] }
 0x131   : > { %7730 = vst [vmem:[#allocation10_spill] sm:$0xff] %v6874_v4  ;;  %2559 = vst [vmem:[#allocation2 + $0x48] sm:$0x44] %v2558_v22  ;;  %v2770_v42 = vsel %vm332_vm1, %v2764_v8, %v6874_v4  ;;  %v5463_v9 = vunpack.i.l.bf16 %v6878_v48  ;;  %v7733_v21 = vunpack.i.h.bf16 %v6573_v18  ;;  %v6895_v22 = vrot.slane %v7648_v59, 4 }
 0x132   : > { %v2771_v41 = vsel %vm812_vm5, %v5448_v6, %v2770_v42  ;;  %v2983_v28 = vrot.slane %v5453_v36, 4  ;;  %v6903_v15 = vrot.slane %v7647_v30, 4  ;;  %v3391_v3 = vrot.slane %v5458_v38, 4  ;;  %v2006_v4 = vpop.permute.xlu0 %2005 }
 0x133   : > { %v2769_v56 = vsel %vm812_vm5, %v7733_v21, %v2768_v55  ;;  %v2784_v8 = vsel %vm5950_vm4, %v2771_v41, %v2783_v16  ;;  %v2008_v55 = vpop.permute.xlu1 %2007  ;;  %v3617_v16 = vrot.slane %v5463_v9, 4  ;;  %v3002_v41 = vld [vmem:[#allocation2 + $0x68] sm:$0x11]  ;;  %v7735_v30 = vunpack.i.h.bf16 %v6595_v1 }
 0x134   : > { %v2781_v24 = vsel %vm5950_vm4, %v2769_v56, %v2780_v40  ;;  %2785 = vst [vmem:[#allocation2 + $0x48] sm:$0x88] %v2784_v8  ;;  %v2987_v6 = vsel %vm332_vm1, %v6806_v19, %v2983_v28  ;;  %v2989_v42 = vsel %vm332_vm1, %v2983_v28, %v6895_v22  ;;  %v7734_v40 = vunpack.i.h.bf16 %v6878_v48  ;;  %v2999_v56 = vld [vmem:[#allocation2 + $0x60] sm:$0x11]  ;;  %v3410_v48 = vld [vmem:[#allocation2 + $0x68] sm:$0x44] }
 0x135   : > { %2782 = vst [vmem:[#allocation2 + $0x40] sm:$0x88] %v2781_v24  ;;  %v2988_v59 = vsel %vm1052_vm14, %v7735_v30, %v2987_v6  ;;  %v2990_v24 = vsel %vm1052_vm14, %v5453_v36, %v2989_v42  ;;  %v3395_v8 = vsel %vm332_vm1, %v6823_v13, %v3391_v3  ;;  %v3397_v19 = vsel %vm332_vm1, %v3391_v3, %v6903_v15 }
 0x136   : > { %v6911_v21 = vrot.slane %v7734_v40, 4  ;;  %v3000_v28 = vsel %vm6163_vm8, %v2988_v59, %v2999_v56  ;;  %v3003_v40 = vsel %vm6163_vm8, %v2990_v24, %v3002_v41  ;;  %v7736_v25 = vunpack.i.h.bf16 %v6615_v20  ;;  %v2412_v42 = vpop.permute.xlu0 %2411 }
 0x137   : > { %v3398_v36 = vsel %vm443_vm2, %v5458_v38, %v3397_v19  ;;  %3001 = vst [vmem:[#allocation2 + $0x60] sm:$0x11] %v3000_v28  ;;  %3004 = vst [vmem:[#allocation2 + $0x68] sm:$0x11] %v3003_v40  ;;  %v3621_v59 = vsel %vm332_vm1, %v6838_v39, %v3617_v16  ;;  %v2414_v56 = vpop.permute.xlu1 %2413  ;;  %v3636_v38 = vld [vmem:[#allocation2 + $0x68] sm:$0x88]  ;;  %v7737_v41 = vunpack.i.h.bf16 %v6639_v50 }
 0x138   : > { %v3396_v30 = vsel %vm443_vm2, %v7736_v25, %v3395_v8  ;;  %v3411_v3 = vsel %vm5929_vm9, %v3398_v36, %v3410_v48  ;;  %v3623_v6 = vsel %vm332_vm1, %v3617_v16, %v6911_v21  ;;  %v3633_v25 = vld [vmem:[#allocation2 + $0x60] sm:$0x88]  ;;  %vm7738_vm12 = vcmask 908288   ;;  %v2032_v19 = vld [vmem:[#allocation2 + $0x50] sm:$0x11] }
 0x139   : > { %v3408_v13 = vsel %vm5929_vm9, %v3396_v30, %v3407_v26  ;;  %3412 = vst [vmem:[#allocation2 + $0x68] sm:$0x44] %v3411_v3  ;;  %v3622_v24 = vsel %vm7738_vm12, %v7737_v41, %v3621_v59  ;;  %vm7739_vm3 = vmmov %vm7738_vm12  ;;  %v2012_v8 = vrot.slane %v2006_v4, 4  ;;  %v2013_v48 = vrot.slane %v2008_v55, 4  ;;  %v2035_v28 = vld [vmem:[#allocation2 + $0x58] sm:$0x11] }
 0x13a   : > { %3409 = vst [vmem:[#allocation2 + $0x60] sm:$0x44] %v3408_v13  ;;  %v3624_v26 = vsel %vm7739_vm3, %v5463_v9, %v3623_v6  ;;  %v3634_v39 = vsel %vm5950_vm4, %v3622_v24, %v3633_v25  ;;  %v2418_v40 = vrot.slane %v2412_v42, 4  ;;  %v2419_v30 = vrot.slane %v2414_v56, 4  ;;  %v2438_v3 = vld [vmem:[#allocation2 + $0x50] sm:$0x44]  ;;  %vm7744_vm12 = vmmov %vm7739_vm3 }
 0x13b   : > { %v3637_v16 = vsel %vm5950_vm4, %v3624_v26, %v3636_v38  ;;  %3635 = vst [vmem:[#allocation2 + $0x60] sm:$0x88] %v3634_v39  ;;  %v7740_v36 = vrot.slane %v6214_v7, 4  ;;  %v2020_v9 = vsel %vm332_vm1, %v2012_v8, %v2013_v48  ;;  %v2441_v55 = vld [vmem:[#allocation2 + $0x58] sm:$0x44]  ;;  %v7741_v59 = vcombine.high %v6796_v44, %v6796_v44  ;;  %v2638_v26 = vpop.permute.xlu0 %2637 }
 0x13c   : > { %3638 = vst [vmem:[#allocation2 + $0x68] sm:$0x88] %v3637_v16  ;;  %v2021_v56 = vsel %vm1052_vm14, %v2006_v4, %v2020_v9  ;;  %v7742_v38 = vrot.slane %v6259_v33, 4  ;;  %v2426_v24 = vsel %vm332_vm1, %v2418_v40, %v2419_v30 }
 0x13d   : > { %v2018_v13 = vsel %vm332_vm1, %v7740_v36, %v2012_v8  ;;  %v6953_v6 = vrot.slane %v7741_v59, %v5646_v5  ;;  %v2640_v8 = vpop.permute.xlu1 %2639  ;;  %v2036_v44 = vsel %vm5888_vm13, %v2021_v56, %v2035_v28  ;;  %v2667_v36 = vld [vmem:[#allocation2 + $0x58] sm:$0x88]  ;;  %v7743_v28 = vrot.slane %v6276_v45, 4  ;;  %v2891_v56 = vld [vmem:[#allocation2 + $0x78] sm:$0x11] }
 0x13e   : > { %v2019_v25 = vsel %vm1052_vm14, %v6214_v7, %v2018_v13  ;;  %v2424_v41 = vsel %vm332_vm1, %v7742_v38, %v2418_v40  ;;  %v2427_v7 = vsel %vm443_vm2, %v2412_v42, %v2426_v24  ;;  %2037 = vst [vmem:[#allocation2 + $0x58] sm:$0x11] %v2036_v44  ;;  %v2644_v40 = vrot.slane %v2638_v26, 4  ;;  %v2888_v13 = vld [vmem:[#allocation2 + $0x70] sm:$0x11]  ;;  %v4098_v44 = vld [vmem:[#allocation2 + $0x48] sm:$0xff] }
 0x13f   : > { %v2033_v48 = vsel %vm5888_vm13, %v2019_v25, %v2032_v19  ;;  %v2425_v39 = vsel %vm443_vm2, %v6259_v33, %v2424_v41  ;;  %v2442_v16 = vsel %vm6040_vm10, %v2427_v7, %v2441_v55  ;;  %v2645_v30 = vrot.slane %v2640_v8, 4  ;;  %v2664_v19 = vld [vmem:[#allocation2 + $0x50] sm:$0x88]  ;;  %v2862_v9 = vpop.permute.xlu0 %2861  ;;  %v4097_v41 = vld [vmem:[#allocation2 + $0x40] sm:$0xff] }
 0x140   : > { %2034 = vst [vmem:[#allocation2 + $0x50] sm:$0x11] %v2033_v48  ;;  %v2439_v4 = vsel %vm6040_vm10, %v2425_v39, %v2438_v3  ;;  %2443 = vst [vmem:[#allocation2 + $0x58] sm:$0x44] %v2442_v16  ;;  %v2650_v33 = vsel %vm332_vm1, %v7743_v28, %v2644_v40  ;;  %v2868_v25 = vrot.slane %v2862_v9, 4  ;;  %v3133_v7 = vcombine.high %v6953_v6, %v6953_v6 }
 0x141   : > { %2440 = vst [vmem:[#allocation2 + $0x50] sm:$0x44] %v2439_v4  ;;  %v2652_v42 = vsel %vm332_vm1, %v2644_v40, %v2645_v30  ;;  %v2864_v59 = vpop.permute.xlu1 %2863  ;;  %v2651_v3 = vsel %vm7744_vm12, %v6276_v45, %v2650_v33  ;;  %v7745_v45 = vrot.slane %v6316_v2, 4  ;;  %vm7746_vm12 = vcmask 785408  }
 0x142   : > { %v2653_v55 = vsel %vm7739_vm3, %v2638_v26, %v2652_v42  ;;  %v2869_v38 = vrot.slane %v2864_v59, 4  ;;  %v2665_v24 = vsel %vm6010_vm7, %v2651_v3, %v2664_v19  ;;  %v4101_v48 = vld [vmem:[#allocation2 + $0x60] sm:$0xff]  ;;  %vm7747_vm3 = vmmov %vm7746_vm12 }
 0x143   : > { %v2668_v8 = vsel %vm6010_vm7, %v2653_v55, %v2667_v36  ;;  %v4102_v39 = vld [vmem:[#allocation2 + $0x68] sm:$0xff]  ;;  %2666 = vst [vmem:[#allocation2 + $0x50] sm:$0x88] %v2665_v24  ;;  %v2874_v26 = vsel %vm332_vm1, %v7745_v45, %v2868_v25  ;;  %v6990_v16 = vcombine.high %v4097_v41, %v4101_v48  ;;  %v6997_v36 = vcombine.low %v4097_v41, %v4101_v48  ;;  %v3082_v33 = vpop.permute.xlu0 %3081 }
 0x144   : > { %2669 = vst [vmem:[#allocation2 + $0x58] sm:$0x88] %v2668_v8  ;;  %v2876_v4 = vsel %vm332_vm1, %v2868_v25, %v2869_v38  ;;  %v6992_v40 = vcombine.high %v4098_v44, %v4102_v39  ;;  %v2875_v30 = vsel %vm7746_vm12, %v6316_v2, %v2874_v26  ;;  %v6999_v28 = vcombine.low %v4098_v44, %v4102_v39 }
 0x145   : > { %v2877_v19 = vsel %vm7747_vm3, %v2862_v9, %v2876_v4  ;;  %v3084_v42 = vpop.permute.xlu1 %3083  ;;  %v2889_v59 = vsel %vm5888_vm13, %v2875_v30, %v2888_v13  ;;  %4247 = vmatprep.subr.bf16.mxu0 %v6990_v16  ;;  %v3088_v55 = vrot.slane %v3082_v33, 4  ;;  %v3108_v9 = vld [vmem:[#allocation2 + $0x70] sm:$0x22]  ;;  %v3154_v25 = vrot.slane %v6953_v6, %v5646_v5  ;;  %v3111_v13 = vld [vmem:[#allocation2 + $0x78] sm:$0x22] }
 0x146   : > { %v2892_v3 = vsel %vm5888_vm13, %v2877_v19, %v2891_v56  ;;  %4290 = vmatprep.subr.bf16.mxu1 %v6992_v40  ;;  %v3089_v2 = vrot.slane %v3084_v42, 4  ;;  %2890 = vst [vmem:[#allocation2 + $0x70] sm:$0x11] %v2889_v59  ;;  %4248 = vmatpush1.bf16.msra.mxu0 %v6997_v36  ;;  %v3161_v38 = vrot.slane %v3133_v7, %v5646_v5  ;;  %v7748_v56 = vrot.slane %v6343_v32, 4  ;;  %v3291_v30 = vld [vmem:[#allocation2 + $0x70] sm:$0x44] }
 0x147   : > { %2893 = vst [vmem:[#allocation2 + $0x78] sm:$0x11] %v2892_v3  ;;  %4291 = vmatpush1.bf16.msra.mxu1 %v6999_v28  ;;  %vm7749_vm12 = vcmask 769024   ;;  %v3265_v44 = vpop.permute.xlu0 %3264  ;;  %v3171_v26 = vshll.u32 %v3154_v25, 16  ;;  %v3294_v19 = vld [vmem:[#allocation2 + $0x78] sm:$0x44] }
 0x148   : > { %v3094_v41 = vsel %vm332_vm1, %v7748_v56, %v3088_v55  ;;  %v3096_v24 = vsel %vm332_vm1, %v3088_v55, %v3089_v2  ;;  %vm7750_vm3 = vmmov %vm7749_vm12  ;;  %v3271_v5 = vrot.slane %v3265_v44, 4  ;;  %v3175_v4 = vshll.u32 %v3161_v38, 16 }
 0x149   : > { %v3095_v8 = vsel %vm7749_vm12, %v6343_v32, %v3094_v41  ;;  %v3097_v48 = vsel %vm7750_vm3, %v3082_v33, %v3096_v24  ;;  %v3267_v39 = vpop.permute.xlu1 %3266  ;;  %v7751_v32 = vrot.slane %v6390_v47, 4  ;;  %v3173_v56 = vrot.slane %v3171_v26, 7  ;;  %v3517_v24 = vld [vmem:[#allocation2 + $0x70] sm:$0x88]  ;;  %vm7755_vm12 = vmmov %vm7750_vm3 }
 0x14a   : > { %v3109_v45 = vsel %vm5984_vm0, %v3095_v8, %v3108_v9  ;;  %v3112_v6 = vsel %vm5984_vm0, %v3097_v48, %v3111_v13  ;;  %v3272_v7 = vrot.slane %v3267_v39, 4  ;;  %v3177_v41 = vrot.slane %v3175_v4, 7  ;;  %v3520_v8 = vld [vmem:[#allocation2 + $0x78] sm:$0x88] }
 0x14b   : > { %3110 = vst [vmem:[#allocation2 + $0x70] sm:$0x22] %v3109_v45  ;;  %3113 = vst [vmem:[#allocation2 + $0x78] sm:$0x22] %v3112_v6  ;;  %v3277_v33 = vsel %vm332_vm1, %v7751_v32, %v3271_v5  ;;  %v3491_v55 = vpop.permute.xlu0 %3490  ;;  %v7752_v48 = vrot.slane %v6416_v11, 4  ;;  %v5434_v45 = vunpack.i.h.bf16 %v6787_v54 }
 0x14c   : > { %v3279_v42 = vsel %vm332_vm1, %v3271_v5, %v3272_v7  ;;  %v3278_v59 = vsel %vm334_vm15, %v6390_v47, %v3277_v33  ;;  %v3497_v13 = vrot.slane %v3491_v55, 4  ;;  %v5424_v47 = vunpack.i.h.bf16 %v6659_v53 }
 0x14d   : > { %v3280_v3 = vsel %vm334_vm15, %v3265_v44, %v3279_v42  ;;  %v3493_v2 = vpop.permute.xlu1 %3492  ;;  %v3292_v9 = vsel %vm6040_vm10, %v3278_v59, %v3291_v30 }
 0x14e   : > { %v3295_v25 = vsel %vm6040_vm10, %v3280_v3, %v3294_v19  ;;  %v3498_v38 = vrot.slane %v3493_v2, 4  ;;  %3293 = vst [vmem:[#allocation2 + $0x70] sm:$0x44] %v3292_v9  ;;  %v3503_v44 = vsel %vm332_vm1, %v7752_v48, %v3497_v13  ;;  %v4060_v9 = vrot.slane %v5434_v45, 4 }
 0x14f   : > { %3296 = vst [vmem:[#allocation2 + $0x78] sm:$0x44] %v3295_v25  ;;  %v3504_v49 = vsel %vm573_vm11, %v6416_v11, %v3503_v44  ;;  %v7043_v5 = vpop.permute.xlu0 %5466  ;;  %v3852_v44 = vld [vmem:[#allocation2 + $0x80] sm:$0x11] }
 0x150   : > { %v3505_v39 = vsel %vm332_vm1, %v3497_v13, %v3498_v38  ;;  %v3518_v30 = vsel %vm6010_vm7, %v3504_v49, %v3517_v24  ;;  %v5469_v32 = vunpack.i.h.bf16 %v7043_v5  ;;  %v5468_v33 = vunpack.i.l.bf16 %v7043_v5 }
 0x151   : > { %v3506_v6 = vsel %vm573_vm11, %v3491_v55, %v3505_v39  ;;  %v7045_v7 = vpop.permute.xlu1 %5471  ;;  %3519 = vst [vmem:[#allocation2 + $0x70] sm:$0x88] %v3518_v30  ;;  %v3835_v55 = vrot.slane %v5424_v47, 4  ;;  %v3855_v39 = vld [vmem:[#allocation2 + $0x88] sm:$0x11] }
 0x152   : > { %v3188_v26 = vld [vmem:[#allocation2 + $0x70] sm:$0x22]  ;;  %v3191_v4 = vld [vmem:[#allocation2 + $0x78] sm:$0x22]  ;;  %v3521_v19 = vsel %vm6010_vm7, %v3506_v6, %v3520_v8  ;;  %v5474_v59 = vunpack.i.h.bf16 %v7045_v7  ;;  %v5473_v3 = vunpack.i.l.bf16 %v7045_v7  ;;  %v7061_v57 = vrot.slane %v5469_v32, 4 }
 0x153   : > { %v3189_v11 = vsel %vm5661_vm6, %v3173_v56, %v3188_v26  ;;  %v3192_v42 = vsel %vm5661_vm6, %v3177_v41, %v3191_v4  ;;  %3522 = vst [vmem:[#allocation2 + $0x78] sm:$0x88] %v3521_v19  ;;  %v3836_v2 = vrot.slane %v5468_v33, 4  ;;  %v3715_v38 = vpop.permute.xlu0 %3714  ;;  %vm7753_vm7 = vcmask 785408   ;;  %v3741_v30 = vld [vmem:[#allocation2 + $0x90] sm:$0x11] }
 0x154   : > { %3190 = vst [vmem:[#allocation2 + $0x70] sm:$0x22] %v3189_v11  ;;  %3193 = vst [vmem:[#allocation2 + $0x78] sm:$0x22] %v3192_v42  ;;  %v7065_v25 = vrot.slane %v5474_v59, 4  ;;  %v4061_v13 = vrot.slane %v5473_v3, 4 }
 0x155   : > { %v3717_v56 = vpop.permute.xlu1 %3716  ;;  %v3840_v41 = vsel %vm332_vm1, %v3835_v55, %v3836_v2  ;;  %v3842_v24 = vsel %vm332_vm1, %v3836_v2, %v7061_v57  ;;  %v3721_v8 = vrot.slane %v3715_v38, 4  ;;  %vm7754_vm10 = vmmov %vm7753_vm7  ;;  %v4077_v42 = vld [vmem:[#allocation2 + $0x80] sm:$0x22]  ;;  %v4080_v55 = vld [vmem:[#allocation2 + $0x88] sm:$0x22] }
 0x156   : > { %v3722_v48 = vrot.slane %v3717_v56, 4  ;;  %v3841_v49 = vsel %vm7753_vm7, %v5424_v47, %v3840_v41  ;;  %v3843_v6 = vsel %vm7754_vm10, %v5468_v33, %v3842_v24  ;;  %v4065_v26 = vsel %vm332_vm1, %v4060_v9, %v4061_v13  ;;  %v3744_v56 = vld [vmem:[#allocation2 + $0x98] sm:$0x11] }
 0x157   : > { %v4067_v4 = vsel %vm332_vm1, %v4061_v13, %v7065_v25  ;;  %v3853_v19 = vsel %vm6163_vm8, %v3841_v49, %v3852_v44  ;;  %v3856_v11 = vsel %vm6163_vm8, %v3843_v6, %v3855_v39  ;;  %v4066_v2 = vsel %vm7755_vm12, %v5434_v45, %v4065_v26  ;;  %v3935_v44 = vpop.permute.xlu0 %3934  ;;  %vm7768_vm12 = vmmov %vm7750_vm3 }
 0x158   : > { %v4068_v47 = vsel %vm7750_vm3, %v5473_v3, %v4067_v4  ;;  %3854 = vst [vmem:[#allocation2 + $0x80] sm:$0x11] %v3853_v19  ;;  %3857 = vst [vmem:[#allocation2 + $0x88] sm:$0x11] %v3856_v11  ;;  %v4078_v33 = vsel %vm5661_vm6, %v4066_v2, %v4077_v42  ;;  %v7756_v13 = vrot.slane %v6466_v23, 4  ;;  %v3729_v24 = vsel %vm332_vm1, %v3721_v8, %v3722_v48 }
 0x159   : > { %v4081_v9 = vsel %vm5661_vm6, %v4068_v47, %v4080_v55  ;;  %v3937_v39 = vpop.permute.xlu1 %3936  ;;  %4079 = vst [vmem:[#allocation2 + $0x80] sm:$0x22] %v4078_v33  ;;  %v3730_v3 = vsel %vm812_vm5, %v3715_v38, %v3729_v24  ;;  %v3941_v49 = vrot.slane %v3935_v44, 4  ;;  %v3961_v19 = vld [vmem:[#allocation2 + $0x90] sm:$0x22]  ;;  %vm7764_vm7 = vcmask 908288  }
 0x15a   : > { %v3727_v41 = vsel %vm332_vm1, %v7756_v13, %v3721_v8  ;;  %4082 = vst [vmem:[#allocation2 + $0x88] sm:$0x22] %v4081_v9  ;;  %v3942_v6 = vrot.slane %v3937_v39, 4  ;;  %v3745_v4 = vsel %vm5888_vm13, %v3730_v3, %v3744_v56  ;;  %v3964_v11 = vld [vmem:[#allocation2 + $0x98] sm:$0x22]  ;;  %v7757_v8 = vrot.slane %v6496_v63, 4  ;;  %vm7765_vm10 = vmmov %vm7764_vm7 }
 0x15b   : > { %v3728_v45 = vsel %vm812_vm5, %v6466_v23, %v3727_v41  ;;  %3746 = vst [vmem:[#allocation2 + $0x98] sm:$0x11] %v3745_v4  ;;  %v360_v39 = vld [vmem:[#allocation2 + $0x18] sm:$0x11] }
 0x15c   : > { %v3742_v26 = vsel %vm5888_vm13, %v3728_v45, %v3741_v30  ;;  %v3947_v48 = vsel %vm332_vm1, %v7757_v8, %v3941_v49  ;;  %v3949_v23 = vsel %vm332_vm1, %v3941_v49, %v3942_v6  ;;  %v5477_v30 = vpop.permute.xlu0 %5476  ;;  %vm4220_vm13 = vcmask 1041408   ;;  %v596_v49 = vld [vmem:[#allocation2 + $0x10] sm:$0x22]  ;;  %v599_v8 = vld [vmem:[#allocation2 + $0x18] sm:$0x22] }
 0x15d   : > { %3743 = vst [vmem:[#allocation2 + $0x90] sm:$0x11] %v3742_v26  ;;  %v3948_v38 = vsel %vm1052_vm14, %v6496_v63, %v3947_v48  ;;  %v3950_v42 = vsel %vm1052_vm14, %v3935_v44, %v3949_v23  ;;  %v5482_v55 = vpop.permute.xlu1 %5481  ;;  %v5479_v33 = vunpack.i.h.bf16 %v5477_v30  ;;  %v5478_v9 = vunpack.i.l.bf16 %v5477_v30  ;;  %v357_v44 = vld [vmem:[#allocation2 + $0x10] sm:$0x11] }
 0x15e   : > { %v3962_v14 = vsel %vm5984_vm0, %v3948_v38, %v3961_v19  ;;  %v3965_v2 = vsel %vm5984_vm0, %v3950_v42, %v3964_v11  ;;  %v5484_v47 = vunpack.i.h.bf16 %v5482_v55  ;;  %v5483_v56 = vunpack.i.l.bf16 %v5482_v55  ;;  %v5014_v19 = vld [vmem:[%s7590_s2] sm:$0xff]  ;;  %v5015_v11 = vld [vmem:[%s7590_s2 + $0x8] sm:$0xff] }
 0x15f   : > { %3963 = vst [vmem:[#allocation2 + $0x90] sm:$0x22] %v3962_v14  ;;  %3966 = vst [vmem:[#allocation2 + $0x98] sm:$0x22] %v3965_v2  ;;  %v331_v63 = vrot.slane %v5479_v33, 4  ;;  %v330_v24 = vrot.slane %v5478_v9, 4  ;;  %v7758_v48 = vunpack.i.l.bf16 %v6548_v46  ;;  %5018 = vperm.xlu0 %5555, %v5014_v19   ;;  %v7759_v46 = vunpack.i.l.bf16 %v6528_v29  ;;  %5023 = vperm.xlu1 %5556, %v5015_v11  }
 0x160   : > { %v571_v13 = vrot.slane %v5484_v47, 4  ;;  %v570_v41 = vrot.slane %v5483_v56, 4  ;;  %v7107_v3 = vpop.permute.xlu0 %5486  ;;  %vm4216_vm0 = vcmask 293888   ;;  %v4105_v55 = vld [vmem:[#allocation2 + $0x80] sm:$0x33]  ;;  %v7760_v11 = vunpack.i.l.bf16 %v6595_v1 }
 0x161   : > { %v5492_v45 = vpop.permute.xlu1 %5491  ;;  %v338_v38 = vsel %vm332_vm1, %v6546_v43, %v330_v24  ;;  %v340_v42 = vsel %vm332_vm1, %v330_v24, %v331_v63  ;;  %v4106_v30 = vld [vmem:[#allocation2 + $0x88] sm:$0x33]  ;;  %v5489_v29 = vunpack.i.h.bf16 %v7107_v3  ;;  %v1078_v19 = vld [vmem:[#allocation2 + $0x18] sm:$0x88] }
 0x162   : > { %v577_v61 = vsel %vm332_vm1, %v6571_v27, %v570_v41  ;;  %v579_v6 = vsel %vm332_vm1, %v570_v41, %v571_v13  ;;  %v5494_v26 = vunpack.i.h.bf16 %v5492_v45  ;;  %v5493_v4 = vunpack.i.l.bf16 %v5492_v45 }
 0x163   : > { %v578_v23 = vsel %vm573_vm11, %v7758_v48, %v577_v61  ;;  %v580_v27 = vsel %vm573_vm11, %v5483_v56, %v579_v6  ;;  %v339_v47 = vsel %vm334_vm15, %v7759_v46, %v338_v38  ;;  %v341_v56 = vsel %vm334_vm15, %v5478_v9, %v340_v42 }
 0x164   : > { %v597_v14 = vsel %vm5661_vm6, %v578_v23, %v596_v49  ;;  %v600_v2 = vsel %vm5661_vm6, %v580_v27, %v599_v8  ;;  %v358_v43 = vsel %vm6163_vm8, %v339_v47, %v357_v44  ;;  %v361_v33 = vsel %vm6163_vm8, %v341_v56, %v360_v39  ;;  %v7139_v24 = vpop.permute.xlu0 %5496  ;;  %v835_v47 = vld [vmem:[#allocation2 + $0x10] sm:$0x44]  ;;  %v838_v56 = vld [vmem:[#allocation2 + $0x18] sm:$0x44] }
 0x165   : > { %598 = vst [vmem:[#allocation2 + $0x10] sm:$0x22] %v597_v14  ;;  %601 = vst [vmem:[#allocation2 + $0x18] sm:$0x22] %v600_v2  ;;  %v1050_v13 = vrot.slane %v5494_v26, 4  ;;  %v1049_v41 = vrot.slane %v5493_v4, 4  ;;  %v7137_v63 = vpop.permute.xlu1 %5501  ;;  %v5488_v9 = vunpack.i.l.bf16 %v7107_v3  ;;  %v7143_v45 = vcombine.high %v4105_v55, %v4105_v55 }
 0x166   : > { %359 = vst [vmem:[#allocation2 + $0x10] sm:$0x11] %v358_v43  ;;  %362 = vst [vmem:[#allocation2 + $0x18] sm:$0x11] %v361_v33  ;;  %v7145_v49 = vcombine.high %v4106_v30, %v4106_v30  ;;  %v5268_v61 = vcombine.low %v4105_v55, %v4105_v55  ;;  %v5270_v6 = vcombine.low %v4106_v30, %v4106_v30  ;;  %v1075_v26 = vld [vmem:[#allocation2 + $0x10] sm:$0x88]  ;;  %v5504_v2 = vunpack.i.h.bf16 %v7137_v63 }
 0x167   : > { %v1056_v44 = vsel %vm332_vm1, %v6613_v0, %v1049_v41  ;;  %v1058_v39 = vsel %vm332_vm1, %v1049_v41, %v1050_v13  ;;  %v810_v3 = vrot.slane %v5489_v29, 4  ;;  %v809_v23 = vrot.slane %v5488_v9, 4  ;;  %5276 = vmatprep.subr.msk.bf16.mxu0 %vm4220_vm13, %v7143_v45  ;;  %v7175_v55 = vld [vmem:[%s7589_s1] sm:$0xff]  }
 0x168   : > { %v1057_v8 = vsel %vm1052_vm14, %v7760_v11, %v1056_v44  ;;  %v1059_v48 = vsel %vm1052_vm14, %v5493_v4, %v1058_v39  ;;  %5278 = vmatprep.subr.msk.bf16.mxu1 %vm4220_vm13, %v7145_v49  ;;  %v7163_v1 = vsel %vm4220_vm13, %v5268_v61, 0  ;;  %v7166_v38 = vsel %vm4220_vm13, %v5270_v6, 0  ;;  %v7170_v42 = vpop.permute.xlu0 %5506 }
 0x169   : > { %v1076_v0 = vsel %vm5950_vm4, %v1057_v8, %v1075_v26  ;;  %v1079_v27 = vsel %vm5950_vm4, %v1059_v48, %v1078_v19  ;;  %v7168_v4 = vpop.permute.xlu1 %5511  ;;  %v816_v30 = vsel %vm332_vm1, %v6593_v62, %v809_v23  ;;  %v818_v14 = vsel %vm332_vm1, %v809_v23, %v810_v3  ;;  %4250 = vmatpush1.bf16.msra.mxu0 %v7163_v1  ;;  %v1704_v23 = vld [vmem:[#allocation2 + $0x30] sm:$0x44] }
 0x16a   : > { %1077 = vst [vmem:[#allocation2 + $0x10] sm:$0x88] %v1076_v0  ;;  %1080 = vst [vmem:[#allocation2 + $0x18] sm:$0x88] %v1079_v27  ;;  %4293 = vmatpush1.bf16.msra.mxu1 %v7166_v38  ;;  %v5503_v46 = vunpack.i.l.bf16 %v7137_v63  ;;  %v7761_v43 = vunpack.i.l.bf16 %v6573_v18  ;;  %v819_v13 = vsel %vm812_vm5, %v5488_v9, %v818_v14  ;;  %v5499_v62 = vunpack.i.h.bf16 %v7139_v24  ;;  %v1707_v0 = vld [vmem:[#allocation2 + $0x38] sm:$0x44] }
 0x16b   : > { %v5498_v41 = vunpack.i.l.bf16 %v7139_v24  ;;  %v839_v44 = vsel %vm5929_vm9, %v819_v13, %v838_v56  ;;  %v1685_v39 = vrot.slane %v5504_v2, 4  ;;  %v5514_v6 = vunpack.i.h.bf16 %v7168_v4  ;;  %v1482_v56 = vld [vmem:[#allocation2 + $0x38] sm:$0x22] }
 0x16c   : > { %v817_v33 = vsel %vm812_vm5, %v7761_v43, %v816_v30  ;;  %v1684_v63 = vrot.slane %v5503_v46, 4  ;;  %840 = vst [vmem:[#allocation2 + $0x18] sm:$0x44] %v839_v44  ;;  %v1460_v61 = vrot.slane %v5499_v62, 4  ;;  %v5513_v9 = vunpack.i.l.bf16 %v7168_v4  ;;  %v7198_v19 = vpop.permute.xlu0 %5516  ;;  %5277 = vmatmul.mubr.msk.bf16.vlgmr.msra.gmra.mrb[0].mxu0 %vm4216_vm0, %v7175_v55 }
 0x16d   : > { %v836_v29 = vsel %vm5929_vm9, %v817_v33, %v835_v47  ;;  %v1459_v18 = vrot.slane %v5498_v41, 4  ;;  %v7196_v26 = vpop.permute.xlu1 %5521  ;;  %5279 = vmatmul.mubr.msk.bf16.vlgmr.msra.gmra.mrb[0].mxu1 %vm4216_vm0, %v7175_v55  ;;  %v5509_v8 = vunpack.i.h.bf16 %v7170_v42  ;;  %v5508_v48 = vunpack.i.l.bf16 %v7170_v42  ;;  %v1479_v47 = vld [vmem:[#allocation2 + $0x30] sm:$0x22] }
 0x16e   : > { %837 = vst [vmem:[#allocation2 + $0x10] sm:$0x44] %v836_v29  ;;  %v1690_v24 = vsel %vm332_vm1, %v6657_v10, %v1684_v63  ;;  %v1692_v11 = vsel %vm332_vm1, %v1684_v63, %v1685_v39  ;;  %v7762_v3 = vmov 0   ;;  %v7763_v27 = vunpack.i.l.bf16 %v6639_v50 }
 0x16f   : > { %4363 = vmatprep.mubr.bf16.mxu0 %v7762_v3  ;;  %4406 = vmatprep.mubr.bf16.mxu1 %v7762_v3  ;;  %v1693_v30 = vsel %vm7765_vm10, %v5503_v46, %v1692_v11  ;;  %v1465_v10 = vsel %vm332_vm1, %v6637_v58, %v1459_v18  ;;  %v1467_v14 = vsel %vm332_vm1, %v1459_v18, %v1460_v61  ;;  %v7766_v43 = vunpack.i.l.bf16 %v6615_v20  ;;  %v2149_v11 = vld [vmem:[#allocation2 + $0x50] sm:$0x11] }
 0x170   : > { %v1691_v4 = vsel %vm7764_vm7, %v7763_v27, %v1690_v24  ;;  %v1708_v2 = vsel %vm5929_vm9, %v1693_v30, %v1707_v0  ;;  %v1468_v33 = vsel %vm443_vm2, %v5498_v41, %v1467_v14  ;;  %v2130_v13 = vrot.slane %v5514_v6, 4  ;;  %v7239_v24 = vpop.permute.xlu0 %5526  ;;  %v1930_v30 = vld [vmem:[#allocation2 + $0x30] sm:$0x88] }
 0x171   : > { %v1705_v42 = vsel %vm5929_vm9, %v1691_v4, %v1704_v23  ;;  %v1466_v50 = vsel %vm443_vm2, %v7766_v43, %v1465_v10  ;;  %1709 = vst [vmem:[#allocation2 + $0x38] sm:$0x44] %v1708_v2  ;;  %v1483_v46 = vsel %vm5661_vm6, %v1468_v33, %v1482_v56  ;;  %v2129_v62 = vrot.slane %v5513_v9, 4  ;;  %v7232_v63 = vpop.permute.xlu1 %5531  ;;  %v1933_v10 = vld [vmem:[#allocation2 + $0x38] sm:$0x88] }
 0x172   : > { %1706 = vst [vmem:[#allocation2 + $0x30] sm:$0x44] %v1705_v42  ;;  %v1480_v58 = vsel %vm5661_vm6, %v1466_v50, %v1479_v47  ;;  %1484 = vst [vmem:[#allocation2 + $0x38] sm:$0x22] %v1483_v46  ;;  %v1911_v29 = vrot.slane %v5509_v8, 4  ;;  %v1910_v44 = vrot.slane %v5508_v48, 4  ;;  %v5524_v20 = vunpack.i.h.bf16 %v7196_v26 }
 0x173   : > { %1481 = vst [vmem:[#allocation2 + $0x30] sm:$0x22] %v1480_v58  ;;  %v5523_v39 = vunpack.i.l.bf16 %v7196_v26  ;;  %v2135_v41 = vsel %vm332_vm1, %v6811_v52, %v2129_v62  ;;  %v2137_v61 = vsel %vm332_vm1, %v2129_v62, %v2130_v13  ;;  %v5519_v18 = vunpack.i.h.bf16 %v7198_v19  ;;  %v2152_v8 = vld [vmem:[#allocation2 + $0x58] sm:$0x11]  ;;  %v2335_v58 = vld [vmem:[#allocation2 + $0x50] sm:$0x22] }
 0x174   : > { %v5518_v6 = vunpack.i.l.bf16 %v7198_v19  ;;  %v7767_v23 = vunpack.i.l.bf16 %v6787_v54  ;;  %v2138_v26 = vsel %vm7750_vm3, %v5513_v9, %v2137_v61  ;;  %v1916_v27 = vsel %vm332_vm1, %v6679_v17, %v1910_v44  ;;  %v2338_v46 = vld [vmem:[#allocation2 + $0x58] sm:$0x22] }
 0x175   : > { %v1918_v52 = vsel %vm332_vm1, %v1910_v44, %v1911_v29  ;;  %v2153_v19 = vsel %vm6163_vm8, %v2138_v26, %v2152_v8  ;;  %v7769_v14 = vunpack.i.l.bf16 %v6659_v53  ;;  %vm7770_vm7 = vcmask 785408   ;;  %v7267_v29 = vpop.permute.xlu1 %5541  ;;  %v2560_v44 = vld [vmem:[#allocation2 + $0x50] sm:$0x44] }
 0x176   : > { %v2136_v0 = vsel %vm7768_vm12, %v7767_v23, %v2135_v41  ;;  %vm7771_vm10 = vmmov %vm7770_vm7  ;;  %2154 = vst [vmem:[#allocation2 + $0x58] sm:$0x11] %v2153_v19  ;;  %v2541_v2 = vrot.slane %v5524_v20, 4  ;;  %v2540_v47 = vrot.slane %v5523_v39, 4  ;;  %v2316_v56 = vrot.slane %v5519_v18, 4  ;;  %v7773_v23 = vld [vmem:[#allocation4_spill] sm:$0xff] }
 0x177   : > { %v2150_v4 = vsel %vm6163_vm8, %v2136_v0, %v2149_v11  ;;  %v1917_v54 = vsel %vm7770_vm7, %v7769_v14, %v1916_v27  ;;  %v1919_v42 = vsel %vm7771_vm10, %v5508_v48, %v1918_v52  ;;  %v2315_v43 = vrot.slane %v5518_v6, 4  ;;  %v2563_v20 = vld [vmem:[#allocation2 + $0x58] sm:$0x44]  ;;  %v7276_v11 = vpop.permute.xlu0 %5536  ;;  %v4091_v35 = vld [vmem:[#allocation2 + $0x10] sm:$0xff] }
 0x178   : > { %2151 = vst [vmem:[#allocation2 + $0x50] sm:$0x11] %v2150_v4  ;;  %v1931_v17 = vsel %vm5950_vm4, %v1917_v54, %v1930_v30  ;;  %v1934_v9 = vsel %vm5950_vm4, %v1919_v42, %v1933_v10  ;;  %v5534_v53 = vunpack.i.h.bf16 %v7232_v63  ;;  %v5533_v50 = vunpack.i.l.bf16 %v7232_v63 }
 0x179   : > { %1932 = vst [vmem:[#allocation2 + $0x30] sm:$0x88] %v1931_v17  ;;  %1935 = vst [vmem:[#allocation2 + $0x38] sm:$0x88] %v1934_v9  ;;  %v2546_v48 = vsel %vm332_vm1, %v6844_v31, %v2540_v47  ;;  %v2548_v33 = vsel %vm332_vm1, %v2540_v47, %v2541_v2  ;;  %v5529_v13 = vunpack.i.h.bf16 %v7239_v24  ;;  %v5528_v62 = vunpack.i.l.bf16 %v7239_v24  ;;  %v3005_v17 = vld [vmem:[#allocation2 + $0x70] sm:$0x11] }
 0x17a   : > { %v7772_v41 = vunpack.i.h.bf16 %v6815_v34  ;;  %v2549_v63 = vsel %vm573_vm11, %v5523_v39, %v2548_v33  ;;  %v2321_v31 = vsel %vm332_vm1, %v6834_v37, %v2315_v43  ;;  %v2323_v18 = vsel %vm332_vm1, %v2315_v43, %v2316_v56  ;;  %v3008_v9 = vld [vmem:[#allocation2 + $0x78] sm:$0x11]  ;;  %v7775_v2 = vld [vmem:[#allocation9_spill] sm:$0xff] }
 0x17b   : > { %v2564_v8 = vsel %vm5929_vm9, %v2549_v63, %v2563_v20  ;;  %v7774_v0 = vunpack.i.h.bf16 %v7773_v23  ;;  %v2324_v26 = vsel %vm334_vm15, %v5518_v6, %v2323_v18  ;;  %v2986_v27 = vrot.slane %v5534_v53, 4  ;;  %v7777_v53 = vld [vmem:[#allocation10_spill] sm:$0xff] }
 0x17c   : > { %v2547_v61 = vsel %vm573_vm11, %v7772_v41, %v2546_v48  ;;  %2565 = vst [vmem:[#allocation2 + $0x58] sm:$0x44] %v2564_v8  ;;  %v2339_v39 = vsel %vm5661_vm6, %v2324_v26, %v2338_v46  ;;  %v2985_v52 = vrot.slane %v5533_v50, 4  ;;  %v2767_v4 = vrot.slane %v5529_v13, 4  ;;  %v2786_v13 = vld [vmem:[#allocation2 + $0x50] sm:$0x88] }
 0x17d   : > { %v2561_v24 = vsel %vm5929_vm9, %v2547_v61, %v2560_v44  ;;  %v2322_v34 = vsel %vm334_vm15, %v7774_v0, %v2321_v31  ;;  %2340 = vst [vmem:[#allocation2 + $0x58] sm:$0x22] %v2339_v39  ;;  %v2766_v19 = vrot.slane %v5528_v62, 4  ;;  %v5544_v30 = vunpack.i.h.bf16 %v7267_v29  ;;  %v7778_v44 = vld [vmem:[#allocation8_spill] sm:$0xff]  ;;  %v7312_v61 = vpop.permute.xlu0 %5546 }
 0x17e   : > { %2562 = vst [vmem:[#allocation2 + $0x50] sm:$0x44] %v2561_v24  ;;  %v2336_v37 = vsel %vm5661_vm6, %v2322_v34, %v2335_v58  ;;  %v5543_v10 = vunpack.i.l.bf16 %v7267_v29  ;;  %v2991_v6 = vsel %vm332_vm1, %v6895_v22, %v2985_v52  ;;  %v2993_v14 = vsel %vm332_vm1, %v2985_v52, %v2986_v27  ;;  %v5552_v22 = vpop.permute.xlu1 %5551  ;;  %v2789_v29 = vld [vmem:[#allocation2 + $0x58] sm:$0x88]  ;;  %v3639_v34 = vld [vmem:[#allocation2 + $0x70] sm:$0x88] }
 0x17f   : > { %2337 = vst [vmem:[#allocation2 + $0x50] sm:$0x22] %v2336_v37  ;;  %v5539_v54 = vunpack.i.h.bf16 %v7276_v11  ;;  %v5538_v42 = vunpack.i.l.bf16 %v7276_v11  ;;  %v7776_v47 = vunpack.i.h.bf16 %v7775_v2  ;;  %v2994_v43 = vsel %vm1052_vm14, %v5533_v50, %v2993_v14  ;;  %v3642_v27 = vld [vmem:[#allocation2 + $0x78] sm:$0x88]  ;;  %v7780_v52 = vld [vmem:[#allocation12_spill] sm:$0xff] }
 0x180   : > { %v2772_v48 = vsel %vm332_vm1, %v7777_v53, %v2766_v19  ;;  %v2774_v33 = vsel %vm332_vm1, %v2766_v19, %v2767_v4  ;;  %v3009_v46 = vsel %vm6163_vm8, %v2994_v43, %v3008_v9  ;;  %v7779_v20 = vunpack.i.h.bf16 %v7778_v44  ;;  %v3413_v2 = vld [vmem:[#allocation2 + $0x70] sm:$0x44] }
 0x181   : > { %v2992_v56 = vsel %vm1052_vm14, %v7776_v47, %v2991_v6  ;;  %v2775_v50 = vsel %vm812_vm5, %v5528_v62, %v2774_v33  ;;  %3010 = vst [vmem:[#allocation2 + $0x78] sm:$0x11] %v3009_v46  ;;  %v3620_v18 = vrot.slane %v5544_v30, 4  ;;  %v3619_v11 = vrot.slane %v5543_v10, 4  ;;  %v3416_v47 = vld [vmem:[#allocation2 + $0x78] sm:$0x44] }
 0x182   : > { %v3006_v58 = vsel %vm6163_vm8, %v2992_v56, %v3005_v17  ;;  %v2773_v41 = vsel %vm812_vm5, %v7779_v20, %v2772_v48  ;;  %v2790_v31 = vsel %vm5950_vm4, %v2775_v50, %v2789_v29  ;;  %v3394_v24 = vrot.slane %v5539_v54, 4  ;;  %v4095_v54 = vld [vmem:[#allocation2 + $0x30] sm:$0xff]  ;;  %v7784_v56 = vld [vmem:[#allocation11_spill] sm:$0xff] }
 0x183   : > { %3007 = vst [vmem:[#allocation2 + $0x70] sm:$0x11] %v3006_v58  ;;  %v2787_v63 = vsel %vm5950_vm4, %v2773_v41, %v2786_v13  ;;  %2791 = vst [vmem:[#allocation2 + $0x58] sm:$0x88] %v2790_v31  ;;  %v3393_v8 = vrot.slane %v5538_v42, 4  ;;  %v5554_v23 = vunpack.i.h.bf16 %v5552_v22  ;;  %v5553_v0 = vunpack.i.l.bf16 %v5552_v22  ;;  %v4092_v58 = vld [vmem:[#allocation2 + $0x18] sm:$0xff] }
 0x184   : > { %2788 = vst [vmem:[#allocation2 + $0x50] sm:$0x88] %v2787_v63  ;;  %v3625_v62 = vsel %vm332_vm1, %v6911_v21, %v3619_v11  ;;  %v3627_v26 = vsel %vm332_vm1, %v3619_v11, %v3620_v18  ;;  %v5549_v37 = vunpack.i.h.bf16 %v7312_v61  ;;  %v5548_v39 = vunpack.i.l.bf16 %v7312_v61  ;;  %v4096_v21 = vld [vmem:[#allocation2 + $0x38] sm:$0xff]  ;;  %v4083_v50 = vld [vmem:[#allocation2 + $0x90] sm:$0x22] }
 0x185   : > { %v7781_v4 = vunpack.i.h.bf16 %v7780_v52  ;;  %vm7782_vm15 = vcmask 908288   ;;  %v3399_v6 = vsel %vm332_vm1, %v6903_v15, %v3393_v8  ;;  %v3401_v14 = vsel %vm332_vm1, %v3393_v8, %v3394_v24  ;;  %v4086_v61 = vld [vmem:[#allocation2 + $0x98] sm:$0x22]  ;;  %v3858_v8 = vld [vmem:[#allocation2 + $0x90] sm:$0x11] }
 0x186   : > { %vm7783_vm11 = vmmov %vm7782_vm15  ;;  %v7785_v43 = vunpack.i.h.bf16 %v7784_v56  ;;  %v4064_v33 = vrot.slane %v5554_v23, 4  ;;  %v4063_v22 = vrot.slane %v5553_v0, 4  ;;  %v3839_v46 = vrot.slane %v5549_v37, 4  ;;  %v3861_v23 = vld [vmem:[#allocation2 + $0x98] sm:$0x11] }
 0x187   : > { %v3626_v19 = vsel %vm7782_vm15, %v7781_v4, %v3625_v62  ;;  %v3628_v30 = vsel %vm7783_vm11, %v5543_v10, %v3627_v26  ;;  %v3402_v10 = vsel %vm443_vm2, %v5538_v42, %v3401_v14  ;;  %v3838_v13 = vrot.slane %v5548_v39, 4 }
 0x188   : > { %v3640_v17 = vsel %vm5950_vm4, %v3626_v19, %v3639_v34  ;;  %v3643_v9 = vsel %vm5950_vm4, %v3628_v30, %v3642_v27  ;;  %v3400_v53 = vsel %vm443_vm2, %v7785_v43, %v3399_v6  ;;  %v3417_v48 = vsel %vm5929_vm9, %v3402_v10, %v3416_v47  ;;  %vm7787_vm4 = vmmov %vm7750_vm3 }
 0x189   : > { %3641 = vst [vmem:[#allocation2 + $0x70] sm:$0x88] %v3640_v17  ;;  %3644 = vst [vmem:[#allocation2 + $0x78] sm:$0x88] %v3643_v9  ;;  %v3414_v15 = vsel %vm5929_vm9, %v3400_v53, %v3413_v2  ;;  %v7342_v29 = vcombine.high %v4091_v35, %v4095_v54  ;;  %v7344_v44 = vcombine.high %v4092_v58, %v4096_v21  ;;  %v7792_v17 = vld [vmem:[#allocation5_spill] sm:$0xff]  ;;  %v7793_v9 = vld [vmem:[#allocation7_spill] sm:$0xff] }
 0x18a   : > { %3415 = vst [vmem:[#allocation2 + $0x70] sm:$0x44] %v3414_v15  ;;  %3418 = vst [vmem:[#allocation2 + $0x78] sm:$0x44] %v3417_v48  ;;  %v4069_v42 = vsel %vm332_vm1, %v7065_v25, %v4063_v22  ;;  %v4071_v20 = vsel %vm332_vm1, %v4063_v22, %v4064_v33  ;;  %v7349_v41 = vcombine.low %v4091_v35, %v4095_v54  ;;  %v7790_v54 = vld [vmem:[#allocation3_spill] sm:$0xff]  ;;  %v5590_v2 = vld [vmem:[%s7589_s1 + $0x10] sm:$0xff]  }
 0x18b   : > { %v7351_v60 = vcombine.low %v4092_v58, %v4096_v21  ;;  %vm7786_vm9 = vmmov %vm7750_vm3  ;;  %v4072_v31 = vsel %vm7787_vm4, %v5553_v0, %v4071_v20  ;;  %v3844_v18 = vsel %vm332_vm1, %v7061_v57, %v3838_v13  ;;  %v3846_v11 = vsel %vm332_vm1, %v3838_v13, %v3839_v46  ;;  %4331 = vmatprep.subr.bf16.mxu0 %v7342_v29  ;;  %v4099_v12 = vld [vmem:[#allocation2 + $0x50] sm:$0xff]  ;;  %v7791_v21 = vld [vmem:[#allocation6_spill] sm:$0xff] }
 0x18c   : > { %v4070_v63 = vsel %vm7786_vm9, %v5474_v59, %v4069_v42  ;;  %v4087_v24 = vsel %vm5661_vm6, %v4072_v31, %v4086_v61  ;;  %vm7788_vm2 = vmmov %vm7770_vm7  ;;  %4374 = vmatprep.subr.bf16.mxu1 %v7344_v44  ;;  %4332 = vmatpush1.bf16.msra.mxu0 %v7349_v41 }
 0x18d   : > { %v4084_v25 = vsel %vm5661_vm6, %v4070_v63, %v4083_v50  ;;  %v3845_v7 = vsel %vm7788_vm2, %v5469_v32, %v3844_v18  ;;  %vm7789_vm5 = vmmov %vm7788_vm2  ;;  %4088 = vst [vmem:[#allocation2 + $0x98] sm:$0x22] %v4087_v24  ;;  %4375 = vmatpush1.bf16.msra.mxu1 %v7351_v60  ;;  %v4100_v32 = vld [vmem:[#allocation2 + $0x58] sm:$0xff] }
 0x18e   : > { %v3847_v59 = vsel %vm7789_vm5, %v5548_v39, %v3846_v11  ;;  %4085 = vst [vmem:[#allocation2 + $0x90] sm:$0x22] %v4084_v25  ;;  %v3859_v57 = vsel %vm6163_vm8, %v3845_v7, %v3858_v8 }
 0x18f   : > { %v3862_v0 = vsel %vm6163_vm8, %v3847_v59, %v3861_v23  ;;  %3860 = vst [vmem:[#allocation2 + $0x90] sm:$0x11] %v3859_v57 }
 0x190   : > { %3863 = vst [vmem:[#allocation2 + $0x98] sm:$0x11] %v3862_v0 }
 0x191   : > { %v4103_v5 = vld [vmem:[#allocation2 + $0x70] sm:$0xff]  ;;  %v4104_v34 = vld [vmem:[#allocation2 + $0x78] sm:$0xff] }
 0x192   : > { %v7376_v62 = vcombine.high %v4099_v12, %v4103_v5  ;;  %v7378_v26 = vcombine.high %v4100_v32, %v4104_v34  ;;  %v7380_v37 = vcombine.low %v4099_v12, %v4103_v5  ;;  %v7382_v39 = vcombine.low %v4100_v32, %v4104_v34 }
 0x194   : > { %4333 = vmatprep.subr.bf16.mxu0 %v7376_v62  ;;  %4376 = vmatprep.subr.bf16.mxu1 %v7378_v26 }
 0x195   : > { %4334 = vmatpush1.bf16.msra.mxu0 %v7380_v37  ;;  %4377 = vmatpush1.bf16.msra.mxu1 %v7382_v39 }
 0x196   : > { %v4107_v51 = vld [vmem:[#allocation2 + $0x90] sm:$0x33] }
 0x197   : > { %v4108_v27 = vld [vmem:[#allocation2 + $0x98] sm:$0x33]  ;;  %v7388_v52 = vcombine.high %v4107_v51, %v4107_v51  ;;  %v5272_v19 = vcombine.low %v4107_v51, %v4107_v51 }
 0x198   : > { %v7390_v4 = vcombine.high %v4108_v27, %v4108_v27  ;;  %v5274_v30 = vcombine.low %v4108_v27, %v4108_v27 }
 0x199   : > { %5280 = vmatprep.subr.msk.bf16.mxu0 %vm4220_vm13, %v7388_v52  ;;  %v7397_v6 = vsel %vm4220_vm13, %v5272_v19, 0 }
 0x19a   : > { %5282 = vmatprep.subr.msk.bf16.mxu1 %vm4220_vm13, %v7390_v4  ;;  %v7400_v14 = vsel %vm4220_vm13, %v5274_v30, 0  ;;  %4336 = vmatpush1.bf16.msra.mxu0 %v7397_v6 }
 0x19b   : > { %4379 = vmatpush1.bf16.msra.mxu1 %v7400_v14  ;;  %4428 = vmatprep.subr.bf16.mxu0 %v7790_v54 }
 0x19c   : > { %4471 = vmatprep.subr.bf16.mxu1 %v7791_v21 }
 0x19d   : > { %5281 = vmatmul.mubr.msk.bf16.vlgmr.msra.gmra.mrb[4].mxu0 %vm4216_vm0, %v7175_v55 }
 0x19e   : > { %5283 = vmatmul.mubr.msk.bf16.vlgmr.msra.gmra.mrb[4].mxu1 %vm4216_vm0, %v7175_v55  ;;  %4429 = vmatpush1.bf16.msra.mxu0 %v7792_v17  ;;  %v5589_v55 = vld [vmem:[%s7589_s1 + $0x8] sm:$0xff]  }
 0x19f   : > { %4472 = vmatpush1.bf16.msra.mxu1 %v7793_v9  ;;  %4430 = vmatprep.subr.bf16.mxu0 %v6990_v16 }
 0x1a0   : > { %4473 = vmatprep.subr.bf16.mxu1 %v6992_v40  ;;  %4460 = vmatprep.mubr.bf16.mxu0 %v7762_v3 }
 0x1a1   : > { %4503 = vmatprep.mubr.bf16.mxu1 %v7762_v3 }
 0x1a2   : > { %4431 = vmatpush1.bf16.msra.mxu0 %v6997_v36 }
 0x1a3   : > { %4474 = vmatpush1.bf16.msra.mxu1 %v6999_v28  ;;  %5287 = vmatprep.subr.msk.bf16.mxu0 %vm4220_vm13, %v7143_v45 }
 0x1a4   : > { %5289 = vmatprep.subr.msk.bf16.mxu1 %vm4220_vm13, %v7145_v49 }
 0x1a6   : > { %4433 = vmatpush1.bf16.msra.mxu0 %v7163_v1 }
 0x1a7   : > { %4476 = vmatpush1.bf16.msra.mxu1 %v7166_v38  ;;  %4514 = vmatprep.subr.bf16.mxu0 %v7342_v29 }
 0x1a8   : > { %4557 = vmatprep.subr.bf16.mxu1 %v7344_v44 }
 0x1a9   : > { %5288 = vmatmul.mubr.msk.bf16.vlgmr.msra.gmra.mrb[8].mxu0 %vm4216_vm0, %v5589_v55 }
 0x1aa   : > { %5290 = vmatmul.mubr.msk.bf16.vlgmr.msra.gmra.mrb[8].mxu1 %vm4216_vm0, %v5589_v55  ;;  %4515 = vmatpush1.bf16.msra.mxu0 %v7349_v41 }
 0x1ab   : > { %4558 = vmatpush1.bf16.msra.mxu1 %v7351_v60  ;;  %4516 = vmatprep.subr.bf16.mxu0 %v7376_v62 }
 0x1ac   : > { %4559 = vmatprep.subr.bf16.mxu1 %v7378_v26  ;;  %4546 = vmatprep.mubr.bf16.mxu0 %v7762_v3 }
 0x1ad   : > { %4589 = vmatprep.mubr.bf16.mxu1 %v7762_v3 }
 0x1ae   : > { %4517 = vmatpush1.bf16.msra.mxu0 %v7380_v37 }
 0x1af   : > { %4560 = vmatpush1.bf16.msra.mxu1 %v7382_v39  ;;  %5291 = vmatprep.subr.msk.bf16.mxu0 %vm4220_vm13, %v7388_v52 }
 0x1b0   : > { %5293 = vmatprep.subr.msk.bf16.mxu1 %vm4220_vm13, %v7390_v4 }
 0x1b2   : > { %4519 = vmatpush1.bf16.msra.mxu0 %v7397_v6 }
 0x1b3   : > { %4562 = vmatpush1.bf16.msra.mxu1 %v7400_v14  ;;  %4627 = vmatprep.subr.bf16.mxu0 %v7790_v54 }
 0x1b4   : > { %4670 = vmatprep.subr.bf16.mxu1 %v7791_v21 }
 0x1b5   : > { %5292 = vmatmul.mubr.msk.bf16.vlgmr.msra.gmra.mrb[12].mxu0 %vm4216_vm0, %v5589_v55 }
 0x1b6   : > { %5294 = vmatmul.mubr.msk.bf16.vlgmr.msra.gmra.mrb[12].mxu1 %vm4216_vm0, %v5589_v55  ;;  %4628 = vmatpush1.bf16.msra.mxu0 %v7792_v17 }
 0x1b7   : > { %4671 = vmatpush1.bf16.msra.mxu1 %v7793_v9  ;;  %4629 = vmatprep.subr.bf16.mxu0 %v6990_v16 }
 0x1b8   : > { %4672 = vmatprep.subr.bf16.mxu1 %v6992_v40  ;;  %4659 = vmatprep.mubr.bf16.mxu0 %v7762_v3 }
 0x1b9   : > { %4702 = vmatprep.mubr.bf16.mxu1 %v7762_v3 }
 0x1ba   : > { %4630 = vmatpush1.bf16.msra.mxu0 %v6997_v36 }
 0x1bb   : > { %4673 = vmatpush1.bf16.msra.mxu1 %v6999_v28  ;;  %5298 = vmatprep.subr.msk.bf16.mxu0 %vm4220_vm13, %v7143_v45 }
 0x1bc   : > { %5300 = vmatprep.subr.msk.bf16.mxu1 %vm4220_vm13, %v7145_v49 }
 0x1be   : > { %4632 = vmatpush1.bf16.msra.mxu0 %v7163_v1 }
 0x1bf   : > { %4675 = vmatpush1.bf16.msra.mxu1 %v7166_v38  ;;  %4713 = vmatprep.subr.bf16.mxu0 %v7342_v29 }
 0x1c0   : > { %4756 = vmatprep.subr.bf16.mxu1 %v7344_v44 }
 0x1c1   : > { %5299 = vmatmul.mubr.msk.bf16.vlgmr.msra.gmra.mrb[16].mxu0 %vm4216_vm0, %v5590_v2 }
 0x1c2   : > { %5301 = vmatmul.mubr.msk.bf16.vlgmr.msra.gmra.mrb[16].mxu1 %vm4216_vm0, %v5590_v2  ;;  %4714 = vmatpush1.bf16.msra.mxu0 %v7349_v41 }
 0x1c3   : > { %4757 = vmatpush1.bf16.msra.mxu1 %v7351_v60  ;;  %4715 = vmatprep.subr.bf16.mxu0 %v7376_v62 }
 0x1c4   : > { %4758 = vmatprep.subr.bf16.mxu1 %v7378_v26  ;;  %4745 = vmatprep.mubr.bf16.mxu0 %v7762_v3 }
 0x1c5   : > { %4788 = vmatprep.mubr.bf16.mxu1 %v7762_v3 }
 0x1c6   : > { %4716 = vmatpush1.bf16.msra.mxu0 %v7380_v37 }
 0x1c7   : > { %4759 = vmatpush1.bf16.msra.mxu1 %v7382_v39  ;;  %5302 = vmatprep.subr.msk.bf16.mxu0 %vm4220_vm13, %v7388_v52 }
 0x1c8   : > { %5304 = vmatprep.subr.msk.bf16.mxu1 %vm4220_vm13, %v7390_v4 }
 0x1ca   : > { %4718 = vmatpush1.bf16.msra.mxu0 %v7397_v6 }
 0x1cb   : > { %4761 = vmatpush1.bf16.msra.mxu1 %v7400_v14  ;;  %4826 = vmatprep.subr.bf16.mxu0 %v7790_v54 }
 0x1cc   : > { %4869 = vmatprep.subr.bf16.mxu1 %v7791_v21 }
 0x1cd   : > { %5303 = vmatmul.mubr.msk.bf16.vlgmr.msra.gmra.mrb[20].mxu0 %vm4216_vm0, %v5590_v2 }
 0x1ce   : > { %5305 = vmatmul.mubr.msk.bf16.vlgmr.msra.gmra.mrb[20].mxu1 %vm4216_vm0, %v5590_v2  ;;  %4827 = vmatpush1.bf16.msra.mxu0 %v7792_v17 }
 0x1cf   : > { %4870 = vmatpush1.bf16.msra.mxu1 %v7793_v9  ;;  %4828 = vmatprep.subr.bf16.mxu0 %v6990_v16  ;;  %v5591_v16 = vld [vmem:[%s7589_s1 + $0x18] sm:$0xff]  }
 0x1d0   : > { %4871 = vmatprep.subr.bf16.mxu1 %v6992_v40  ;;  %4858 = vmatprep.mubr.bf16.mxu0 %v7762_v3 }
 0x1d1   : > { %4901 = vmatprep.mubr.bf16.mxu1 %v7762_v3 }
 0x1d2   : > { %4829 = vmatpush1.bf16.msra.mxu0 %v6997_v36 }
 0x1d3   : > { %4872 = vmatpush1.bf16.msra.mxu1 %v6999_v28  ;;  %5309 = vmatprep.subr.msk.bf16.mxu0 %vm4220_vm13, %v7143_v45 }
 0x1d4   : > { %5311 = vmatprep.subr.msk.bf16.mxu1 %vm4220_vm13, %v7145_v49 }
 0x1d6   : > { %4831 = vmatpush1.bf16.msra.mxu0 %v7163_v1 }
 0x1d7   : > { %4874 = vmatpush1.bf16.msra.mxu1 %v7166_v38  ;;  %4912 = vmatprep.subr.bf16.mxu0 %v7342_v29 }
 0x1d8   : > { %4955 = vmatprep.subr.bf16.mxu1 %v7344_v44 }
 0x1d9   : > { %5310 = vmatmul.mubr.msk.bf16.vlgmr.msra.gmra.mrb[24].mxu0 %vm4216_vm0, %v5591_v16 }
 0x1da   : > { %5312 = vmatmul.mubr.msk.bf16.vlgmr.msra.gmra.mrb[24].mxu1 %vm4216_vm0, %v5591_v16  ;;  %4913 = vmatpush1.bf16.msra.mxu0 %v7349_v41 }
 0x1db   : > { %4956 = vmatpush1.bf16.msra.mxu1 %v7351_v60  ;;  %4914 = vmatprep.subr.bf16.mxu0 %v7376_v62 }
 0x1dc   : > { %4957 = vmatprep.subr.bf16.mxu1 %v7378_v26  ;;  %4944 = vmatprep.mubr.bf16.mxu0 %v7762_v3 }
 0x1dd   : > { %4987 = vmatprep.mubr.bf16.mxu1 %v7762_v3 }
 0x1de   : > { %4915 = vmatpush1.bf16.msra.mxu0 %v7380_v37 }
 0x1df   : > { %4958 = vmatpush1.bf16.msra.mxu1 %v7382_v39  ;;  %5313 = vmatprep.subr.msk.bf16.mxu0 %vm4220_vm13, %v7388_v52 }
 0x1e0   : > { %5315 = vmatprep.subr.msk.bf16.mxu1 %vm4220_vm13, %v7390_v4 }
 0x1e2   : > { %4917 = vmatpush1.bf16.msra.mxu0 %v7397_v6 }
 0x1e3   : > { %4960 = vmatpush1.bf16.msra.mxu1 %v7400_v14 }
 0x1e5   : > { %5314 = vmatmul.mubr.msk.bf16.vlgmr.msra.gmra.mrb[28].mxu0 %vm4216_vm0, %v5591_v16 }
 0x1e6   : > { %5316 = vmatmul.mubr.msk.bf16.vlgmr.msra.gmra.mrb[28].mxu1 %vm4216_vm0, %v5591_v16 }
 0x23f   : > { %v4279_v40 = vpop.f32.mrb[0].mxu0 }
 0x240   : > { %v4322_v36 = vpop.f32.mrb[0].mxu1  ;;  %v4281_v28 = vpop.f32.mrb[1].mxu0 }
 0x241   : > { %v4324_v45 = vpop.f32.mrb[1].mxu1  ;;  %v4283_v49 = vpop.f32.mrb[2].mxu0 }
 0x242   : > { %v4326_v1 = vpop.f32.mrb[2].mxu1  ;;  %v4285_v38 = vpop.f32.mrb[3].mxu0 }
 0x243   : > { %v4328_v3 = vpop.f32.mrb[3].mxu1 }
 0x270   : > { %v4365_v47 = vpop.f32.mrb[4].mxu0 }
 0x271   : > { %v4408_v56 = vpop.f32.mrb[4].mxu1  ;;  %v4367_v43 = vpop.f32.mrb[5].mxu0 }
 0x272   : > { %v4410_v53 = vpop.f32.mrb[5].mxu1  ;;  %v7525_v10 = vpop.f32.mrb[6].mxu0 }
 0x273   : > { %v7527_v15 = vpop.f32.mrb[6].mxu1  ;;  %v7529_v48 = vpop.f32.mrb[7].mxu0 }
 0x274   : > { %v7531_v33 = vpop.f32.mrb[7].mxu1 }
 0x27c   : > { %v4462_v22 = vpop.f32.mrb[8].mxu0 }
 0x27d   : > { %v4505_v35 = vpop.f32.mrb[8].mxu1  ;;  %v4600_v58 = vmax.f32 %v4279_v40, %v4462_v22  ;;  %v4464_v13 = vpop.f32.mrb[9].mxu0 }
 0x27e   : > { %v4602_v46 = vmax.f32 %v4322_v36, %v4505_v35  ;;  %v4507_v29 = vpop.f32.mrb[9].mxu1  ;;  %v4601_v44 = vmax.f32 %v4281_v28, %v4464_v13  ;;  %v4466_v20 = vpop.f32.mrb[10].mxu0 }
 0x27f   : > { %v4603_v42 = vmax.f32 %v4324_v45, %v4507_v29  ;;  %v4509_v41 = vpop.f32.mrb[10].mxu1  ;;  %v4608_v60 = vmax.f32 %v4283_v49, %v4466_v20  ;;  %v4468_v61 = vpop.f32.mrb[11].mxu0 }
 0x280   : > { %v4610_v50 = vmax.f32 %v4326_v1, %v4509_v41  ;;  %v4511_v63 = vpop.f32.mrb[11].mxu1  ;;  %v4609_v31 = vmax.f32 %v4285_v38, %v4468_v61  ;;  %v5019_v22 = vpop.permute.xlu0 %5018 }
 0x281   : > { %v4611_v18 = vmax.f32 %v4328_v3, %v4511_v63  ;;  %v7553_v35 = vpop.permute.xlu1 %5023 }
 0x288   : > { %v4548_v11 = vpop.f32.mrb[12].mxu0 }
 0x289   : > { %v4591_v25 = vpop.f32.mrb[12].mxu1  ;;  %v4604_v24 = vmax.f32 %v4365_v47, %v4548_v11  ;;  %v4550_v23 = vpop.f32.mrb[13].mxu0 }
 0x28a   : > { %v4606_v8 = vmax.f32 %v4408_v56, %v4591_v25  ;;  %v4593_v7 = vpop.f32.mrb[13].mxu1  ;;  %v4605_v59 = vmax.f32 %v4367_v43, %v4550_v23  ;;  %v4552_v0 = vpop.f32.mrb[14].mxu0 }
 0x28b   : > { %v4607_v57 = vmax.f32 %v4410_v53, %v4593_v7  ;;  %v4595_v12 = vpop.f32.mrb[14].mxu1  ;;  %v4612_v5 = vmax.f32 %v7525_v10, %v4552_v0  ;;  %v4554_v34 = vpop.f32.mrb[15].mxu0 }
 0x28c   : > { %v4614_v32 = vmax.f32 %v7527_v15, %v4595_v12  ;;  %v4597_v62 = vpop.f32.mrb[15].mxu1  ;;  %v4613_v26 = vmax.f32 %v7529_v48, %v4554_v34 }
 0x28d   : > { %v4615_v37 = vmax.f32 %v7531_v33, %v4597_v62 }
 0x294   : > { %v4661_v39 = vpop.f32.mrb[16].mxu0 }
 0x295   : > { %v4704_v51 = vpop.f32.mrb[16].mxu1  ;;  %v4799_v27 = vmax.f32 %v4600_v58, %v4661_v39  ;;  %v4663_v4 = vpop.f32.mrb[17].mxu0 }
 0x296   : > { %v4801_v52 = vmax.f32 %v4602_v46, %v4704_v51  ;;  %v4706_v19 = vpop.f32.mrb[17].mxu1  ;;  %v4800_v30 = vmax.f32 %v4601_v44, %v4663_v4  ;;  %v4665_v14 = vpop.f32.mrb[18].mxu0 }
 0x297   : > { %v4802_v6 = vmax.f32 %v4603_v42, %v4706_v19  ;;  %v4708_v54 = vpop.f32.mrb[18].mxu1  ;;  %v4807_v21 = vmax.f32 %v4608_v60, %v4665_v14  ;;  %v4667_v9 = vpop.f32.mrb[19].mxu0 }
 0x298   : > { %v4809_v17 = vmax.f32 %v4610_v50, %v4708_v54  ;;  %v4710_v55 = vpop.f32.mrb[19].mxu1  ;;  %v4808_v2 = vmax.f32 %v4609_v31, %v4667_v9 }
 0x299   : > { %v4810_v16 = vmax.f32 %v4611_v18, %v4710_v55 }
 0x2a0   : > { %v4747_v40 = vpop.f32.mrb[20].mxu0 }
 0x2a1   : > { %v4790_v36 = vpop.f32.mrb[20].mxu1  ;;  %v7537_v28 = vmax.f32 %v4604_v24, %v4747_v40  ;;  %v4749_v49 = vpop.f32.mrb[21].mxu0 }
 0x2a2   : > { %v7539_v45 = vmax.f32 %v4606_v8, %v4790_v36  ;;  %v4792_v1 = vpop.f32.mrb[21].mxu1  ;;  %v7541_v38 = vmax.f32 %v4605_v59, %v4749_v49  ;;  %v4751_v47 = vpop.f32.mrb[22].mxu0 }
 0x2a3   : > { %v7543_v3 = vmax.f32 %v4607_v57, %v4792_v1  ;;  %v4794_v56 = vpop.f32.mrb[22].mxu1  ;;  %v7545_v43 = vmax.f32 %v4612_v5, %v4751_v47  ;;  %v4753_v10 = vpop.f32.mrb[23].mxu0 }
 0x2a4   : > { %v7547_v53 = vmax.f32 %v4614_v32, %v4794_v56  ;;  %v4796_v15 = vpop.f32.mrb[23].mxu1  ;;  %v7549_v48 = vmax.f32 %v4613_v26, %v4753_v10 }
 0x2a5   : > { %v7551_v33 = vmax.f32 %v4615_v37, %v4796_v15 }
 0x2ac   : > { %v4860_v58 = vpop.f32.mrb[24].mxu0 }
 0x2ad   : > { %v4903_v46 = vpop.f32.mrb[24].mxu1  ;;  %v4998_v13 = vmax.f32 %v4799_v27, %v4860_v58  ;;  %v4862_v44 = vpop.f32.mrb[25].mxu0 }
 0x2ae   : > { %v5000_v29 = vmax.f32 %v4801_v52, %v4903_v46  ;;  %v4905_v42 = vpop.f32.mrb[25].mxu1  ;;  %v4999_v20 = vmax.f32 %v4800_v30, %v4862_v44  ;;  %v4864_v60 = vpop.f32.mrb[26].mxu0 }
 0x2af   : > { %v5001_v41 = vmax.f32 %v4802_v6, %v4905_v42  ;;  %v4907_v50 = vpop.f32.mrb[26].mxu1  ;;  %v5026_v61 = vadd.f32 %v5019_v22, %v4998_v13  ;;  %v5006_v31 = vmax.f32 %v4807_v21, %v4864_v60  ;;  %v4866_v11 = vpop.f32.mrb[27].mxu0 }
 0x2b0   : > { %v5028_v63 = vadd.f32 %v5019_v22, %v5000_v29  ;;  %v5008_v18 = vmax.f32 %v4809_v17, %v4907_v50  ;;  %v4909_v25 = vpop.f32.mrb[27].mxu1  ;;  %v5027_v24 = vadd.f32 %v5019_v22, %v4999_v20  ;;  %v5007_v23 = vmax.f32 %v4808_v2, %v4866_v11 }
 0x2b1   : > { %v5029_v8 = vadd.f32 %v5019_v22, %v5001_v41  ;;  %v5009_v7 = vmax.f32 %v4810_v16, %v4909_v25  ;;  %v5042_v59 = vmax.f32 %v5026_v61, 0.0  ;;  %v5034_v0 = vadd.f32 %v7553_v35, %v5006_v31 }
 0x2b2   : > { %v5044_v57 = vmax.f32 %v5028_v63, 0.0  ;;  %v5036_v12 = vadd.f32 %v7553_v35, %v5008_v18  ;;  %v5043_v5 = vmax.f32 %v5027_v24, 0.0  ;;  %v5035_v34 = vadd.f32 %v7553_v35, %v5007_v23 }
 0x2b3   : > { %v5045_v32 = vmax.f32 %v5029_v8, 0.0  ;;  %v5037_v62 = vadd.f32 %v7553_v35, %v5009_v7  ;;  %v5050_v26 = vmax.f32 %v5034_v0, 0.0 }
 0x2b4   : > { %v5052_v37 = vmax.f32 %v5036_v12, 0.0  ;;  %v5328_v39 = vpack.c.bf16 %v5043_v5, %v5042_v59  ;;  %v5051_v27 = vmax.f32 %v5035_v34, 0.0 }
 0x2b5   : > { %v5329_v51 = vpack.c.bf16 %v5045_v32, %v5044_v57  ;;  %v5053_v52 = vmax.f32 %v5037_v62, 0.0 }
 0x2b6   : > { %5106 = vst [vmem:[%s7563_s13] sm:$0xff] %v5328_v39  ;;  %v5332_v4 = vpack.c.bf16 %v5051_v27, %v5050_v26 }
 0x2b7   : > { %5107 = vst [vmem:[%s7563_s13 + $0x8] sm:$0xff] %v5329_v51  ;;  %v5333_v19 = vpack.c.bf16 %v5053_v52, %v5052_v37 }
 0x2b8   : > { %5110 = vst [vmem:[%s7563_s13 + $0x20] sm:$0xff] %v5332_v4  ;;  %v4946_v30 = vpop.f32.mrb[28].mxu0 }
 0x2b9   : > { %5111 = vst [vmem:[%s7563_s13 + $0x28] sm:$0xff] %v5333_v19  ;;  %v4989_v6 = vpop.f32.mrb[28].mxu1  ;;  %v5002_v14 = vmax.f32 %v7537_v28, %v4946_v30  ;;  %v4948_v21 = vpop.f32.mrb[29].mxu0 }
 0x2ba   : > { %v5004_v54 = vmax.f32 %v7539_v45, %v4989_v6  ;;  %v4991_v17 = vpop.f32.mrb[29].mxu1  ;;  %v5003_v9 = vmax.f32 %v7541_v38, %v4948_v21  ;;  %v4950_v2 = vpop.f32.mrb[30].mxu0 }
 0x2bb   : > { %v5005_v55 = vmax.f32 %v7543_v3, %v4991_v17  ;;  %v4993_v16 = vpop.f32.mrb[30].mxu1  ;;  %v5030_v40 = vadd.f32 %v5019_v22, %v5002_v14  ;;  %v5010_v49 = vmax.f32 %v7545_v43, %v4950_v2  ;;  %v4952_v47 = vpop.f32.mrb[31].mxu0 }
 0x2bc   : > { %v5032_v36 = vadd.f32 %v5019_v22, %v5004_v54  ;;  %v5012_v1 = vmax.f32 %v7547_v53, %v4993_v16  ;;  %v4995_v56 = vpop.f32.mrb[31].mxu1  ;;  %v5031_v10 = vadd.f32 %v5019_v22, %v5003_v9  ;;  %v5011_v45 = vmax.f32 %v7549_v48, %v4952_v47 }
 0x2bd   : > { %v5033_v28 = vadd.f32 %v5019_v22, %v5005_v55  ;;  %v5013_v15 = vmax.f32 %v7551_v33, %v4995_v56  ;;  %v5046_v38 = vmax.f32 %v5030_v40, 0.0  ;;  %v5038_v58 = vadd.f32 %v7553_v35, %v5010_v49 }
 0x2be   : > { %v5048_v3 = vmax.f32 %v5032_v36, 0.0  ;;  %v5040_v46 = vadd.f32 %v7553_v35, %v5012_v1  ;;  %v5047_v43 = vmax.f32 %v5031_v10, 0.0  ;;  %v5039_v13 = vadd.f32 %v7553_v35, %v5011_v45 }
 0x2bf   : > { %v5049_v53 = vmax.f32 %v5033_v28, 0.0  ;;  %v5041_v22 = vadd.f32 %v7553_v35, %v5013_v15  ;;  %v5054_v29 = vmax.f32 %v5038_v58, 0.0 }
 0x2c0   : > { %v5056_v48 = vmax.f32 %v5040_v46, 0.0  ;;  %v5330_v44 = vpack.c.bf16 %v5047_v43, %v5046_v38  ;;  %v5055_v33 = vmax.f32 %v5039_v13, 0.0 }
 0x2c1   : > { %v5331_v42 = vpack.c.bf16 %v5049_v53, %v5048_v3  ;;  %v5057_v20 = vmax.f32 %v5041_v22, 0.0 }
 0x2c2   : > { %5108 = vst [vmem:[%s7563_s13 + $0x10] sm:$0xff] %v5330_v44  ;;  %v5334_v41 = vpack.c.bf16 %v5055_v33, %v5054_v29 }
 0x2c3   : > { %5109 = vst [vmem:[%s7563_s13 + $0x18] sm:$0xff] %v5331_v42  ;;  %v5335_v60 = vpack.c.bf16 %v5057_v20, %v5056_v48 }
 0x2c4   : > { %5112 = vst [vmem:[%s7563_s13 + $0x30] sm:$0xff] %v5334_v41 }
 0x2c5   : > { %5113 = vst [vmem:[%s7563_s13 + $0x38] sm:$0xff] %v5335_v60 }
 0x2c6 PF: > { %s13_s12 = sadd.s32 1, %s5603_s12  }
 0x2c7   : > { %p10_p4 = scmp.ge.s32.totalorder %s13_s12, 4  }
 0x2c9   :  { %12 = sbr.rel (!%p10_p4) target bundleno = 1 (0x1), region = 68 }

// kernel: convnet_forward.4
= control target key start
LH: loop header
LB: loop body
LE: loop exit
PB: predicated region body
PF: predicated region fallthrough
CT: control target
= control target key end

     0   :  { %s4134_s12 = smov 0   ;;  %s5698_s0 = inlined_call_operand.vmem [shape: bf16[2,4,16,512], index: 0, kind: input, shape index: {}]   ;;  %s5699_s1 = inlined_call_operand.vmem [shape: bf16[4,32,576], index: 1, kind: input, shape index: {}]   ;;  %s5700_s2 = inlined_call_operand.vmem [shape: f32[32,1], index: 2, kind: input, shape index: {}]   ;;  %s5701_s3 = inlined_call_operand.vmem [shape: bf16[2,32,384], index: 3, kind: output, shape index: {}]  }
   0x1 LB: > { %s3254_s13 = sadd.s32 4294967295, %s4103_s12   ;;  %p3258_p0 = scmp.ge.s32.totalorder %s4103_s12, 1  ;;  %s4103_s12 = sphi %s4134_s12, %s13_s12  }
   0x2   : > { %p137_p1 = scmp.lt.s32.totalorder %s4103_s12, 3 }
   0x4   : > { %p138_p2 = pnand %p3258_p0, %p137_p1 }
   0x6   : > { %141 = sbr.rel (%p138_p2) target bundleno = 928 (0x3a0), region = 32 }
   0xd   : > { %p161_p3 = scmp.lt.s32.totalorder %s3254_s13, 1  ;;  %s4105_s18 = smov 108   ;;  %v4026_v6 = vld [vmem:[%s5699_s1 + $0x4] ss:$20 sps:$4 sm:$0xff]   ;;  %vm489_vm0 = vcmask 883712   ;;  %vm223_vm1 = vcmask 1039360  }
   0xe   : > { %s4106_s19 = smov 127   ;;  %s4107_s20 = smov 126   ;;  %1827 = vmatprep.mubr.bf16.mxu1 %v4026_v6  ;;  %1668 = vmatprep.mubr.bf16.mxu0 %v4026_v6  ;;  %vm261_vm2 = vcmask 1031168   ;;  %vm299_vm3 = vcmask 973824   ;;  %vm337_vm4 = vcmask 965632   ;;  %vm375_vm5 = vcmask 957440  }
   0xf   : > { %s6102_s13 = smov (!%p161_p3, %s3254_s13), 1  ;;  %s4108_s21 = smov 119   ;;  %vm413_vm6 = vcmask 900096   ;;  %vm451_vm7 = vcmask 891904   ;;  %vm1629_vm8 = vcmask 523264  }
  0x10   : > { %s3612_s14 = sshll.u32 %s6102_s13, 7  ;;  %s4109_s22 = smov 118  }
  0x11   : > { %s4148_s17 = scalar_lea.vmem %s5698_s0, %s3612_s14  ;;  %s4110_s23 = smov 117  }
  0x12   : > { %v4001_v0 = vld [vmem:[%s4148_s17 + $0x8] ss:$16 sps:$4 sm:$0xff]   ;;  %v4003_v1 = vld [vmem:[%s4148_s17 + $0xc] ss:$16 sps:$4 sm:$0xff]   ;;  %v4155_v2 = vld [vmem:[%s4148_s17 + $0x4] ss:$16 sps:$4 sm:$0xff]  }
  0x13   : > { %485 = vrot.lane.b32.xlu0 %v4001_v0, %s4105_s18  ;;  %219 = vrot.lane.b32.xlu1 %v4001_v0, %s4106_s19  ;;  %v4004_v3 = vld [vmem:[%s4148_s17 + $0x28] ss:$16 sps:$4 sm:$0xff]   ;;  %v4159_v4 = vld [vmem:[%s4148_s17] ss:$16 sps:$4 sm:$0xff]   ;;  %s4111_s24 = smov 110   ;;  %s4112_s27 = smov 109  }
  0x14   : > { %1636 = vmatprep.subr.bf16.mxu0 %v4155_v2  ;;  %v4006_v5 = vld [vmem:[%s4148_s17 + $0x2c] ss:$16 sps:$4 sm:$0xff]   ;;  %v4218_v7 = vld [vmem:[%s4148_s17 + $0x48] ss:$16 sps:$4 sm:$0xff]   ;;  %v4252_v9 = vld [vmem:[%s4148_s17 + $0x24] ss:$16 sps:$4 sm:$0xff]  }
  0x15   : > { %1637 = vmatpush1.bf16.msra.mxu0 %v4159_v4  ;;  %v4221_v8 = vld [vmem:[%s4148_s17 + $0x4c] ss:$16 sps:$4 sm:$0xff]   ;;  %v4255_v10 = vld [vmem:[%s4148_s17 + $0x20] ss:$16 sps:$4 sm:$0xff]   ;;  %v4262_v11 = vld [vmem:[%s4148_s17 + $0x68] ss:$16 sps:$4 sm:$0xff]  }
  0x16   : > { %v4265_v12 = vld [vmem:[%s4148_s17 + $0x6c] ss:$16 sps:$4 sm:$0xff]   ;;  %v4274_v15 = vld [vmem:[%s4148_s17 + $0x8] ss:$16 sps:$4 sm:$0xff]   ;;  %s3981_s16 = smul.u32 48, %s6102_s13 }
  0x17   : > { %487 = vrot.lane.b32.xlu0 %v4003_v1, %s4105_s18  ;;  %221 = vrot.lane.b32.xlu1 %v4003_v1, %s4106_s19  ;;  %5897 = vst [vmem:[#allocation3_spill] sm:$0xff] %v4274_v15  ;;  %v4277_v18 = vld [vmem:[%s4148_s17 + $0x28] ss:$16 sps:$4 sm:$0xff]  }
  0x18   : > { %5898 = vst [vmem:[#allocation4_spill] sm:$0xff] %v4277_v18 }
  0x1b   : > { %547 = vrot.lane.b32.xlu0 %v4004_v3, %s4106_s19  ;;  %549 = vrot.lane.b32.xlu1 %v4006_v5, %s4106_s19 }
  0x1f   : > { %257 = vrot.lane.b32.xlu0 %v4001_v0, %s4107_s20  ;;  %259 = vrot.lane.b32.xlu1 %v4003_v1, %s4107_s20 }
  0x23   : > { %217 = vrot.lane.b32.xlu0 %v4155_v2, %s4106_s19  ;;  %215 = vrot.lane.b32.xlu1 %v4159_v4, %s4106_s19 }
  0x27   : > { %584 = vrot.lane.b32.xlu0 %v4004_v3, %s4107_s20  ;;  %586 = vrot.lane.b32.xlu1 %v4006_v5, %s4107_s20 }
  0x2b   : > { %295 = vrot.lane.b32.xlu0 %v4001_v0, %s4108_s21  ;;  %297 = vrot.lane.b32.xlu1 %v4003_v1, %s4108_s21 }
  0x2f   : > { %255 = vrot.lane.b32.xlu0 %v4155_v2, %s4107_s20  ;;  %253 = vrot.lane.b32.xlu1 %v4159_v4, %s4107_s20 }
  0x33   : > { %621 = vrot.lane.b32.xlu0 %v4004_v3, %s4108_s21  ;;  %623 = vrot.lane.b32.xlu1 %v4006_v5, %s4108_s21 }
  0x37   : > { %333 = vrot.lane.b32.xlu0 %v4001_v0, %s4109_s22  ;;  %335 = vrot.lane.b32.xlu1 %v4003_v1, %s4109_s22 }
  0x3b   : > { %293 = vrot.lane.b32.xlu0 %v4155_v2, %s4108_s21  ;;  %291 = vrot.lane.b32.xlu1 %v4159_v4, %s4108_s21 }
  0x3f   : > { %658 = vrot.lane.b32.xlu0 %v4004_v3, %s4109_s22  ;;  %660 = vrot.lane.b32.xlu1 %v4006_v5, %s4109_s22 }
  0x43   : > { %371 = vrot.lane.b32.xlu0 %v4001_v0, %s4110_s23  ;;  %373 = vrot.lane.b32.xlu1 %v4003_v1, %s4110_s23 }
  0x47   : > { %331 = vrot.lane.b32.xlu0 %v4155_v2, %s4109_s22  ;;  %329 = vrot.lane.b32.xlu1 %v4159_v4, %s4109_s22 }
  0x4b   : > { %695 = vrot.lane.b32.xlu0 %v4004_v3, %s4110_s23  ;;  %697 = vrot.lane.b32.xlu1 %v4006_v5, %s4110_s23 }
  0x4f   : > { %409 = vrot.lane.b32.xlu0 %v4001_v0, %s4111_s24  ;;  %411 = vrot.lane.b32.xlu1 %v4003_v1, %s4111_s24 }
  0x53   : > { %369 = vrot.lane.b32.xlu0 %v4155_v2, %s4110_s23  ;;  %367 = vrot.lane.b32.xlu1 %v4159_v4, %s4110_s23 }
  0x57   : > { %732 = vrot.lane.b32.xlu0 %v4004_v3, %s4111_s24  ;;  %734 = vrot.lane.b32.xlu1 %v4006_v5, %s4111_s24 }
  0x5b   : > { %447 = vrot.lane.b32.xlu0 %v4001_v0, %s4112_s27  ;;  %449 = vrot.lane.b32.xlu1 %v4003_v1, %s4112_s27 }
  0x5f   : > { %407 = vrot.lane.b32.xlu0 %v4155_v2, %s4111_s24  ;;  %405 = vrot.lane.b32.xlu1 %v4159_v4, %s4111_s24 }
  0x63   : > { %1052 = vrot.lane.b32.xlu0 %v4218_v7, %s4111_s24  ;;  %1054 = vrot.lane.b32.xlu1 %v4221_v8, %s4111_s24 }
  0x67   : > { %769 = vrot.lane.b32.xlu0 %v4004_v3, %s4112_s27  ;;  %771 = vrot.lane.b32.xlu1 %v4006_v5, %s4112_s27 }
  0x6b   : > { %445 = vrot.lane.b32.xlu0 %v4155_v2, %s4112_s27  ;;  %443 = vrot.lane.b32.xlu1 %v4159_v4, %s4112_s27 }
  0x6f   : > { %1089 = vrot.lane.b32.xlu0 %v4218_v7, %s4112_s27  ;;  %1091 = vrot.lane.b32.xlu1 %v4221_v8, %s4112_s27 }
  0x73   : > { %806 = vrot.lane.b32.xlu0 %v4004_v3, %s4105_s18  ;;  %808 = vrot.lane.b32.xlu1 %v4006_v5, %s4105_s18 }
  0x77   : > { %483 = vrot.lane.b32.xlu0 %v4155_v2, %s4105_s18  ;;  %481 = vrot.lane.b32.xlu1 %v4159_v4, %s4105_s18 }
  0x7b   : > { %1126 = vrot.lane.b32.xlu0 %v4218_v7, %s4105_s18  ;;  %1128 = vrot.lane.b32.xlu1 %v4221_v8, %s4105_s18 }
  0x7f   : > { %867 = vrot.lane.b32.xlu0 %v4218_v7, %s4106_s19  ;;  %869 = vrot.lane.b32.xlu1 %v4221_v8, %s4106_s19 }
  0x83   : > { %545 = vrot.lane.b32.xlu0 %v4252_v9, %s4106_s19  ;;  %543 = vrot.lane.b32.xlu1 %v4255_v10, %s4106_s19 }
  0x85   : > { %v4267_v13 = vpop.permute.xlu0 %485  ;;  %v220_v14 = vpop.permute.xlu1 %219 }
  0x87   : > { %1187 = vrot.lane.b32.xlu0 %v4262_v11, %s4106_s19  ;;  %1189 = vrot.lane.b32.xlu1 %v4265_v12, %s4106_s19 }
  0x89   : > { %v488_v16 = vpop.permute.xlu0 %487  ;;  %v222_v17 = vpop.permute.xlu1 %221 }
  0x8a   : > { %v4281_v19 = vsel %vm489_vm0, %v4267_v13, %v488_v16  ;;  %v4293_v22 = vsel %vm223_vm1, %v220_v14, %v222_v17 }
  0x8b   : > { %5899 = vst [vmem:[#allocation5_spill] sm:$0xff] %v4281_v19  ;;  %3621 = vmatprep.subr.bf16.mxu1 %v4281_v19  ;;  %904 = vrot.lane.b32.xlu0 %v4218_v7, %s4107_s20  ;;  %5900 = vst [vmem:[#allocation6_spill] sm:$0xff] %v4293_v22 }
  0x8c   : > { %906 = vrot.lane.b32.xlu1 %v4221_v8, %s4107_s20  ;;  %3622 = vmatpush3.bf16.msra.mxu1 %v4274_v15 }
  0x8d   : > { %v4289_v20 = vpop.permute.xlu0 %547  ;;  %v550_v21 = vpop.permute.xlu1 %549  ;;  %3623 = vmatprep.subr.bf16.mxu1 %v4277_v18 }
  0x8e   : > { %v4299_v23 = vsel %vm223_vm1, %v4289_v20, %v550_v21 }
  0x8f   : > { %582 = vrot.lane.b32.xlu0 %v4252_v9, %s4107_s20  ;;  %5901 = vst [vmem:[#allocation7_spill] sm:$0xff] %v4299_v23 }
  0x90   : > { %580 = vrot.lane.b32.xlu1 %v4255_v10, %s4107_s20  ;;  %3624 = vmatpush3.bf16.msra.mxu1 %v4293_v22 }
  0x91   : > { %v258_v24 = vpop.permute.xlu0 %257  ;;  %v260_v25 = vpop.permute.xlu1 %259  ;;  %3625 = vmatprep.subr.bf16.mxu1 %v4299_v23 }
  0x92   : > { %v4306_v26 = vsel %vm261_vm2, %v258_v24, %v260_v25 }
  0x93   : > { %5902 = vst [vmem:[#allocation8_spill] sm:$0xff] %v4306_v26  ;;  %1224 = vrot.lane.b32.xlu0 %v4262_v11, %s4107_s20 }
  0x94   : > { %1226 = vrot.lane.b32.xlu1 %v4265_v12, %s4107_s20  ;;  %3626 = vmatpush3.bf16.msra.mxu1 %v4306_v26 }
  0x95   : > { %v218_v27 = vpop.permute.xlu0 %217  ;;  %v216_v28 = vpop.permute.xlu1 %215 }
  0x96   : > { %v4314_v29 = vsel %vm223_vm1, %v216_v28, %v218_v27  ;;  %v4317_v30 = vsel %vm223_vm1, %v218_v27, %v220_v14  ;;  %v4466_v27 = vld [vmem:[%s5699_s1] ss:$20 sps:$4 sm:$0xff]  }
  0x97   : > { %5903 = vst [vmem:[#allocation9_spill] sm:$0xff] %v4317_v30  ;;  %941 = vrot.lane.b32.xlu0 %v4218_v7, %s4108_s21  ;;  %1638 = vmatprep.subr.bf16.mxu0 %v4317_v30  ;;  %v4472_v28 = vld [vmem:[%s4148_s17 + $0x44] ss:$16 sps:$4 sm:$0xff]  }
  0x98   : > { %943 = vrot.lane.b32.xlu1 %v4221_v8, %s4108_s21  ;;  %1639 = vmatpush1.bf16.msra.mxu0 %v4314_v29 }
  0x99   : > { %v4325_v31 = vpop.permute.xlu0 %584  ;;  %v587_v32 = vpop.permute.xlu1 %586 }
  0x9a   : > { %v4329_v33 = vsel %vm261_vm2, %v4325_v31, %v587_v32  ;;  %v4477_v32 = vld [vmem:[%s4148_s17 + $0x40] ss:$16 sps:$4 sm:$0xff]  }
  0x9b   : > { %5904 = vst [vmem:[#allocation10_spill] sm:$0xff] %v4329_v33  ;;  %619 = vrot.lane.b32.xlu0 %v4252_v9, %s4108_s21  ;;  %3627 = vmatprep.subr.bf16.mxu1 %v4329_v33  ;;  %5918 = vst [vmem:[#allocation24_spill] sm:$0xff] %v4477_v32 }
  0x9c   : > { %617 = vrot.lane.b32.xlu1 %v4255_v10, %s4108_s21 }
  0x9d   : > { %v296_v34 = vpop.permute.xlu0 %295  ;;  %v298_v35 = vpop.permute.xlu1 %297 }
  0x9e   : > { %v4337_v36 = vsel %vm299_vm3, %v296_v34, %v298_v35 }
  0x9f   : > { %5905 = vst [vmem:[#allocation11_spill] sm:$0xff] %v4337_v36  ;;  %1261 = vrot.lane.b32.xlu0 %v4262_v11, %s4108_s21  ;;  %3628 = vmatpush3.bf16.msra.mxu1 %v4337_v36 }
  0xa0   : > { %1263 = vrot.lane.b32.xlu1 %v4265_v12, %s4108_s21 }
  0xa1   : > { %v256_v37 = vpop.permute.xlu0 %255  ;;  %v254_v38 = vpop.permute.xlu1 %253 }
  0xa2   : > { %v4345_v39 = vsel %vm261_vm2, %v254_v38, %v256_v37  ;;  %v4348_v40 = vsel %vm261_vm2, %v256_v37, %v258_v24  ;;  %v4482_v37 = vld [vmem:[%s5699_s1 + $0x2c] ss:$20 sps:$4 sm:$0xff]  }
  0xa3   : > { %5906 = vst [vmem:[#allocation12_spill] sm:$0xff] %v4348_v40  ;;  %978 = vrot.lane.b32.xlu0 %v4218_v7, %s4109_s22  ;;  %1640 = vmatprep.subr.bf16.mxu0 %v4348_v40 }
  0xa4   : > { %980 = vrot.lane.b32.xlu1 %v4221_v8, %s4109_s22  ;;  %1641 = vmatpush1.bf16.msra.mxu0 %v4345_v39 }
  0xa5   : > { %v4356_v41 = vpop.permute.xlu0 %621  ;;  %v624_v42 = vpop.permute.xlu1 %623 }
  0xa6   : > { %v4360_v43 = vsel %vm299_vm3, %v4356_v41, %v624_v42 }
  0xa7   : > { %5907 = vst [vmem:[#allocation13_spill] sm:$0xff] %v4360_v43  ;;  %656 = vrot.lane.b32.xlu0 %v4252_v9, %s4109_s22  ;;  %3629 = vmatprep.subr.bf16.mxu1 %v4360_v43 }
  0xa8   : > { %654 = vrot.lane.b32.xlu1 %v4255_v10, %s4109_s22 }
  0xa9   : > { %v334_v44 = vpop.permute.xlu0 %333  ;;  %v336_v45 = vpop.permute.xlu1 %335 }
  0xaa   : > { %v4368_v46 = vsel %vm337_vm4, %v334_v44, %v336_v45  ;;  %v4507_v45 = vld [vmem:[%s5699_s1 + $0x28] ss:$20 sps:$4 sm:$0xff]  }
  0xab   : > { %5908 = vst [vmem:[#allocation14_spill] sm:$0xff] %v4368_v46  ;;  %1298 = vrot.lane.b32.xlu0 %v4262_v11, %s4109_s22  ;;  %3630 = vmatpush3.bf16.msra.mxu1 %v4368_v46 }
  0xac   : > { %1300 = vrot.lane.b32.xlu1 %v4265_v12, %s4109_s22 }
  0xad   : > { %v294_v47 = vpop.permute.xlu0 %293  ;;  %v292_v48 = vpop.permute.xlu1 %291 }
  0xae   : > { %v4376_v49 = vsel %vm299_vm3, %v292_v48, %v294_v47  ;;  %v4379_v50 = vsel %vm299_vm3, %v294_v47, %v296_v34  ;;  %v4517_v47 = vld [vmem:[%s5699_s1 + $0xc] ss:$20 sps:$4 sm:$0xff]  }
  0xaf   : > { %5909 = vst [vmem:[#allocation15_spill] sm:$0xff] %v4379_v50  ;;  %1015 = vrot.lane.b32.xlu0 %v4218_v7, %s4110_s23  ;;  %1642 = vmatprep.subr.bf16.mxu0 %v4379_v50 }
  0xb0   : > { %1017 = vrot.lane.b32.xlu1 %v4221_v8, %s4110_s23  ;;  %1643 = vmatpush1.bf16.msra.mxu0 %v4376_v49 }
  0xb1   : > { %v4387_v51 = vpop.permute.xlu0 %658  ;;  %v661_v52 = vpop.permute.xlu1 %660 }
  0xb2   : > { %v4391_v53 = vsel %vm337_vm4, %v4387_v51, %v661_v52 }
  0xb3   : > { %5910 = vst [vmem:[#allocation16_spill] sm:$0xff] %v4391_v53  ;;  %693 = vrot.lane.b32.xlu0 %v4252_v9, %s4110_s23  ;;  %3631 = vmatprep.subr.bf16.mxu1 %v4391_v53 }
  0xb4   : > { %691 = vrot.lane.b32.xlu1 %v4255_v10, %s4110_s23 }
  0xb5   : > { %v372_v54 = vpop.permute.xlu0 %371  ;;  %v374_v55 = vpop.permute.xlu1 %373 }
  0xb6   : > { %v4399_v56 = vsel %vm375_vm5, %v372_v54, %v374_v55 }
  0xb7   : > { %5911 = vst [vmem:[#allocation17_spill] sm:$0xff] %v4399_v56  ;;  %1335 = vrot.lane.b32.xlu0 %v4262_v11, %s4110_s23  ;;  %3632 = vmatpush3.bf16.msra.mxu1 %v4399_v56 }
  0xb8   : > { %1337 = vrot.lane.b32.xlu1 %v4265_v12, %s4110_s23 }
  0xb9   : > { %v332_v57 = vpop.permute.xlu0 %331  ;;  %v330_v58 = vpop.permute.xlu1 %329 }
  0xba   : > { %v4407_v59 = vsel %vm337_vm4, %v330_v58, %v332_v57  ;;  %v4410_v60 = vsel %vm337_vm4, %v332_v57, %v334_v44 }
  0xbb   : > { %5912 = vst [vmem:[#allocation18_spill] sm:$0xff] %v4410_v60  ;;  %730 = vrot.lane.b32.xlu0 %v4252_v9, %s4111_s24  ;;  %1644 = vmatprep.subr.bf16.mxu0 %v4410_v60 }
  0xbc   : > { %728 = vrot.lane.b32.xlu1 %v4255_v10, %s4111_s24  ;;  %1645 = vmatpush1.bf16.msra.mxu0 %v4407_v59 }
  0xbd   : > { %v4418_v61 = vpop.permute.xlu0 %695  ;;  %v698_v62 = vpop.permute.xlu1 %697 }
  0xbe   : > { %v4422_v63 = vsel %vm375_vm5, %v4418_v61, %v698_v62 }
  0xbf   : > { %5913 = vst [vmem:[#allocation19_spill] sm:$0xff] %v4422_v63  ;;  %1372 = vrot.lane.b32.xlu0 %v4262_v11, %s4111_s24  ;;  %3633 = vmatprep.subr.bf16.mxu1 %v4422_v63 }
  0xc0   : > { %1374 = vrot.lane.b32.xlu1 %v4265_v12, %s4111_s24 }
  0xc1   : > { %v410_v0 = vpop.permute.xlu0 %409  ;;  %v412_v1 = vpop.permute.xlu1 %411 }
  0xc2   : > { %v4430_v3 = vsel %vm413_vm6, %v410_v0, %v412_v1 }
  0xc3   : > { %5914 = vst [vmem:[#allocation20_spill] sm:$0xff] %v4430_v3  ;;  %767 = vrot.lane.b32.xlu0 %v4252_v9, %s4112_s27  ;;  %3634 = vmatpush3.bf16.msra.mxu1 %v4430_v3 }
  0xc4   : > { %765 = vrot.lane.b32.xlu1 %v4255_v10, %s4112_s27 }
  0xc5   : > { %v370_v5 = vpop.permute.xlu0 %369  ;;  %v368_v6 = vpop.permute.xlu1 %367 }
  0xc6   : > { %v4438_v7 = vsel %vm375_vm5, %v368_v6, %v370_v5  ;;  %v4441_v8 = vsel %vm375_vm5, %v370_v5, %v372_v54 }
  0xc7   : > { %5915 = vst [vmem:[#allocation21_spill] sm:$0xff] %v4441_v8  ;;  %1409 = vrot.lane.b32.xlu0 %v4262_v11, %s4112_s27  ;;  %1646 = vmatprep.subr.bf16.mxu0 %v4441_v8 }
  0xc8   : > { %1411 = vrot.lane.b32.xlu1 %v4265_v12, %s4112_s27  ;;  %1647 = vmatpush1.bf16.msra.mxu0 %v4438_v7 }
  0xc9   : > { %v4449_v14 = vpop.permute.xlu0 %732  ;;  %v735_v16 = vpop.permute.xlu1 %734 }
  0xca   : > { %v4453_v17 = vsel %vm413_vm6, %v4449_v14, %v735_v16 }
  0xcb   : > { %5916 = vst [vmem:[#allocation22_spill] sm:$0xff] %v4453_v17  ;;  %804 = vrot.lane.b32.xlu0 %v4252_v9, %s4105_s18  ;;  %3635 = vmatprep.subr.bf16.mxu1 %v4453_v17 }
  0xcc   : > { %802 = vrot.lane.b32.xlu1 %v4255_v10, %s4105_s18 }
  0xcd   : > { %v448_v21 = vpop.permute.xlu0 %447  ;;  %v450_v24 = vpop.permute.xlu1 %449 }
  0xce   : > { %v4461_v25 = vsel %vm451_vm7, %v448_v21, %v450_v24 }
  0xcf   : > { %5917 = vst [vmem:[#allocation23_spill] sm:$0xff] %v4461_v25  ;;  %1446 = vrot.lane.b32.xlu0 %v4262_v11, %s4105_s18  ;;  %3636 = vmatpush3.bf16.msra.mxu1 %v4461_v25 }
  0xd0   : > { %1448 = vrot.lane.b32.xlu1 %v4265_v12, %s4105_s18 }
  0xd1   : > { %v408_v34 = vpop.permute.xlu0 %407  ;;  %v406_v35 = vpop.permute.xlu1 %405 }
  0xd2   : > { %v4485_v38 = vsel %vm413_vm6, %v408_v34, %v410_v0  ;;  %v4488_v11 = vsel %vm413_vm6, %v406_v35, %v408_v34  ;;  %1828 = vmatmul.mubr.bf16.vlgmr.msra.gmra.mrb[0].mxu1 %v4466_v27 }
  0xd3   : > { %5919 = vst [vmem:[#allocation25_spill] sm:$0xff] %v4485_v38  ;;  %865 = vrot.lane.b32.xlu0 %v4472_v28, %s4106_s19  ;;  %1648 = vmatprep.subr.bf16.mxu0 %v4485_v38 }
  0xd4   : > { %863 = vrot.lane.b32.xlu1 %v4477_v32, %s4106_s19  ;;  %1649 = vmatpush1.bf16.msra.mxu0 %v4488_v11 }
  0xd5   : > { %v4497_v12 = vpop.permute.xlu0 %1052  ;;  %v1055_v42 = vpop.permute.xlu1 %1054  ;;  %1835 = vmatprep.mubr.bf16.mxu1 %v4482_v37 }
  0xd6   : > { %v4502_v44 = vsel %vm413_vm6, %v4497_v12, %v1055_v42 }
  0xd7   : > { %5920 = vst [vmem:[#allocation26_spill] sm:$0xff] %v4502_v44  ;;  %902 = vrot.lane.b32.xlu0 %v4472_v28, %s4107_s20  ;;  %3649 = vmatprep.subr.bf16.mxu1 %v4502_v44 }
  0xd8   : > { %900 = vrot.lane.b32.xlu1 %v4477_v32, %s4107_s20 }
  0xd9   : > { %v4519_v48 = vpop.permute.xlu0 %769  ;;  %v772_v52 = vpop.permute.xlu1 %771 }
  0xda   : > { %v4523_v54 = vsel %vm451_vm7, %v4519_v48, %v772_v52  ;;  %1836 = vmatmul.mubr.bf16.gmra.mrb[4].mxu1 %v4507_v45  ;;  %v4580_v52 = vld [vmem:[%s4148_s17 + $0x48] ss:$16 sps:$4 sm:$0xff]  }
  0xdb   : > { %5921 = vst [vmem:[#allocation27_spill] sm:$0xff] %v4523_v54  ;;  %939 = vrot.lane.b32.xlu0 %v4472_v28, %s4108_s21  ;;  %3650 = vmatpush3.bf16.msra.mxu1 %v4523_v54  ;;  %5927 = vst [vmem:[#allocation33_spill] sm:$0xff] %v4580_v52 }
  0xdc   : > { %937 = vrot.lane.b32.xlu1 %v4477_v32, %s4108_s21  ;;  %1876 = vmatprep.mubr.bf16.mxu1 %v4517_v47 }
  0xdd   : > { %v446_v55 = vpop.permute.xlu0 %445  ;;  %v444_v57 = vpop.permute.xlu1 %443 }
  0xde   : > { %v4533_v58 = vsel %vm451_vm7, %v446_v55, %v448_v21  ;;  %v4536_v62 = vsel %vm451_vm7, %v444_v57, %v446_v55  ;;  %v4586_v57 = vld [vmem:[%s4148_s17 + $0x68] ss:$16 sps:$4 sm:$0xff]  }
  0xdf   : > { %5922 = vst [vmem:[#allocation28_spill] sm:$0xff] %v4536_v62  ;;  %976 = vrot.lane.b32.xlu0 %v4472_v28, %s4109_s22  ;;  %1650 = vmatprep.subr.bf16.mxu0 %v4533_v58  ;;  %5928 = vst [vmem:[#allocation34_spill] sm:$0xff] %v4586_v57 }
  0xe0   : > { %974 = vrot.lane.b32.xlu1 %v4477_v32, %s4109_s22  ;;  %1651 = vmatpush1.bf16.msra.mxu0 %v4536_v62 }
  0xe1   : > { %v4544_v0 = vpop.permute.xlu0 %1089  ;;  %v1092_v1 = vpop.permute.xlu1 %1091 }
  0xe2   : > { %v4548_v5 = vsel %vm451_vm7, %v4544_v0, %v1092_v1 }
  0xe3   : > { %5923 = vst [vmem:[#allocation29_spill] sm:$0xff] %v4548_v5  ;;  %1013 = vrot.lane.b32.xlu0 %v4472_v28, %s4110_s23  ;;  %3651 = vmatprep.subr.bf16.mxu1 %v4548_v5 }
  0xe4   : > { %1011 = vrot.lane.b32.xlu1 %v4477_v32, %s4110_s23 }
  0xe5   : > { %v4555_v6 = vpop.permute.xlu0 %806  ;;  %v809_v16 = vpop.permute.xlu1 %808 }
  0xe6   : > { %v4559_v21 = vsel %vm489_vm0, %v4555_v6, %v809_v16  ;;  %v4596_v16 = vld [vmem:[%s4148_s17 + $0x64] ss:$16 sps:$4 sm:$0xff]  }
  0xe7   : > { %5924 = vst [vmem:[#allocation30_spill] sm:$0xff] %v4559_v21  ;;  %1050 = vrot.lane.b32.xlu0 %v4472_v28, %s4111_s24  ;;  %3652 = vmatpush3.bf16.msra.mxu1 %v4559_v21 }
  0xe8   : > { %1048 = vrot.lane.b32.xlu1 %v4477_v32, %s4111_s24 }
  0xe9   : > { %v484_v24 = vpop.permute.xlu0 %483  ;;  %v482_v34 = vpop.permute.xlu1 %481 }
  0xea   : > { %v4568_v35 = vsel %vm489_vm0, %v484_v24, %v4267_v13  ;;  %v4571_v42 = vsel %vm489_vm0, %v482_v34, %v484_v24  ;;  %v4602_v24 = vld [vmem:[%s4148_s17 + $0x60] ss:$16 sps:$4 sm:$0xff]  }
  0xeb   : > { %5925 = vst [vmem:[#allocation31_spill] sm:$0xff] %v4568_v35  ;;  %5926 = vst [vmem:[#allocation32_spill] sm:$0xff] %v4571_v42  ;;  %1087 = vrot.lane.b32.xlu0 %v4472_v28, %s4112_s27  ;;  %1652 = vmatprep.subr.bf16.mxu0 %v4568_v35 }
  0xec   : > { %1085 = vrot.lane.b32.xlu1 %v4477_v32, %s4112_s27  ;;  %1653 = vmatpush1.bf16.msra.mxu0 %v4571_v42 }
  0xed   : > { %v4582_v55 = vpop.permute.xlu0 %1126  ;;  %v1129_v13 = vpop.permute.xlu1 %1128  ;;  %1654 = vmatprep.subr.bf16.mxu0 %v4252_v9 }
  0xee   : > { %v4590_v1 = vsel %vm489_vm0, %v4582_v55, %v1129_v13 }
  0xef   : > { %5929 = vst [vmem:[#allocation35_spill] sm:$0xff] %v4590_v1  ;;  %1124 = vrot.lane.b32.xlu0 %v4472_v28, %s4105_s18  ;;  %3653 = vmatprep.subr.bf16.mxu1 %v4590_v1 }
  0xf0   : > { %1122 = vrot.lane.b32.xlu1 %v4477_v32, %s4105_s18  ;;  %3654 = vmatpush3.bf16.msra.mxu1 %v4580_v52 }
  0xf1   : > { %v4604_v34 = vpop.permute.xlu0 %867  ;;  %v870_v21 = vpop.permute.xlu1 %869  ;;  %3655 = vmatprep.subr.bf16.mxu1 %v4586_v57  ;;  %1655 = vmatpush1.bf16.msra.mxu0 %v4255_v10 }
  0xf2   : > { %v4610_v13 = vsel %vm223_vm1, %v4604_v34, %v870_v21 }
  0xf3   : > { %5930 = vst [vmem:[#allocation36_spill] sm:$0xff] %v4610_v13  ;;  %1185 = vrot.lane.b32.xlu0 %v4596_v16, %s4106_s19 }
  0xf4   : > { %3656 = vmatpush3.bf16.msra.mxu1 %v4610_v13  ;;  %1183 = vrot.lane.b32.xlu1 %v4602_v24, %s4106_s19  ;;  %s5678_s19 = scalar_lea.vmem %s5701_s3, %s3981_s16 }
  0xf5   : > { %v546_v52 = vpop.permute.xlu0 %545  ;;  %v544_v1 = vpop.permute.xlu1 %543 }
  0xf6   : > { %v4619_v5 = vsel %vm223_vm1, %v546_v52, %v4289_v20  ;;  %v4622_v57 = vsel %vm223_vm1, %v544_v1, %v546_v52 }
  0xf7   : > { %1222 = vrot.lane.b32.xlu0 %v4596_v16, %s4107_s20  ;;  %1656 = vmatprep.subr.bf16.mxu0 %v4619_v5 }
  0xf8   : > { %1657 = vmatpush1.bf16.msra.mxu0 %v4622_v57  ;;  %1220 = vrot.lane.b32.xlu1 %v4602_v24, %s4107_s20 }
  0xf9   : > { %v4630_v21 = vpop.permute.xlu0 %1187  ;;  %v1190_v13 = vpop.permute.xlu1 %1189 }
  0xfa   : > { %v4634_v20 = vsel %vm223_vm1, %v4630_v21, %v1190_v13 }
  0xfb   : > { %5931 = vst [vmem:[#allocation37_spill] sm:$0xff] %v4634_v20  ;;  %1259 = vrot.lane.b32.xlu0 %v4596_v16, %s4108_s21  ;;  %3657 = vmatprep.subr.bf16.mxu1 %v4634_v20 }
  0xfc   : > { %1257 = vrot.lane.b32.xlu1 %v4602_v24, %s4108_s21 }
  0xfd   : > { %v4641_v52 = vpop.permute.xlu0 %904 }
  0xfe   : > { %v907_v1 = vpop.permute.xlu1 %906 }
  0xff   : > { %v4645_v54 = vsel %vm261_vm2, %v4641_v52, %v907_v1  ;;  %1296 = vrot.lane.b32.xlu0 %v4596_v16, %s4109_s22 }
 0x100   : > { %5932 = vst [vmem:[#allocation38_spill] sm:$0xff] %v4645_v54  ;;  %3658 = vmatpush3.bf16.msra.mxu1 %v4645_v54  ;;  %1294 = vrot.lane.b32.xlu1 %v4602_v24, %s4109_s22 }
 0x101   : > { %v583_v13 = vpop.permute.xlu0 %582 }
 0x102   : > { %v4654_v20 = vsel %vm261_vm2, %v583_v13, %v4325_v31  ;;  %v581_v44 = vpop.permute.xlu1 %580 }
 0x103   : > { %v4657_v25 = vsel %vm261_vm2, %v581_v44, %v583_v13  ;;  %1333 = vrot.lane.b32.xlu0 %v4596_v16, %s4110_s23  ;;  %1658 = vmatprep.subr.bf16.mxu0 %v4654_v20 }
 0x104   : > { %5933 = vst [vmem:[#allocation39_spill] sm:$0xff] %v4657_v25  ;;  %1659 = vmatpush1.bf16.msra.mxu0 %v4657_v25  ;;  %1331 = vrot.lane.b32.xlu1 %v4602_v24, %s4110_s23 }
 0x105   : > { %v4665_v1 = vpop.permute.xlu0 %1224 }
 0x106   : > { %v1227_v54 = vpop.permute.xlu1 %1226 }
 0x107   : > { %v4669_v31 = vsel %vm261_vm2, %v4665_v1, %v1227_v54  ;;  %1370 = vrot.lane.b32.xlu0 %v4596_v16, %s4111_s24  ;;  %v5734_v54 = vmov 0  }
 0x108   : > { %5934 = vst [vmem:[#allocation40_spill] sm:$0xff] %v4669_v31  ;;  %3659 = vmatprep.subr.bf16.mxu1 %v4669_v31  ;;  %1368 = vrot.lane.b32.xlu1 %v4602_v24, %s4111_s24 }
 0x109   : > { %v4676_v44 = vpop.permute.xlu0 %941  ;;  %4000 = vset.pattern.permute.xlu1 %v5734_v54  ;;  %3999 = vset.pattern.permute.xlu0 %v5734_v54 }
 0x10a   : > { %v944_v13 = vpop.permute.xlu1 %943 }
 0x10b   : > { %v4680_v17 = vsel %vm299_vm3, %v4676_v44, %v944_v13  ;;  %1407 = vrot.lane.b32.xlu0 %v4596_v16, %s4112_s27 }
 0x10c   : > { %5935 = vst [vmem:[#allocation41_spill] sm:$0xff] %v4680_v17  ;;  %3660 = vmatpush3.bf16.msra.mxu1 %v4680_v17  ;;  %1405 = vrot.lane.b32.xlu1 %v4602_v24, %s4112_s27 }
 0x10d   : > { %v620_v31 = vpop.permute.xlu0 %619 }
 0x10e   : > { %v4691_v3 = vsel %vm299_vm3, %v620_v31, %v4356_v41  ;;  %v618_v13 = vpop.permute.xlu1 %617 }
 0x10f   : > { %v4694_v63 = vsel %vm299_vm3, %v618_v13, %v620_v31  ;;  %1444 = vrot.lane.b32.xlu0 %v4596_v16, %s4105_s18  ;;  %1660 = vmatprep.subr.bf16.mxu0 %v4691_v3 }
 0x110   : > { %5936 = vst [vmem:[#allocation42_spill] sm:$0xff] %v4694_v63  ;;  %1661 = vmatpush1.bf16.msra.mxu0 %v4694_v63  ;;  %1442 = vrot.lane.b32.xlu1 %v4602_v24, %s4105_s18 }
 0x111   : > { %v4702_v17 = vpop.permute.xlu0 %1261 }
 0x112   : > { %v1264_v54 = vpop.permute.xlu1 %1263 }
 0x113   : > { %v4706_v41 = vsel %vm299_vm3, %v4702_v17, %v1264_v54 }
 0x114   : > { %5937 = vst [vmem:[#allocation43_spill] sm:$0xff] %v4706_v41  ;;  %3661 = vmatprep.subr.bf16.mxu1 %v4706_v41 }
 0x115   : > { %v4709_v31 = vpop.permute.xlu0 %978 }
 0x116   : > { %v981_v13 = vpop.permute.xlu1 %980 }
 0x117   : > { %v4713_v56 = vsel %vm337_vm4, %v4709_v31, %v981_v13 }
 0x118   : > { %5938 = vst [vmem:[#allocation44_spill] sm:$0xff] %v4713_v56  ;;  %3662 = vmatpush3.bf16.msra.mxu1 %v4713_v56 }
 0x119   : > { %v657_v53 = vpop.permute.xlu0 %656 }
 0x11a   : > { %v4718_v46 = vsel %vm337_vm4, %v657_v53, %v4387_v51  ;;  %v655_v43 = vpop.permute.xlu1 %654 }
 0x11b   : > { %5939 = vst [vmem:[#allocation45_spill] sm:$0xff] %v4718_v46  ;;  %v4721_v54 = vsel %vm337_vm4, %v655_v43, %v657_v53  ;;  %1662 = vmatprep.subr.bf16.mxu0 %v4718_v46  ;;  %v4741_v53 = vld [vmem:[%s5699_s1 + $0x8] ss:$20 sps:$4 sm:$0xff]  }
 0x11c   : > { %5940 = vst [vmem:[#allocation46_spill] sm:$0xff] %v4721_v54  ;;  %1663 = vmatpush1.bf16.msra.mxu0 %v4721_v54 }
 0x11d   : > { %v4725_v41 = vpop.permute.xlu0 %1298 }
 0x11e   : > { %v1301_v36 = vpop.permute.xlu1 %1300 }
 0x11f   : > { %v4729_v13 = vsel %vm337_vm4, %v4725_v41, %v1301_v36  ;;  %v4747_v36 = vld [vmem:[%s5699_s1 + $0x34] ss:$20 sps:$4 sm:$0xff]  }
 0x120   : > { %5941 = vst [vmem:[#allocation47_spill] sm:$0xff] %v4729_v13  ;;  %3663 = vmatprep.subr.bf16.mxu1 %v4729_v13 }
 0x121   : > { %v4732_v56 = vpop.permute.xlu0 %1015 }
 0x122   : > { %v1018_v51 = vpop.permute.xlu1 %1017 }
 0x123   : > { %v4736_v43 = vsel %vm375_vm5, %v4732_v56, %v1018_v51 }
 0x124   : > { %5942 = vst [vmem:[#allocation48_spill] sm:$0xff] %v4736_v43  ;;  %3664 = vmatpush3.bf16.msra.mxu1 %v4736_v43 }
 0x125   : > { %v694_v13 = vpop.permute.xlu0 %693 }
 0x126   : > { %v4751_v33 = vsel %vm375_vm5, %v694_v13, %v4418_v61  ;;  %v692_v26 = vpop.permute.xlu1 %691  ;;  %v4775_v61 = vld [vmem:[%s5699_s1 + $0x10] ss:$20 sps:$4 sm:$0xff]  }
 0x127   : > { %5943 = vst [vmem:[#allocation49_spill] sm:$0xff] %v4751_v33  ;;  %v4754_v51 = vsel %vm375_vm5, %v692_v26, %v694_v13  ;;  %1877 = vmatmul.mubr.bf16.vlgmr.msra.gmra.mrb[8].mxu1 %v4741_v53  ;;  %1664 = vmatprep.subr.bf16.mxu0 %v4751_v33  ;;  %v4769_v26 = vld [vmem:[%s5699_s1 + $0x30] ss:$20 sps:$4 sm:$0xff]   ;;  %5946 = vst [vmem:[#allocation52_spill] sm:$0xff] %v4775_v61 }
 0x128   : > { %5944 = vst [vmem:[#allocation50_spill] sm:$0xff] %v4754_v51  ;;  %1665 = vmatpush1.bf16.msra.mxu0 %v4754_v51  ;;  %1884 = vmatprep.mubr.bf16.mxu1 %v4747_v36 }
 0x129   : > { %v4760_v43 = vpop.permute.xlu0 %1335 }
 0x12a   : > { %v1338_v23 = vpop.permute.xlu1 %1337 }
 0x12b   : > { %v4764_v22 = vsel %vm375_vm5, %v4760_v43, %v1338_v23 }
 0x12c   : > { %5945 = vst [vmem:[#allocation51_spill] sm:$0xff] %v4764_v22  ;;  %3869 = vmatprep.subr.bf16.mxu1 %v4764_v22 }
 0x12d   : > { %3870 = vmatpush3.bf16.msra.mxu1 %v4764_v22  ;;  %v731_v13 = vpop.permute.xlu0 %730 }
 0x12e   : > { %v4780_v23 = vsel %vm413_vm6, %v731_v13, %v4449_v14  ;;  %v729_v18 = vpop.permute.xlu1 %728 }
 0x12f   : > { %5947 = vst [vmem:[#allocation53_spill] sm:$0xff] %v4780_v23  ;;  %v4783_v15 = vsel %vm413_vm6, %v729_v18, %v731_v13  ;;  %1885 = vmatmul.mubr.bf16.gmra.mrb[12].mxu1 %v4769_v26  ;;  %1666 = vmatprep.subr.bf16.mxu0 %v4780_v23 }
 0x130   : > { %5948 = vst [vmem:[#allocation54_spill] sm:$0xff] %v4783_v15  ;;  %1667 = vmatpush1.bf16.msra.mxu0 %v4783_v15  ;;  %3877 = vmatprep.mubr.msk.bf16.mxu1 %vm1629_vm8, %v4775_v61 }
 0x131   : > { %v4790_v22 = vpop.permute.xlu0 %1372 }
 0x132   : > { %v1375_v19 = vpop.permute.xlu1 %1374 }
 0x133   : > { %v4794_v14 = vsel %vm413_vm6, %v4790_v22, %v1375_v19  ;;  %1669 = vmatmul.mubr.bf16.vlgmr.msra.gmra.mrb[0].mxu0 %v4466_v27 }
 0x134   : > { %5949 = vst [vmem:[#allocation55_spill] sm:$0xff] %v4794_v14  ;;  %3871 = vmatprep.subr.bf16.mxu1 %v4794_v14  ;;  %1678 = vmatprep.mubr.bf16.mxu0 %v4482_v37 }
 0x135   : > { %3872 = vmatpush3.bf16.msra.mxu1 %v4794_v14  ;;  %v768_v18 = vpop.permute.xlu0 %767 }
 0x136   : > { %v4802_v13 = vsel %vm451_vm7, %v768_v18, %v4519_v48  ;;  %v766_v61 = vpop.permute.xlu1 %765 }
 0x137   : > { %5950 = vst [vmem:[#allocation56_spill] sm:$0xff] %v4802_v13  ;;  %v4805_v15 = vsel %vm451_vm7, %v766_v61, %v768_v18  ;;  %1689 = vmatprep.subr.bf16.mxu0 %v4802_v13 }
 0x138   : > { %5951 = vst [vmem:[#allocation57_spill] sm:$0xff] %v4805_v15  ;;  %1690 = vmatpush1.bf16.msra.mxu0 %v4805_v15 }
 0x139   : > { %v4809_v19 = vpop.permute.xlu0 %1409 }
 0x13a   : > { %v1412_v27 = vpop.permute.xlu1 %1411 }
 0x13b   : > { %v4813_v37 = vsel %vm451_vm7, %v4809_v19, %v1412_v27  ;;  %1679 = vmatmul.mubr.bf16.gmra.mrb[4].mxu0 %v4507_v45 }
 0x13c   : > { %5952 = vst [vmem:[#allocation58_spill] sm:$0xff] %v4813_v37  ;;  %3873 = vmatprep.subr.bf16.mxu1 %v4813_v37  ;;  %1721 = vmatprep.mubr.bf16.mxu0 %v4517_v47 }
 0x13d   : > { %3874 = vmatpush3.bf16.msra.mxu1 %v4813_v37  ;;  %v805_v48 = vpop.permute.xlu0 %804 }
 0x13e   : > { %v4821_v61 = vsel %vm489_vm0, %v805_v48, %v4555_v6  ;;  %v803_v18 = vpop.permute.xlu1 %802  ;;  %v4840_v6 = vld [vmem:[%s5699_s1 + $0x38] ss:$20 sps:$4 sm:$0xff]  }
 0x13f   : > { %5953 = vst [vmem:[#allocation59_spill] sm:$0xff] %v4821_v61  ;;  %v4824_v14 = vsel %vm489_vm0, %v803_v18, %v805_v48  ;;  %1691 = vmatprep.subr.bf16.mxu0 %v4821_v61  ;;  %v4846_v18 = vld [vmem:[%s5699_s1 + $0x54] ss:$20 sps:$4 sm:$0xff]  }
 0x140   : > { %5954 = vst [vmem:[#allocation60_spill] sm:$0xff] %v4824_v14  ;;  %1692 = vmatpush1.bf16.msra.mxu0 %v4824_v14 }
 0x141   : > { %v4828_v45 = vpop.permute.xlu0 %1446  ;;  %1693 = vmatprep.subr.bf16.mxu0 %v4472_v28 }
 0x142   : > { %v1449_v47 = vpop.permute.xlu1 %1448 }
 0x143   : > { %v4833_v27 = vsel %vm489_vm0, %v4828_v45, %v1449_v47 }
 0x144   : > { %5955 = vst [vmem:[#allocation61_spill] sm:$0xff] %v4833_v27  ;;  %3875 = vmatprep.subr.bf16.mxu1 %v4833_v27  ;;  %1694 = vmatpush1.bf16.msra.mxu0 %v4477_v32 }
 0x145   : > { %3876 = vmatpush3.bf16.msra.mxu1 %v4833_v27  ;;  %v866_v48 = vpop.permute.xlu0 %865 }
 0x146   : > { %v4850_v47 = vsel %vm223_vm1, %v866_v48, %v4604_v34  ;;  %v864_v37 = vpop.permute.xlu1 %863  ;;  %2011 = vmatprep.subr.bf16.mxu1 %v4155_v2 }
 0x147   : > { %5956 = vst [vmem:[#allocation62_spill] sm:$0xff] %v4850_v47  ;;  %v4854_v32 = vsel %vm223_vm1, %v864_v37, %v866_v48  ;;  %1695 = vmatprep.subr.bf16.mxu0 %v4850_v47 }
 0x148   : > { %5957 = vst [vmem:[#allocation63_spill] sm:$0xff] %v4854_v32  ;;  %3878 = vmatmul.mubr.msk.bf16.vlgmr.msra.gmra.mrb[16].mxu1 %vm1629_vm8, %v4840_v6  ;;  %1696 = vmatpush1.bf16.msra.mxu0 %v4854_v32 }
 0x149   : > { %2012 = vmatpush1.bf16.msra.mxu1 %v4159_v4  ;;  %v903_v27 = vpop.permute.xlu0 %902  ;;  %2043 = vmatprep.mubr.bf16.mxu1 %v4846_v18 }
 0x14a   : > { %v4864_v34 = vsel %vm261_vm2, %v903_v27, %v4641_v52  ;;  %2013 = vmatprep.subr.bf16.mxu1 %v4317_v30  ;;  %v901_v2 = vpop.permute.xlu1 %900 }
 0x14b   : > { %5958 = vst [vmem:[#allocation64_spill] sm:$0xff] %v4864_v34  ;;  %v4868_v37 = vsel %vm261_vm2, %v901_v2, %v903_v27  ;;  %1697 = vmatprep.subr.bf16.mxu0 %v4864_v34 }
 0x14c   : > { %5959 = vst [vmem:[#allocation65_spill] sm:$0xff] %v4868_v37  ;;  %1698 = vmatpush1.bf16.msra.mxu0 %v4868_v37 }
 0x14d   : > { %2014 = vmatpush1.bf16.msra.mxu1 %v4314_v29  ;;  %v940_v4 = vpop.permute.xlu0 %939 }
 0x14e   : > { %v4875_v48 = vsel %vm299_vm3, %v940_v4, %v4676_v44  ;;  %2015 = vmatprep.subr.bf16.mxu1 %v4348_v40  ;;  %v938_v52 = vpop.permute.xlu1 %937 }
 0x14f   : > { %5960 = vst [vmem:[#allocation66_spill] sm:$0xff] %v4875_v48  ;;  %v4879_v30 = vsel %vm299_vm3, %v938_v52, %v940_v4  ;;  %1699 = vmatprep.subr.bf16.mxu0 %v4875_v48 }
 0x150   : > { %5961 = vst [vmem:[#allocation67_spill] sm:$0xff] %v4879_v30  ;;  %1700 = vmatpush1.bf16.msra.mxu0 %v4879_v30 }
 0x151   : > { %2016 = vmatpush1.bf16.msra.mxu1 %v4345_v39  ;;  %v977_v27 = vpop.permute.xlu0 %976 }
 0x152   : > { %v4886_v2 = vsel %vm337_vm4, %v977_v27, %v4709_v31  ;;  %2017 = vmatprep.subr.bf16.mxu1 %v4379_v50  ;;  %v975_v44 = vpop.permute.xlu1 %974 }
 0x153   : > { %5962 = vst [vmem:[#allocation68_spill] sm:$0xff] %v4886_v2  ;;  %v4890_v40 = vsel %vm337_vm4, %v975_v44, %v977_v27  ;;  %1701 = vmatprep.subr.bf16.mxu0 %v4886_v2 }
 0x154   : > { %5963 = vst [vmem:[#allocation69_spill] sm:$0xff] %v4890_v40  ;;  %1702 = vmatpush1.bf16.msra.mxu0 %v4890_v40 }
 0x155   : > { %2018 = vmatpush1.bf16.msra.mxu1 %v4376_v49  ;;  %v1014_v4 = vpop.permute.xlu0 %1013 }
 0x156   : > { %v4897_v52 = vsel %vm375_vm5, %v1014_v4, %v4732_v56  ;;  %2019 = vmatprep.subr.bf16.mxu1 %v4410_v60  ;;  %v1012_v31 = vpop.permute.xlu1 %1011 }
 0x157   : > { %5964 = vst [vmem:[#allocation70_spill] sm:$0xff] %v4897_v52  ;;  %v4901_v50 = vsel %vm375_vm5, %v1012_v31, %v1014_v4  ;;  %1703 = vmatprep.subr.bf16.mxu0 %v4897_v52 }
 0x158   : > { %5965 = vst [vmem:[#allocation71_spill] sm:$0xff] %v4901_v50  ;;  %1704 = vmatpush1.bf16.msra.mxu0 %v4901_v50 }
 0x159   : > { %2020 = vmatpush1.bf16.msra.mxu1 %v4407_v59  ;;  %v1051_v27 = vpop.permute.xlu0 %1050 }
 0x15a   : > { %v4908_v44 = vsel %vm413_vm6, %v1051_v27, %v4497_v12  ;;  %2021 = vmatprep.subr.bf16.mxu1 %v4441_v8  ;;  %v1049_v56 = vpop.permute.xlu1 %1048 }
 0x15b   : > { %5966 = vst [vmem:[#allocation72_spill] sm:$0xff] %v4908_v44  ;;  %v4912_v60 = vsel %vm413_vm6, %v1049_v56, %v1051_v27  ;;  %1705 = vmatprep.subr.bf16.mxu0 %v4908_v44 }
 0x15c   : > { %5967 = vst [vmem:[#allocation73_spill] sm:$0xff] %v4912_v60  ;;  %1706 = vmatpush1.bf16.msra.mxu0 %v4912_v60 }
 0x15d   : > { %2022 = vmatpush1.bf16.msra.mxu1 %v4438_v7  ;;  %v1088_v4 = vpop.permute.xlu0 %1087 }
 0x15e   : > { %v4919_v31 = vsel %vm451_vm7, %v1088_v4, %v4544_v0  ;;  %2023 = vmatprep.subr.bf16.mxu1 %v4485_v38  ;;  %v1086_v12 = vpop.permute.xlu1 %1085 }
 0x15f   : > { %v4923_v8 = vsel %vm451_vm7, %v1086_v12, %v1088_v4  ;;  %1707 = vmatprep.subr.bf16.mxu0 %v4919_v31 }
 0x160   : > { %1708 = vmatpush1.bf16.msra.mxu0 %v4923_v8 }
 0x161   : > { %2024 = vmatpush1.bf16.msra.mxu1 %v4488_v11  ;;  %v1125_v27 = vpop.permute.xlu0 %1124 }
 0x162   : > { %v4930_v56 = vsel %vm489_vm0, %v1125_v27, %v4582_v55  ;;  %2025 = vmatprep.subr.bf16.mxu1 %v4533_v58  ;;  %v1123_v0 = vpop.permute.xlu1 %1122 }
 0x163   : > { %v4934_v38 = vsel %vm489_vm0, %v1123_v0, %v1125_v27  ;;  %1709 = vmatprep.subr.bf16.mxu0 %v4930_v56 }
 0x164   : > { %5968 = vst [vmem:[#allocation74_spill] sm:$0xff] %v4934_v38  ;;  %1710 = vmatpush1.bf16.msra.mxu0 %v4934_v38 }
 0x165   : > { %2026 = vmatpush1.bf16.msra.mxu1 %v4536_v62  ;;  %v1186_v4 = vpop.permute.xlu0 %1185  ;;  %1711 = vmatprep.subr.bf16.mxu0 %v4596_v16 }
 0x166   : > { %2027 = vmatprep.subr.bf16.mxu1 %v4568_v35  ;;  %v1184_v12 = vpop.permute.xlu1 %1183  ;;  %v4943_v55 = vsel %vm223_vm1, %v1186_v4, %v4630_v21 }
 0x167   : > { %v4949_v0 = vsel %vm223_vm1, %v1184_v12, %v1186_v4 }
 0x168   : > { %1712 = vmatpush1.bf16.msra.mxu0 %v4602_v24 }
 0x169   : > { %2028 = vmatpush1.bf16.msra.mxu1 %v4571_v42  ;;  %v1223_v27 = vpop.permute.xlu0 %1222  ;;  %1713 = vmatprep.subr.bf16.mxu0 %v4943_v55 }
 0x16a   : > { %2029 = vmatprep.subr.bf16.mxu1 %v4252_v9  ;;  %v1221_v62 = vpop.permute.xlu1 %1220  ;;  %v4954_v35 = vsel %vm261_vm2, %v1223_v27, %v4665_v1 }
 0x16b   : > { %v4960_v42 = vsel %vm261_vm2, %v1221_v62, %v1223_v27 }
 0x16c   : > { %1714 = vmatpush1.bf16.msra.mxu0 %v4949_v0  ;;  %5969 = vst [vmem:[#allocation75_spill] sm:$0xff] %v4960_v42 }
 0x16d   : > { %2030 = vmatpush1.bf16.msra.mxu1 %v4255_v10  ;;  %v1260_v21 = vpop.permute.xlu0 %1259  ;;  %1715 = vmatprep.subr.bf16.mxu0 %v4954_v35 }
 0x16e   : > { %2031 = vmatprep.subr.bf16.mxu1 %v4619_v5  ;;  %v1258_v4 = vpop.permute.xlu1 %1257  ;;  %v4965_v9 = vsel %vm299_vm3, %v1260_v21, %v4702_v17 }
 0x16f   : > { %5970 = vst [vmem:[#allocation76_spill] sm:$0xff] %v4965_v9  ;;  %v4971_v10 = vsel %vm299_vm3, %v1258_v4, %v1260_v21 }
 0x170   : > { %1716 = vmatpush1.bf16.msra.mxu0 %v4960_v42  ;;  %5971 = vst [vmem:[#allocation77_spill] sm:$0xff] %v4971_v10 }
 0x171   : > { %2032 = vmatpush1.bf16.msra.mxu1 %v4622_v57  ;;  %v1297_v1 = vpop.permute.xlu0 %1296  ;;  %1717 = vmatprep.subr.bf16.mxu0 %v4965_v9 }
 0x172   : > { %2033 = vmatprep.subr.bf16.mxu1 %v4654_v20  ;;  %v1295_v62 = vpop.permute.xlu1 %1294  ;;  %v4976_v12 = vsel %vm337_vm4, %v1297_v1, %v4725_v41 }
 0x173   : > { %5972 = vst [vmem:[#allocation78_spill] sm:$0xff] %v4976_v12  ;;  %v4982_v27 = vsel %vm337_vm4, %v1295_v62, %v1297_v1 }
 0x174   : > { %1718 = vmatpush1.bf16.msra.mxu0 %v4971_v10  ;;  %5973 = vst [vmem:[#allocation79_spill] sm:$0xff] %v4982_v27 }
 0x175   : > { %2034 = vmatpush1.bf16.msra.mxu1 %v4657_v25  ;;  %v1334_v17 = vpop.permute.xlu0 %1333  ;;  %1719 = vmatprep.subr.bf16.mxu0 %v4976_v12 }
 0x176   : > { %2035 = vmatprep.subr.bf16.mxu1 %v4691_v3  ;;  %v1332_v21 = vpop.permute.xlu1 %1331  ;;  %v4987_v4 = vsel %vm375_vm5, %v1334_v17, %v4760_v43 }
 0x177   : > { %5974 = vst [vmem:[#allocation80_spill] sm:$0xff] %v4987_v4  ;;  %v4993_v25 = vsel %vm375_vm5, %v1332_v21, %v1334_v17 }
 0x178   : > { %1720 = vmatpush1.bf16.msra.mxu0 %v4982_v27 }
 0x179   : > { %2036 = vmatpush1.bf16.msra.mxu1 %v4694_v63  ;;  %v1371_v41 = vpop.permute.xlu0 %1370  ;;  %1742 = vmatprep.subr.bf16.mxu0 %v4987_v4  ;;  %v6002_v63 = vld [vmem:[#allocation30_spill] sm:$0xff] }
 0x17a   : > { %2037 = vmatprep.subr.bf16.mxu1 %v4718_v46  ;;  %v1369_v1 = vpop.permute.xlu1 %1368  ;;  %v4999_v62 = vsel %vm413_vm6, %v1371_v41, %v4790_v22 }
 0x17b   : > { %1722 = vmatmul.mubr.bf16.vlgmr.msra.gmra.mrb[0].mxu0 %v4741_v53  ;;  %v5006_v17 = vsel %vm413_vm6, %v1369_v1, %v1371_v41 }
 0x17c   : > { %1743 = vmatpush1.bf16.msra.mxu0 %v4993_v25  ;;  %1731 = vmatprep.mubr.bf16.mxu0 %v4747_v36 }
 0x17d   : > { %2038 = vmatpush1.bf16.msra.mxu1 %v4721_v54  ;;  %v1408_v43 = vpop.permute.xlu0 %1407  ;;  %1744 = vmatprep.subr.bf16.mxu0 %v4999_v62  ;;  %v5999_v54 = vld [vmem:[#allocation26_spill] sm:$0xff] }
 0x17e   : > { %2039 = vmatprep.subr.bf16.mxu1 %v4751_v33  ;;  %v1406_v21 = vpop.permute.xlu1 %1405  ;;  %v5011_v53 = vsel %vm451_vm7, %v1408_v43, %v4809_v19  ;;  %v4043_v19 = vld [vmem:[%s5699_s1 + $0x50] ss:$20 sps:$4 sm:$0xff]   ;;  %v5979_v33 = vld [vmem:[#allocation54_spill] sm:$0xff] }
 0x17f   : > { %5975 = vst [vmem:[#allocation81_spill] sm:$0xff] %v5011_v53  ;;  %v5017_v36 = vsel %vm451_vm7, %v1406_v21, %v1408_v43  ;;  %v5982_v21 = vld [vmem:[#allocation52_spill] sm:$0xff] }
 0x180   : > { %1745 = vmatpush1.bf16.msra.mxu0 %v5006_v17  ;;  %5976 = vst [vmem:[#allocation82_spill] sm:$0xff] %v5017_v36 }
 0x181   : > { %2040 = vmatpush1.bf16.msra.mxu1 %v4754_v51  ;;  %v1445_v22 = vpop.permute.xlu0 %1444  ;;  %1746 = vmatprep.subr.bf16.mxu0 %v5011_v53  ;;  %v5978_v51 = vmov 0  }
 0x182   : > { %2041 = vmatprep.subr.bf16.mxu1 %v4780_v23  ;;  %v1443_v41 = vpop.permute.xlu1 %1442  ;;  %v5023_v1 = vsel %vm489_vm0, %v1445_v22, %v4828_v45  ;;  %v5981_v45 = vld [vmem:[#allocation5_spill] sm:$0xff]  ;;  %v5998_v23 = vld [vmem:[#allocation23_spill] sm:$0xff] }
 0x183   : > { %1732 = vmatmul.mubr.bf16.gmra.mrb[4].mxu0 %v4769_v26  ;;  %5977 = vst [vmem:[#allocation83_spill] sm:$0xff] %v5023_v1  ;;  %v5033_v43 = vsel %vm489_vm0, %v1443_v41, %v1445_v22  ;;  %v4046_v26 = vld [vmem:[%s5699_s1 + $0x7c] ss:$20 sps:$4 sm:$0xff]   ;;  %v5983_v22 = vld [vmem:[#allocation3_spill] sm:$0xff]  ;;  %v4048_v41 = vld [vmem:[%s5699_s1 + $0x78] ss:$20 sps:$4 sm:$0xff]  }
 0x184   : > { %1747 = vmatpush1.bf16.msra.mxu0 %v5017_v36  ;;  %1774 = vmatprep.mubr.bf16.mxu0 %v5978_v51  ;;  %5980 = vst [vmem:[#allocation84_spill] sm:$0xff] %v5033_v43 }
 0x185   : > { %2042 = vmatpush1.bf16.msra.mxu1 %v5979_v33  ;;  %1748 = vmatprep.subr.bf16.mxu0 %v5023_v1 }
 0x186   : > { %2064 = vmatprep.subr.bf16.mxu1 %v4802_v13  ;;  %v5984_v13 = vld [vmem:[#allocation4_spill] sm:$0xff] }
 0x188   : > { %1749 = vmatpush1.bf16.msra.mxu0 %v5033_v43  ;;  %2044 = vmatmul.mubr.bf16.vlgmr.msra.gmra.mrb[20].mxu1 %v4043_v19 }
 0x189   : > { %2065 = vmatpush1.bf16.msra.mxu1 %v4805_v15  ;;  %3683 = vmatprep.subr.bf16.mxu0 %v5981_v45  ;;  %v5985_v15 = vld [vmem:[#allocation6_spill] sm:$0xff] }
 0x18a   : > { %2066 = vmatprep.subr.bf16.mxu1 %v4821_v61  ;;  %2053 = vmatprep.mubr.bf16.mxu1 %v4046_v26  ;;  %v4051_v61 = vld [vmem:[%s5699_s1 + $0x5c] ss:$20 sps:$4 sm:$0xff]  }
 0x18b   : > { %3520 = vmatmul.mubr.msk.bf16.vlgmr.msra.gmra.mrb[0].mxu0 %vm1629_vm8, %v5982_v21  ;;  %v5986_v21 = vld [vmem:[#allocation24_spill] sm:$0xff] }
 0x18c   : > { %3684 = vmatpush3.bf16.msra.mxu0 %v5983_v22  ;;  %1784 = vmatprep.mubr.bf16.mxu0 %v5978_v51  ;;  %v5987_v22 = vld [vmem:[#allocation7_spill] sm:$0xff] }
 0x18d   : > { %2067 = vmatpush1.bf16.msra.mxu1 %v4824_v14  ;;  %3685 = vmatprep.subr.bf16.mxu0 %v5984_v13  ;;  %v5988_v13 = vld [vmem:[#allocation8_spill] sm:$0xff]  ;;  %v5990_v14 = vld [vmem:[#allocation11_spill] sm:$0xff] }
 0x18e   : > { %2068 = vmatprep.subr.bf16.mxu1 %v4472_v28  ;;  %v5989_v28 = vld [vmem:[#allocation10_spill] sm:$0xff] }
 0x190   : > { %3686 = vmatpush3.bf16.msra.mxu0 %v5985_v15  ;;  %2054 = vmatmul.mubr.bf16.gmra.mrb[24].mxu1 %v4048_v41 }
 0x191   : > { %2069 = vmatpush1.bf16.msra.mxu1 %v5986_v21  ;;  %3687 = vmatprep.subr.bf16.mxu0 %v5987_v22  ;;  %v5991_v21 = vld [vmem:[#allocation13_spill] sm:$0xff] }
 0x192   : > { %2070 = vmatprep.subr.bf16.mxu1 %v4850_v47  ;;  %2096 = vmatprep.mubr.bf16.mxu1 %v4051_v61  ;;  %v5992_v47 = vld [vmem:[#allocation14_spill] sm:$0xff] }
 0x193   : > { %3521 = vmatmul.mubr.msk.bf16.gmra.mrb[4].mxu0 %vm1629_vm8, %v4840_v6  ;;  %v5993_v6 = vld [vmem:[#allocation16_spill] sm:$0xff] }
 0x194   : > { %3688 = vmatpush3.bf16.msra.mxu0 %v5988_v13  ;;  %2202 = vmatprep.mubr.bf16.mxu0 %v4846_v18  ;;  %v5994_v18 = vld [vmem:[#allocation17_spill] sm:$0xff] }
 0x195   : > { %2071 = vmatpush1.bf16.msra.mxu1 %v4854_v32  ;;  %3689 = vmatprep.subr.bf16.mxu0 %v5989_v28 }
 0x196   : > { %2072 = vmatprep.subr.bf16.mxu1 %v4864_v34  ;;  %v5995_v34 = vld [vmem:[#allocation19_spill] sm:$0xff] }
 0x198   : > { %3690 = vmatpush3.bf16.msra.mxu0 %v5990_v14 }
 0x199   : > { %2073 = vmatpush1.bf16.msra.mxu1 %v4868_v37  ;;  %3691 = vmatprep.subr.bf16.mxu0 %v5991_v21  ;;  %v5996_v37 = vld [vmem:[#allocation20_spill] sm:$0xff] }
 0x19a   : > { %2074 = vmatprep.subr.bf16.mxu1 %v4875_v48  ;;  %v5997_v48 = vld [vmem:[#allocation22_spill] sm:$0xff] }
 0x19c   : > { %3692 = vmatpush3.bf16.msra.mxu0 %v5992_v47 }
 0x19d   : > { %2075 = vmatpush1.bf16.msra.mxu1 %v4879_v30  ;;  %3693 = vmatprep.subr.bf16.mxu0 %v5993_v6 }
 0x19e   : > { %2076 = vmatprep.subr.bf16.mxu1 %v4886_v2 }
 0x1a0   : > { %3694 = vmatpush3.bf16.msra.mxu0 %v5994_v18 }
 0x1a1   : > { %2077 = vmatpush1.bf16.msra.mxu1 %v4890_v40  ;;  %3695 = vmatprep.subr.bf16.mxu0 %v5995_v34 }
 0x1a2   : > { %2078 = vmatprep.subr.bf16.mxu1 %v4897_v52 }
 0x1a4   : > { %3696 = vmatpush3.bf16.msra.mxu0 %v5996_v37 }
 0x1a5   : > { %2079 = vmatpush1.bf16.msra.mxu1 %v4901_v50  ;;  %3697 = vmatprep.subr.bf16.mxu0 %v5997_v48  ;;  %v3637_v32 = vpop.f32.mrb[0].mxu1  ;;  %v6000_v50 = vld [vmem:[#allocation27_spill] sm:$0xff] }
 0x1a6   : > { %2080 = vmatprep.subr.bf16.mxu1 %v4908_v44  ;;  %v3638_v30 = vpop.f32.mrb[1].mxu1 }
 0x1a7   : > { %v5083_v33 = vadd.f32 %v3638_v30, %v3637_v32  ;;  %v3640_v2 = vpop.f32.mrb[2].mxu1  ;;  %v6001_v30 = vld [vmem:[#allocation29_spill] sm:$0xff] }
 0x1a8   : > { %3698 = vmatpush3.bf16.msra.mxu0 %v5998_v23  ;;  %v3641_v40 = vpop.f32.mrb[3].mxu1 }
 0x1a9   : > { %2081 = vmatpush1.bf16.msra.mxu1 %v4912_v60  ;;  %3711 = vmatprep.subr.bf16.mxu0 %v5999_v54  ;;  %v5088_v52 = vadd.f32 %v3641_v40, %v3640_v2  ;;  %v6003_v2 = vld [vmem:[#allocation35_spill] sm:$0xff] }
 0x1aa   : > { %2082 = vmatprep.subr.bf16.mxu1 %v4919_v31 }
 0x1ab   : > { %2203 = vmatmul.mubr.bf16.vlgmr.msra.gmra.mrb[8].mxu0 %v4043_v19 }
 0x1ac   : > { %3712 = vmatpush3.bf16.msra.mxu0 %v6000_v50  ;;  %2210 = vmatprep.mubr.bf16.mxu0 %v4046_v26  ;;  %v6004_v26 = vld [vmem:[#allocation33_spill] sm:$0xff] }
 0x1ad   : > { %2083 = vmatpush1.bf16.msra.mxu1 %v4923_v8  ;;  %3713 = vmatprep.subr.bf16.mxu0 %v6001_v30  ;;  %v3643_v32 = vpop.f32.mrb[4].mxu1 }
 0x1ae   : > { %2084 = vmatprep.subr.bf16.mxu1 %v4930_v56  ;;  %v3644_v44 = vpop.f32.mrb[5].mxu1 }
 0x1af   : > { %v5095_v46 = vadd.f32 %v3644_v44, %v3643_v32  ;;  %v3646_v60 = vpop.f32.mrb[6].mxu1  ;;  %v6005_v44 = vld [vmem:[#allocation34_spill] sm:$0xff]  ;;  %v6006_v32 = vld [vmem:[#allocation36_spill] sm:$0xff] }
 0x1b0   : > { %3714 = vmatpush3.bf16.msra.mxu0 %v6002_v63  ;;  %v3647_v40 = vpop.f32.mrb[7].mxu1 }
 0x1b1   : > { %2085 = vmatpush1.bf16.msra.mxu1 %v4934_v38  ;;  %3715 = vmatprep.subr.bf16.mxu0 %v6003_v2  ;;  %v5100_v19 = vadd.f32 %v3647_v40, %v3646_v60  ;;  %v6007_v38 = vld [vmem:[#allocation37_spill] sm:$0xff]  ;;  %v6008_v60 = vld [vmem:[#allocation38_spill] sm:$0xff] }
 0x1b2   : > { %2086 = vmatprep.subr.bf16.mxu1 %v4596_v16  ;;  %v6009_v16 = vld [vmem:[#allocation40_spill] sm:$0xff] }
 0x1b3   : > { %2211 = vmatmul.mubr.bf16.gmra.mrb[12].mxu0 %v4048_v41  ;;  %v6012_v41 = vld [vmem:[#allocation44_spill] sm:$0xff] }
 0x1b4   : > { %3716 = vmatpush3.bf16.msra.mxu0 %v6004_v26  ;;  %2251 = vmatprep.mubr.bf16.mxu0 %v4051_v61  ;;  %v6011_v61 = vld [vmem:[#allocation43_spill] sm:$0xff]  ;;  %v4049_v40 = vld [vmem:[%s5699_s1 + $0x58] ss:$20 sps:$4 sm:$0xff]  }
 0x1b5   : > { %2087 = vmatpush1.bf16.msra.mxu1 %v4602_v24  ;;  %3717 = vmatprep.subr.bf16.mxu0 %v6005_v44  ;;  %v6010_v24 = vld [vmem:[#allocation41_spill] sm:$0xff] }
 0x1b6   : > { %2088 = vmatprep.subr.bf16.mxu1 %v4943_v55 }
 0x1b8   : > { %3718 = vmatpush3.bf16.msra.mxu0 %v6006_v32 }
 0x1b9   : > { %2089 = vmatpush1.bf16.msra.mxu1 %v4949_v0  ;;  %3719 = vmatprep.subr.bf16.mxu0 %v6007_v38 }
 0x1ba   : > { %2090 = vmatprep.subr.bf16.mxu1 %v4954_v35 }
 0x1bc   : > { %3720 = vmatpush3.bf16.msra.mxu0 %v6008_v60 }
 0x1bd   : > { %2091 = vmatpush1.bf16.msra.mxu1 %v4960_v42  ;;  %3721 = vmatprep.subr.bf16.mxu0 %v6009_v16  ;;  %v6013_v42 = vld [vmem:[#allocation47_spill] sm:$0xff] }
 0x1be   : > { %2092 = vmatprep.subr.bf16.mxu1 %v4965_v9  ;;  %v6014_v9 = vld [vmem:[#allocation48_spill] sm:$0xff] }
 0x1c0   : > { %3722 = vmatpush3.bf16.msra.mxu0 %v6010_v24 }
 0x1c1   : > { %2093 = vmatpush1.bf16.msra.mxu1 %v4971_v10  ;;  %3723 = vmatprep.subr.bf16.mxu0 %v6011_v61  ;;  %v4052_v10 = vld [vmem:[%s5699_s1 + $0x84] ss:$20 sps:$4 sm:$0xff]  }
 0x1c2   : > { %2094 = vmatprep.subr.bf16.mxu1 %v4976_v12  ;;  %v6015_v12 = vld [vmem:[#allocation51_spill] sm:$0xff] }
 0x1c4   : > { %3724 = vmatpush3.bf16.msra.mxu0 %v6012_v41 }
 0x1c5   : > { %2095 = vmatpush1.bf16.msra.mxu1 %v4982_v27  ;;  %3725 = vmatprep.subr.bf16.mxu0 %v6013_v42  ;;  %v6016_v27 = vld [vmem:[#allocation55_spill] sm:$0xff] }
 0x1c6   : > { %2117 = vmatprep.subr.bf16.mxu1 %v4987_v4  ;;  %v4054_v4 = vld [vmem:[%s5699_s1 + $0x80] ss:$20 sps:$4 sm:$0xff]  }
 0x1c8   : > { %2097 = vmatmul.mubr.bf16.vlgmr.msra.gmra.mrb[20].mxu1 %v4049_v40  ;;  %3726 = vmatpush3.bf16.msra.mxu0 %v6014_v9 }
 0x1c9   : > { %2118 = vmatpush1.bf16.msra.mxu1 %v4993_v25  ;;  %3881 = vmatprep.subr.bf16.mxu0 %v6015_v12 }
 0x1ca   : > { %2119 = vmatprep.subr.bf16.mxu1 %v4999_v62  ;;  %2106 = vmatprep.mubr.bf16.mxu1 %v4052_v10 }
 0x1cb   : > { %2252 = vmatmul.mubr.bf16.vlgmr.msra.gmra.mrb[16].mxu0 %v4049_v40  ;;  %v6017_v40 = vld [vmem:[#allocation58_spill] sm:$0xff] }
 0x1cc   : > { %3882 = vmatpush3.bf16.msra.mxu0 %v6015_v12  ;;  %2259 = vmatprep.mubr.bf16.mxu0 %v4052_v10  ;;  %v4055_v10 = vld [vmem:[%s5699_s1 + $0x60] ss:$20 sps:$4 sm:$0xff]  }
 0x1cd   : > { %2120 = vmatpush1.bf16.msra.mxu1 %v5006_v17  ;;  %3883 = vmatprep.subr.bf16.mxu0 %v6016_v27 }
 0x1ce   : > { %2121 = vmatprep.subr.bf16.mxu1 %v5011_v53  ;;  %v5163_v53 = vld [vmem:[%s4148_s17 + $0x4] ss:$16 sps:$4 sm:$0xff]  }
 0x1d0   : > { %2107 = vmatmul.mubr.bf16.gmra.mrb[24].mxu1 %v4054_v4  ;;  %3884 = vmatpush3.bf16.msra.mxu0 %v6016_v27 }
 0x1d1   : > { %2122 = vmatpush1.bf16.msra.mxu1 %v5017_v36  ;;  %3885 = vmatprep.subr.bf16.mxu0 %v6017_v40  ;;  %v6018_v36 = vld [vmem:[#allocation61_spill] sm:$0xff] }
 0x1d2   : > { %2123 = vmatprep.subr.bf16.mxu1 %v5023_v1  ;;  %2149 = vmatprep.mubr.bf16.mxu1 %v5978_v51  ;;  %v4056_v1 = vld [vmem:[%s5699_s1 + $0x88] ss:$20 sps:$4 sm:$0xff]  }
 0x1d3   : > { %2260 = vmatmul.mubr.bf16.gmra.mrb[20].mxu0 %v4054_v4  ;;  %v5159_v4 = vld [vmem:[%s4148_s17 + $0x8] ss:$16 sps:$4 sm:$0xff]  }
 0x1d4   : > { %3886 = vmatpush3.bf16.msra.mxu0 %v6017_v40  ;;  %3889 = vmatprep.mubr.msk.bf16.mxu0 %vm1629_vm8, %v4055_v10  ;;  %6019 = vst [vmem:[#allocation52_spill] sm:$0xff] %v5159_v4 }
 0x1d5   : > { %2124 = vmatpush1.bf16.msra.mxu1 %v5033_v43  ;;  %3887 = vmatprep.subr.bf16.mxu0 %v6018_v36  ;;  %v5167_v43 = vld [vmem:[%s4148_s17 + $0x28] ss:$16 sps:$4 sm:$0xff]  }
 0x1d6   : > { %3745 = vmatprep.subr.bf16.mxu1 %v5981_v45  ;;  %6020 = vst [vmem:[#allocation3_spill] sm:$0xff] %v5167_v43  ;;  %v5176_v45 = vld [vmem:[%s4148_s17] ss:$16 sps:$4 sm:$0xff]  }
 0x1d8   : > { %3546 = vmatmul.mubr.msk.bf16.vlgmr.msra.gmra.mrb[20].mxu1 %vm1629_vm8, %v4055_v10  ;;  %3888 = vmatpush3.bf16.msra.mxu0 %v6018_v36  ;;  %v4059_v10 = vld [vmem:[%s5699_s1 + $0xa4] ss:$20 sps:$4 sm:$0xff]  }
 0x1d9   : > { %3746 = vmatpush3.bf16.msra.mxu1 %v5159_v4  ;;  %2398 = vmatprep.subr.bf16.mxu0 %v5163_v53  ;;  %v6021_v4 = vld [vmem:[#allocation9_spill] sm:$0xff] }
 0x1da   : > { %3747 = vmatprep.subr.bf16.mxu1 %v5167_v43  ;;  %2159 = vmatprep.mubr.bf16.mxu1 %v5978_v51  ;;  %v6022_v43 = vld [vmem:[#allocation12_spill] sm:$0xff] }
 0x1db   : > { %3890 = vmatmul.mubr.msk.bf16.vlgmr.msra.gmra.mrb[24].mxu0 %vm1629_vm8, %v4056_v1 }
 0x1dc   : > { %2399 = vmatpush1.bf16.msra.mxu0 %v5176_v45  ;;  %2430 = vmatprep.mubr.bf16.mxu0 %v4059_v10 }
 0x1dd   : > { %3748 = vmatpush3.bf16.msra.mxu1 %v5985_v15  ;;  %2400 = vmatprep.subr.bf16.mxu0 %v6021_v4  ;;  %v6023_v15 = vld [vmem:[#allocation15_spill] sm:$0xff] }
 0x1de   : > { %3749 = vmatprep.subr.bf16.mxu1 %v5987_v22  ;;  %v5242_v22 = vld [vmem:[%s4148_s17 + $0x20] ss:$16 sps:$4 sm:$0xff]  }
 0x1e0   : > { %3547 = vmatmul.mubr.msk.bf16.gmra.mrb[24].mxu1 %vm1629_vm8, %v4056_v1  ;;  %2401 = vmatpush1.bf16.msra.mxu0 %v4314_v29  ;;  %v6024_v1 = vld [vmem:[#allocation18_spill] sm:$0xff] }
 0x1e1   : > { %3750 = vmatpush3.bf16.msra.mxu1 %v5988_v13  ;;  %2402 = vmatprep.subr.bf16.mxu0 %v6022_v43 }
 0x1e2   : > { %3751 = vmatprep.subr.bf16.mxu1 %v5989_v28  ;;  %2589 = vmatprep.mubr.bf16.mxu1 %v4059_v10  ;;  %v6025_v10 = vld [vmem:[#allocation21_spill] sm:$0xff]  ;;  %v5227_v28 = vld [vmem:[%s5699_s1 + $0xc8] ss:$20 sps:$4 sm:$0xff]  }
 0x1e4   : > { %2403 = vmatpush1.bf16.msra.mxu0 %v4345_v39 }
 0x1e5   : > { %3752 = vmatpush3.bf16.msra.mxu1 %v5990_v14  ;;  %2404 = vmatprep.subr.bf16.mxu0 %v6023_v15  ;;  %v6029_v14 = vld [vmem:[#allocation32_spill] sm:$0xff] }
 0x1e6   : > { %3753 = vmatprep.subr.bf16.mxu1 %v5991_v21  ;;  %v6026_v21 = vld [vmem:[#allocation25_spill] sm:$0xff] }
 0x1e8   : > { %2405 = vmatpush1.bf16.msra.mxu0 %v4376_v49 }
 0x1e9   : > { %3754 = vmatpush3.bf16.msra.mxu1 %v5992_v47  ;;  %2406 = vmatprep.subr.bf16.mxu0 %v6024_v1 }
 0x1ea   : > { %3755 = vmatprep.subr.bf16.mxu1 %v5993_v6  ;;  %v5207_v6 = vld [vmem:[%s5699_s1 + $0xa0] ss:$20 sps:$4 sm:$0xff]  }
 0x1ec   : > { %2407 = vmatpush1.bf16.msra.mxu0 %v4407_v59 }
 0x1ed   : > { %3756 = vmatpush3.bf16.msra.mxu1 %v5994_v18  ;;  %2408 = vmatprep.subr.bf16.mxu0 %v6025_v10 }
 0x1ee   : > { %3757 = vmatprep.subr.bf16.mxu1 %v5995_v34  ;;  %v6028_v34 = vld [vmem:[#allocation31_spill] sm:$0xff] }
 0x1f0   : > { %2409 = vmatpush1.bf16.msra.mxu0 %v4438_v7 }
 0x1f1   : > { %3758 = vmatpush3.bf16.msra.mxu1 %v5996_v37  ;;  %2410 = vmatprep.subr.bf16.mxu0 %v6026_v21  ;;  %v5215_v37 = vld [vmem:[%s5699_s1 + $0xcc] ss:$20 sps:$4 sm:$0xff]  }
 0x1f2   : > { %3759 = vmatprep.subr.bf16.mxu1 %v5997_v48  ;;  %v6027_v48 = vld [vmem:[#allocation28_spill] sm:$0xff] }
 0x1f4   : > { %2411 = vmatpush1.bf16.msra.mxu0 %v4488_v11 }
 0x1f5   : > { %3760 = vmatpush3.bf16.msra.mxu1 %v5998_v23  ;;  %2412 = vmatprep.subr.bf16.mxu0 %v4533_v58 }
 0x1f6   : > { %3773 = vmatprep.subr.bf16.mxu1 %v5999_v54 }
 0x1f8   : > { %2590 = vmatmul.mubr.bf16.vlgmr.msra.gmra.mrb[28].mxu1 %v5207_v6  ;;  %2413 = vmatpush1.bf16.msra.mxu0 %v6027_v48 }
 0x1f9   : > { %3774 = vmatpush3.bf16.msra.mxu1 %v6000_v50  ;;  %2414 = vmatprep.subr.bf16.mxu0 %v6028_v34  ;;  %v5231_v50 = vld [vmem:[%s4148_s17 + $0x24] ss:$16 sps:$4 sm:$0xff]  }
 0x1fa   : > { %v3665_v18 = vpop.f32.mrb[8].mxu1  ;;  %3775 = vmatprep.subr.bf16.mxu1 %v6001_v30  ;;  %2597 = vmatprep.mubr.bf16.mxu1 %v5215_v37 }
 0x1fb   : > { %v3666_v54 = vpop.f32.mrb[9].mxu1 }
 0x1fc   : > { %v3667_v23 = vadd.f32 %v3666_v54, %v3665_v18  ;;  %v3668_v47 = vpop.f32.mrb[10].mxu1  ;;  %2415 = vmatpush1.bf16.msra.mxu0 %v6029_v14  ;;  %v5238_v54 = vld [vmem:[%s5699_s1 + $0xac] ss:$20 sps:$4 sm:$0xff]  }
 0x1fd   : > { %v3669_v13 = vpop.f32.mrb[11].mxu1  ;;  %3776 = vmatpush3.bf16.msra.mxu1 %v6002_v63  ;;  %2416 = vmatprep.subr.bf16.mxu0 %v5231_v50 }
 0x1fe   : > { %v3670_v30 = vadd.f32 %v3669_v13, %v3668_v47  ;;  %3777 = vmatprep.subr.bf16.mxu1 %v6003_v2  ;;  %v1879_v18 = vadd.f32 %v3667_v23, %v5083_v33 }
 0x200   : > { %2417 = vmatpush1.bf16.msra.mxu0 %v5242_v22  ;;  %2598 = vmatmul.mubr.bf16.gmra.mrb[32].mxu1 %v5227_v28  ;;  %v1882_v63 = vadd.f32 %v3670_v30, %v5088_v52 }
 0x201   : > { %3778 = vmatpush3.bf16.msra.mxu1 %v6004_v26  ;;  %2418 = vmatprep.subr.bf16.mxu0 %v4619_v5  ;;  %v6030_v26 = vld [vmem:[#allocation39_spill] sm:$0xff] }
 0x202   : > { %v3671_v47 = vpop.f32.mrb[12].mxu1  ;;  %3779 = vmatprep.subr.bf16.mxu1 %v6005_v44  ;;  %2638 = vmatprep.mubr.bf16.mxu1 %v5238_v54 }
 0x203   : > { %v3672_v13 = vpop.f32.mrb[13].mxu1 }
 0x204   : > { %v3673_v2 = vadd.f32 %v3672_v13, %v3671_v47  ;;  %v3674_v33 = vpop.f32.mrb[14].mxu1  ;;  %2419 = vmatpush1.bf16.msra.mxu0 %v4622_v57  ;;  %v6031_v47 = vld [vmem:[#allocation42_spill] sm:$0xff]  ;;  %v6032_v13 = vld [vmem:[#allocation45_spill] sm:$0xff] }
 0x205   : > { %v3675_v23 = vpop.f32.mrb[15].mxu1  ;;  %3780 = vmatpush3.bf16.msra.mxu1 %v6006_v32  ;;  %2420 = vmatprep.subr.bf16.mxu0 %v4654_v20 }
 0x206   : > { %v3676_v52 = vadd.f32 %v3675_v23, %v3674_v33  ;;  %3781 = vmatprep.subr.bf16.mxu1 %v6007_v38  ;;  %v1887_v30 = vadd.f32 %v3673_v2, %v5095_v46  ;;  %v6033_v33 = vld [vmem:[#allocation46_spill] sm:$0xff]  ;;  %v6034_v46 = vld [vmem:[#allocation49_spill] sm:$0xff] }
 0x207   : > { %v6035_v2 = vld [vmem:[#allocation50_spill] sm:$0xff]  ;;  %v6036_v23 = vld [vmem:[#allocation53_spill] sm:$0xff] }
 0x208   : > { %2421 = vmatpush1.bf16.msra.mxu0 %v6030_v26  ;;  %v1890_v44 = vadd.f32 %v3676_v52, %v5100_v19  ;;  %v5273_v19 = vld [vmem:[%s5699_s1 + $0xa8] ss:$20 sps:$4 sm:$0xff]  }
 0x209   : > { %3782 = vmatpush3.bf16.msra.mxu1 %v6008_v60  ;;  %2422 = vmatprep.subr.bf16.mxu0 %v4691_v3  ;;  %v5281_v52 = vld [vmem:[%s5699_s1 + $0xd4] ss:$20 sps:$4 sm:$0xff]   ;;  %v5296_v60 = vld [vmem:[%s5699_s1 + $0xd0] ss:$20 sps:$4 sm:$0xff]  }
 0x20a   : > { %3783 = vmatprep.subr.bf16.mxu1 %v6009_v16  ;;  %v6040_v16 = vld [vmem:[#allocation57_spill] sm:$0xff] }
 0x20c   : > { %2423 = vmatpush1.bf16.msra.mxu0 %v6031_v47 }
 0x20d   : > { %3784 = vmatpush3.bf16.msra.mxu1 %v6010_v24  ;;  %2424 = vmatprep.subr.bf16.mxu0 %v6032_v13 }
 0x20e   : > { %3785 = vmatprep.subr.bf16.mxu1 %v6011_v61 }
 0x210   : > { %2425 = vmatpush1.bf16.msra.mxu0 %v6033_v33 }
 0x211   : > { %3786 = vmatpush3.bf16.msra.mxu1 %v6012_v41  ;;  %2426 = vmatprep.subr.bf16.mxu0 %v6034_v46  ;;  %v6038_v41 = vld [vmem:[#allocation56_spill] sm:$0xff] }
 0x212   : > { %3787 = vmatprep.subr.bf16.mxu1 %v6013_v42  ;;  %v6037_v42 = vld [vmem:[#allocation54_spill] sm:$0xff] }
 0x214   : > { %2427 = vmatpush1.bf16.msra.mxu0 %v6035_v2 }
 0x215   : > { %3788 = vmatpush3.bf16.msra.mxu1 %v6014_v9  ;;  %2428 = vmatprep.subr.bf16.mxu0 %v6036_v23 }
 0x216   : > { %3893 = vmatprep.subr.bf16.mxu1 %v6015_v12 }
 0x218   : > { %2639 = vmatmul.mubr.bf16.vlgmr.msra.gmra.mrb[36].mxu1 %v5273_v19  ;;  %2429 = vmatpush1.bf16.msra.mxu0 %v6037_v42 }
 0x219   : > { %3894 = vmatpush3.bf16.msra.mxu1 %v6015_v12  ;;  %2451 = vmatprep.subr.bf16.mxu0 %v6038_v41 }
 0x21a   : > { %3895 = vmatprep.subr.bf16.mxu1 %v6016_v27  ;;  %2646 = vmatprep.mubr.bf16.mxu1 %v5281_v52 }
 0x21b   : > { %v3879_v9 = vpop.f32.mrb[16].mxu1  ;;  %2431 = vmatmul.mubr.bf16.vlgmr.msra.gmra.mrb[28].mxu0 %v5207_v6  ;;  %v6041_v6 = vld [vmem:[#allocation59_spill] sm:$0xff] }
 0x21c   : > { %v5290_v61 = vadd.f32 %v3879_v9, %v1887_v30  ;;  %v1927_v24 = vpop.f32.mrb[17].mxu1  ;;  %2452 = vmatpush1.bf16.msra.mxu0 %v6040_v16  ;;  %2440 = vmatprep.mubr.bf16.mxu0 %v5215_v37  ;;  %v6043_v37 = vld [vmem:[#allocation60_spill] sm:$0xff] }
 0x21d   : > { %v5299_v12 = vadd.f32 %v1927_v24, %v1879_v18  ;;  %v3880_v38 = vpop.f32.mrb[18].mxu1  ;;  %3896 = vmatpush3.bf16.msra.mxu1 %v6016_v27  ;;  %2453 = vmatprep.subr.bf16.mxu0 %v6041_v6  ;;  %v5317_v24 = vld [vmem:[%s4148_s17 + $0x44] ss:$16 sps:$4 sm:$0xff]   ;;  %v6044_v18 = vld [vmem:[#allocation62_spill] sm:$0xff] }
 0x21e   : > { %6039 = vst [vmem:[#allocation4_spill] sm:$0xff] %v5290_v61  ;;  %v5303_v9 = vadd.f32 %v3880_v38, %v1890_v44  ;;  %v1930_v30 = vpop.f32.mrb[19].mxu1  ;;  %3897 = vmatprep.subr.bf16.mxu1 %v6017_v40  ;;  %v5309_v61 = vld [vmem:[%s5699_s1 + $0xb0] ss:$20 sps:$4 sm:$0xff]  }
 0x21f   : > { %v5311_v32 = vadd.f32 %v1930_v30, %v1882_v63  ;;  %v5325_v38 = vld [vmem:[%s4148_s17 + $0x40] ss:$16 sps:$4 sm:$0xff]   ;;  %v5331_v63 = vld [vmem:[%s5699_s1 + $0xd8] ss:$20 sps:$4 sm:$0xff]  }
 0x220   : > { %2647 = vmatmul.mubr.bf16.gmra.mrb[40].mxu1 %v5296_v60  ;;  %2454 = vmatpush1.bf16.msra.mxu0 %v6043_v37  ;;  %v6045_v44 = vld [vmem:[#allocation63_spill] sm:$0xff]  ;;  %v6046_v30 = vld [vmem:[#allocation64_spill] sm:$0xff] }
 0x221   : > { %6042 = vst [vmem:[#allocation24_spill] sm:$0xff] %v5311_v32  ;;  %3898 = vmatpush3.bf16.msra.mxu1 %v6017_v40  ;;  %2455 = vmatprep.subr.bf16.mxu0 %v5317_v24  ;;  %v6050_v32 = vld [vmem:[#allocation68_spill] sm:$0xff] }
 0x222   : > { %3899 = vmatprep.subr.bf16.mxu1 %v6018_v36  ;;  %3901 = vmatprep.mubr.msk.bf16.mxu1 %vm1629_vm8, %v5309_v61 }
 0x223   : > { %2441 = vmatmul.mubr.bf16.gmra.mrb[32].mxu0 %v5227_v28  ;;  %v5340_v28 = vld [vmem:[%s5699_s1 + $0xf4] ss:$20 sps:$4 sm:$0xff]  }
 0x224   : > { %2456 = vmatpush1.bf16.msra.mxu0 %v5325_v38  ;;  %2483 = vmatprep.mubr.bf16.mxu0 %v5238_v54  ;;  %v6047_v54 = vld [vmem:[#allocation65_spill] sm:$0xff] }
 0x225   : > { %3900 = vmatpush3.bf16.msra.mxu1 %v6018_v36  ;;  %2457 = vmatprep.subr.bf16.mxu0 %v6044_v18  ;;  %v6049_v36 = vld [vmem:[#allocation67_spill] sm:$0xff] }
 0x226   : > { %2785 = vmatprep.subr.bf16.mxu1 %v5163_v53  ;;  %v6048_v53 = vld [vmem:[#allocation66_spill] sm:$0xff] }
 0x228   : > { %3902 = vmatmul.mubr.msk.bf16.vlgmr.msra.gmra.mrb[44].mxu1 %vm1629_vm8, %v5331_v63  ;;  %2458 = vmatpush1.bf16.msra.mxu0 %v6045_v44 }
 0x229   : > { %2786 = vmatpush1.bf16.msra.mxu1 %v5176_v45  ;;  %2459 = vmatprep.subr.bf16.mxu0 %v6046_v30  ;;  %v6051_v45 = vld [vmem:[#allocation69_spill] sm:$0xff] }
 0x22a   : > { %2787 = vmatprep.subr.bf16.mxu1 %v6021_v4  ;;  %2817 = vmatprep.mubr.bf16.mxu1 %v5340_v28  ;;  %v6052_v4 = vld [vmem:[#allocation70_spill] sm:$0xff] }
 0x22c   : > { %2460 = vmatpush1.bf16.msra.mxu0 %v6047_v54 }
 0x22d   : > { %2788 = vmatpush1.bf16.msra.mxu1 %v4314_v29  ;;  %2461 = vmatprep.subr.bf16.mxu0 %v6048_v53  ;;  %v6053_v29 = vld [vmem:[#allocation71_spill] sm:$0xff] }
 0x22e   : > { %2789 = vmatprep.subr.bf16.mxu1 %v6022_v43  ;;  %v6054_v43 = vld [vmem:[#allocation72_spill] sm:$0xff] }
 0x230   : > { %2462 = vmatpush1.bf16.msra.mxu0 %v6049_v36 }
 0x231   : > { %2790 = vmatpush1.bf16.msra.mxu1 %v4345_v39  ;;  %2463 = vmatprep.subr.bf16.mxu0 %v6050_v32  ;;  %v6055_v39 = vld [vmem:[#allocation73_spill] sm:$0xff] }
 0x232   : > { %2791 = vmatprep.subr.bf16.mxu1 %v6023_v15  ;;  %v6056_v15 = vld [vmem:[#allocation74_spill] sm:$0xff] }
 0x234   : > { %2464 = vmatpush1.bf16.msra.mxu0 %v6051_v45 }
 0x235   : > { %2792 = vmatpush1.bf16.msra.mxu1 %v4376_v49  ;;  %2465 = vmatprep.subr.bf16.mxu0 %v6052_v4  ;;  %v5376_v49 = vld [vmem:[%s4148_s17 + $0x64] ss:$16 sps:$4 sm:$0xff]  }
 0x236   : > { %2793 = vmatprep.subr.bf16.mxu1 %v6024_v1  ;;  %v6065_v1 = vld [vmem:[#allocation83_spill] sm:$0xff] }
 0x238   : > { %2466 = vmatpush1.bf16.msra.mxu0 %v6053_v29 }
 0x239   : > { %2794 = vmatpush1.bf16.msra.mxu1 %v4407_v59  ;;  %2467 = vmatprep.subr.bf16.mxu0 %v6054_v43  ;;  %v5381_v59 = vld [vmem:[%s4148_s17 + $0x60] ss:$16 sps:$4 sm:$0xff]  }
 0x23a   : > { %2795 = vmatprep.subr.bf16.mxu1 %v6025_v10 }
 0x23c   : > { %2468 = vmatpush1.bf16.msra.mxu0 %v6055_v39 }
 0x23d   : > { %2796 = vmatpush1.bf16.msra.mxu1 %v4438_v7  ;;  %2469 = vmatprep.subr.bf16.mxu0 %v4919_v31  ;;  %v6057_v7 = vld [vmem:[#allocation75_spill] sm:$0xff] }
 0x23e   : > { %2797 = vmatprep.subr.bf16.mxu1 %v6026_v21  ;;  %v5426_v21 = vld [vmem:[%s5699_s1 + $0xf0] ss:$20 sps:$4 sm:$0xff]  }
 0x240   : > { %2470 = vmatpush1.bf16.msra.mxu0 %v4923_v8 }
 0x241   : > { %2798 = vmatpush1.bf16.msra.mxu1 %v4488_v11  ;;  %2471 = vmatprep.subr.bf16.mxu0 %v4930_v56  ;;  %v6058_v11 = vld [vmem:[#allocation76_spill] sm:$0xff] }
 0x242   : > { %2799 = vmatprep.subr.bf16.mxu1 %v4533_v58  ;;  %v6059_v58 = vld [vmem:[#allocation77_spill] sm:$0xff] }
 0x244   : > { %2472 = vmatpush1.bf16.msra.mxu0 %v6056_v15 }
 0x245   : > { %2800 = vmatpush1.bf16.msra.mxu1 %v6027_v48  ;;  %2473 = vmatprep.subr.bf16.mxu0 %v5376_v49  ;;  %v6063_v48 = vld [vmem:[#allocation81_spill] sm:$0xff] }
 0x246   : > { %2801 = vmatprep.subr.bf16.mxu1 %v6028_v34 }
 0x248   : > { %2474 = vmatpush1.bf16.msra.mxu0 %v5381_v59 }
 0x249   : > { %2802 = vmatpush1.bf16.msra.mxu1 %v6029_v14  ;;  %2475 = vmatprep.subr.bf16.mxu0 %v4943_v55  ;;  %v6061_v14 = vld [vmem:[#allocation79_spill] sm:$0xff] }
 0x24a   : > { %2803 = vmatprep.subr.bf16.mxu1 %v5231_v50  ;;  %v6060_v50 = vld [vmem:[#allocation78_spill] sm:$0xff] }
 0x24c   : > { %2476 = vmatpush1.bf16.msra.mxu0 %v4949_v0 }
 0x24d   : > { %2804 = vmatpush1.bf16.msra.mxu1 %v5242_v22  ;;  %2477 = vmatprep.subr.bf16.mxu0 %v4954_v35  ;;  %v6064_v22 = vld [vmem:[#allocation82_spill] sm:$0xff] }
 0x24e   : > { %2805 = vmatprep.subr.bf16.mxu1 %v4619_v5  ;;  %v6062_v5 = vld [vmem:[#allocation80_spill] sm:$0xff] }
 0x250   : > { %2478 = vmatpush1.bf16.msra.mxu0 %v6057_v7 }
 0x251   : > { %2806 = vmatpush1.bf16.msra.mxu1 %v4622_v57  ;;  %2479 = vmatprep.subr.bf16.mxu0 %v6058_v11 }
 0x252   : > { %2807 = vmatprep.subr.bf16.mxu1 %v4654_v20 }
 0x254   : > { %2480 = vmatpush1.bf16.msra.mxu0 %v6059_v58 }
 0x255   : > { %2808 = vmatpush1.bf16.msra.mxu1 %v6030_v26  ;;  %2481 = vmatprep.subr.bf16.mxu0 %v6060_v50 }
 0x256   : > { %2809 = vmatprep.subr.bf16.mxu1 %v4691_v3 }
 0x258   : > { %2482 = vmatpush1.bf16.msra.mxu0 %v6061_v14 }
 0x259   : > { %2810 = vmatpush1.bf16.msra.mxu1 %v6031_v47  ;;  %2504 = vmatprep.subr.bf16.mxu0 %v6062_v5 }
 0x25a   : > { %2811 = vmatprep.subr.bf16.mxu1 %v6032_v13  ;;  %v6066_v13 = vld [vmem:[#allocation84_spill] sm:$0xff] }
 0x25b   : > { %2484 = vmatmul.mubr.bf16.vlgmr.msra.gmra.mrb[28].mxu0 %v5273_v19  ;;  %v6071_v19 = vld [vmem:[#allocation7_spill] sm:$0xff] }
 0x25c   : > { %2505 = vmatpush1.bf16.msra.mxu0 %v4993_v25  ;;  %2493 = vmatprep.mubr.bf16.mxu0 %v5281_v52  ;;  %v6073_v52 = vld [vmem:[#allocation10_spill] sm:$0xff] }
 0x25d   : > { %2812 = vmatpush1.bf16.msra.mxu1 %v6033_v33  ;;  %2506 = vmatprep.subr.bf16.mxu0 %v4999_v62  ;;  %v6068_v33 = vld [vmem:[#allocation52_spill] sm:$0xff] }
 0x25e   : > { %2813 = vmatprep.subr.bf16.mxu1 %v6034_v46  ;;  %v5409_v3 = vpop.f32.mrb[0].mxu0  ;;  %v5458_v46 = vld [vmem:[%s5699_s1 + $0x118] ss:$20 sps:$4 sm:$0xff]  }
 0x25f   : > { %v5411_v57 = vpop.f32.mrb[1].mxu0 }
 0x260   : > { %v5413_v20 = vpop.f32.mrb[2].mxu0  ;;  %2507 = vmatpush1.bf16.msra.mxu0 %v5006_v17 }
 0x261   : > { %2814 = vmatpush1.bf16.msra.mxu1 %v6035_v2  ;;  %v5417_v34 = vpop.f32.mrb[3].mxu0  ;;  %2508 = vmatprep.subr.bf16.mxu0 %v6063_v48  ;;  %v5466_v2 = vld [vmem:[%s5699_s1 + $0xfc] ss:$20 sps:$4 sm:$0xff]  }
 0x262   : > { %2815 = vmatprep.subr.bf16.mxu1 %v6036_v23  ;;  %v6072_v23 = vld [vmem:[#allocation8_spill] sm:$0xff] }
 0x263   : > { %2494 = vmatmul.mubr.bf16.gmra.mrb[32].mxu0 %v5296_v60  ;;  %v5437_v60 = vld [vmem:[%s5699_s1 + $0x11c] ss:$20 sps:$4 sm:$0xff]  }
 0x264   : > { %2509 = vmatpush1.bf16.msra.mxu0 %v6064_v22  ;;  %2536 = vmatprep.mubr.bf16.mxu0 %v5978_v51 }
 0x265   : > { %2816 = vmatpush1.bf16.msra.mxu1 %v6037_v42  ;;  %2510 = vmatprep.subr.bf16.mxu0 %v6065_v1 }
 0x266   : > { %2838 = vmatprep.subr.bf16.mxu1 %v6038_v41  ;;  %v5432_v10 = vpop.f32.mrb[4].mxu0  ;;  %v6067_v41 = vld [vmem:[#allocation5_spill] sm:$0xff] }
 0x267   : > { %v5439_v26 = vpop.f32.mrb[5].mxu0 }
 0x268   : > { %v5441_v47 = vpop.f32.mrb[6].mxu0  ;;  %2511 = vmatpush1.bf16.msra.mxu0 %v6066_v13  ;;  %2818 = vmatmul.mubr.bf16.vlgmr.msra.gmra.mrb[48].mxu1 %v5426_v21 }
 0x269   : > { %2839 = vmatpush1.bf16.msra.mxu1 %v6040_v16  ;;  %v5446_v42 = vpop.f32.mrb[7].mxu0  ;;  %3807 = vmatprep.subr.bf16.mxu0 %v6067_v41  ;;  %v6069_v16 = vld [vmem:[#allocation3_spill] sm:$0xff] }
 0x26a   : > { %2840 = vmatprep.subr.bf16.mxu1 %v6041_v6  ;;  %2827 = vmatprep.mubr.bf16.mxu1 %v5437_v60  ;;  %v6074_v6 = vld [vmem:[#allocation11_spill] sm:$0xff] }
 0x26b   : > { %3572 = vmatmul.mubr.msk.bf16.vlgmr.msra.gmra.mrb[28].mxu0 %vm1629_vm8, %v5309_v61  ;;  %v6070_v61 = vld [vmem:[#allocation6_spill] sm:$0xff]  ;;  %v6079_v41 = vld [vmem:[#allocation19_spill] sm:$0xff] }
 0x26c   : > { %3808 = vmatpush3.bf16.msra.mxu0 %v6068_v33  ;;  %2546 = vmatprep.mubr.bf16.mxu0 %v5978_v51  ;;  %v6080_v33 = vld [vmem:[#allocation20_spill] sm:$0xff] }
 0x26d   : > { %2841 = vmatpush1.bf16.msra.mxu1 %v6043_v37  ;;  %3809 = vmatprep.subr.bf16.mxu0 %v6069_v16  ;;  %v6075_v37 = vld [vmem:[#allocation13_spill] sm:$0xff] }
 0x26e   : > { %2842 = vmatprep.subr.bf16.mxu1 %v5317_v24  ;;  %v6076_v24 = vld [vmem:[#allocation14_spill] sm:$0xff]  ;;  %v3105_v16 = vld [vmem:[%s5700_s2 + $0x10] sm:$0xff] }
 0x270   : > { %3810 = vmatpush3.bf16.msra.mxu0 %v6070_v61  ;;  %2828 = vmatmul.mubr.bf16.gmra.mrb[52].mxu1 %v5458_v46  ;;  %v6081_v61 = vld [vmem:[#allocation22_spill] sm:$0xff] }
 0x271   : > { %2843 = vmatpush1.bf16.msra.mxu1 %v5325_v38  ;;  %3811 = vmatprep.subr.bf16.mxu0 %v6071_v19  ;;  %v6077_v38 = vld [vmem:[#allocation16_spill] sm:$0xff] }
 0x272   : > { %2844 = vmatprep.subr.bf16.mxu1 %v6044_v18  ;;  %2870 = vmatprep.mubr.bf16.mxu1 %v5466_v2 }
 0x273   : > { %3573 = vmatmul.mubr.msk.bf16.gmra.mrb[32].mxu0 %vm1629_vm8, %v5331_v63 }
 0x274   : > { %3812 = vmatpush3.bf16.msra.mxu0 %v6072_v23  ;;  %2976 = vmatprep.mubr.bf16.mxu0 %v5340_v28  ;;  %v6082_v23 = vld [vmem:[#allocation23_spill] sm:$0xff] }
 0x275   : > { %2845 = vmatpush1.bf16.msra.mxu1 %v6045_v44  ;;  %3813 = vmatprep.subr.bf16.mxu0 %v6073_v52 }
 0x276   : > { %2846 = vmatprep.subr.bf16.mxu1 %v6046_v30  ;;  %v6078_v30 = vld [vmem:[#allocation17_spill] sm:$0xff] }
 0x278   : > { %3814 = vmatpush3.bf16.msra.mxu0 %v6074_v6 }
 0x279   : > { %2847 = vmatpush1.bf16.msra.mxu1 %v6047_v54  ;;  %3815 = vmatprep.subr.bf16.mxu0 %v6075_v37  ;;  %v6083_v37 = vld [vmem:[#allocation26_spill] sm:$0xff] }
 0x27a   : > { %2848 = vmatprep.subr.bf16.mxu1 %v6048_v53 }
 0x27c   : > { %3816 = vmatpush3.bf16.msra.mxu0 %v6076_v24 }
 0x27d   : > { %2849 = vmatpush1.bf16.msra.mxu1 %v6049_v36  ;;  %3817 = vmatprep.subr.bf16.mxu0 %v6077_v38  ;;  %v3103_v36 = vld [vmem:[%s5700_s2] sm:$0xff]  ;;  %v6085_v38 = vld [vmem:[#allocation29_spill] sm:$0xff] }
 0x27e   : > { %2850 = vmatprep.subr.bf16.mxu1 %v6050_v32  ;;  %v3699_v63 = vpop.f32.mrb[8].mxu0  ;;  %v3104_v32 = vld [vmem:[%s5700_s2 + $0x8] sm:$0xff]  ;;  %3109 = vperm.xlu0 %3999, %v3103_v36  }
 0x27f   : > { %v3700_v18 = vpop.f32.mrb[9].mxu0  ;;  %3114 = vperm.xlu1 %4000, %v3104_v32   ;;  %v6096_v32 = vld [vmem:[#allocation48_spill] sm:$0xff] }
 0x280   : > { %v5489_v28 = vadd.f32 %v3700_v18, %v3699_v63  ;;  %v3702_v44 = vpop.f32.mrb[10].mxu0  ;;  %3818 = vmatpush3.bf16.msra.mxu0 %v6078_v30  ;;  %v6092_v63 = vld [vmem:[#allocation41_spill] sm:$0xff]  ;;  %v6093_v18 = vld [vmem:[#allocation43_spill] sm:$0xff] }
 0x281   : > { %2851 = vmatpush1.bf16.msra.mxu1 %v6051_v45  ;;  %v3703_v54 = vpop.f32.mrb[11].mxu0  ;;  %3819 = vmatprep.subr.bf16.mxu0 %v6079_v41  ;;  %v3106_v45 = vld [vmem:[%s5700_s2 + $0x18] sm:$0xff] }
 0x282   : > { %v3704_v53 = vadd.f32 %v3703_v54, %v3702_v44  ;;  %2852 = vmatprep.subr.bf16.mxu1 %v6052_v4  ;;  %3124 = vperm.xlu0 %3999, %v3106_v45   ;;  %v6094_v44 = vld [vmem:[#allocation44_spill] sm:$0xff]  ;;  %v6095_v54 = vld [vmem:[#allocation47_spill] sm:$0xff] }
 0x283   : > { %3119 = vperm.xlu1 %4000, %v3105_v16   ;;  %v6097_v45 = vld [vmem:[#allocation51_spill] sm:$0xff] }
 0x284   : > { %3820 = vmatpush3.bf16.msra.mxu0 %v6080_v33 }
 0x285   : > { %2853 = vmatpush1.bf16.msra.mxu1 %v6053_v29  ;;  %3821 = vmatprep.subr.bf16.mxu0 %v6081_v61 }
 0x286   : > { %2854 = vmatprep.subr.bf16.mxu1 %v6054_v43  ;;  %v3705_v19 = vpop.f32.mrb[12].mxu0  ;;  %v6084_v43 = vld [vmem:[#allocation27_spill] sm:$0xff] }
 0x287   : > { %v3706_v4 = vpop.f32.mrb[13].mxu0 }
 0x288   : > { %3822 = vmatpush3.bf16.msra.mxu0 %v6082_v23  ;;  %v3707_v52 = vadd.f32 %v3706_v4, %v3705_v19  ;;  %v3708_v6 = vpop.f32.mrb[14].mxu0 }
 0x289   : > { %2855 = vmatpush1.bf16.msra.mxu1 %v6055_v39  ;;  %3835 = vmatprep.subr.bf16.mxu0 %v6083_v37  ;;  %v3709_v24 = vpop.f32.mrb[15].mxu0  ;;  %v6086_v39 = vld [vmem:[#allocation30_spill] sm:$0xff] }
 0x28a   : > { %2856 = vmatprep.subr.bf16.mxu1 %v4919_v31  ;;  %v5515_v29 = vadd.f32 %v3709_v24, %v3708_v6  ;;  %v6087_v31 = vld [vmem:[#allocation35_spill] sm:$0xff] }
 0x28b   : > { %2977 = vmatmul.mubr.bf16.vlgmr.msra.gmra.mrb[36].mxu0 %v5426_v21  ;;  %v4095_v21 = vld [vmem:[%s4148_s17 + $0x48] ss:$16 sps:$4 sm:$0xff]  }
 0x28c   : > { %3836 = vmatpush3.bf16.msra.mxu0 %v6084_v43  ;;  %2984 = vmatprep.mubr.bf16.mxu0 %v5437_v60  ;;  %v6091_v60 = vld [vmem:[#allocation40_spill] sm:$0xff] }
 0x28d   : > { %2857 = vmatpush1.bf16.msra.mxu1 %v4923_v8  ;;  %3837 = vmatprep.subr.bf16.mxu0 %v6085_v38  ;;  %v4096_v8 = vld [vmem:[%s4148_s17 + $0x68] ss:$16 sps:$4 sm:$0xff]  }
 0x28e   : > { %2858 = vmatprep.subr.bf16.mxu1 %v4930_v56  ;;  %v6088_v56 = vld [vmem:[#allocation36_spill] sm:$0xff] }
 0x28f   : > { %v6098_v38 = vld [vmem:[#allocation4_spill] sm:$0xff] }
 0x290   : > { %3838 = vmatpush3.bf16.msra.mxu0 %v6086_v39 }
 0x291   : > { %2859 = vmatpush1.bf16.msra.mxu1 %v6056_v15  ;;  %3839 = vmatprep.subr.bf16.mxu0 %v6087_v31  ;;  %v6089_v15 = vld [vmem:[#allocation37_spill] sm:$0xff] }
 0x292   : > { %2860 = vmatprep.subr.bf16.mxu1 %v5376_v49  ;;  %v6090_v49 = vld [vmem:[#allocation38_spill] sm:$0xff] }
 0x293   : > { %2985 = vmatmul.mubr.bf16.gmra.mrb[40].mxu0 %v5458_v46 }
 0x294   : > { %3840 = vmatpush3.bf16.msra.mxu0 %v4095_v21  ;;  %3025 = vmatprep.mubr.bf16.mxu0 %v5466_v2 }
 0x295   : > { %2861 = vmatpush1.bf16.msra.mxu1 %v5381_v59  ;;  %3841 = vmatprep.subr.bf16.mxu0 %v4096_v8 }
 0x296   : > { %2862 = vmatprep.subr.bf16.mxu1 %v4943_v55 }
 0x298   : > { %3842 = vmatpush3.bf16.msra.mxu0 %v6088_v56 }
 0x299   : > { %2863 = vmatpush1.bf16.msra.mxu1 %v4949_v0  ;;  %3843 = vmatprep.subr.bf16.mxu0 %v6089_v15  ;;  %v6099_v15 = vld [vmem:[#allocation24_spill] sm:$0xff] }
 0x29a   : > { %2864 = vmatprep.subr.bf16.mxu1 %v4954_v35 }
 0x29c   : > { %3844 = vmatpush3.bf16.msra.mxu0 %v6090_v49 }
 0x29d   : > { %2865 = vmatpush1.bf16.msra.mxu1 %v6057_v7  ;;  %3845 = vmatprep.subr.bf16.mxu0 %v6091_v60 }
 0x29e   : > { %2866 = vmatprep.subr.bf16.mxu1 %v6058_v11  ;;  %v3727_v59 = vpop.f32.mrb[16].mxu0  ;;  %v4077_v11 = vld [vmem:[%s5699_s1 + $0xf8] ss:$20 sps:$4 sm:$0xff]  }
 0x29f   : > { %v3728_v46 = vpop.f32.mrb[17].mxu0 }
 0x2a0   : > { %v3729_v2 = vadd.f32 %v3728_v46, %v3727_v59  ;;  %v3730_v55 = vpop.f32.mrb[18].mxu0  ;;  %3846 = vmatpush3.bf16.msra.mxu0 %v6092_v63 }
 0x2a1   : > { %2867 = vmatpush1.bf16.msra.mxu1 %v6059_v58  ;;  %v3731_v0 = vpop.f32.mrb[19].mxu0  ;;  %3847 = vmatprep.subr.bf16.mxu0 %v6093_v18 }
 0x2a2   : > { %v3732_v35 = vadd.f32 %v3731_v0, %v3730_v55  ;;  %2868 = vmatprep.subr.bf16.mxu1 %v6060_v50  ;;  %v2254_v7 = vadd.f32 %v3729_v2, %v5489_v28  ;;  %v4080_v50 = vld [vmem:[%s5699_s1 + $0x124] ss:$20 sps:$4 sm:$0xff]  }
 0x2a4   : > { %3848 = vmatpush3.bf16.msra.mxu0 %v6094_v44  ;;  %v2257_v30 = vadd.f32 %v3732_v35, %v3704_v53 }
 0x2a5   : > { %2869 = vmatpush1.bf16.msra.mxu1 %v6061_v14  ;;  %3849 = vmatprep.subr.bf16.mxu0 %v6095_v54 }
 0x2a6   : > { %2891 = vmatprep.subr.bf16.mxu1 %v6062_v5  ;;  %v3733_v58 = vpop.f32.mrb[20].mxu0 }
 0x2a7   : > { %v3734_v41 = vpop.f32.mrb[21].mxu0 }
 0x2a8   : > { %v3735_v28 = vadd.f32 %v3734_v41, %v3733_v58  ;;  %2871 = vmatmul.mubr.bf16.vlgmr.msra.gmra.mrb[48].mxu1 %v4077_v11  ;;  %v3736_v36 = vpop.f32.mrb[22].mxu0  ;;  %3850 = vmatpush3.bf16.msra.mxu0 %v6096_v32 }
 0x2a9   : > { %2892 = vmatpush1.bf16.msra.mxu1 %v4993_v25  ;;  %v3737_v53 = vpop.f32.mrb[23].mxu0  ;;  %3905 = vmatprep.subr.bf16.mxu0 %v6097_v45  ;;  %v4082_v25 = vld [vmem:[%s5699_s1 + $0x120] ss:$20 sps:$4 sm:$0xff]  }
 0x2aa   : > { %v3738_v14 = vadd.f32 %v3737_v53, %v3736_v36  ;;  %2893 = vmatprep.subr.bf16.mxu1 %v4999_v62  ;;  %v2262_v5 = vadd.f32 %v3735_v28, %v3707_v52  ;;  %2880 = vmatprep.mubr.bf16.mxu1 %v4080_v50 }
 0x2ab   : > { %v5560_v33 = vpop.f32.mrb[20].mxu1  ;;  %3026 = vmatmul.mubr.bf16.vlgmr.msra.gmra.mrb[44].mxu0 %v4077_v11 }
 0x2ac   : > { %v2317_v16 = vmax.f32 %v5409_v3, %v5560_v33  ;;  %v5564_v61 = vpop.f32.mrb[21].mxu1  ;;  %3906 = vmatpush3.bf16.msra.mxu0 %v6097_v45  ;;  %v2265_v19 = vadd.f32 %v3738_v14, %v5515_v29  ;;  %3033 = vmatprep.mubr.bf16.mxu0 %v4080_v50 }
 0x2ad   : > { %v2318_v62 = vmax.f32 %v5411_v57, %v5564_v61  ;;  %v5573_v4 = vpop.f32.mrb[22].mxu1  ;;  %2894 = vmatpush1.bf16.msra.mxu1 %v5006_v17  ;;  %3907 = vmatprep.subr.bf16.mxu0 %v6016_v27 }
 0x2ae   : > { %v2320_v23 = vmax.f32 %v5413_v20, %v5573_v4  ;;  %v5579_v52 = vpop.f32.mrb[23].mxu1  ;;  %2895 = vmatprep.subr.bf16.mxu1 %v6063_v48  ;;  %v3891_v6 = vpop.f32.mrb[24].mxu0 }
 0x2af   : > { %v2321_v37 = vmax.f32 %v5417_v34, %v5579_v52  ;;  %v5584_v24 = vadd.f32 %v3891_v6, %v2262_v5  ;;  %v2302_v29 = vpop.f32.mrb[25].mxu0 }
 0x2b0   : > { %v5586_v43 = vadd.f32 %v2302_v29, %v2254_v7  ;;  %2881 = vmatmul.mubr.bf16.gmra.mrb[52].mxu1 %v4082_v25  ;;  %v3892_v17 = vpop.f32.mrb[26].mxu0  ;;  %3908 = vmatpush3.bf16.msra.mxu0 %v6016_v27  ;;  %v4083_v27 = vld [vmem:[%s5699_s1 + $0x100] ss:$20 sps:$4 sm:$0xff]  }
 0x2b1   : > { %v2325_v39 = vmax.f32 %v6098_v38, %v5584_v24  ;;  %v5591_v31 = vadd.f32 %v3892_v17, %v2265_v19  ;;  %2896 = vmatpush1.bf16.msra.mxu1 %v6064_v22  ;;  %v2305_v48 = vpop.f32.mrb[27].mxu0  ;;  %3909 = vmatprep.subr.bf16.mxu0 %v6017_v40 }
 0x2b2   : > { %v2319_v21 = vmax.f32 %v5299_v12, %v5586_v43  ;;  %v5597_v8 = vadd.f32 %v2305_v48, %v2257_v30  ;;  %2897 = vmatprep.subr.bf16.mxu1 %v6065_v1  ;;  %2923 = vmatprep.mubr.bf16.mxu1 %v5978_v51 }
 0x2b3   : > { %v2328_v56 = vmax.f32 %v5303_v9, %v5591_v31  ;;  %v5606_v22 = vpop.f32.mrb[24].mxu1  ;;  %3034 = vmatmul.mubr.bf16.gmra.mrb[48].mxu0 %v4082_v25  ;;  %v6100_v9 = vld [vmem:[#allocation61_spill] sm:$0xff] }
 0x2b4   : > { %v2322_v49 = vmax.f32 %v6099_v15, %v5597_v8  ;;  %v2323_v12 = vmax.f32 %v5432_v10, %v5606_v22  ;;  %v5612_v60 = vpop.f32.mrb[25].mxu1  ;;  %3910 = vmatpush3.bf16.msra.mxu0 %v6017_v40  ;;  %3913 = vmatprep.mubr.msk.bf16.mxu0 %vm1629_vm8, %v4083_v27  ;;  %v4084_v40 = vld [vmem:[%s5699_s1 + $0x128] ss:$20 sps:$4 sm:$0xff]  }
 0x2b5   : > { %v2324_v1 = vmax.f32 %v5439_v26, %v5612_v60  ;;  %v5618_v59 = vpop.f32.mrb[26].mxu1  ;;  %2898 = vmatpush1.bf16.msra.mxu1 %v6066_v13  ;;  %3911 = vmatprep.subr.bf16.mxu0 %v6100_v9 }
 0x2b6   : > { %v2326_v46 = vmax.f32 %v5441_v47, %v5618_v59  ;;  %v5624_v2 = vpop.f32.mrb[27].mxu1 }
 0x2b7   : > { %v2327_v55 = vmax.f32 %v5446_v42, %v5624_v2 }
 0x2b8   : > { %3598 = vmatmul.mubr.msk.bf16.vlgmr.msra.gmra.mrb[48].mxu1 %vm1629_vm8, %v4083_v27  ;;  %3912 = vmatpush3.bf16.msra.mxu0 %v6100_v9 }
 0x2b9   : > { %2933 = vmatprep.mubr.bf16.mxu1 %v5978_v51 }
 0x2bb   : > { %3914 = vmatmul.mubr.msk.bf16.vlgmr.msra.gmra.mrb[52].mxu0 %vm1629_vm8, %v4084_v40 }
 0x2c0   : > { %3599 = vmatmul.mubr.msk.bf16.gmra.mrb[52].mxu1 %vm1629_vm8, %v4084_v40 }
 0x2cb   : > { %v3761_v47 = vpop.f32.mrb[28].mxu1 }
 0x2cc   : > { %v3762_v13 = vpop.f32.mrb[29].mxu1 }
 0x2cd   : > { %v3763_v63 = vadd.f32 %v3762_v13, %v3761_v47  ;;  %v3764_v0 = vpop.f32.mrb[30].mxu1 }
 0x2ce   : > { %v3765_v18 = vpop.f32.mrb[31].mxu1 }
 0x2cf   : > { %v3766_v42 = vadd.f32 %v3765_v18, %v3764_v0 }
 0x2d3   : > { %v3767_v35 = vpop.f32.mrb[32].mxu1 }
 0x2d4   : > { %v3768_v7 = vpop.f32.mrb[33].mxu1 }
 0x2d5   : > { %v3769_v44 = vadd.f32 %v3768_v7, %v3767_v35  ;;  %v3770_v11 = vpop.f32.mrb[34].mxu1 }
 0x2d6   : > { %v3771_v30 = vpop.f32.mrb[35].mxu1 }
 0x2d7   : > { %v3772_v54 = vadd.f32 %v3771_v30, %v3770_v11 }
 0x2eb   : > { %v3789_v58 = vpop.f32.mrb[36].mxu1 }
 0x2ec   : > { %v3790_v50 = vpop.f32.mrb[37].mxu1 }
 0x2ed   : > { %v3791_v41 = vadd.f32 %v3790_v50, %v3789_v58  ;;  %v3792_v51 = vpop.f32.mrb[38].mxu1 }
 0x2ee   : > { %v3793_v28 = vpop.f32.mrb[39].mxu1 }
 0x2ef   : > { %v3794_v36 = vadd.f32 %v3793_v28, %v3792_v51  ;;  %v2641_v32 = vadd.f32 %v3791_v41, %v3763_v63 }
 0x2f1   : > { %v2644_v53 = vadd.f32 %v3794_v36, %v3766_v42 }
 0x2f3   : > { %v3795_v45 = vpop.f32.mrb[40].mxu1 }
 0x2f4   : > { %v3796_v14 = vpop.f32.mrb[41].mxu1 }
 0x2f5   : > { %v3797_v5 = vadd.f32 %v3796_v14, %v3795_v45  ;;  %v3798_v25 = vpop.f32.mrb[42].mxu1 }
 0x2f6   : > { %v3799_v19 = vpop.f32.mrb[43].mxu1 }
 0x2f7   : > { %v3800_v6 = vadd.f32 %v3799_v19, %v3798_v25  ;;  %v2649_v29 = vadd.f32 %v3797_v5, %v3769_v44 }
 0x2f9   : > { %v2652_v43 = vadd.f32 %v3800_v6, %v3772_v54 }
 0x2fb   : > { %v3903_v17 = vpop.f32.mrb[44].mxu1 }
 0x2fc   : > { %v2698_v31 = vadd.f32 %v3903_v17, %v2649_v29  ;;  %v2689_v48 = vpop.f32.mrb[45].mxu1 }
 0x2fd   : > { %v2690_v8 = vadd.f32 %v2689_v48, %v2641_v32  ;;  %v3904_v27 = vpop.f32.mrb[46].mxu1  ;;  %v3110_v14 = vpop.permute.xlu0 %3109 }
 0x2fe   : > { %v5639_v15 = vmax.f32 %v2325_v39, %v2698_v31  ;;  %v2701_v59 = vadd.f32 %v3904_v27, %v2652_v43  ;;  %v2692_v9 = vpop.f32.mrb[47].mxu1  ;;  %v3115_v32 = vpop.permute.xlu1 %3114 }
 0x2ff   : > { %v5641_v2 = vmax.f32 %v2319_v21, %v2690_v8  ;;  %v2693_v40 = vadd.f32 %v2692_v9, %v2644_v53 }
 0x300   : > { %v5643_v47 = vmax.f32 %v2328_v56, %v2701_v59 }
 0x301   : > { %v5645_v13 = vmax.f32 %v2322_v49, %v2693_v40 }
 0x33e   : > { %v2538_v63 = vpop.f32.mrb[28].mxu0 }
 0x33f   : > { %v2704_v0 = vmax.f32 %v2317_v16, %v2538_v63  ;;  %v2540_v18 = vpop.f32.mrb[29].mxu0 }
 0x340   : > { %v2705_v24 = vmax.f32 %v2318_v62, %v2540_v18  ;;  %v2542_v38 = vpop.f32.mrb[30].mxu0 }
 0x341   : > { %v2707_v39 = vmax.f32 %v2320_v23, %v2542_v38  ;;  %v2544_v21 = vpop.f32.mrb[31].mxu0 }
 0x342   : > { %v2708_v56 = vmax.f32 %v2321_v37, %v2544_v21  ;;  %v3120_v21 = vpop.permute.xlu1 %3119 }
 0x346   : > { %v2548_v49 = vpop.f32.mrb[32].mxu0 }
 0x347   : > { %v5662_v3 = vmax.f32 %v2323_v12, %v2548_v49  ;;  %v2550_v33 = vpop.f32.mrb[33].mxu0 }
 0x348   : > { %v5667_v57 = vmax.f32 %v2324_v1, %v2550_v33  ;;  %v2552_v16 = vpop.f32.mrb[34].mxu0 }
 0x349   : > { %v5669_v20 = vmax.f32 %v2326_v46, %v2552_v16  ;;  %v2554_v61 = vpop.f32.mrb[35].mxu0 }
 0x34a   : > { %v5671_v62 = vmax.f32 %v2327_v55, %v2554_v61 }
 0x35e   : > { %v3823_v34 = vpop.f32.mrb[36].mxu0 }
 0x35f   : > { %v3824_v4 = vpop.f32.mrb[37].mxu0 }
 0x360   : > { %v3825_v23 = vadd.f32 %v3824_v4, %v3823_v34  ;;  %v3826_v52 = vpop.f32.mrb[38].mxu0  ;;  %v3125_v34 = vpop.permute.xlu0 %3124 }
 0x361   : > { %v3827_v37 = vpop.f32.mrb[39].mxu0 }
 0x362   : > { %v3828_v10 = vadd.f32 %v3827_v37, %v3826_v52 }
 0x366   : > { %v3829_v22 = vpop.f32.mrb[40].mxu0 }
 0x367   : > { %v3830_v12 = vpop.f32.mrb[41].mxu0 }
 0x368   : > { %v3831_v42 = vadd.f32 %v3830_v12, %v3829_v22  ;;  %v3832_v35 = vpop.f32.mrb[42].mxu0 }
 0x369   : > { %v3833_v7 = vpop.f32.mrb[43].mxu0 }
 0x36a   : > { %v3834_v26 = vadd.f32 %v3833_v7, %v3832_v35 }
 0x37e   : > { %v3851_v60 = vpop.f32.mrb[44].mxu0 }
 0x37f   : > { %v3852_v1 = vpop.f32.mrb[45].mxu0 }
 0x380   : > { %v3853_v44 = vadd.f32 %v3852_v1, %v3851_v60  ;;  %v3854_v46 = vpop.f32.mrb[46].mxu0 }
 0x381   : > { %v3855_v11 = vpop.f32.mrb[47].mxu0 }
 0x382   : > { %v3856_v30 = vadd.f32 %v3855_v11, %v3854_v46  ;;  %v3028_v55 = vadd.f32 %v3853_v44, %v3825_v23 }
 0x384   : > { %v3031_v54 = vadd.f32 %v3856_v30, %v3828_v10 }
 0x386   : > { %v3857_v58 = vpop.f32.mrb[48].mxu0 }
 0x387   : > { %v3858_v50 = vpop.f32.mrb[49].mxu0 }
 0x388   : > { %v3859_v41 = vadd.f32 %v3858_v50, %v3857_v58  ;;  %v3860_v51 = vpop.f32.mrb[50].mxu0 }
 0x389   : > { %v3861_v28 = vpop.f32.mrb[51].mxu0 }
 0x38a   : > { %v3862_v36 = vadd.f32 %v3861_v28, %v3860_v51  ;;  %v3036_v53 = vadd.f32 %v3859_v41, %v3831_v42 }
 0x38b   : > { %v2925_v45 = vpop.f32.mrb[48].mxu1 }
 0x38c   : > { %v3091_v5 = vmax.f32 %v2704_v0, %v2925_v45  ;;  %v2927_v25 = vpop.f32.mrb[49].mxu1  ;;  %v3039_v19 = vadd.f32 %v3862_v36, %v3834_v26 }
 0x38d   : > { %v3092_v6 = vmax.f32 %v2705_v24, %v2927_v25  ;;  %v2929_v29 = vpop.f32.mrb[50].mxu1 }
 0x38e   : > { %v3127_v43 = vadd.f32 %v3110_v14, %v3091_v5  ;;  %v3094_v17 = vmax.f32 %v2707_v39, %v2929_v29  ;;  %v2931_v31 = vpop.f32.mrb[51].mxu1  ;;  %v3915_v48 = vpop.f32.mrb[52].mxu0 }
 0x38f   : > { %v3128_v8 = vadd.f32 %v3110_v14, %v3092_v6  ;;  %v3095_v27 = vmax.f32 %v2708_v56, %v2931_v31  ;;  %v3085_v59 = vadd.f32 %v3915_v48, %v3036_v53  ;;  %v3076_v9 = vpop.f32.mrb[53].mxu0 }
 0x390   : > { %v3139_v40 = vmax.f32 %v3127_v43, 0.0  ;;  %v3130_v63 = vadd.f32 %v3115_v32, %v3094_v17  ;;  %v3077_v18 = vadd.f32 %v3076_v9, %v3028_v55  ;;  %v3916_v38 = vpop.f32.mrb[54].mxu0 }
 0x391   : > { %v3140_v49 = vmax.f32 %v3128_v8, 0.0  ;;  %v3131_v0 = vadd.f32 %v3115_v32, %v3095_v27  ;;  %v3099_v33 = vmax.f32 %v5639_v15, %v3085_v59  ;;  %v3088_v24 = vadd.f32 %v3916_v38, %v3039_v19  ;;  %v3079_v16 = vpop.f32.mrb[55].mxu0 }
 0x392   : > { %v3142_v39 = vmax.f32 %v3130_v63, 0.0  ;;  %v3093_v56 = vmax.f32 %v5641_v2, %v3077_v18  ;;  %v3080_v61 = vadd.f32 %v3079_v16, %v3031_v54 }
 0x393   : > { %v3613_v4 = vpack.c.bf16 %v3140_v49, %v3139_v40  ;;  %v3143_v23 = vmax.f32 %v3131_v0, 0.0  ;;  %v3102_v52 = vmax.f32 %v5643_v47, %v3088_v24  ;;  %v3135_v37 = vadd.f32 %v3120_v21, %v3099_v33  ;;  %v2935_v10 = vpop.f32.mrb[52].mxu1 }
 0x394   : > { %v3129_v15 = vadd.f32 %v3110_v14, %v3093_v56  ;;  %v3096_v22 = vmax.f32 %v5645_v13, %v3080_v61  ;;  %v3097_v12 = vmax.f32 %v5662_v3, %v2935_v10  ;;  %v2937_v42 = vpop.f32.mrb[53].mxu1 }
 0x395   : > { %3191 = vst [vmem:[%s5678_s19] sm:$0xff] %v3613_v4  ;;  %v3615_v35 = vpack.c.bf16 %v3143_v23, %v3142_v39  ;;  %v3147_v7 = vmax.f32 %v3135_v37, 0.0  ;;  %v3098_v2 = vmax.f32 %v5667_v57, %v2937_v42  ;;  %v3138_v26 = vadd.f32 %v3125_v34, %v3102_v52  ;;  %v2939_v60 = vpop.f32.mrb[54].mxu1 }
 0x396   : > { %v3141_v1 = vmax.f32 %v3129_v15, 0.0  ;;  %v3132_v44 = vadd.f32 %v3115_v32, %v3096_v22  ;;  %v3133_v47 = vadd.f32 %v3120_v21, %v3097_v12  ;;  %v3100_v46 = vmax.f32 %v5669_v20, %v2939_v60  ;;  %v2941_v11 = vpop.f32.mrb[55].mxu1 }
 0x397   : > { %3193 = vst [vmem:[%s5678_s19 + $0xc] sm:$0xff] %v3615_v35  ;;  %v3618_v13 = vpack.c.bf16 %v3147_v7, %v3147_v7  ;;  %v3134_v3 = vadd.f32 %v3120_v21, %v3098_v2  ;;  %v3150_v30 = vmax.f32 %v3138_v26, 0.0  ;;  %v3101_v55 = vmax.f32 %v5671_v62, %v2941_v11 }
 0x398   : > { %v3614_v57 = vpack.c.bf16 %v3141_v1, %v3141_v1  ;;  %v3144_v54 = vmax.f32 %v3132_v44, 0.0  ;;  %v3145_v58 = vmax.f32 %v3133_v47, 0.0  ;;  %v3136_v50 = vadd.f32 %v3125_v34, %v3100_v46 }
 0x399   : > { %3196 = vst [vmem:[%s5678_s19 + $0x20] sm:$0xf] %v3618_v13  ;;  %v3146_v41 = vmax.f32 %v3134_v3, 0.0  ;;  %v3620_v51 = vpack.c.bf16 %v3150_v30, %v3150_v30  ;;  %v3137_v28 = vadd.f32 %v3125_v34, %v3101_v55 }
 0x39a   : > { %3192 = vst [vmem:[%s5678_s19 + $0x8] sm:$0xf] %v3614_v57  ;;  %v3616_v20 = vpack.c.bf16 %v3144_v54, %v3144_v54  ;;  %v3148_v36 = vmax.f32 %v3136_v50, 0.0 }
 0x39b   : > { %v3617_v32 = vpack.c.bf16 %v3146_v41, %v3145_v58  ;;  %3198 = vst [vmem:[%s5678_s19 + $0x2c] sm:$0xf] %v3620_v51  ;;  %v3149_v53 = vmax.f32 %v3137_v28, 0.0 }
 0x39c   : > { %3194 = vst [vmem:[%s5678_s19 + $0x14] sm:$0xf] %v3616_v20 }
 0x39d   : > { %3195 = vst [vmem:[%s5678_s19 + $0x18] sm:$0xff] %v3617_v32  ;;  %v3619_v45 = vpack.c.bf16 %v3149_v53, %v3148_v36 }
 0x39f   : > { %3197 = vst [vmem:[%s5678_s19 + $0x24] sm:$0xff] %v3619_v45 }
 0x3a0 PF: > { %s13_s12 = sadd.s32 1, %s4103_s12  }
 0x3a1   : > { %p10_p4 = scmp.ge.s32.totalorder %s13_s12, 4  }
 0x3a3   :  { %12 = sbr.rel (!%p10_p4) target bundleno = 1 (0x1), region = 68 }

// kernel: convnet_forward.5
= control target key start
LH: loop header
LB: loop body
LE: loop exit
PB: predicated region body
PF: predicated region fallthrough
CT: control target
= control target key end

     0   :  { %vm1518_vm0 = vmmov 0   ;;  %vm858_vm1 = vcmask 261120   ;;  %vm1142_vm2 = vcmask 80896   ;;  %s1860_s1 = inlined_call_operand.vmem [shape: bf16[1568,10], index: 1, kind: input, shape index: {}]   ;;  %s1861_s0 = inlined_call_operand.vmem [shape: bf16[8,1568], index: 0, kind: input, shape index: {}]   ;;  %s1862_s2 = inlined_call_operand.vmem [shape: f32[1,10], index: 2, kind: input, shape index: {}]   ;;  %s1863_s3 = inlined_call_operand.vmem [shape: f32[8,10], index: 3, kind: output, shape index: {}]  }
   0x1   :  { %v1406_v0 = vld [vmem:[%s1860_s1 + $0x40] sm:$0xff]   ;;  %v1410_v4 = vld [vmem:[%s1860_s1 + $0x48] sm:$0xff]   ;;  %v1414_v8 = vld [vmem:[%s1860_s1 + $0x50] sm:$0xff]  }
   0x2   :  { %v1407_v1 = vld [vmem:[%s1860_s1] sm:$0xff]   ;;  %1261 = vmatprep.subr.bf16.mxu0 %v1406_v0  ;;  %v1411_v5 = vld [vmem:[%s1860_s1 + $0x8] sm:$0xff]   ;;  %v1415_v9 = vld [vmem:[%s1860_s1 + $0x10] sm:$0xff]  }
   0x3   :  { %v1408_v2 = vld [vmem:[%s1860_s1 + $0xc0] sm:$0xff]   ;;  %1262 = vmatpush3.bf16.msra.mxu0 %v1407_v1  ;;  %v1412_v6 = vld [vmem:[%s1860_s1 + $0xc8] sm:$0xff]   ;;  %v1416_v10 = vld [vmem:[%s1860_s1 + $0xd0] sm:$0xff]  }
   0x4   :  { %v1409_v3 = vld [vmem:[%s1860_s1 + $0x80] sm:$0xff]   ;;  %1283 = vmatprep.subr.bf16.mxu1 %v1408_v2  ;;  %1263 = vmatprep.subr.bf16.mxu0 %v1410_v4  ;;  %v1413_v7 = vld [vmem:[%s1860_s1 + $0x88] sm:$0xff]   ;;  %v1417_v11 = vld [vmem:[%s1860_s1 + $0x90] sm:$0xff]  }
   0x5   :  { %1284 = vmatpush3.bf16.msra.mxu1 %v1409_v3  ;;  %v1418_v12 = vld [vmem:[%s1860_s1 + $0x58] sm:$0xff]   ;;  %v1422_v16 = vld [vmem:[%s1860_s1 + $0x60] sm:$0xff]   ;;  %v1426_v20 = vld [vmem:[%s1860_s1 + $0x68] sm:$0xff]  }
   0x6   :  { %1285 = vmatprep.subr.bf16.mxu1 %v1412_v6  ;;  %v1419_v13 = vld [vmem:[%s1860_s1 + $0x18] sm:$0xff]   ;;  %v1423_v17 = vld [vmem:[%s1860_s1 + $0x20] sm:$0xff]   ;;  %v1427_v21 = vld [vmem:[%s1860_s1 + $0x28] sm:$0xff]  }
   0x7   :  { %1264 = vmatpush3.bf16.msra.mxu0 %v1411_v5  ;;  %v1420_v14 = vld [vmem:[%s1860_s1 + $0xd8] sm:$0xff]   ;;  %v1424_v18 = vld [vmem:[%s1860_s1 + $0xe0] sm:$0xff]   ;;  %v1428_v22 = vld [vmem:[%s1860_s1 + $0xe8] sm:$0xff]  }
   0x8   :  { %1265 = vmatprep.subr.bf16.mxu0 %v1414_v8  ;;  %v1421_v15 = vld [vmem:[%s1860_s1 + $0x98] sm:$0xff]   ;;  %v1425_v19 = vld [vmem:[%s1860_s1 + $0xa0] sm:$0xff]   ;;  %v1429_v23 = vld [vmem:[%s1860_s1 + $0xa8] sm:$0xff]  }
   0x9   :  { %1286 = vmatpush3.bf16.msra.mxu1 %v1413_v7  ;;  %v1430_v24 = vld [vmem:[%s1860_s1 + $0x70] sm:$0xff]   ;;  %v1434_v28 = vld [vmem:[%s1860_s1 + $0x78] sm:$0xff]   ;;  %v15_v32 = vld [vmem:[%s1861_s0] sm:$0xff] }
   0xa   :  { %1287 = vmatprep.subr.bf16.mxu1 %v1416_v10  ;;  %v1431_v25 = vld [vmem:[%s1860_s1 + $0x30] sm:$0xff]   ;;  %v1435_v29 = vld [vmem:[%s1860_s1 + $0x38] sm:$0xff]   ;;  %v1149_v33 = vcombine.low %v15_v32, %v15_v32  ;;  %v1150_v34 = vcombine.high %v15_v32, %v15_v32  ;;  %v1440_v35 = vld [vmem:[%s1860_s1 + $0x140] sm:$0xff]  }
   0xb   :  { %1266 = vmatpush3.bf16.msra.mxu0 %v1415_v9  ;;  %v1432_v26 = vld [vmem:[%s1860_s1 + $0xf0] sm:$0xff]   ;;  %v1436_v30 = vld [vmem:[%s1860_s1 + $0xf8] sm:$0xff]   ;;  %v16_v36 = vld [vmem:[%s1861_s0 + $0x8] sm:$0xff] }
   0xc   :  { %1267 = vmatprep.subr.bf16.mxu0 %v1418_v12  ;;  %v1433_v27 = vld [vmem:[%s1860_s1 + $0xb0] sm:$0xff]   ;;  %v1437_v31 = vld [vmem:[%s1860_s1 + $0xb8] sm:$0xff]   ;;  %v1151_v37 = vcombine.low %v16_v36, %v16_v36  ;;  %v1152_v38 = vcombine.high %v16_v36, %v16_v36  ;;  %v1443_v39 = vld [vmem:[%s1860_s1 + $0x100] sm:$0xff]   ;;  %894 = vmatprep.mubr.bf16.mxu0 %v1150_v34 }
   0xd   :  { %1288 = vmatpush3.bf16.msra.mxu1 %v1417_v11  ;;  %v1444_v40 = vld [vmem:[%s1860_s1 + $0x1c0] sm:$0xff]   ;;  %v1446_v42 = vld [vmem:[%s1860_s1 + $0x148] sm:$0xff]   ;;  %v1450_v46 = vld [vmem:[%s1860_s1 + $0x150] sm:$0xff]  }
   0xe   :  { %1289 = vmatprep.subr.bf16.mxu1 %v1420_v14  ;;  %934 = vmatprep.mubr.bf16.mxu1 %v1152_v38  ;;  %v1445_v41 = vld [vmem:[%s1860_s1 + $0x180] sm:$0xff]   ;;  %v1447_v43 = vld [vmem:[%s1860_s1 + $0x108] sm:$0xff]   ;;  %v1451_v47 = vld [vmem:[%s1860_s1 + $0x110] sm:$0xff]  }
   0xf   :  { %1268 = vmatpush3.bf16.msra.mxu0 %v1419_v13  ;;  %v1448_v44 = vld [vmem:[%s1860_s1 + $0x1c8] sm:$0xff]   ;;  %v1452_v48 = vld [vmem:[%s1860_s1 + $0x1d0] sm:$0xff]   ;;  %v1454_v50 = vld [vmem:[%s1860_s1 + $0x158] sm:$0xff]  }
  0x10   :  { %1269 = vmatprep.subr.bf16.mxu0 %v1422_v16  ;;  %v1449_v45 = vld [vmem:[%s1860_s1 + $0x188] sm:$0xff]   ;;  %v1453_v49 = vld [vmem:[%s1860_s1 + $0x190] sm:$0xff]   ;;  %v1455_v51 = vld [vmem:[%s1860_s1 + $0x118] sm:$0xff]  }
  0x11   :  { %1290 = vmatpush3.bf16.msra.mxu1 %v1421_v15  ;;  %v1456_v52 = vld [vmem:[%s1860_s1 + $0x1d8] sm:$0xff]   ;;  %v1458_v54 = vld [vmem:[%s1860_s1 + $0x160] sm:$0xff]   ;;  %v1462_v58 = vld [vmem:[%s1860_s1 + $0x168] sm:$0xff]  }
  0x12   :  { %1291 = vmatprep.subr.bf16.mxu1 %v1424_v18  ;;  %v1457_v53 = vld [vmem:[%s1860_s1 + $0x198] sm:$0xff]   ;;  %v1459_v55 = vld [vmem:[%s1860_s1 + $0x120] sm:$0xff]   ;;  %v1463_v59 = vld [vmem:[%s1860_s1 + $0x128] sm:$0xff]  }
  0x13   :  { %1270 = vmatpush3.bf16.msra.mxu0 %v1423_v17  ;;  %v1460_v56 = vld [vmem:[%s1860_s1 + $0x1e0] sm:$0xff]   ;;  %v1464_v60 = vld [vmem:[%s1860_s1 + $0x1e8] sm:$0xff]   ;;  %v1466_v62 = vld [vmem:[%s1860_s1 + $0x170] sm:$0xff]  }
  0x14   :  { %1271 = vmatprep.subr.bf16.mxu0 %v1426_v20  ;;  %v1461_v57 = vld [vmem:[%s1860_s1 + $0x1a0] sm:$0xff]   ;;  %v1465_v61 = vld [vmem:[%s1860_s1 + $0x1a8] sm:$0xff]   ;;  %v1467_v63 = vld [vmem:[%s1860_s1 + $0x130] sm:$0xff]  }
  0x15   :  { %1292 = vmatpush3.bf16.msra.mxu1 %v1425_v19  ;;  %v1468_v0 = vld [vmem:[%s1860_s1 + $0x1f0] sm:$0xff]   ;;  %v1470_v2 = vld [vmem:[%s1860_s1 + $0x178] sm:$0xff]   ;;  %v1476_v9 = vld [vmem:[%s1860_s1 + $0x240] sm:$0xff]  }
  0x16   :  { %1293 = vmatprep.subr.bf16.mxu1 %v1428_v22  ;;  %v1469_v1 = vld [vmem:[%s1860_s1 + $0x1b0] sm:$0xff]   ;;  %v1471_v3 = vld [vmem:[%s1860_s1 + $0x138] sm:$0xff]   ;;  %v1479_v13 = vld [vmem:[%s1860_s1 + $0x200] sm:$0xff]  }
  0x17   :  { %1272 = vmatpush3.bf16.msra.mxu0 %v1427_v21  ;;  %v1472_v4 = vld [vmem:[%s1860_s1 + $0x1f8] sm:$0xff]   ;;  %v17_v6 = vld [vmem:[%s1861_s0 + $0x10] sm:$0xff]  ;;  %v1480_v14 = vld [vmem:[%s1860_s1 + $0x2c0] sm:$0xff]  }
  0x18   :  { %1273 = vmatprep.subr.bf16.mxu0 %v1430_v24  ;;  %v1473_v5 = vld [vmem:[%s1860_s1 + $0x1b8] sm:$0xff]   ;;  %v1153_v7 = vcombine.low %v17_v6, %v17_v6  ;;  %v1154_v8 = vcombine.high %v17_v6, %v17_v6  ;;  %v1481_v15 = vld [vmem:[%s1860_s1 + $0x280] sm:$0xff]   ;;  %v1482_v16 = vld [vmem:[%s1860_s1 + $0x248] sm:$0xff]  }
  0x19   :  { %1294 = vmatpush3.bf16.msra.mxu1 %v1429_v23  ;;  %v18_v10 = vld [vmem:[%s1861_s0 + $0x18] sm:$0xff]  ;;  %v1483_v17 = vld [vmem:[%s1860_s1 + $0x208] sm:$0xff]   ;;  %v1486_v20 = vld [vmem:[%s1860_s1 + $0x250] sm:$0xff]  }
  0x1a   :  { %1295 = vmatprep.subr.bf16.mxu1 %v1432_v26  ;;  %v1155_v11 = vcombine.low %v18_v10, %v18_v10  ;;  %v1156_v12 = vcombine.high %v18_v10, %v18_v10  ;;  %v1484_v18 = vld [vmem:[%s1860_s1 + $0x2c8] sm:$0xff]   ;;  %v1487_v21 = vld [vmem:[%s1860_s1 + $0x210] sm:$0xff]   ;;  %v1490_v24 = vld [vmem:[%s1860_s1 + $0x258] sm:$0xff]  }
  0x1b   :  { %1274 = vmatpush3.bf16.msra.mxu0 %v1431_v25  ;;  %v1485_v19 = vld [vmem:[%s1860_s1 + $0x288] sm:$0xff]   ;;  %v1488_v22 = vld [vmem:[%s1860_s1 + $0x2d0] sm:$0xff]   ;;  %v1491_v25 = vld [vmem:[%s1860_s1 + $0x218] sm:$0xff]  }
  0x1c   :  { %1275 = vmatprep.subr.bf16.mxu0 %v1434_v28  ;;  %v1489_v23 = vld [vmem:[%s1860_s1 + $0x290] sm:$0xff]   ;;  %v1492_v26 = vld [vmem:[%s1860_s1 + $0x2d8] sm:$0xff]   ;;  %v1494_v28 = vld [vmem:[%s1860_s1 + $0x260] sm:$0xff]  }
  0x1d   :  { %1296 = vmatpush3.bf16.msra.mxu1 %v1433_v27  ;;  %v1493_v27 = vld [vmem:[%s1860_s1 + $0x298] sm:$0xff]   ;;  %v1498_v32 = vld [vmem:[%s1860_s1 + $0x268] sm:$0xff]   ;;  %v1502_v36 = vld [vmem:[%s1860_s1 + $0x270] sm:$0xff]  }
  0x1e   :  { %1297 = vmatprep.subr.bf16.mxu1 %v1436_v30  ;;  %v1496_v30 = vld [vmem:[%s1860_s1 + $0x2e0] sm:$0xff]   ;;  %v1500_v34 = vld [vmem:[%s1860_s1 + $0x2e8] sm:$0xff]   ;;  %v1504_v38 = vld [vmem:[%s1860_s1 + $0x2f0] sm:$0xff]  }
  0x1f   :  { %1276 = vmatpush3.bf16.msra.mxu0 %v1435_v29  ;;  %v1495_v29 = vld [vmem:[%s1860_s1 + $0x220] sm:$0xff]  }
  0x20   :  { %1305 = vmatprep.subr.bf16.mxu0 %v1440_v35  ;;  %v1501_v35 = vld [vmem:[%s1860_s1 + $0x2a8] sm:$0xff]  }
  0x21   :  { %1298 = vmatpush3.bf16.msra.mxu1 %v1437_v31  ;;  %v1497_v31 = vld [vmem:[%s1860_s1 + $0x2a0] sm:$0xff]  }
  0x22   :  { %895 = vmatmul.mubr.bf16.vlgmr.msra.gmra.mrb[0].mxu0 %v1149_v33  ;;  %1327 = vmatprep.subr.bf16.mxu1 %v1444_v40  ;;  %v1499_v33 = vld [vmem:[%s1860_s1 + $0x228] sm:$0xff]   ;;  %v1506_v40 = vld [vmem:[%s1860_s1 + $0x278] sm:$0xff]  }
  0x23   :  { %1306 = vmatpush3.bf16.msra.mxu0 %v1443_v39  ;;  %974 = vmatprep.mubr.bf16.mxu0 %v1154_v8  ;;  %v1505_v39 = vld [vmem:[%s1860_s1 + $0x2b0] sm:$0xff]  }
  0x24   :  { %935 = vmatmul.mubr.bf16.vlgmr.msra.gmra.mrb[0].mxu1 %v1151_v37  ;;  %1307 = vmatprep.subr.bf16.mxu0 %v1446_v42  ;;  %v1503_v37 = vld [vmem:[%s1860_s1 + $0x230] sm:$0xff]   ;;  %v1508_v42 = vld [vmem:[%s1860_s1 + $0x2f8] sm:$0xff]  }
  0x25   :  { %1328 = vmatpush3.bf16.msra.mxu1 %v1445_v41  ;;  %1014 = vmatprep.mubr.bf16.mxu1 %v1156_v12  ;;  %v1507_v41 = vld [vmem:[%s1860_s1 + $0x238] sm:$0xff]  }
  0x26   :  { %1329 = vmatprep.subr.bf16.mxu1 %v1448_v44  ;;  %v19_v44 = vld [vmem:[%s1861_s0 + $0x20] sm:$0xff] }
  0x27   :  { %1308 = vmatpush3.bf16.msra.mxu0 %v1447_v43  ;;  %v1509_v43 = vld [vmem:[%s1860_s1 + $0x2b8] sm:$0xff]  }
  0x28   :  { %1309 = vmatprep.subr.bf16.mxu0 %v1450_v46  ;;  %v1157_v46 = vcombine.low %v19_v44, %v19_v44 }
  0x29   :  { %1330 = vmatpush3.bf16.msra.mxu1 %v1449_v45  ;;  %v20_v45 = vld [vmem:[%s1861_s0 + $0x28] sm:$0xff] }
  0x2a   :  { %1331 = vmatprep.subr.bf16.mxu1 %v1452_v48  ;;  %v1159_v48 = vcombine.low %v20_v45, %v20_v45 }
  0x2b   :  { %1310 = vmatpush3.bf16.msra.mxu0 %v1451_v47  ;;  %v1158_v47 = vcombine.high %v19_v44, %v19_v44 }
  0x2c   :  { %1311 = vmatprep.subr.bf16.mxu0 %v1454_v50  ;;  %v1514_v50 = vld [vmem:[%s1860_s1 + $0x300] sm:$0xff]  }
  0x2d   :  { %1332 = vmatpush3.bf16.msra.mxu1 %v1453_v49  ;;  %v1160_v49 = vcombine.high %v20_v45, %v20_v45 }
  0x2e   :  { %1333 = vmatprep.subr.bf16.mxu1 %v1456_v52  ;;  %v1515_v52 = vld [vmem:[%s1860_s1 + $0x308] sm:$0xff]  }
  0x2f   :  { %1312 = vmatpush3.bf16.msra.mxu0 %v1455_v51  ;;  %v1517_v51 = vmov 0.0  }
  0x30   :  { %1313 = vmatprep.subr.bf16.mxu0 %v1458_v54 }
  0x31   :  { %1334 = vmatpush3.bf16.msra.mxu1 %v1457_v53  ;;  %v1516_v53 = vld [vmem:[%s1861_s0 + $0x30] ss:$0 sps:$4 sm:$0xff]  }
  0x32   :  { %1335 = vmatprep.subr.bf16.mxu1 %v1460_v56 }
  0x33   :  { %1314 = vmatpush3.bf16.msra.mxu0 %v1459_v55  ;;  %v1148_v55 = vld [vmem:[%s1862_s2] ss:$0 sm:$0xff] }
  0x34   :  { %1315 = vmatprep.subr.bf16.mxu0 %v1462_v58 }
  0x35   :  { %1336 = vmatpush3.bf16.msra.mxu1 %v1461_v57 }
  0x36   :  { %1337 = vmatprep.subr.bf16.mxu1 %v1464_v60 }
  0x37   :  { %1316 = vmatpush3.bf16.msra.mxu0 %v1463_v59 }
  0x38   :  { %1317 = vmatprep.subr.bf16.mxu0 %v1466_v62 }
  0x39   :  { %1338 = vmatpush3.bf16.msra.mxu1 %v1465_v61 }
  0x3a   :  { %1339 = vmatprep.subr.bf16.mxu1 %v1468_v0 }
  0x3b   :  { %1318 = vmatpush3.bf16.msra.mxu0 %v1467_v63 }
  0x3c   :  { %1319 = vmatprep.subr.bf16.mxu0 %v1470_v2 }
  0x3d   :  { %1340 = vmatpush3.bf16.msra.mxu1 %v1469_v1 }
  0x3e   :  { %1341 = vmatprep.subr.bf16.mxu1 %v1472_v4 }
  0x3f   :  { %1320 = vmatpush3.bf16.msra.mxu0 %v1471_v3 }
  0x40   :  { %1349 = vmatprep.subr.bf16.mxu0 %v1476_v9 }
  0x41   :  { %1342 = vmatpush3.bf16.msra.mxu1 %v1473_v5 }
  0x42   :  { %975 = vmatmul.mubr.bf16.vlgmr.msra.gmra.mrb[4].mxu0 %v1153_v7  ;;  %1371 = vmatprep.subr.bf16.mxu1 %v1480_v14 }
  0x43   :  { %1350 = vmatpush3.bf16.msra.mxu0 %v1479_v13  ;;  %1054 = vmatprep.mubr.bf16.mxu0 %v1158_v47 }
  0x44   :  { %1015 = vmatmul.mubr.bf16.vlgmr.msra.gmra.mrb[4].mxu1 %v1155_v11  ;;  %1351 = vmatprep.subr.bf16.mxu0 %v1482_v16 }
  0x45   :  { %1372 = vmatpush3.bf16.msra.mxu1 %v1481_v15  ;;  %1094 = vmatprep.mubr.bf16.mxu1 %v1160_v49 }
  0x46   :  { %1373 = vmatprep.subr.bf16.mxu1 %v1484_v18 }
  0x47   :  { %1352 = vmatpush3.bf16.msra.mxu0 %v1483_v17 }
  0x48   :  { %1353 = vmatprep.subr.bf16.mxu0 %v1486_v20 }
  0x49   :  { %1374 = vmatpush3.bf16.msra.mxu1 %v1485_v19 }
  0x4a   :  { %1375 = vmatprep.subr.bf16.mxu1 %v1488_v22 }
  0x4b   :  { %1354 = vmatpush3.bf16.msra.mxu0 %v1487_v21 }
  0x4c   :  { %1355 = vmatprep.subr.bf16.mxu0 %v1490_v24 }
  0x4d   :  { %1376 = vmatpush3.bf16.msra.mxu1 %v1489_v23 }
  0x4e   :  { %1377 = vmatprep.subr.bf16.mxu1 %v1492_v26 }
  0x4f   :  { %1356 = vmatpush3.bf16.msra.mxu0 %v1491_v25 }
  0x50   :  { %1357 = vmatprep.subr.bf16.mxu0 %v1494_v28 }
  0x51   :  { %1378 = vmatpush3.bf16.msra.mxu1 %v1493_v27 }
  0x52   :  { %1379 = vmatprep.subr.bf16.mxu1 %v1496_v30 }
  0x53   :  { %1358 = vmatpush3.bf16.msra.mxu0 %v1495_v29 }
  0x54   :  { %1359 = vmatprep.subr.bf16.mxu0 %v1498_v32 }
  0x55   :  { %1380 = vmatpush3.bf16.msra.mxu1 %v1497_v31 }
  0x56   :  { %1381 = vmatprep.subr.bf16.mxu1 %v1500_v34 }
  0x57   :  { %1360 = vmatpush3.bf16.msra.mxu0 %v1499_v33 }
  0x58   :  { %1361 = vmatprep.subr.bf16.mxu0 %v1502_v36 }
  0x59   :  { %1382 = vmatpush3.bf16.msra.mxu1 %v1501_v35 }
  0x5a   :  { %1383 = vmatprep.subr.bf16.mxu1 %v1504_v38 }
  0x5b   :  { %1362 = vmatpush3.bf16.msra.mxu0 %v1503_v37 }
  0x5c   :  { %1363 = vmatprep.subr.bf16.mxu0 %v1506_v40 }
  0x5d   :  { %1384 = vmatpush3.bf16.msra.mxu1 %v1505_v39 }
  0x5e   :  { %1385 = vmatprep.subr.bf16.mxu1 %v1508_v42 }
  0x5f   :  { %1364 = vmatpush3.bf16.msra.mxu0 %v1507_v41 }
  0x60   :  { %1396 = vmatprep.subr.bf16.mxu0 %v1517_v51 }
  0x61   :  { %1386 = vmatpush3.bf16.msra.mxu1 %v1509_v43 }
  0x62   :  { %1055 = vmatmul.mubr.bf16.vlgmr.msra.gmra.mrb[8].mxu0 %v1157_v46 }
  0x63   :  { %1397 = vmatpush3.bf16.msra.mxu0 %v1514_v50  ;;  %1400 = vmatprep.mubr.msk.bf16.mxu0 %vm1518_vm0, %v1517_v51 }
  0x64   :  { %1095 = vmatmul.mubr.bf16.vlgmr.msra.gmra.mrb[8].mxu1 %v1159_v48  ;;  %1398 = vmatprep.subr.bf16.mxu0 %v1517_v51 }
  0x67   :  { %1399 = vmatpush3.bf16.msra.mxu0 %v1515_v52 }
  0x6a   :  { %1401 = vmatmul.mubr.msk.bf16.vlgmr.msra.gmra.mrb[12].mxu0 %vm858_vm1, %v1516_v53 }
  0xf5   :  { %v1277_v54 = vpop.f32.mrb[0].mxu0 }
  0xf6   :  { %v1278_v56 = vpop.f32.mrb[1].mxu0 }
  0xf7   :  { %v1279_v57 = vadd.f32 %v1278_v56, %v1277_v54  ;;  %v1280_v58 = vpop.f32.mrb[2].mxu0  ;;  %v1299_v59 = vpop.f32.mrb[0].mxu1 }
  0xf8   :  { %v1281_v60 = vpop.f32.mrb[3].mxu0  ;;  %v1300_v61 = vpop.f32.mrb[1].mxu1 }
  0xf9   :  { %v897_v62 = vadd.f32 %v1279_v57, %v1148_v55  ;;  %v1301_v63 = vadd.f32 %v1300_v61, %v1299_v59  ;;  %v1302_v0 = vpop.f32.mrb[2].mxu1 }
  0xfa   :  { %v1303_v1 = vpop.f32.mrb[3].mxu1 }
  0xfb   :  { %v937_v2 = vadd.f32 %v1301_v63, %v897_v62 }
 0x115   :  { %v1321_v3 = vpop.f32.mrb[4].mxu0 }
 0x116   :  { %v1322_v4 = vpop.f32.mrb[5].mxu0 }
 0x117   :  { %v1323_v5 = vadd.f32 %v1322_v4, %v1321_v3  ;;  %v1324_v6 = vpop.f32.mrb[6].mxu0  ;;  %v1343_v7 = vpop.f32.mrb[4].mxu1 }
 0x118   :  { %v1325_v8 = vpop.f32.mrb[7].mxu0  ;;  %v1344_v9 = vpop.f32.mrb[5].mxu1 }
 0x119   :  { %v977_v10 = vadd.f32 %v1323_v5, %v937_v2  ;;  %v1345_v11 = vadd.f32 %v1344_v9, %v1343_v7  ;;  %v1346_v12 = vpop.f32.mrb[6].mxu1 }
 0x11a   :  { %v1347_v13 = vpop.f32.mrb[7].mxu1 }
 0x11b   :  { %v1017_v14 = vadd.f32 %v1345_v11, %v977_v10 }
 0x135   :  { %v1365_v15 = vpop.f32.mrb[8].mxu0 }
 0x136   :  { %v1366_v16 = vpop.f32.mrb[9].mxu0 }
 0x137   :  { %v1387_v17 = vpop.f32.mrb[8].mxu1  ;;  %v1367_v18 = vadd.f32 %v1366_v16, %v1365_v15  ;;  %v1368_v19 = vpop.f32.mrb[10].mxu0 }
 0x138   :  { %v1388_v20 = vpop.f32.mrb[9].mxu1  ;;  %v1369_v22 = vpop.f32.mrb[11].mxu0 }
 0x139   :  { %v1389_v21 = vadd.f32 %v1388_v20, %v1387_v17  ;;  %v1390_v23 = vpop.f32.mrb[10].mxu1  ;;  %v1057_v24 = vadd.f32 %v1367_v18, %v1017_v14 }
 0x13a   :  { %v1391_v25 = vpop.f32.mrb[11].mxu1 }
 0x13b   :  { %v1097_v26 = vadd.f32 %v1389_v21, %v1057_v24 }
 0x13d   :  { %v1136_v27 = vpop.f32.mrb[12].mxu0 }
 0x13e   :  { %v1137_v28 = vadd.f32 %v1136_v27, %v1097_v26  ;;  %v1402_v29 = vpop.f32.mrb[13].mxu0 }
 0x13f   :  { %v1139_v30 = vpop.f32.mrb[14].mxu0 }
 0x140   :  { %1143 = vst.msk [vmem:[%s1863_s3] sm:$0xff] %vm1142_vm2, %v1137_v28  ;;  %v1403_v31 = vpop.f32.mrb[15].mxu0 }

</bundles_post_ra>
